<compile_context>
chip_gen: v6e
topology: v6e:2x2x1
jax: 0.10.0
libtpu: 0.0.40
codegen_flags: <defaults>
</compile_context>

<pallas_src>
import functools

import jax
import jax.numpy as jnp
import numpy as np
from jax.experimental import pallas as pl
from jax.experimental.pallas import tpu as pltpu


def _round_up(x, m):
    return ((x + m - 1) // m) * m


# ---------------------------------------------------------------------------
# Activation layout ("chunk"): chunk[n, c, h*(W+2) + w], w in [0, W+2); columns
# 0 and W+1 of every row are always zero (per-row halo), so a 3x3 tap is a
# constant flat offset and InstanceNorm lane-sums equal sums over valid pixels.
# ---------------------------------------------------------------------------
def nchw_to_chunk(x):
    n, c, h, w = x.shape
    xp = jnp.pad(x, ((0, 0), (0, 0), (0, 0), (1, 1)))
    return xp.reshape(n, c, h * (w + 2))


def chunk_to_nchw(x, H, W):
    n, c, _ = x.shape
    return x.reshape(n, c, H, W + 2)[:, :, :, 1:W + 1]


def _col_mask(H, W):
    """[1, H*(W+2)] f32: 1 on valid pixels, 0 on per-row halo columns."""
    m = np.zeros((H, W + 2), np.float32)
    m[:, 1:W + 1] = 1.0
    return jnp.asarray(m.reshape(1, H * (W + 2)))


def _subsample_matrix(H, W):
    """[H*(W+2), (H//2)*(W//2+2)] 0/1 matrix: chunk @ T == stride-2 subsample
    (even rows / even cols); halo columns of the output stay zero."""
    assert H % 2 == 0 and W % 2 == 0
    Wp, Hs, Ws = W + 2, H // 2, W // 2
    Wsp = Ws + 2
    T = np.zeros((H * Wp, Hs * Wsp), np.float32)
    for ho in range(Hs):
        for wo in range(Ws):
            T[2 * ho * Wp + 1 + 2 * wo, ho * Wsp + 1 + wo] = 1.0
    return jnp.asarray(T)


# ---------------------------------------------------------------------------
# Fully fused encoder kernel (one grid step == one image).
# ---------------------------------------------------------------------------
def _make_encoder_kernel(H, W, cin_store, chans, n_res):
    n_down = len(chans) - 1
    eps = 1e-5

    LV = []
    h, w = H, W
    for _ in range(n_down + 1):
        wp = w + 2
        LV.append(dict(H=h, W=w, Wp=wp, L=h * wp, base=2 * wp,
                       inv_n=1.0 / float(h * w)))
        h, w = h // 2, w // 2

    def kernel(*refs):
        it = iter(refs)
        x_ref = next(it)
        mask_refs = [next(it) for _ in range(n_down + 1)]
        t_refs = [next(it) for _ in range(n_down)]
        w0_ref, b0_ref = next(it), next(it)
        down_refs = [tuple(next(it) for _ in range(4)) for _ in range(n_down)]
        res_refs = [tuple(next(it) for _ in range(4)) for _ in range(n_res)]
        out_ref = next(it)
        skip_refs = [next(it) for _ in range(n_down)]
        pad_refs = [next(it) for _ in range(n_down + 1)]
        stk_ref = next(it)

        # Halo rows/cols of the pad buffers must be zero; interiors are always
        # overwritten before use, so a cheap zero-fill per image suffices.
        for p in pad_refs:
            p[...] = jnp.zeros(p.shape, p.dtype)

        def inst_relu(v, l):
            # InstanceNorm2d defaults (affine=False, eps=1e-5, biased var) + ReLU.
            # Halo columns are zero, so lane sums == sums over the H*W valid pixels.
            inv_n = LV[l]["inv_n"]
            mean = jnp.sum(v, axis=1, keepdims=True) * inv_n
            var = jnp.sum(v * v, axis=1, keepdims=True) * inv_n - mean * mean
            y = (v - mean) * jax.lax.rsqrt(jnp.maximum(var, 0.0) + eps)
            # re-zero halo columns so the next conv's taps read zeros there
            return jnp.maximum(y, 0.0) * mask_refs[l][...]

        def conv3x3(v, l, w_ref, b_ref, extra=None):
            # 3x3/s1/p1 conv: embed v into the zero-halo pad buffer, gather the
            # 9 shifted windows into one K-stacked VMEM slab, cast once to bf16
            # and run a single MXU matmul with the [Cout, 9*Cin(+Cres)] stacked
            # weights (f32 accumulation).  `extra` folds the 1x1 projection
            # shortcut into the same matmul.
            lv = LV[l]
            C = v.shape[0]
            Lc, base, Wp = lv["L"], lv["base"], lv["Wp"]
            pad = pad_refs[l]
            pad[0:C, base:base + Lc] = v
            a = pad[0:C, :]
            for t in range(9):
                di, dj = divmod(t, 3)
                s = base + (di - 1) * Wp + (dj - 1)
                stk_ref[t * C:(t + 1) * C, 0:Lc] = a[:, s:s + Lc]
            k = 9 * C
            if extra is not None:
                ce = extra.shape[0]
                stk_ref[k:k + ce, 0:Lc] = extra
                k += ce
            stk = stk_ref[0:k, 0:Lc].astype(jnp.bfloat16)
            out = jnp.dot(w_ref[...], stk, preferred_element_type=jnp.float32)
            # bias, then zero the per-row wrap-around junk columns
            return (out + b_ref[...]) * mask_refs[l][...]

        # --- initial conv 3x3 s1 p1 (no pre-activation) ----------------------
        cur = conv3x3(x_ref[0], 0, w0_ref, b0_ref)

        # --- down blocks (pre-act basic_block, subsample, projection shortcut)
        for d in range(n_down):
            w1, b1, w2c, b2c = down_refs[d]
            skip_refs[d][0] = cur                      # skip == block input
            # IN->ReLU->conv3x3 computed at stride 1, subsampled in-register
            # (stride-2/pad-1 conv output == stride-1 output at even positions).
            h_full = conv3x3(inst_relu(cur, d), d, w1, b1)
            t_mat = t_refs[d][...]
            h_sub = jnp.dot(h_full, t_mat, preferred_element_type=jnp.float32)
            x_sub = jnp.dot(cur, t_mat, preferred_element_type=jnp.float32)
            # IN->ReLU->conv3x3 s1 with the 1x1/s2 projection of the raw block
            # input fused into the same stacked matmul (combined weight/bias).
            cur = conv3x3(inst_relu(h_sub, d + 1), d + 1, w2c, b2c, extra=x_sub)

        # --- residual blocks at the deepest level (identity shortcut) --------
        deep = n_down
        for r in range(n_res):
            w1, b1, w2, b2 = res_refs[r]
            h1 = conv3x3(inst_relu(cur, deep), deep, w1, b1)
            h2 = conv3x3(inst_relu(h1, deep), deep, w2, b2)
            cur = cur + h2

        # --- trailing InstanceNorm + ReLU epilogue ----------------------------
        out_ref[0] = inst_relu(cur, deep)

    return kernel


# ---------------------------------------------------------------------------
# Wrapper: one pallas_call for the whole encoder.
# ---------------------------------------------------------------------------
def encoder_fwd(x_nchw, params):
    """Returns (out, skips) matching the PyTorch encoder.forward semantics."""
    N, Cin, H, W = x_nchw.shape
    chans = [params["conv0_w"].shape[0]] + [d["w1"].shape[0] for d in params["down"]]
    n_down = len(params["down"])
    n_res = len(params["resblocks"])
    cin_store = params["conv0_w"].shape[1] // 9
    assert H % (1 << n_down) == 0 and W % (1 << n_down) == 0

    hw = [(H >> l, W >> l) for l in range(n_down + 1)]
    Ls = [h * (w + 2) for h, w in hw]

    x = nchw_to_chunk(x_nchw)
    if cin_store != Cin:
        x = jnp.pad(x, ((0, 0), (0, cin_store - Cin), (0, 0)))

    masks = [_col_mask(h, w) for h, w in hw]
    t_mats = [_subsample_matrix(h, w) for h, w in hw[:-1]]

    args = [x] + masks + t_mats + [params["conv0_w"], params["conv0_b"]]
    for bp in params["down"]:
        args += [bp["w1"], bp["b1"], bp["w2c"], bp["b2c"]]
    for rp in params["resblocks"]:
        args += [rp["w1"], rp["b1"], rp["w2"], rp["b2"]]

    def _resident(a):
        zeros = (0,) * a.ndim
        return pl.BlockSpec(a.shape, lambda n, _z=zeros: _z)

    in_specs = [pl.BlockSpec((1, cin_store, Ls[0]), lambda n: (n, 0, 0))]
    in_specs += [_resident(a) for a in args[1:]]

    out_shape = (jax.ShapeDtypeStruct((N, chans[-1], Ls[-1]), jnp.float32),) + tuple(
        jax.ShapeDtypeStruct((N, chans[d], Ls[d]), jnp.float32) for d in range(n_down))
    out_specs = (pl.BlockSpec((1, chans[-1], Ls[-1]), lambda n: (n, 0, 0)),) + tuple(
        pl.BlockSpec((1, chans[d], Ls[d]), lambda n: (n, 0, 0)) for d in range(n_down))

    # VMEM scratch: one zero-halo pad buffer per resolution level + the K-stack slab.
    pad_rows = [max(cin_store, chans[0])] + [chans[l] for l in range(1, n_down + 1)]
    scratch = [pltpu.VMEM((pad_rows[l], (hw[l][0] + 4) * (hw[l][1] + 2)), jnp.float32)
               for l in range(n_down + 1)]
    k_list = [9 * cin_store, 9 * chans[-1]]
    for d in range(n_down):
        k_list += [9 * chans[d], 9 * chans[d + 1] + chans[d]]
    scratch.append(pltpu.VMEM((max(k_list), Ls[0]), jnp.float32))

    kernel = _make_encoder_kernel(H, W, cin_store, chans, n_res)

    outs = pl.pallas_call(
        kernel,
        grid=(N,),
        in_specs=in_specs,
        out_specs=out_specs,
        out_shape=out_shape,
        scratch_shapes=scratch,
        compiler_params=pltpu.CompilerParams(dimension_semantics=("parallel",)),
    )(*args)

    out_chunk, skip_chunks = outs[0], outs[1:]
    skips = [x_nchw] + [chunk_to_nchw(s, hw[d][0], hw[d][1])
                        for d, s in enumerate(skip_chunks)]
    return chunk_to_nchw(out_chunk, hw[-1][0], hw[-1][1]), skips


# ---------------------------------------------------------------------------
# Deterministic parameter construction (kaiming_normal_-style, zero bias).
# 3x3 weights are stored K-stacked [Cout, 9*Cin] (column = tap*Cin + cin) in bf16;
# the down-block conv2 weight has the 1x1 projection columns appended.
# ---------------------------------------------------------------------------
def _init_conv3x3(key, cin, cout, cin_store=None):
    cin_store = cin if cin_store is None else cin_store
    w = jax.random.normal(key, (3, 3, cin, cout), jnp.float32) * np.sqrt(2.0 / (9 * cin))
    if cin_store != cin:  # zero weights for padded (always-zero) input channels
        w = jnp.pad(w, ((0, 0), (0, 0), (0, cin_store - cin), (0, 0)))
    wstk = jnp.transpose(w.reshape(9, cin_store, cout), (2, 0, 1)).reshape(
        cout, 9 * cin_store)
    return wstk.astype(jnp.bfloat16), jnp.zeros((cout, 1), jnp.float32)


def _init_conv1x1(key, cin, cout):
    w = jax.random.normal(key, (cin, cout), jnp.float32) * np.sqrt(2.0 / cin)
    return jnp.transpose(w).astype(jnp.bfloat16), jnp.zeros((cout, 1), jnp.float32)


def make_params(in_channels, num_channels_list, num_resblocks, key):
    keys = iter(jax.random.split(key, 128))
    cin_store = _round_up(in_channels, 8)
    params = {}
    params["conv0_w"], params["conv0_b"] = _init_conv3x3(
        next(keys), in_channels, num_channels_list[0], cin_store)

    downs = []
    last = num_channels_list[0]
    for c in num_channels_list[1:]:
        w1, b1 = _init_conv3x3(next(keys), last, c)
        w2, b2 = _init_conv3x3(next(keys), c, c)
        ws, bs = _init_conv1x1(next(keys), last, c)  # 1x1 s2 projection shortcut
        downs.append({"w1": w1, "b1": b1,
                      "w2c": jnp.concatenate([w2, ws], axis=1),  # conv2 + proj fused
                      "b2c": b2 + bs})
        last = c
    params["down"] = downs

    res = []
    c = num_channels_list[-1]
    for _ in range(num_resblocks):
        w1, b1 = _init_conv3x3(next(keys), c, c)
        w2, b2 = _init_conv3x3(next(keys), c, c)
        res.append({"w1": w1, "b1": b1, "w2": w2, "b2": b2})
    params["resblocks"] = res
    return params


# ---------------------------------------------------------------------------
if __name__ == "__main__":
    # Small synthetic config: input_shape=(4,16,16), num_conv_blocks=3,
    # num_channels_list=[8,16,32], num_resblocks=2, instance norm, ReLU, skip=True.
    key = jax.random.PRNGKey(0)
    k_x, k_p = jax.random.split(key)

    batch, cin, H, W = 2, 4, 16, 16
    num_channels_list = [8, 16, 32]
    num_resblocks = 2

    x = jax.random.normal(k_x, (batch, cin, H, W), jnp.float32)  # NCHW, like PyTorch
    params = make_params(cin, num_channels_list, num_resblocks, k_p)

    fwd = jax.jit(functools.partial(encoder_fwd, params=params))
    out, skips = fwd(x)
    out = jax.block_until_ready(out)
    skips = [jax.block_until_ready(s) for s in skips]

    assert out.shape == (batch, num_channels_list[-1], H // 4, W // 4), out.shape
    assert len(skips) == 3
    assert skips[0].shape == (batch, cin, H, W)
    assert skips[1].shape == (batch, num_channels_list[0], H, W)
    assert skips[2].shape == (batch, num_channels_list[1], H // 2, W // 2)
    assert bool(jnp.isfinite(out).all())

    print("KERNEL_OK")
</pallas_src>

<mosaic_0001>
module attributes {stable_mosaic.version = 11 : i64} {
  func.func @kernel(%arg0: i32, %arg1: memref<1x8x288xf32, #tpu.memory_space<vmem>>, %arg2: memref<1x288xf32, #tpu.memory_space<vmem>>, %arg3: memref<1x80xf32, #tpu.memory_space<vmem>>, %arg4: memref<1x24xf32, #tpu.memory_space<vmem>>, %arg5: memref<288x80xf32, #tpu.memory_space<vmem>>, %arg6: memref<80x24xf32, #tpu.memory_space<vmem>>, %arg7: memref<8x72xbf16, #tpu.memory_space<vmem>>, %arg8: memref<8x1xf32, #tpu.memory_space<vmem>>, %arg9: memref<16x72xbf16, #tpu.memory_space<vmem>>, %arg10: memref<16x1xf32, #tpu.memory_space<vmem>>, %arg11: memref<16x152xbf16, #tpu.memory_space<vmem>>, %arg12: memref<16x1xf32, #tpu.memory_space<vmem>>, %arg13: memref<32x144xbf16, #tpu.memory_space<vmem>>, %arg14: memref<32x1xf32, #tpu.memory_space<vmem>>, %arg15: memref<32x304xbf16, #tpu.memory_space<vmem>>, %arg16: memref<32x1xf32, #tpu.memory_space<vmem>>, %arg17: memref<32x288xbf16, #tpu.memory_space<vmem>>, %arg18: memref<32x1xf32, #tpu.memory_space<vmem>>, %arg19: memref<32x288xbf16, #tpu.memory_space<vmem>>, %arg20: memref<32x1xf32, #tpu.memory_space<vmem>>, %arg21: memref<32x288xbf16, #tpu.memory_space<vmem>>, %arg22: memref<32x1xf32, #tpu.memory_space<vmem>>, %arg23: memref<32x288xbf16, #tpu.memory_space<vmem>>, %arg24: memref<32x1xf32, #tpu.memory_space<vmem>>, %arg25: memref<1x32x24xf32, #tpu.memory_space<vmem>>, %arg26: memref<1x8x288xf32, #tpu.memory_space<vmem>>, %arg27: memref<1x16x80xf32, #tpu.memory_space<vmem>>, %arg28: memref<8x360xf32, #tpu.memory_space<vmem>>, %arg29: memref<16x120xf32, #tpu.memory_space<vmem>>, %arg30: memref<32x48xf32, #tpu.memory_space<vmem>>, %arg31: memref<304x288xf32, #tpu.memory_space<vmem>>) attributes {dimension_semantics = [#tpu.dimension_semantics<parallel>], iteration_bounds = array<i64: 2>, scalar_prefetch = 0 : i64, scratch_operands = 4 : i64, tpu.core_type = #tpu.core_type<tc>, window_params = [{transform_indices = @transform_0, window_bounds = array<i64: 1, 8, 288>}, {pipeline_mode = #tpu.pipeline_mode<synchronous>, transform_indices = @transform_1, window_bounds = array<i64: 1, 288>}, {pipeline_mode = #tpu.pipeline_mode<synchronous>, transform_indices = @transform_2, window_bounds = array<i64: 1, 80>}, {pipeline_mode = #tpu.pipeline_mode<synchronous>, transform_indices = @transform_3, window_bounds = array<i64: 1, 24>}, {pipeline_mode = #tpu.pipeline_mode<synchronous>, transform_indices = @transform_4, window_bounds = array<i64: 288, 80>}, {pipeline_mode = #tpu.pipeline_mode<synchronous>, transform_indices = @transform_5, window_bounds = array<i64: 80, 24>}, {pipeline_mode = #tpu.pipeline_mode<synchronous>, transform_indices = @transform_6, window_bounds = array<i64: 8, 72>}, {pipeline_mode = #tpu.pipeline_mode<synchronous>, transform_indices = @transform_7, window_bounds = array<i64: 8, 1>}, {pipeline_mode = #tpu.pipeline_mode<synchronous>, transform_indices = @transform_8, window_bounds = array<i64: 16, 72>}, {pipeline_mode = #tpu.pipeline_mode<synchronous>, transform_indices = @transform_9, window_bounds = array<i64: 16, 1>}, {pipeline_mode = #tpu.pipeline_mode<synchronous>, transform_indices = @transform_10, window_bounds = array<i64: 16, 152>}, {pipeline_mode = #tpu.pipeline_mode<synchronous>, transform_indices = @transform_11, window_bounds = array<i64: 16, 1>}, {pipeline_mode = #tpu.pipeline_mode<synchronous>, transform_indices = @transform_12, window_bounds = array<i64: 32, 144>}, {pipeline_mode = #tpu.pipeline_mode<synchronous>, transform_indices = @transform_13, window_bounds = array<i64: 32, 1>}, {pipeline_mode = #tpu.pipeline_mode<synchronous>, transform_indices = @transform_14, window_bounds = array<i64: 32, 304>}, {pipeline_mode = #tpu.pipeline_mode<synchronous>, transform_indices = @transform_15, window_bounds = array<i64: 32, 1>}, {pipeline_mode = #tpu.pipeline_mode<synchronous>, transform_indices = @transform_16, window_bounds = array<i64: 32, 288>}, {pipeline_mode = #tpu.pipeline_mode<synchronous>, transform_indices = @transform_17, window_bounds = array<i64: 32, 1>}, {pipeline_mode = #tpu.pipeline_mode<synchronous>, transform_indices = @transform_18, window_bounds = array<i64: 32, 288>}, {pipeline_mode = #tpu.pipeline_mode<synchronous>, transform_indices = @transform_19, window_bounds = array<i64: 32, 1>}, {pipeline_mode = #tpu.pipeline_mode<synchronous>, transform_indices = @transform_20, window_bounds = array<i64: 32, 288>}, {pipeline_mode = #tpu.pipeline_mode<synchronous>, transform_indices = @transform_21, window_bounds = array<i64: 32, 1>}, {pipeline_mode = #tpu.pipeline_mode<synchronous>, transform_indices = @transform_22, window_bounds = array<i64: 32, 288>}, {pipeline_mode = #tpu.pipeline_mode<synchronous>, transform_indices = @transform_23, window_bounds = array<i64: 32, 1>}, {transform_indices = @transform_24, window_bounds = array<i64: 1, 32, 24>}, {transform_indices = @transform_25, window_bounds = array<i64: 1, 8, 288>}, {transform_indices = @transform_26, window_bounds = array<i64: 1, 16, 80>}]} {
    %cst = arith.constant 0.000000e+00 : f32
    %0 = vector.broadcast %cst : f32 to vector<8x360xf32>
    %c0 = arith.constant 0 : index
    %c0_0 = arith.constant 0 : index
    %1 = vector.load %arg28[%c0, %c0_0] : memref<8x360xf32, #tpu.memory_space<vmem>>, vector<8x360xf32>
    tpu.vector_store %arg28[%c0, %c0_0], %0 {strides = array<i32>} : memref<8x360xf32, #tpu.memory_space<vmem>>, vector<8x360xf32>,
    %cst_1 = arith.constant 0.000000e+00 : f32
    %2 = vector.broadcast %cst_1 : f32 to vector<16x120xf32>
    %c0_2 = arith.constant 0 : index
    %c0_3 = arith.constant 0 : index
    %3 = vector.load %arg29[%c0_2, %c0_3] : memref<16x120xf32, #tpu.memory_space<vmem>>, vector<16x120xf32>
    tpu.vector_store %arg29[%c0_2, %c0_3], %2 {strides = array<i32>} : memref<16x120xf32, #tpu.memory_space<vmem>>, vector<16x120xf32>,
    %cst_4 = arith.constant 0.000000e+00 : f32
    %4 = vector.broadcast %cst_4 : f32 to vector<32x48xf32>
    %c0_5 = arith.constant 0 : index
    %c0_6 = arith.constant 0 : index
    %5 = vector.load %arg30[%c0_5, %c0_6] : memref<32x48xf32, #tpu.memory_space<vmem>>, vector<32x48xf32>
    tpu.vector_store %arg30[%c0_5, %c0_6], %4 {strides = array<i32>} : memref<32x48xf32, #tpu.memory_space<vmem>>, vector<32x48xf32>,
    %c0_7 = arith.constant 0 : index
    %c0_8 = arith.constant 0 : index
    %c0_9 = arith.constant 0 : index
    %6 = vector.load %arg1[%c0_7, %c0_8, %c0_9] : memref<1x8x288xf32, #tpu.memory_space<vmem>>, vector<1x8x288xf32>
    %7 = vector.shape_cast %6 : vector<1x8x288xf32> to vector<8x288xf32>
    %c0_10 = arith.constant 0 : index
    %c36 = arith.constant 36 : index
    %8 = vector.load %arg28[%c0_10, %c36] : memref<8x360xf32, #tpu.memory_space<vmem>>, vector<8x288xf32>
    tpu.vector_store %arg28[%c0_10, %c36], %7 {strides = array<i32>} : memref<8x360xf32, #tpu.memory_space<vmem>>, vector<8x288xf32>,
    %c0_11 = arith.constant 0 : index
    %c0_12 = arith.constant 0 : index
    %9 = vector.load %arg28[%c0_11, %c0_12] : memref<8x360xf32, #tpu.memory_space<vmem>>, vector<8x360xf32>
    %10 = vector.extract_strided_slice %9 {offsets = [0, 17], sizes = [8, 288], strides = [1, 1]} : vector<8x360xf32> to vector<8x288xf32>
    %c0_13 = arith.constant 0 : index
    %c0_14 = arith.constant 0 : index
    %11 = vector.load %arg31[%c0_13, %c0_14] : memref<304x288xf32, #tpu.memory_space<vmem>>, vector<8x288xf32>
    tpu.vector_store %arg31[%c0_13, %c0_14], %10 {strides = array<i32>} : memref<304x288xf32, #tpu.memory_space<vmem>>, vector<8x288xf32>,
    %12 = vector.extract_strided_slice %9 {offsets = [0, 18], sizes = [8, 288], strides = [1, 1]} : vector<8x360xf32> to vector<8x288xf32>
    %c8 = arith.constant 8 : index
    %c0_15 = arith.constant 0 : index
    %13 = vector.load %arg31[%c8, %c0_15] : memref<304x288xf32, #tpu.memory_space<vmem>>, vector<8x288xf32>
    tpu.vector_store %arg31[%c8, %c0_15], %12 {strides = array<i32>} : memref<304x288xf32, #tpu.memory_space<vmem>>, vector<8x288xf32>,
    %14 = vector.extract_strided_slice %9 {offsets = [0, 19], sizes = [8, 288], strides = [1, 1]} : vector<8x360xf32> to vector<8x288xf32>
    %c16 = arith.constant 16 : index
    %c0_16 = arith.constant 0 : index
    %15 = vector.load %arg31[%c16, %c0_16] : memref<304x288xf32, #tpu.memory_space<vmem>>, vector<8x288xf32>
    tpu.vector_store %arg31[%c16, %c0_16], %14 {strides = array<i32>} : memref<304x288xf32, #tpu.memory_space<vmem>>, vector<8x288xf32>,
    %16 = vector.extract_strided_slice %9 {offsets = [0, 35], sizes = [8, 288], strides = [1, 1]} : vector<8x360xf32> to vector<8x288xf32>
    %c24 = arith.constant 24 : index
    %c0_17 = arith.constant 0 : index
    %17 = vector.load %arg31[%c24, %c0_17] : memref<304x288xf32, #tpu.memory_space<vmem>>, vector<8x288xf32>
    tpu.vector_store %arg31[%c24, %c0_17], %16 {strides = array<i32>} : memref<304x288xf32, #tpu.memory_space<vmem>>, vector<8x288xf32>,
    %18 = vector.extract_strided_slice %9 {offsets = [0, 36], sizes = [8, 288], strides = [1, 1]} : vector<8x360xf32> to vector<8x288xf32>
    %c32 = arith.constant 32 : index
    %c0_18 = arith.constant 0 : index
    %19 = vector.load %arg31[%c32, %c0_18] : memref<304x288xf32, #tpu.memory_space<vmem>>, vector<8x288xf32>
    tpu.vector_store %arg31[%c32, %c0_18], %18 {strides = array<i32>} : memref<304x288xf32, #tpu.memory_space<vmem>>, vector<8x288xf32>,
    %20 = vector.extract_strided_slice %9 {offsets = [0, 37], sizes = [8, 288], strides = [1, 1]} : vector<8x360xf32> to vector<8x288xf32>
    %c40 = arith.constant 40 : index
    %c0_19 = arith.constant 0 : index
    %21 = vector.load %arg31[%c40, %c0_19] : memref<304x288xf32, #tpu.memory_space<vmem>>, vector<8x288xf32>
    tpu.vector_store %arg31[%c40, %c0_19], %20 {strides = array<i32>} : memref<304x288xf32, #tpu.memory_space<vmem>>, vector<8x288xf32>,
    %22 = vector.extract_strided_slice %9 {offsets = [0, 53], sizes = [8, 288], strides = [1, 1]} : vector<8x360xf32> to vector<8x288xf32>
    %c48 = arith.constant 48 : index
    %c0_20 = arith.constant 0 : index
    %23 = vector.load %arg31[%c48, %c0_20] : memref<304x288xf32, #tpu.memory_space<vmem>>, vector<8x288xf32>
    tpu.vector_store %arg31[%c48, %c0_20], %22 {strides = array<i32>} : memref<304x288xf32, #tpu.memory_space<vmem>>, vector<8x288xf32>,
    %24 = vector.extract_strided_slice %9 {offsets = [0, 54], sizes = [8, 288], strides = [1, 1]} : vector<8x360xf32> to vector<8x288xf32>
    %c56 = arith.constant 56 : index
    %c0_21 = arith.constant 0 : index
    %25 = vector.load %arg31[%c56, %c0_21] : memref<304x288xf32, #tpu.memory_space<vmem>>, vector<8x288xf32>
    tpu.vector_store %arg31[%c56, %c0_21], %24 {strides = array<i32>} : memref<304x288xf32, #tpu.memory_space<vmem>>, vector<8x288xf32>,
    %26 = vector.extract_strided_slice %9 {offsets = [0, 55], sizes = [8, 288], strides = [1, 1]} : vector<8x360xf32> to vector<8x288xf32>
    %c64 = arith.constant 64 : index
    %c0_22 = arith.constant 0 : index
    %27 = vector.load %arg31[%c64, %c0_22] : memref<304x288xf32, #tpu.memory_space<vmem>>, vector<8x288xf32>
    tpu.vector_store %arg31[%c64, %c0_22], %26 {strides = array<i32>} : memref<304x288xf32, #tpu.memory_space<vmem>>, vector<8x288xf32>,
    %c0_23 = arith.constant 0 : index
    %c0_24 = arith.constant 0 : index
    %28 = vector.load %arg31[%c0_23, %c0_24] : memref<304x288xf32, #tpu.memory_space<vmem>>, vector<72x288xf32>
    %29 = arith.truncf %28 : vector<72x288xf32> to vector<72x288xbf16>
    %c0_25 = arith.constant 0 : index
    %c0_26 = arith.constant 0 : index
    %30 = vector.load %arg7[%c0_25, %c0_26] : memref<8x72xbf16, #tpu.memory_space<vmem>>, vector<8x72xbf16>
    %cst_27 = arith.constant dense<0.000000e+00> : vector<8x288xf32>
    %31 = tpu.matmul %30, %29, %cst_27 {dimension_numbers = #tpu.dot_dimension_numbers<[1], [0], [0], [1], [0, 0, 1, 1], [], []>} : vector<8x72xbf16>, vector<72x288xbf16>, vector<8x288xf32> -> vector<8x288xf32>
    %c0_28 = arith.constant 0 : index
    %c0_29 = arith.constant 0 : index
    %32 = vector.load %arg8[%c0_28, %c0_29] : memref<8x1xf32, #tpu.memory_space<vmem>>, vector<8x1xf32>
    %33 = vector.broadcast %32 : vector<8x1xf32> to vector<8x288xf32>
    %34 = arith.addf %31, %33 : vector<8x288xf32>
    %c0_30 = arith.constant 0 : index
    %c0_31 = arith.constant 0 : index
    %35 = vector.load %arg2[%c0_30, %c0_31] : memref<1x288xf32, #tpu.memory_space<vmem>>, vector<1x288xf32>
    %36 = vector.broadcast %35 : vector<1x288xf32> to vector<8x288xf32>
    %37 = arith.mulf %34, %36 : vector<8x288xf32>
    %c0_32 = arith.constant 0 : index
    %c0_33 = arith.constant 0 : index
    %c0_34 = arith.constant 0 : index
    %38 = vector.load %arg26[%c0_32, %c0_33, %c0_34] : memref<1x8x288xf32, #tpu.memory_space<vmem>>, vector<1x8x288xf32>
    %39 = vector.shape_cast %38 : vector<1x8x288xf32> to vector<8x288xf32>
    %40 = vector.shape_cast %37 : vector<8x288xf32> to vector<1x8x288xf32>
    tpu.vector_store %arg26[%c0_32, %c0_33, %c0_34], %40 {strides = array<i32>} : memref<1x8x288xf32, #tpu.memory_space<vmem>>, vector<1x8x288xf32>,
    %cst_35 = arith.constant dense<0.000000e+00> : vector<8xf32>
    %41 = vector.multi_reduction <add>, %37, %cst_35 [1] : vector<8x288xf32> to vector<8xf32>
    %42 = vector.shape_cast %41 : vector<8xf32> to vector<8x1xf32>
    %cst_36 = arith.constant 3.906250e-03 : f32
    %43 = vector.broadcast %cst_36 : f32 to vector<8x1xf32>
    %44 = arith.mulf %42, %43 : vector<8x1xf32>
    %45 = arith.mulf %37, %37 : vector<8x288xf32>
    %cst_37 = arith.constant dense<0.000000e+00> : vector<8xf32>
    %46 = vector.multi_reduction <add>, %45, %cst_37 [1] : vector<8x288xf32> to vector<8xf32>
    %47 = vector.shape_cast %46 : vector<8xf32> to vector<8x1xf32>
    %cst_38 = arith.constant 3.906250e-03 : f32
    %48 = vector.broadcast %cst_38 : f32 to vector<8x1xf32>
    %49 = arith.mulf %47, %48 : vector<8x1xf32>
    %50 = arith.mulf %44, %44 : vector<8x1xf32>
    %51 = arith.subf %49, %50 : vector<8x1xf32>
    %52 = vector.broadcast %44 : vector<8x1xf32> to vector<8x288xf32>
    %53 = arith.subf %37, %52 : vector<8x288xf32>
    %cst_39 = arith.constant 0.000000e+00 : f32
    %54 = vector.broadcast %cst_39 : f32 to vector<8x1xf32>
    %55 = arith.maximumf %51, %54 : vector<8x1xf32>
    %cst_40 = arith.constant 9.99999974E-6 : f32
    %56 = vector.broadcast %cst_40 : f32 to vector<8x1xf32>
    %57 = arith.addf %55, %56 : vector<8x1xf32>
    %58 = math.rsqrt %57 : vector<8x1xf32>
    %59 = vector.broadcast %58 : vector<8x1xf32> to vector<8x288xf32>
    %60 = arith.mulf %53, %59 : vector<8x288xf32>
    %cst_41 = arith.constant 0.000000e+00 : f32
    %61 = vector.broadcast %cst_41 : f32 to vector<8x288xf32>
    %62 = arith.maximumf %60, %61 : vector<8x288xf32>
    %c0_42 = arith.constant 0 : index
    %c0_43 = arith.constant 0 : index
    %63 = vector.load %arg2[%c0_42, %c0_43] : memref<1x288xf32, #tpu.memory_space<vmem>>, vector<1x288xf32>
    %64 = vector.broadcast %63 : vector<1x288xf32> to vector<8x288xf32>
    %65 = arith.mulf %62, %64 : vector<8x288xf32>
    %c0_44 = arith.constant 0 : index
    %c36_45 = arith.constant 36 : index
    %66 = vector.load %arg28[%c0_44, %c36_45] : memref<8x360xf32, #tpu.memory_space<vmem>>, vector<8x288xf32>
    tpu.vector_store %arg28[%c0_44, %c36_45], %65 {strides = array<i32>} : memref<8x360xf32, #tpu.memory_space<vmem>>, vector<8x288xf32>,
    %c0_46 = arith.constant 0 : index
    %c0_47 = arith.constant 0 : index
    %67 = vector.load %arg28[%c0_46, %c0_47] : memref<8x360xf32, #tpu.memory_space<vmem>>, vector<8x360xf32>
    %68 = vector.extract_strided_slice %67 {offsets = [0, 17], sizes = [8, 288], strides = [1, 1]} : vector<8x360xf32> to vector<8x288xf32>
    %c0_48 = arith.constant 0 : index
    %c0_49 = arith.constant 0 : index
    %69 = vector.load %arg31[%c0_48, %c0_49] : memref<304x288xf32, #tpu.memory_space<vmem>>, vector<8x288xf32>
    tpu.vector_store %arg31[%c0_48, %c0_49], %68 {strides = array<i32>} : memref<304x288xf32, #tpu.memory_space<vmem>>, vector<8x288xf32>,
    %70 = vector.extract_strided_slice %67 {offsets = [0, 18], sizes = [8, 288], strides = [1, 1]} : vector<8x360xf32> to vector<8x288xf32>
    %c8_50 = arith.constant 8 : index
    %c0_51 = arith.constant 0 : index
    %71 = vector.load %arg31[%c8_50, %c0_51] : memref<304x288xf32, #tpu.memory_space<vmem>>, vector<8x288xf32>
    tpu.vector_store %arg31[%c8_50, %c0_51], %70 {strides = array<i32>} : memref<304x288xf32, #tpu.memory_space<vmem>>, vector<8x288xf32>,
    %72 = vector.extract_strided_slice %67 {offsets = [0, 19], sizes = [8, 288], strides = [1, 1]} : vector<8x360xf32> to vector<8x288xf32>
    %c16_52 = arith.constant 16 : index
    %c0_53 = arith.constant 0 : index
    %73 = vector.load %arg31[%c16_52, %c0_53] : memref<304x288xf32, #tpu.memory_space<vmem>>, vector<8x288xf32>
    tpu.vector_store %arg31[%c16_52, %c0_53], %72 {strides = array<i32>} : memref<304x288xf32, #tpu.memory_space<vmem>>, vector<8x288xf32>,
    %74 = vector.extract_strided_slice %67 {offsets = [0, 35], sizes = [8, 288], strides = [1, 1]} : vector<8x360xf32> to vector<8x288xf32>
    %c24_54 = arith.constant 24 : index
    %c0_55 = arith.constant 0 : index
    %75 = vector.load %arg31[%c24_54, %c0_55] : memref<304x288xf32, #tpu.memory_space<vmem>>, vector<8x288xf32>
    tpu.vector_store %arg31[%c24_54, %c0_55], %74 {strides = array<i32>} : memref<304x288xf32, #tpu.memory_space<vmem>>, vector<8x288xf32>,
    %76 = vector.extract_strided_slice %67 {offsets = [0, 36], sizes = [8, 288], strides = [1, 1]} : vector<8x360xf32> to vector<8x288xf32>
    %c32_56 = arith.constant 32 : index
    %c0_57 = arith.constant 0 : index
    %77 = vector.load %arg31[%c32_56, %c0_57] : memref<304x288xf32, #tpu.memory_space<vmem>>, vector<8x288xf32>
    tpu.vector_store %arg31[%c32_56, %c0_57], %76 {strides = array<i32>} : memref<304x288xf32, #tpu.memory_space<vmem>>, vector<8x288xf32>,
    %78 = vector.extract_strided_slice %67 {offsets = [0, 37], sizes = [8, 288], strides = [1, 1]} : vector<8x360xf32> to vector<8x288xf32>
    %c40_58 = arith.constant 40 : index
    %c0_59 = arith.constant 0 : index
    %79 = vector.load %arg31[%c40_58, %c0_59] : memref<304x288xf32, #tpu.memory_space<vmem>>, vector<8x288xf32>
    tpu.vector_store %arg31[%c40_58, %c0_59], %78 {strides = array<i32>} : memref<304x288xf32, #tpu.memory_space<vmem>>, vector<8x288xf32>,
    %80 = vector.extract_strided_slice %67 {offsets = [0, 53], sizes = [8, 288], strides = [1, 1]} : vector<8x360xf32> to vector<8x288xf32>
    %c48_60 = arith.constant 48 : index
    %c0_61 = arith.constant 0 : index
    %81 = vector.load %arg31[%c48_60, %c0_61] : memref<304x288xf32, #tpu.memory_space<vmem>>, vector<8x288xf32>
    tpu.vector_store %arg31[%c48_60, %c0_61], %80 {strides = array<i32>} : memref<304x288xf32, #tpu.memory_space<vmem>>, vector<8x288xf32>,
    %82 = vector.extract_strided_slice %67 {offsets = [0, 54], sizes = [8, 288], strides = [1, 1]} : vector<8x360xf32> to vector<8x288xf32>
    %c56_62 = arith.constant 56 : index
    %c0_63 = arith.constant 0 : index
    %83 = vector.load %arg31[%c56_62, %c0_63] : memref<304x288xf32, #tpu.memory_space<vmem>>, vector<8x288xf32>
    tpu.vector_store %arg31[%c56_62, %c0_63], %82 {strides = array<i32>} : memref<304x288xf32, #tpu.memory_space<vmem>>, vector<8x288xf32>,
    %84 = vector.extract_strided_slice %67 {offsets = [0, 55], sizes = [8, 288], strides = [1, 1]} : vector<8x360xf32> to vector<8x288xf32>
    %c64_64 = arith.constant 64 : index
    %c0_65 = arith.constant 0 : index
    %85 = vector.load %arg31[%c64_64, %c0_65] : memref<304x288xf32, #tpu.memory_space<vmem>>, vector<8x288xf32>
    tpu.vector_store %arg31[%c64_64, %c0_65], %84 {strides = array<i32>} : memref<304x288xf32, #tpu.memory_space<vmem>>, vector<8x288xf32>,
    %c0_66 = arith.constant 0 : index
    %c0_67 = arith.constant 0 : index
    %86 = vector.load %arg31[%c0_66, %c0_67] : memref<304x288xf32, #tpu.memory_space<vmem>>, vector<72x288xf32>
    %87 = arith.truncf %86 : vector<72x288xf32> to vector<72x288xbf16>
    %c0_68 = arith.constant 0 : index
    %c0_69 = arith.constant 0 : index
    %88 = vector.load %arg9[%c0_68, %c0_69] : memref<16x72xbf16, #tpu.memory_space<vmem>>, vector<16x72xbf16>
    %cst_70 = arith.constant dense<0.000000e+00> : vector<16x288xf32>
    %89 = tpu.matmul %88, %87, %cst_70 {dimension_numbers = #tpu.dot_dimension_numbers<[1], [0], [0], [1], [0, 0, 1, 1], [], []>} : vector<16x72xbf16>, vector<72x288xbf16>, vector<16x288xf32> -> vector<16x288xf32>
    %c0_71 = arith.constant 0 : index
    %c0_72 = arith.constant 0 : index
    %90 = vector.load %arg10[%c0_71, %c0_72] : memref<16x1xf32, #tpu.memory_space<vmem>>, vector<16x1xf32>
    %91 = vector.broadcast %90 : vector<16x1xf32> to vector<16x288xf32>
    %92 = arith.addf %89, %91 : vector<16x288xf32>
    %c0_73 = arith.constant 0 : index
    %c0_74 = arith.constant 0 : index
    %93 = vector.load %arg2[%c0_73, %c0_74] : memref<1x288xf32, #tpu.memory_space<vmem>>, vector<1x288xf32>
    %94 = vector.broadcast %93 : vector<1x288xf32> to vector<16x288xf32>
    %95 = arith.mulf %92, %94 : vector<16x288xf32>
    %c0_75 = arith.constant 0 : index
    %c0_76 = arith.constant 0 : index
    %96 = vector.load %arg5[%c0_75, %c0_76] : memref<288x80xf32, #tpu.memory_space<vmem>>, vector<288x80xf32>
    %cst_77 = arith.constant dense<0.000000e+00> : vector<16x80xf32>
    %97 = tpu.matmul %95, %96, %cst_77 {dimension_numbers = #tpu.dot_dimension_numbers<[1], [0], [0], [1], [0, 0, 1, 1], [], []>} : vector<16x288xf32>, vector<288x80xf32>, vector<16x80xf32> -> vector<16x80xf32>
    %cst_78 = arith.constant dense<0.000000e+00> : vector<8x80xf32>
    %98 = tpu.matmul %37, %96, %cst_78 {dimension_numbers = #tpu.dot_dimension_numbers<[1], [0], [0], [1], [0, 0, 1, 1], [], []>} : vector<8x288xf32>, vector<288x80xf32>, vector<8x80xf32> -> vector<8x80xf32>
    %cst_79 = arith.constant dense<0.000000e+00> : vector<16xf32>
    %99 = vector.multi_reduction <add>, %97, %cst_79 [1] : vector<16x80xf32> to vector<16xf32>
    %100 = vector.shape_cast %99 : vector<16xf32> to vector<16x1xf32>
    %cst_80 = arith.constant 1.562500e-02 : f32
    %101 = vector.broadcast %cst_80 : f32 to vector<16x1xf32>
    %102 = arith.mulf %100, %101 : vector<16x1xf32>
    %103 = arith.mulf %97, %97 : vector<16x80xf32>
    %cst_81 = arith.constant dense<0.000000e+00> : vector<16xf32>
    %104 = vector.multi_reduction <add>, %103, %cst_81 [1] : vector<16x80xf32> to vector<16xf32>
    %105 = vector.shape_cast %104 : vector<16xf32> to vector<16x1xf32>
    %cst_82 = arith.constant 1.562500e-02 : f32
    %106 = vector.broadcast %cst_82 : f32 to vector<16x1xf32>
    %107 = arith.mulf %105, %106 : vector<16x1xf32>
    %108 = arith.mulf %102, %102 : vector<16x1xf32>
    %109 = arith.subf %107, %108 : vector<16x1xf32>
    %110 = vector.broadcast %102 : vector<16x1xf32> to vector<16x80xf32>
    %111 = arith.subf %97, %110 : vector<16x80xf32>
    %cst_83 = arith.constant 0.000000e+00 : f32
    %112 = vector.broadcast %cst_83 : f32 to vector<16x1xf32>
    %113 = arith.maximumf %109, %112 : vector<16x1xf32>
    %cst_84 = arith.constant 9.99999974E-6 : f32
    %114 = vector.broadcast %cst_84 : f32 to vector<16x1xf32>
    %115 = arith.addf %113, %114 : vector<16x1xf32>
    %116 = math.rsqrt %115 : vector<16x1xf32>
    %117 = vector.broadcast %116 : vector<16x1xf32> to vector<16x80xf32>
    %118 = arith.mulf %111, %117 : vector<16x80xf32>
    %cst_85 = arith.constant 0.000000e+00 : f32
    %119 = vector.broadcast %cst_85 : f32 to vector<16x80xf32>
    %120 = arith.maximumf %118, %119 : vector<16x80xf32>
    %c0_86 = arith.constant 0 : index
    %c0_87 = arith.constant 0 : index
    %121 = vector.load %arg3[%c0_86, %c0_87] : memref<1x80xf32, #tpu.memory_space<vmem>>, vector<1x80xf32>
    %122 = vector.broadcast %121 : vector<1x80xf32> to vector<16x80xf32>
    %123 = arith.mulf %120, %122 : vector<16x80xf32>
    %c0_88 = arith.constant 0 : index
    %c20 = arith.constant 20 : index
    %124 = vector.load %arg29[%c0_88, %c20] : memref<16x120xf32, #tpu.memory_space<vmem>>, vector<16x80xf32>
    tpu.vector_store %arg29[%c0_88, %c20], %123 {strides = array<i32>} : memref<16x120xf32, #tpu.memory_space<vmem>>, vector<16x80xf32>,
    %c0_89 = arith.constant 0 : index
    %c0_90 = arith.constant 0 : index
    %125 = vector.load %arg29[%c0_89, %c0_90] : memref<16x120xf32, #tpu.memory_space<vmem>>, vector<16x120xf32>
    %126 = vector.extract_strided_slice %125 {offsets = [0, 9], sizes = [16, 80], strides = [1, 1]} : vector<16x120xf32> to vector<16x80xf32>
    %c0_91 = arith.constant 0 : index
    %c0_92 = arith.constant 0 : index
    %127 = vector.load %arg31[%c0_91, %c0_92] : memref<304x288xf32, #tpu.memory_space<vmem>>, vector<16x80xf32>
    tpu.vector_store %arg31[%c0_91, %c0_92], %126 {strides = array<i32>} : memref<304x288xf32, #tpu.memory_space<vmem>>, vector<16x80xf32>,
    %128 = vector.extract_strided_slice %125 {offsets = [0, 10], sizes = [16, 80], strides = [1, 1]} : vector<16x120xf32> to vector<16x80xf32>
    %c16_93 = arith.constant 16 : index
    %c0_94 = arith.constant 0 : index
    %129 = vector.load %arg31[%c16_93, %c0_94] : memref<304x288xf32, #tpu.memory_space<vmem>>, vector<16x80xf32>
    tpu.vector_store %arg31[%c16_93, %c0_94], %128 {strides = array<i32>} : memref<304x288xf32, #tpu.memory_space<vmem>>, vector<16x80xf32>,
    %130 = vector.extract_strided_slice %125 {offsets = [0, 11], sizes = [16, 80], strides = [1, 1]} : vector<16x120xf32> to vector<16x80xf32>
    %c32_95 = arith.constant 32 : index
    %c0_96 = arith.constant 0 : index
    %131 = vector.load %arg31[%c32_95, %c0_96] : memref<304x288xf32, #tpu.memory_space<vmem>>, vector<16x80xf32>
    tpu.vector_store %arg31[%c32_95, %c0_96], %130 {strides = array<i32>} : memref<304x288xf32, #tpu.memory_space<vmem>>, vector<16x80xf32>,
    %132 = vector.extract_strided_slice %125 {offsets = [0, 19], sizes = [16, 80], strides = [1, 1]} : vector<16x120xf32> to vector<16x80xf32>
    %c48_97 = arith.constant 48 : index
    %c0_98 = arith.constant 0 : index
    %133 = vector.load %arg31[%c48_97, %c0_98] : memref<304x288xf32, #tpu.memory_space<vmem>>, vector<16x80xf32>
    tpu.vector_store %arg31[%c48_97, %c0_98], %132 {strides = array<i32>} : memref<304x288xf32, #tpu.memory_space<vmem>>, vector<16x80xf32>,
    %134 = vector.extract_strided_slice %125 {offsets = [0, 20], sizes = [16, 80], strides = [1, 1]} : vector<16x120xf32> to vector<16x80xf32>
    %c64_99 = arith.constant 64 : index
    %c0_100 = arith.constant 0 : index
    %135 = vector.load %arg31[%c64_99, %c0_100] : memref<304x288xf32, #tpu.memory_space<vmem>>, vector<16x80xf32>
    tpu.vector_store %arg31[%c64_99, %c0_100], %134 {strides = array<i32>} : memref<304x288xf32, #tpu.memory_space<vmem>>, vector<16x80xf32>,
    %136 = vector.extract_strided_slice %125 {offsets = [0, 21], sizes = [16, 80], strides = [1, 1]} : vector<16x120xf32> to vector<16x80xf32>
    %c80 = arith.constant 80 : index
    %c0_101 = arith.constant 0 : index
    %137 = vector.load %arg31[%c80, %c0_101] : memref<304x288xf32, #tpu.memory_space<vmem>>, vector<16x80xf32>
    tpu.vector_store %arg31[%c80, %c0_101], %136 {strides = array<i32>} : memref<304x288xf32, #tpu.memory_space<vmem>>, vector<16x80xf32>,
    %138 = vector.extract_strided_slice %125 {offsets = [0, 29], sizes = [16, 80], strides = [1, 1]} : vector<16x120xf32> to vector<16x80xf32>
    %c96 = arith.constant 96 : index
    %c0_102 = arith.constant 0 : index
    %139 = vector.load %arg31[%c96, %c0_102] : memref<304x288xf32, #tpu.memory_space<vmem>>, vector<16x80xf32>
    tpu.vector_store %arg31[%c96, %c0_102], %138 {strides = array<i32>} : memref<304x288xf32, #tpu.memory_space<vmem>>, vector<16x80xf32>,
    %140 = vector.extract_strided_slice %125 {offsets = [0, 30], sizes = [16, 80], strides = [1, 1]} : vector<16x120xf32> to vector<16x80xf32>
    %c112 = arith.constant 112 : index
    %c0_103 = arith.constant 0 : index
    %141 = vector.load %arg31[%c112, %c0_103] : memref<304x288xf32, #tpu.memory_space<vmem>>, vector<16x80xf32>
    tpu.vector_store %arg31[%c112, %c0_103], %140 {strides = array<i32>} : memref<304x288xf32, #tpu.memory_space<vmem>>, vector<16x80xf32>,
    %142 = vector.extract_strided_slice %125 {offsets = [0, 31], sizes = [16, 80], strides = [1, 1]} : vector<16x120xf32> to vector<16x80xf32>
    %c128 = arith.constant 128 : index
    %c0_104 = arith.constant 0 : index
    %143 = vector.load %arg31[%c128, %c0_104] : memref<304x288xf32, #tpu.memory_space<vmem>>, vector<16x80xf32>
    tpu.vector_store %arg31[%c128, %c0_104], %142 {strides = array<i32>} : memref<304x288xf32, #tpu.memory_space<vmem>>, vector<16x80xf32>,
    %c144 = arith.constant 144 : index
    %c0_105 = arith.constant 0 : index
    %144 = vector.load %arg31[%c144, %c0_105] : memref<304x288xf32, #tpu.memory_space<vmem>>, vector<8x80xf32>
    tpu.vector_store %arg31[%c144, %c0_105], %98 {strides = array<i32>} : memref<304x288xf32, #tpu.memory_space<vmem>>, vector<8x80xf32>,
    %c0_106 = arith.constant 0 : index
    %c0_107 = arith.constant 0 : index
    %145 = vector.load %arg31[%c0_106, %c0_107] : memref<304x288xf32, #tpu.memory_space<vmem>>, vector<152x80xf32>
    %146 = arith.truncf %145 : vector<152x80xf32> to vector<152x80xbf16>
    %c0_108 = arith.constant 0 : index
    %c0_109 = arith.constant 0 : index
    %147 = vector.load %arg11[%c0_108, %c0_109] : memref<16x152xbf16, #tpu.memory_space<vmem>>, vector<16x152xbf16>
    %cst_110 = arith.constant dense<0.000000e+00> : vector<16x80xf32>
    %148 = tpu.matmul %147, %146, %cst_110 {dimension_numbers = #tpu.dot_dimension_numbers<[1], [0], [0], [1], [0, 0, 1, 1], [], []>} : vector<16x152xbf16>, vector<152x80xbf16>, vector<16x80xf32> -> vector<16x80xf32>
    %c0_111 = arith.constant 0 : index
    %c0_112 = arith.constant 0 : index
    %149 = vector.load %arg12[%c0_111, %c0_112] : memref<16x1xf32, #tpu.memory_space<vmem>>, vector<16x1xf32>
    %150 = vector.broadcast %149 : vector<16x1xf32> to vector<16x80xf32>
    %151 = arith.addf %148, %150 : vector<16x80xf32>
    %c0_113 = arith.constant 0 : index
    %c0_114 = arith.constant 0 : index
    %152 = vector.load %arg3[%c0_113, %c0_114] : memref<1x80xf32, #tpu.memory_space<vmem>>, vector<1x80xf32>
    %153 = vector.broadcast %152 : vector<1x80xf32> to vector<16x80xf32>
    %154 = arith.mulf %151, %153 : vector<16x80xf32>
    %c0_115 = arith.constant 0 : index
    %c0_116 = arith.constant 0 : index
    %c0_117 = arith.constant 0 : index
    %155 = vector.load %arg27[%c0_115, %c0_116, %c0_117] : memref<1x16x80xf32, #tpu.memory_space<vmem>>, vector<1x16x80xf32>
    %156 = vector.shape_cast %155 : vector<1x16x80xf32> to vector<16x80xf32>
    %157 = vector.shape_cast %154 : vector<16x80xf32> to vector<1x16x80xf32>
    tpu.vector_store %arg27[%c0_115, %c0_116, %c0_117], %157 {strides = array<i32>} : memref<1x16x80xf32, #tpu.memory_space<vmem>>, vector<1x16x80xf32>,
    %cst_118 = arith.constant dense<0.000000e+00> : vector<16xf32>
    %158 = vector.multi_reduction <add>, %154, %cst_118 [1] : vector<16x80xf32> to vector<16xf32>
    %159 = vector.shape_cast %158 : vector<16xf32> to vector<16x1xf32>
    %cst_119 = arith.constant 1.562500e-02 : f32
    %160 = vector.broadcast %cst_119 : f32 to vector<16x1xf32>
    %161 = arith.mulf %159, %160 : vector<16x1xf32>
    %162 = arith.mulf %154, %154 : vector<16x80xf32>
    %cst_120 = arith.constant dense<0.000000e+00> : vector<16xf32>
    %163 = vector.multi_reduction <add>, %162, %cst_120 [1] : vector<16x80xf32> to vector<16xf32>
    %164 = vector.shape_cast %163 : vector<16xf32> to vector<16x1xf32>
    %cst_121 = arith.constant 1.562500e-02 : f32
    %165 = vector.broadcast %cst_121 : f32 to vector<16x1xf32>
    %166 = arith.mulf %164, %165 : vector<16x1xf32>
    %167 = arith.mulf %161, %161 : vector<16x1xf32>
    %168 = arith.subf %166, %167 : vector<16x1xf32>
    %169 = vector.broadcast %161 : vector<16x1xf32> to vector<16x80xf32>
    %170 = arith.subf %154, %169 : vector<16x80xf32>
    %cst_122 = arith.constant 0.000000e+00 : f32
    %171 = vector.broadcast %cst_122 : f32 to vector<16x1xf32>
    %172 = arith.maximumf %168, %171 : vector<16x1xf32>
    %cst_123 = arith.constant 9.99999974E-6 : f32
    %173 = vector.broadcast %cst_123 : f32 to vector<16x1xf32>
    %174 = arith.addf %172, %173 : vector<16x1xf32>
    %175 = math.rsqrt %174 : vector<16x1xf32>
    %176 = vector.broadcast %175 : vector<16x1xf32> to vector<16x80xf32>
    %177 = arith.mulf %170, %176 : vector<16x80xf32>
    %cst_124 = arith.constant 0.000000e+00 : f32
    %178 = vector.broadcast %cst_124 : f32 to vector<16x80xf32>
    %179 = arith.maximumf %177, %178 : vector<16x80xf32>
    %c0_125 = arith.constant 0 : index
    %c0_126 = arith.constant 0 : index
    %180 = vector.load %arg3[%c0_125, %c0_126] : memref<1x80xf32, #tpu.memory_space<vmem>>, vector<1x80xf32>
    %181 = vector.broadcast %180 : vector<1x80xf32> to vector<16x80xf32>
    %182 = arith.mulf %179, %181 : vector<16x80xf32>
    %c0_127 = arith.constant 0 : index
    %c20_128 = arith.constant 20 : index
    %183 = vector.load %arg29[%c0_127, %c20_128] : memref<16x120xf32, #tpu.memory_space<vmem>>, vector<16x80xf32>
    tpu.vector_store %arg29[%c0_127, %c20_128], %182 {strides = array<i32>} : memref<16x120xf32, #tpu.memory_space<vmem>>, vector<16x80xf32>,
    %c0_129 = arith.constant 0 : index
    %c0_130 = arith.constant 0 : index
    %184 = vector.load %arg29[%c0_129, %c0_130] : memref<16x120xf32, #tpu.memory_space<vmem>>, vector<16x120xf32>
    %185 = vector.extract_strided_slice %184 {offsets = [0, 9], sizes = [16, 80], strides = [1, 1]} : vector<16x120xf32> to vector<16x80xf32>
    %c0_131 = arith.constant 0 : index
    %c0_132 = arith.constant 0 : index
    %186 = vector.load %arg31[%c0_131, %c0_132] : memref<304x288xf32, #tpu.memory_space<vmem>>, vector<16x80xf32>
    tpu.vector_store %arg31[%c0_131, %c0_132], %185 {strides = array<i32>} : memref<304x288xf32, #tpu.memory_space<vmem>>, vector<16x80xf32>,
    %187 = vector.extract_strided_slice %184 {offsets = [0, 10], sizes = [16, 80], strides = [1, 1]} : vector<16x120xf32> to vector<16x80xf32>
    %c16_133 = arith.constant 16 : index
    %c0_134 = arith.constant 0 : index
    %188 = vector.load %arg31[%c16_133, %c0_134] : memref<304x288xf32, #tpu.memory_space<vmem>>, vector<16x80xf32>
    tpu.vector_store %arg31[%c16_133, %c0_134], %187 {strides = array<i32>} : memref<304x288xf32, #tpu.memory_space<vmem>>, vector<16x80xf32>,
    %189 = vector.extract_strided_slice %184 {offsets = [0, 11], sizes = [16, 80], strides = [1, 1]} : vector<16x120xf32> to vector<16x80xf32>
    %c32_135 = arith.constant 32 : index
    %c0_136 = arith.constant 0 : index
    %190 = vector.load %arg31[%c32_135, %c0_136] : memref<304x288xf32, #tpu.memory_space<vmem>>, vector<16x80xf32>
    tpu.vector_store %arg31[%c32_135, %c0_136], %189 {strides = array<i32>} : memref<304x288xf32, #tpu.memory_space<vmem>>, vector<16x80xf32>,
    %191 = vector.extract_strided_slice %184 {offsets = [0, 19], sizes = [16, 80], strides = [1, 1]} : vector<16x120xf32> to vector<16x80xf32>
    %c48_137 = arith.constant 48 : index
    %c0_138 = arith.constant 0 : index
    %192 = vector.load %arg31[%c48_137, %c0_138] : memref<304x288xf32, #tpu.memory_space<vmem>>, vector<16x80xf32>
    tpu.vector_store %arg31[%c48_137, %c0_138], %191 {strides = array<i32>} : memref<304x288xf32, #tpu.memory_space<vmem>>, vector<16x80xf32>,
    %193 = vector.extract_strided_slice %184 {offsets = [0, 20], sizes = [16, 80], strides = [1, 1]} : vector<16x120xf32> to vector<16x80xf32>
    %c64_139 = arith.constant 64 : index
    %c0_140 = arith.constant 0 : index
    %194 = vector.load %arg31[%c64_139, %c0_140] : memref<304x288xf32, #tpu.memory_space<vmem>>, vector<16x80xf32>
    tpu.vector_store %arg31[%c64_139, %c0_140], %193 {strides = array<i32>} : memref<304x288xf32, #tpu.memory_space<vmem>>, vector<16x80xf32>,
    %195 = vector.extract_strided_slice %184 {offsets = [0, 21], sizes = [16, 80], strides = [1, 1]} : vector<16x120xf32> to vector<16x80xf32>
    %c80_141 = arith.constant 80 : index
    %c0_142 = arith.constant 0 : index
    %196 = vector.load %arg31[%c80_141, %c0_142] : memref<304x288xf32, #tpu.memory_space<vmem>>, vector<16x80xf32>
    tpu.vector_store %arg31[%c80_141, %c0_142], %195 {strides = array<i32>} : memref<304x288xf32, #tpu.memory_space<vmem>>, vector<16x80xf32>,
    %197 = vector.extract_strided_slice %184 {offsets = [0, 29], sizes = [16, 80], strides = [1, 1]} : vector<16x120xf32> to vector<16x80xf32>
    %c96_143 = arith.constant 96 : index
    %c0_144 = arith.constant 0 : index
    %198 = vector.load %arg31[%c96_143, %c0_144] : memref<304x288xf32, #tpu.memory_space<vmem>>, vector<16x80xf32>
    tpu.vector_store %arg31[%c96_143, %c0_144], %197 {strides = array<i32>} : memref<304x288xf32, #tpu.memory_space<vmem>>, vector<16x80xf32>,
    %199 = vector.extract_strided_slice %184 {offsets = [0, 30], sizes = [16, 80], strides = [1, 1]} : vector<16x120xf32> to vector<16x80xf32>
    %c112_145 = arith.constant 112 : index
    %c0_146 = arith.constant 0 : index
    %200 = vector.load %arg31[%c112_145, %c0_146] : memref<304x288xf32, #tpu.memory_space<vmem>>, vector<16x80xf32>
    tpu.vector_store %arg31[%c112_145, %c0_146], %199 {strides = array<i32>} : memref<304x288xf32, #tpu.memory_space<vmem>>, vector<16x80xf32>,
    %201 = vector.extract_strided_slice %184 {offsets = [0, 31], sizes = [16, 80], strides = [1, 1]} : vector<16x120xf32> to vector<16x80xf32>
    %c128_147 = arith.constant 128 : index
    %c0_148 = arith.constant 0 : index
    %202 = vector.load %arg31[%c128_147, %c0_148] : memref<304x288xf32, #tpu.memory_space<vmem>>, vector<16x80xf32>
    tpu.vector_store %arg31[%c128_147, %c0_148], %201 {strides = array<i32>} : memref<304x288xf32, #tpu.memory_space<vmem>>, vector<16x80xf32>,
    %c0_149 = arith.constant 0 : index
    %c0_150 = arith.constant 0 : index
    %203 = vector.load %arg31[%c0_149, %c0_150] : memref<304x288xf32, #tpu.memory_space<vmem>>, vector<144x80xf32>
    %204 = arith.truncf %203 : vector<144x80xf32> to vector<144x80xbf16>
    %c0_151 = arith.constant 0 : index
    %c0_152 = arith.constant 0 : index
    %205 = vector.load %arg13[%c0_151, %c0_152] : memref<32x144xbf16, #tpu.memory_space<vmem>>, vector<32x144xbf16>
    %cst_153 = arith.constant dense<0.000000e+00> : vector<32x80xf32>
    %206 = tpu.matmul %205, %204, %cst_153 {dimension_numbers = #tpu.dot_dimension_numbers<[1], [0], [0], [1], [0, 0, 1, 1], [], []>} : vector<32x144xbf16>, vector<144x80xbf16>, vector<32x80xf32> -> vector<32x80xf32>
    %c0_154 = arith.constant 0 : index
    %c0_155 = arith.constant 0 : index
    %207 = vector.load %arg14[%c0_154, %c0_155] : memref<32x1xf32, #tpu.memory_space<vmem>>, vector<32x1xf32>
    %208 = vector.broadcast %207 : vector<32x1xf32> to vector<32x80xf32>
    %209 = arith.addf %206, %208 : vector<32x80xf32>
    %c0_156 = arith.constant 0 : index
    %c0_157 = arith.constant 0 : index
    %210 = vector.load %arg3[%c0_156, %c0_157] : memref<1x80xf32, #tpu.memory_space<vmem>>, vector<1x80xf32>
    %211 = vector.broadcast %210 : vector<1x80xf32> to vector<32x80xf32>
    %212 = arith.mulf %209, %211 : vector<32x80xf32>
    %c0_158 = arith.constant 0 : index
    %c0_159 = arith.constant 0 : index
    %213 = vector.load %arg6[%c0_158, %c0_159] : memref<80x24xf32, #tpu.memory_space<vmem>>, vector<80x24xf32>
    %cst_160 = arith.constant dense<0.000000e+00> : vector<32x24xf32>
    %214 = tpu.matmul %212, %213, %cst_160 {dimension_numbers = #tpu.dot_dimension_numbers<[1], [0], [0], [1], [0, 0, 1, 1], [], []>} : vector<32x80xf32>, vector<80x24xf32>, vector<32x24xf32> -> vector<32x24xf32>
    %cst_161 = arith.constant dense<0.000000e+00> : vector<16x24xf32>
    %215 = tpu.matmul %154, %213, %cst_161 {dimension_numbers = #tpu.dot_dimension_numbers<[1], [0], [0], [1], [0, 0, 1, 1], [], []>} : vector<16x80xf32>, vector<80x24xf32>, vector<16x24xf32> -> vector<16x24xf32>
    %cst_162 = arith.constant dense<0.000000e+00> : vector<32xf32>
    %216 = vector.multi_reduction <add>, %214, %cst_162 [1] : vector<32x24xf32> to vector<32xf32>
    %217 = vector.shape_cast %216 : vector<32xf32> to vector<32x1xf32>
    %cst_163 = arith.constant 6.250000e-02 : f32
    %218 = vector.broadcast %cst_163 : f32 to vector<32x1xf32>
    %219 = arith.mulf %217, %218 : vector<32x1xf32>
    %220 = arith.mulf %214, %214 : vector<32x24xf32>
    %cst_164 = arith.constant dense<0.000000e+00> : vector<32xf32>
    %221 = vector.multi_reduction <add>, %220, %cst_164 [1] : vector<32x24xf32> to vector<32xf32>
    %222 = vector.shape_cast %221 : vector<32xf32> to vector<32x1xf32>
    %cst_165 = arith.constant 6.250000e-02 : f32
    %223 = vector.broadcast %cst_165 : f32 to vector<32x1xf32>
    %224 = arith.mulf %222, %223 : vector<32x1xf32>
    %225 = arith.mulf %219, %219 : vector<32x1xf32>
    %226 = arith.subf %224, %225 : vector<32x1xf32>
    %227 = vector.broadcast %219 : vector<32x1xf32> to vector<32x24xf32>
    %228 = arith.subf %214, %227 : vector<32x24xf32>
    %cst_166 = arith.constant 0.000000e+00 : f32
    %229 = vector.broadcast %cst_166 : f32 to vector<32x1xf32>
    %230 = arith.maximumf %226, %229 : vector<32x1xf32>
    %cst_167 = arith.constant 9.99999974E-6 : f32
    %231 = vector.broadcast %cst_167 : f32 to vector<32x1xf32>
    %232 = arith.addf %230, %231 : vector<32x1xf32>
    %233 = math.rsqrt %232 : vector<32x1xf32>
    %234 = vector.broadcast %233 : vector<32x1xf32> to vector<32x24xf32>
    %235 = arith.mulf %228, %234 : vector<32x24xf32>
    %cst_168 = arith.constant 0.000000e+00 : f32
    %236 = vector.broadcast %cst_168 : f32 to vector<32x24xf32>
    %237 = arith.maximumf %235, %236 : vector<32x24xf32>
    %c0_169 = arith.constant 0 : index
    %c0_170 = arith.constant 0 : index
    %238 = vector.load %arg4[%c0_169, %c0_170] : memref<1x24xf32, #tpu.memory_space<vmem>>, vector<1x24xf32>
    %239 = vector.broadcast %238 : vector<1x24xf32> to vector<32x24xf32>
    %240 = arith.mulf %237, %239 : vector<32x24xf32>
    %c0_171 = arith.constant 0 : index
    %c12 = arith.constant 12 : index
    %241 = vector.load %arg30[%c0_171, %c12] : memref<32x48xf32, #tpu.memory_space<vmem>>, vector<32x24xf32>
    tpu.vector_store %arg30[%c0_171, %c12], %240 {strides = array<i32>} : memref<32x48xf32, #tpu.memory_space<vmem>>, vector<32x24xf32>,
    %c0_172 = arith.constant 0 : index
    %c0_173 = arith.constant 0 : index
    %242 = vector.load %arg30[%c0_172, %c0_173] : memref<32x48xf32, #tpu.memory_space<vmem>>, vector<32x48xf32>
    %243 = vector.extract_strided_slice %242 {offsets = [0, 5], sizes = [32, 24], strides = [1, 1]} : vector<32x48xf32> to vector<32x24xf32>
    %c0_174 = arith.constant 0 : index
    %c0_175 = arith.constant 0 : index
    %244 = vector.load %arg31[%c0_174, %c0_175] : memref<304x288xf32, #tpu.memory_space<vmem>>, vector<32x24xf32>
    tpu.vector_store %arg31[%c0_174, %c0_175], %243 {strides = array<i32>} : memref<304x288xf32, #tpu.memory_space<vmem>>, vector<32x24xf32>,
    %245 = vector.extract_strided_slice %242 {offsets = [0, 6], sizes = [32, 24], strides = [1, 1]} : vector<32x48xf32> to vector<32x24xf32>
    %c32_176 = arith.constant 32 : index
    %c0_177 = arith.constant 0 : index
    %246 = vector.load %arg31[%c32_176, %c0_177] : memref<304x288xf32, #tpu.memory_space<vmem>>, vector<32x24xf32>
    tpu.vector_store %arg31[%c32_176, %c0_177], %245 {strides = array<i32>} : memref<304x288xf32, #tpu.memory_space<vmem>>, vector<32x24xf32>,
    %247 = vector.extract_strided_slice %242 {offsets = [0, 7], sizes = [32, 24], strides = [1, 1]} : vector<32x48xf32> to vector<32x24xf32>
    %c64_178 = arith.constant 64 : index
    %c0_179 = arith.constant 0 : index
    %248 = vector.load %arg31[%c64_178, %c0_179] : memref<304x288xf32, #tpu.memory_space<vmem>>, vector<32x24xf32>
    tpu.vector_store %arg31[%c64_178, %c0_179], %247 {strides = array<i32>} : memref<304x288xf32, #tpu.memory_space<vmem>>, vector<32x24xf32>,
    %249 = vector.extract_strided_slice %242 {offsets = [0, 11], sizes = [32, 24], strides = [1, 1]} : vector<32x48xf32> to vector<32x24xf32>
    %c96_180 = arith.constant 96 : index
    %c0_181 = arith.constant 0 : index
    %250 = vector.load %arg31[%c96_180, %c0_181] : memref<304x288xf32, #tpu.memory_space<vmem>>, vector<32x24xf32>
    tpu.vector_store %arg31[%c96_180, %c0_181], %249 {strides = array<i32>} : memref<304x288xf32, #tpu.memory_space<vmem>>, vector<32x24xf32>,
    %251 = vector.extract_strided_slice %242 {offsets = [0, 12], sizes = [32, 24], strides = [1, 1]} : vector<32x48xf32> to vector<32x24xf32>
    %c128_182 = arith.constant 128 : index
    %c0_183 = arith.constant 0 : index
    %252 = vector.load %arg31[%c128_182, %c0_183] : memref<304x288xf32, #tpu.memory_space<vmem>>, vector<32x24xf32>
    tpu.vector_store %arg31[%c128_182, %c0_183], %251 {strides = array<i32>} : memref<304x288xf32, #tpu.memory_space<vmem>>, vector<32x24xf32>,
    %253 = vector.extract_strided_slice %242 {offsets = [0, 13], sizes = [32, 24], strides = [1, 1]} : vector<32x48xf32> to vector<32x24xf32>
    %c160 = arith.constant 160 : index
    %c0_184 = arith.constant 0 : index
    %254 = vector.load %arg31[%c160, %c0_184] : memref<304x288xf32, #tpu.memory_space<vmem>>, vector<32x24xf32>
    tpu.vector_store %arg31[%c160, %c0_184], %253 {strides = array<i32>} : memref<304x288xf32, #tpu.memory_space<vmem>>, vector<32x24xf32>,
    %255 = vector.extract_strided_slice %242 {offsets = [0, 17], sizes = [32, 24], strides = [1, 1]} : vector<32x48xf32> to vector<32x24xf32>
    %c192 = arith.constant 192 : index
    %c0_185 = arith.constant 0 : index
    %256 = vector.load %arg31[%c192, %c0_185] : memref<304x288xf32, #tpu.memory_space<vmem>>, vector<32x24xf32>
    tpu.vector_store %arg31[%c192, %c0_185], %255 {strides = array<i32>} : memref<304x288xf32, #tpu.memory_space<vmem>>, vector<32x24xf32>,
    %257 = vector.extract_strided_slice %242 {offsets = [0, 18], sizes = [32, 24], strides = [1, 1]} : vector<32x48xf32> to vector<32x24xf32>
    %c224 = arith.constant 224 : index
    %c0_186 = arith.constant 0 : index
    %258 = vector.load %arg31[%c224, %c0_186] : memref<304x288xf32, #tpu.memory_space<vmem>>, vector<32x24xf32>
    tpu.vector_store %arg31[%c224, %c0_186], %257 {strides = array<i32>} : memref<304x288xf32, #tpu.memory_space<vmem>>, vector<32x24xf32>,
    %259 = vector.extract_strided_slice %242 {offsets = [0, 19], sizes = [32, 24], strides = [1, 1]} : vector<32x48xf32> to vector<32x24xf32>
    %c256 = arith.constant 256 : index
    %c0_187 = arith.constant 0 : index
    %260 = vector.load %arg31[%c256, %c0_187] : memref<304x288xf32, #tpu.memory_space<vmem>>, vector<32x24xf32>
    tpu.vector_store %arg31[%c256, %c0_187], %259 {strides = array<i32>} : memref<304x288xf32, #tpu.memory_space<vmem>>, vector<32x24xf32>,
    %c288 = arith.constant 288 : index
    %c0_188 = arith.constant 0 : index
    %261 = vector.load %arg31[%c288, %c0_188] : memref<304x288xf32, #tpu.memory_space<vmem>>, vector<16x24xf32>
    tpu.vector_store %arg31[%c288, %c0_188], %215 {strides = array<i32>} : memref<304x288xf32, #tpu.memory_space<vmem>>, vector<16x24xf32>,
    %c0_189 = arith.constant 0 : index
    %c0_190 = arith.constant 0 : index
    %262 = vector.load %arg31[%c0_189, %c0_190] : memref<304x288xf32, #tpu.memory_space<vmem>>, vector<304x24xf32>
    %263 = arith.truncf %262 : vector<304x24xf32> to vector<304x24xbf16>
    %c0_191 = arith.constant 0 : index
    %c0_192 = arith.constant 0 : index
    %264 = vector.load %arg15[%c0_191, %c0_192] : memref<32x304xbf16, #tpu.memory_space<vmem>>, vector<32x304xbf16>
    %cst_193 = arith.constant dense<0.000000e+00> : vector<32x24xf32>
    %265 = tpu.matmul %264, %263, %cst_193 {dimension_numbers = #tpu.dot_dimension_numbers<[1], [0], [0], [1], [0, 0, 1, 1], [], []>} : vector<32x304xbf16>, vector<304x24xbf16>, vector<32x24xf32> -> vector<32x24xf32>
    %c0_194 = arith.constant 0 : index
    %c0_195 = arith.constant 0 : index
    %266 = vector.load %arg16[%c0_194, %c0_195] : memref<32x1xf32, #tpu.memory_space<vmem>>, vector<32x1xf32>
    %267 = vector.broadcast %266 : vector<32x1xf32> to vector<32x24xf32>
    %268 = arith.addf %265, %267 : vector<32x24xf32>
    %c0_196 = arith.constant 0 : index
    %c0_197 = arith.constant 0 : index
    %269 = vector.load %arg4[%c0_196, %c0_197] : memref<1x24xf32, #tpu.memory_space<vmem>>, vector<1x24xf32>
    %270 = vector.broadcast %269 : vector<1x24xf32> to vector<32x24xf32>
    %271 = arith.mulf %268, %270 : vector<32x24xf32>
    %cst_198 = arith.constant dense<0.000000e+00> : vector<32xf32>
    %272 = vector.multi_reduction <add>, %271, %cst_198 [1] : vector<32x24xf32> to vector<32xf32>
    %273 = vector.shape_cast %272 : vector<32xf32> to vector<32x1xf32>
    %cst_199 = arith.constant 6.250000e-02 : f32
    %274 = vector.broadcast %cst_199 : f32 to vector<32x1xf32>
    %275 = arith.mulf %273, %274 : vector<32x1xf32>
    %276 = arith.mulf %271, %271 : vector<32x24xf32>
    %cst_200 = arith.constant dense<0.000000e+00> : vector<32xf32>
    %277 = vector.multi_reduction <add>, %276, %cst_200 [1] : vector<32x24xf32> to vector<32xf32>
    %278 = vector.shape_cast %277 : vector<32xf32> to vector<32x1xf32>
    %cst_201 = arith.constant 6.250000e-02 : f32
    %279 = vector.broadcast %cst_201 : f32 to vector<32x1xf32>
    %280 = arith.mulf %278, %279 : vector<32x1xf32>
    %281 = arith.mulf %275, %275 : vector<32x1xf32>
    %282 = arith.subf %280, %281 : vector<32x1xf32>
    %283 = vector.broadcast %275 : vector<32x1xf32> to vector<32x24xf32>
    %284 = arith.subf %271, %283 : vector<32x24xf32>
    %cst_202 = arith.constant 0.000000e+00 : f32
    %285 = vector.broadcast %cst_202 : f32 to vector<32x1xf32>
    %286 = arith.maximumf %282, %285 : vector<32x1xf32>
    %cst_203 = arith.constant 9.99999974E-6 : f32
    %287 = vector.broadcast %cst_203 : f32 to vector<32x1xf32>
    %288 = arith.addf %286, %287 : vector<32x1xf32>
    %289 = math.rsqrt %288 : vector<32x1xf32>
    %290 = vector.broadcast %289 : vector<32x1xf32> to vector<32x24xf32>
    %291 = arith.mulf %284, %290 : vector<32x24xf32>
    %cst_204 = arith.constant 0.000000e+00 : f32
    %292 = vector.broadcast %cst_204 : f32 to vector<32x24xf32>
    %293 = arith.maximumf %291, %292 : vector<32x24xf32>
    %c0_205 = arith.constant 0 : index
    %c0_206 = arith.constant 0 : index
    %294 = vector.load %arg4[%c0_205, %c0_206] : memref<1x24xf32, #tpu.memory_space<vmem>>, vector<1x24xf32>
    %295 = vector.broadcast %294 : vector<1x24xf32> to vector<32x24xf32>
    %296 = arith.mulf %293, %295 : vector<32x24xf32>
    %c0_207 = arith.constant 0 : index
    %c12_208 = arith.constant 12 : index
    %297 = vector.load %arg30[%c0_207, %c12_208] : memref<32x48xf32, #tpu.memory_space<vmem>>, vector<32x24xf32>
    tpu.vector_store %arg30[%c0_207, %c12_208], %296 {strides = array<i32>} : memref<32x48xf32, #tpu.memory_space<vmem>>, vector<32x24xf32>,
    %c0_209 = arith.constant 0 : index
    %c0_210 = arith.constant 0 : index
    %298 = vector.load %arg30[%c0_209, %c0_210] : memref<32x48xf32, #tpu.memory_space<vmem>>, vector<32x48xf32>
    %299 = vector.extract_strided_slice %298 {offsets = [0, 5], sizes = [32, 24], strides = [1, 1]} : vector<32x48xf32> to vector<32x24xf32>
    %c0_211 = arith.constant 0 : index
    %c0_212 = arith.constant 0 : index
    %300 = vector.load %arg31[%c0_211, %c0_212] : memref<304x288xf32, #tpu.memory_space<vmem>>, vector<32x24xf32>
    tpu.vector_store %arg31[%c0_211, %c0_212], %299 {strides = array<i32>} : memref<304x288xf32, #tpu.memory_space<vmem>>, vector<32x24xf32>,
    %301 = vector.extract_strided_slice %298 {offsets = [0, 6], sizes = [32, 24], strides = [1, 1]} : vector<32x48xf32> to vector<32x24xf32>
    %c32_213 = arith.constant 32 : index
    %c0_214 = arith.constant 0 : index
    %302 = vector.load %arg31[%c32_213, %c0_214] : memref<304x288xf32, #tpu.memory_space<vmem>>, vector<32x24xf32>
    tpu.vector_store %arg31[%c32_213, %c0_214], %301 {strides = array<i32>} : memref<304x288xf32, #tpu.memory_space<vmem>>, vector<32x24xf32>,
    %303 = vector.extract_strided_slice %298 {offsets = [0, 7], sizes = [32, 24], strides = [1, 1]} : vector<32x48xf32> to vector<32x24xf32>
    %c64_215 = arith.constant 64 : index
    %c0_216 = arith.constant 0 : index
    %304 = vector.load %arg31[%c64_215, %c0_216] : memref<304x288xf32, #tpu.memory_space<vmem>>, vector<32x24xf32>
    tpu.vector_store %arg31[%c64_215, %c0_216], %303 {strides = array<i32>} : memref<304x288xf32, #tpu.memory_space<vmem>>, vector<32x24xf32>,
    %305 = vector.extract_strided_slice %298 {offsets = [0, 11], sizes = [32, 24], strides = [1, 1]} : vector<32x48xf32> to vector<32x24xf32>
    %c96_217 = arith.constant 96 : index
    %c0_218 = arith.constant 0 : index
    %306 = vector.load %arg31[%c96_217, %c0_218] : memref<304x288xf32, #tpu.memory_space<vmem>>, vector<32x24xf32>
    tpu.vector_store %arg31[%c96_217, %c0_218], %305 {strides = array<i32>} : memref<304x288xf32, #tpu.memory_space<vmem>>, vector<32x24xf32>,
    %307 = vector.extract_strided_slice %298 {offsets = [0, 12], sizes = [32, 24], strides = [1, 1]} : vector<32x48xf32> to vector<32x24xf32>
    %c128_219 = arith.constant 128 : index
    %c0_220 = arith.constant 0 : index
    %308 = vector.load %arg31[%c128_219, %c0_220] : memref<304x288xf32, #tpu.memory_space<vmem>>, vector<32x24xf32>
    tpu.vector_store %arg31[%c128_219, %c0_220], %307 {strides = array<i32>} : memref<304x288xf32, #tpu.memory_space<vmem>>, vector<32x24xf32>,
    %309 = vector.extract_strided_slice %298 {offsets = [0, 13], sizes = [32, 24], strides = [1, 1]} : vector<32x48xf32> to vector<32x24xf32>
    %c160_221 = arith.constant 160 : index
    %c0_222 = arith.constant 0 : index
    %310 = vector.load %arg31[%c160_221, %c0_222] : memref<304x288xf32, #tpu.memory_space<vmem>>, vector<32x24xf32>
    tpu.vector_store %arg31[%c160_221, %c0_222], %309 {strides = array<i32>} : memref<304x288xf32, #tpu.memory_space<vmem>>, vector<32x24xf32>,
    %311 = vector.extract_strided_slice %298 {offsets = [0, 17], sizes = [32, 24], strides = [1, 1]} : vector<32x48xf32> to vector<32x24xf32>
    %c192_223 = arith.constant 192 : index
    %c0_224 = arith.constant 0 : index
    %312 = vector.load %arg31[%c192_223, %c0_224] : memref<304x288xf32, #tpu.memory_space<vmem>>, vector<32x24xf32>
    tpu.vector_store %arg31[%c192_223, %c0_224], %311 {strides = array<i32>} : memref<304x288xf32, #tpu.memory_space<vmem>>, vector<32x24xf32>,
    %313 = vector.extract_strided_slice %298 {offsets = [0, 18], sizes = [32, 24], strides = [1, 1]} : vector<32x48xf32> to vector<32x24xf32>
    %c224_225 = arith.constant 224 : index
    %c0_226 = arith.constant 0 : index
    %314 = vector.load %arg31[%c224_225, %c0_226] : memref<304x288xf32, #tpu.memory_space<vmem>>, vector<32x24xf32>
    tpu.vector_store %arg31[%c224_225, %c0_226], %313 {strides = array<i32>} : memref<304x288xf32, #tpu.memory_space<vmem>>, vector<32x24xf32>,
    %315 = vector.extract_strided_slice %298 {offsets = [0, 19], sizes = [32, 24], strides = [1, 1]} : vector<32x48xf32> to vector<32x24xf32>
    %c256_227 = arith.constant 256 : index
    %c0_228 = arith.constant 0 : index
    %316 = vector.load %arg31[%c256_227, %c0_228] : memref<304x288xf32, #tpu.memory_space<vmem>>, vector<32x24xf32>
    tpu.vector_store %arg31[%c256_227, %c0_228], %315 {strides = array<i32>} : memref<304x288xf32, #tpu.memory_space<vmem>>, vector<32x24xf32>,
    %c0_229 = arith.constant 0 : index
    %c0_230 = arith.constant 0 : index
    %317 = vector.load %arg31[%c0_229, %c0_230] : memref<304x288xf32, #tpu.memory_space<vmem>>, vector<288x24xf32>
    %318 = arith.truncf %317 : vector<288x24xf32> to vector<288x24xbf16>
    %c0_231 = arith.constant 0 : index
    %c0_232 = arith.constant 0 : index
    %319 = vector.load %arg17[%c0_231, %c0_232] : memref<32x288xbf16, #tpu.memory_space<vmem>>, vector<32x288xbf16>
    %cst_233 = arith.constant dense<0.000000e+00> : vector<32x24xf32>
    %320 = tpu.matmul %319, %318, %cst_233 {dimension_numbers = #tpu.dot_dimension_numbers<[1], [0], [0], [1], [0, 0, 1, 1], [], []>} : vector<32x288xbf16>, vector<288x24xbf16>, vector<32x24xf32> -> vector<32x24xf32>
    %c0_234 = arith.constant 0 : index
    %c0_235 = arith.constant 0 : index
    %321 = vector.load %arg18[%c0_234, %c0_235] : memref<32x1xf32, #tpu.memory_space<vmem>>, vector<32x1xf32>
    %322 = vector.broadcast %321 : vector<32x1xf32> to vector<32x24xf32>
    %323 = arith.addf %320, %322 : vector<32x24xf32>
    %c0_236 = arith.constant 0 : index
    %c0_237 = arith.constant 0 : index
    %324 = vector.load %arg4[%c0_236, %c0_237] : memref<1x24xf32, #tpu.memory_space<vmem>>, vector<1x24xf32>
    %325 = vector.broadcast %324 : vector<1x24xf32> to vector<32x24xf32>
    %326 = arith.mulf %323, %325 : vector<32x24xf32>
    %cst_238 = arith.constant dense<0.000000e+00> : vector<32xf32>
    %327 = vector.multi_reduction <add>, %326, %cst_238 [1] : vector<32x24xf32> to vector<32xf32>
    %328 = vector.shape_cast %327 : vector<32xf32> to vector<32x1xf32>
    %cst_239 = arith.constant 6.250000e-02 : f32
    %329 = vector.broadcast %cst_239 : f32 to vector<32x1xf32>
    %330 = arith.mulf %328, %329 : vector<32x1xf32>
    %331 = arith.mulf %326, %326 : vector<32x24xf32>
    %cst_240 = arith.constant dense<0.000000e+00> : vector<32xf32>
    %332 = vector.multi_reduction <add>, %331, %cst_240 [1] : vector<32x24xf32> to vector<32xf32>
    %333 = vector.shape_cast %332 : vector<32xf32> to vector<32x1xf32>
    %cst_241 = arith.constant 6.250000e-02 : f32
    %334 = vector.broadcast %cst_241 : f32 to vector<32x1xf32>
    %335 = arith.mulf %333, %334 : vector<32x1xf32>
    %336 = arith.mulf %330, %330 : vector<32x1xf32>
    %337 = arith.subf %335, %336 : vector<32x1xf32>
    %338 = vector.broadcast %330 : vector<32x1xf32> to vector<32x24xf32>
    %339 = arith.subf %326, %338 : vector<32x24xf32>
    %cst_242 = arith.constant 0.000000e+00 : f32
    %340 = vector.broadcast %cst_242 : f32 to vector<32x1xf32>
    %341 = arith.maximumf %337, %340 : vector<32x1xf32>
    %cst_243 = arith.constant 9.99999974E-6 : f32
    %342 = vector.broadcast %cst_243 : f32 to vector<32x1xf32>
    %343 = arith.addf %341, %342 : vector<32x1xf32>
    %344 = math.rsqrt %343 : vector<32x1xf32>
    %345 = vector.broadcast %344 : vector<32x1xf32> to vector<32x24xf32>
    %346 = arith.mulf %339, %345 : vector<32x24xf32>
    %cst_244 = arith.constant 0.000000e+00 : f32
    %347 = vector.broadcast %cst_244 : f32 to vector<32x24xf32>
    %348 = arith.maximumf %346, %347 : vector<32x24xf32>
    %c0_245 = arith.constant 0 : index
    %c0_246 = arith.constant 0 : index
    %349 = vector.load %arg4[%c0_245, %c0_246] : memref<1x24xf32, #tpu.memory_space<vmem>>, vector<1x24xf32>
    %350 = vector.broadcast %349 : vector<1x24xf32> to vector<32x24xf32>
    %351 = arith.mulf %348, %350 : vector<32x24xf32>
    %c0_247 = arith.constant 0 : index
    %c12_248 = arith.constant 12 : index
    %352 = vector.load %arg30[%c0_247, %c12_248] : memref<32x48xf32, #tpu.memory_space<vmem>>, vector<32x24xf32>
    tpu.vector_store %arg30[%c0_247, %c12_248], %351 {strides = array<i32>} : memref<32x48xf32, #tpu.memory_space<vmem>>, vector<32x24xf32>,
    %c0_249 = arith.constant 0 : index
    %c0_250 = arith.constant 0 : index
    %353 = vector.load %arg30[%c0_249, %c0_250] : memref<32x48xf32, #tpu.memory_space<vmem>>, vector<32x48xf32>
    %354 = vector.extract_strided_slice %353 {offsets = [0, 5], sizes = [32, 24], strides = [1, 1]} : vector<32x48xf32> to vector<32x24xf32>
    %c0_251 = arith.constant 0 : index
    %c0_252 = arith.constant 0 : index
    %355 = vector.load %arg31[%c0_251, %c0_252] : memref<304x288xf32, #tpu.memory_space<vmem>>, vector<32x24xf32>
    tpu.vector_store %arg31[%c0_251, %c0_252], %354 {strides = array<i32>} : memref<304x288xf32, #tpu.memory_space<vmem>>, vector<32x24xf32>,
    %356 = vector.extract_strided_slice %353 {offsets = [0, 6], sizes = [32, 24], strides = [1, 1]} : vector<32x48xf32> to vector<32x24xf32>
    %c32_253 = arith.constant 32 : index
    %c0_254 = arith.constant 0 : index
    %357 = vector.load %arg31[%c32_253, %c0_254] : memref<304x288xf32, #tpu.memory_space<vmem>>, vector<32x24xf32>
    tpu.vector_store %arg31[%c32_253, %c0_254], %356 {strides = array<i32>} : memref<304x288xf32, #tpu.memory_space<vmem>>, vector<32x24xf32>,
    %358 = vector.extract_strided_slice %353 {offsets = [0, 7], sizes = [32, 24], strides = [1, 1]} : vector<32x48xf32> to vector<32x24xf32>
    %c64_255 = arith.constant 64 : index
    %c0_256 = arith.constant 0 : index
    %359 = vector.load %arg31[%c64_255, %c0_256] : memref<304x288xf32, #tpu.memory_space<vmem>>, vector<32x24xf32>
    tpu.vector_store %arg31[%c64_255, %c0_256], %358 {strides = array<i32>} : memref<304x288xf32, #tpu.memory_space<vmem>>, vector<32x24xf32>,
    %360 = vector.extract_strided_slice %353 {offsets = [0, 11], sizes = [32, 24], strides = [1, 1]} : vector<32x48xf32> to vector<32x24xf32>
    %c96_257 = arith.constant 96 : index
    %c0_258 = arith.constant 0 : index
    %361 = vector.load %arg31[%c96_257, %c0_258] : memref<304x288xf32, #tpu.memory_space<vmem>>, vector<32x24xf32>
    tpu.vector_store %arg31[%c96_257, %c0_258], %360 {strides = array<i32>} : memref<304x288xf32, #tpu.memory_space<vmem>>, vector<32x24xf32>,
    %362 = vector.extract_strided_slice %353 {offsets = [0, 12], sizes = [32, 24], strides = [1, 1]} : vector<32x48xf32> to vector<32x24xf32>
    %c128_259 = arith.constant 128 : index
    %c0_260 = arith.constant 0 : index
    %363 = vector.load %arg31[%c128_259, %c0_260] : memref<304x288xf32, #tpu.memory_space<vmem>>, vector<32x24xf32>
    tpu.vector_store %arg31[%c128_259, %c0_260], %362 {strides = array<i32>} : memref<304x288xf32, #tpu.memory_space<vmem>>, vector<32x24xf32>,
    %364 = vector.extract_strided_slice %353 {offsets = [0, 13], sizes = [32, 24], strides = [1, 1]} : vector<32x48xf32> to vector<32x24xf32>
    %c160_261 = arith.constant 160 : index
    %c0_262 = arith.constant 0 : index
    %365 = vector.load %arg31[%c160_261, %c0_262] : memref<304x288xf32, #tpu.memory_space<vmem>>, vector<32x24xf32>
    tpu.vector_store %arg31[%c160_261, %c0_262], %364 {strides = array<i32>} : memref<304x288xf32, #tpu.memory_space<vmem>>, vector<32x24xf32>,
    %366 = vector.extract_strided_slice %353 {offsets = [0, 17], sizes = [32, 24], strides = [1, 1]} : vector<32x48xf32> to vector<32x24xf32>
    %c192_263 = arith.constant 192 : index
    %c0_264 = arith.constant 0 : index
    %367 = vector.load %arg31[%c192_263, %c0_264] : memref<304x288xf32, #tpu.memory_space<vmem>>, vector<32x24xf32>
    tpu.vector_store %arg31[%c192_263, %c0_264], %366 {strides = array<i32>} : memref<304x288xf32, #tpu.memory_space<vmem>>, vector<32x24xf32>,
    %368 = vector.extract_strided_slice %353 {offsets = [0, 18], sizes = [32, 24], strides = [1, 1]} : vector<32x48xf32> to vector<32x24xf32>
    %c224_265 = arith.constant 224 : index
    %c0_266 = arith.constant 0 : index
    %369 = vector.load %arg31[%c224_265, %c0_266] : memref<304x288xf32, #tpu.memory_space<vmem>>, vector<32x24xf32>
    tpu.vector_store %arg31[%c224_265, %c0_266], %368 {strides = array<i32>} : memref<304x288xf32, #tpu.memory_space<vmem>>, vector<32x24xf32>,
    %370 = vector.extract_strided_slice %353 {offsets = [0, 19], sizes = [32, 24], strides = [1, 1]} : vector<32x48xf32> to vector<32x24xf32>
    %c256_267 = arith.constant 256 : index
    %c0_268 = arith.constant 0 : index
    %371 = vector.load %arg31[%c256_267, %c0_268] : memref<304x288xf32, #tpu.memory_space<vmem>>, vector<32x24xf32>
    tpu.vector_store %arg31[%c256_267, %c0_268], %370 {strides = array<i32>} : memref<304x288xf32, #tpu.memory_space<vmem>>, vector<32x24xf32>,
    %c0_269 = arith.constant 0 : index
    %c0_270 = arith.constant 0 : index
    %372 = vector.load %arg31[%c0_269, %c0_270] : memref<304x288xf32, #tpu.memory_space<vmem>>, vector<288x24xf32>
    %373 = arith.truncf %372 : vector<288x24xf32> to vector<288x24xbf16>
    %c0_271 = arith.constant 0 : index
    %c0_272 = arith.constant 0 : index
    %374 = vector.load %arg19[%c0_271, %c0_272] : memref<32x288xbf16, #tpu.memory_space<vmem>>, vector<32x288xbf16>
    %cst_273 = arith.constant dense<0.000000e+00> : vector<32x24xf32>
    %375 = tpu.matmul %374, %373, %cst_273 {dimension_numbers = #tpu.dot_dimension_numbers<[1], [0], [0], [1], [0, 0, 1, 1], [], []>} : vector<32x288xbf16>, vector<288x24xbf16>, vector<32x24xf32> -> vector<32x24xf32>
    %c0_274 = arith.constant 0 : index
    %c0_275 = arith.constant 0 : index
    %376 = vector.load %arg20[%c0_274, %c0_275] : memref<32x1xf32, #tpu.memory_space<vmem>>, vector<32x1xf32>
    %377 = vector.broadcast %376 : vector<32x1xf32> to vector<32x24xf32>
    %378 = arith.addf %375, %377 : vector<32x24xf32>
    %c0_276 = arith.constant 0 : index
    %c0_277 = arith.constant 0 : index
    %379 = vector.load %arg4[%c0_276, %c0_277] : memref<1x24xf32, #tpu.memory_space<vmem>>, vector<1x24xf32>
    %380 = vector.broadcast %379 : vector<1x24xf32> to vector<32x24xf32>
    %381 = arith.mulf %378, %380 : vector<32x24xf32>
    %382 = arith.addf %271, %381 : vector<32x24xf32>
    %cst_278 = arith.constant dense<0.000000e+00> : vector<32xf32>
    %383 = vector.multi_reduction <add>, %382, %cst_278 [1] : vector<32x24xf32> to vector<32xf32>
    %384 = vector.shape_cast %383 : vector<32xf32> to vector<32x1xf32>
    %cst_279 = arith.constant 6.250000e-02 : f32
    %385 = vector.broadcast %cst_279 : f32 to vector<32x1xf32>
    %386 = arith.mulf %384, %385 : vector<32x1xf32>
    %387 = arith.mulf %382, %382 : vector<32x24xf32>
    %cst_280 = arith.constant dense<0.000000e+00> : vector<32xf32>
    %388 = vector.multi_reduction <add>, %387, %cst_280 [1] : vector<32x24xf32> to vector<32xf32>
    %389 = vector.shape_cast %388 : vector<32xf32> to vector<32x1xf32>
    %cst_281 = arith.constant 6.250000e-02 : f32
    %390 = vector.broadcast %cst_281 : f32 to vector<32x1xf32>
    %391 = arith.mulf %389, %390 : vector<32x1xf32>
    %392 = arith.mulf %386, %386 : vector<32x1xf32>
    %393 = arith.subf %391, %392 : vector<32x1xf32>
    %394 = vector.broadcast %386 : vector<32x1xf32> to vector<32x24xf32>
    %395 = arith.subf %382, %394 : vector<32x24xf32>
    %cst_282 = arith.constant 0.000000e+00 : f32
    %396 = vector.broadcast %cst_282 : f32 to vector<32x1xf32>
    %397 = arith.maximumf %393, %396 : vector<32x1xf32>
    %cst_283 = arith.constant 9.99999974E-6 : f32
    %398 = vector.broadcast %cst_283 : f32 to vector<32x1xf32>
    %399 = arith.addf %397, %398 : vector<32x1xf32>
    %400 = math.rsqrt %399 : vector<32x1xf32>
    %401 = vector.broadcast %400 : vector<32x1xf32> to vector<32x24xf32>
    %402 = arith.mulf %395, %401 : vector<32x24xf32>
    %cst_284 = arith.constant 0.000000e+00 : f32
    %403 = vector.broadcast %cst_284 : f32 to vector<32x24xf32>
    %404 = arith.maximumf %402, %403 : vector<32x24xf32>
    %c0_285 = arith.constant 0 : index
    %c0_286 = arith.constant 0 : index
    %405 = vector.load %arg4[%c0_285, %c0_286] : memref<1x24xf32, #tpu.memory_space<vmem>>, vector<1x24xf32>
    %406 = vector.broadcast %405 : vector<1x24xf32> to vector<32x24xf32>
    %407 = arith.mulf %404, %406 : vector<32x24xf32>
    %c0_287 = arith.constant 0 : index
    %c12_288 = arith.constant 12 : index
    %408 = vector.load %arg30[%c0_287, %c12_288] : memref<32x48xf32, #tpu.memory_space<vmem>>, vector<32x24xf32>
    tpu.vector_store %arg30[%c0_287, %c12_288], %407 {strides = array<i32>} : memref<32x48xf32, #tpu.memory_space<vmem>>, vector<32x24xf32>,
    %c0_289 = arith.constant 0 : index
    %c0_290 = arith.constant 0 : index
    %409 = vector.load %arg30[%c0_289, %c0_290] : memref<32x48xf32, #tpu.memory_space<vmem>>, vector<32x48xf32>
    %410 = vector.extract_strided_slice %409 {offsets = [0, 5], sizes = [32, 24], strides = [1, 1]} : vector<32x48xf32> to vector<32x24xf32>
    %c0_291 = arith.constant 0 : index
    %c0_292 = arith.constant 0 : index
    %411 = vector.load %arg31[%c0_291, %c0_292] : memref<304x288xf32, #tpu.memory_space<vmem>>, vector<32x24xf32>
    tpu.vector_store %arg31[%c0_291, %c0_292], %410 {strides = array<i32>} : memref<304x288xf32, #tpu.memory_space<vmem>>, vector<32x24xf32>,
    %412 = vector.extract_strided_slice %409 {offsets = [0, 6], sizes = [32, 24], strides = [1, 1]} : vector<32x48xf32> to vector<32x24xf32>
    %c32_293 = arith.constant 32 : index
    %c0_294 = arith.constant 0 : index
    %413 = vector.load %arg31[%c32_293, %c0_294] : memref<304x288xf32, #tpu.memory_space<vmem>>, vector<32x24xf32>
    tpu.vector_store %arg31[%c32_293, %c0_294], %412 {strides = array<i32>} : memref<304x288xf32, #tpu.memory_space<vmem>>, vector<32x24xf32>,
    %414 = vector.extract_strided_slice %409 {offsets = [0, 7], sizes = [32, 24], strides = [1, 1]} : vector<32x48xf32> to vector<32x24xf32>
    %c64_295 = arith.constant 64 : index
    %c0_296 = arith.constant 0 : index
    %415 = vector.load %arg31[%c64_295, %c0_296] : memref<304x288xf32, #tpu.memory_space<vmem>>, vector<32x24xf32>
    tpu.vector_store %arg31[%c64_295, %c0_296], %414 {strides = array<i32>} : memref<304x288xf32, #tpu.memory_space<vmem>>, vector<32x24xf32>,
    %416 = vector.extract_strided_slice %409 {offsets = [0, 11], sizes = [32, 24], strides = [1, 1]} : vector<32x48xf32> to vector<32x24xf32>
    %c96_297 = arith.constant 96 : index
    %c0_298 = arith.constant 0 : index
    %417 = vector.load %arg31[%c96_297, %c0_298] : memref<304x288xf32, #tpu.memory_space<vmem>>, vector<32x24xf32>
    tpu.vector_store %arg31[%c96_297, %c0_298], %416 {strides = array<i32>} : memref<304x288xf32, #tpu.memory_space<vmem>>, vector<32x24xf32>,
    %418 = vector.extract_strided_slice %409 {offsets = [0, 12], sizes = [32, 24], strides = [1, 1]} : vector<32x48xf32> to vector<32x24xf32>
    %c128_299 = arith.constant 128 : index
    %c0_300 = arith.constant 0 : index
    %419 = vector.load %arg31[%c128_299, %c0_300] : memref<304x288xf32, #tpu.memory_space<vmem>>, vector<32x24xf32>
    tpu.vector_store %arg31[%c128_299, %c0_300], %418 {strides = array<i32>} : memref<304x288xf32, #tpu.memory_space<vmem>>, vector<32x24xf32>,
    %420 = vector.extract_strided_slice %409 {offsets = [0, 13], sizes = [32, 24], strides = [1, 1]} : vector<32x48xf32> to vector<32x24xf32>
    %c160_301 = arith.constant 160 : index
    %c0_302 = arith.constant 0 : index
    %421 = vector.load %arg31[%c160_301, %c0_302] : memref<304x288xf32, #tpu.memory_space<vmem>>, vector<32x24xf32>
    tpu.vector_store %arg31[%c160_301, %c0_302], %420 {strides = array<i32>} : memref<304x288xf32, #tpu.memory_space<vmem>>, vector<32x24xf32>,
    %422 = vector.extract_strided_slice %409 {offsets = [0, 17], sizes = [32, 24], strides = [1, 1]} : vector<32x48xf32> to vector<32x24xf32>
    %c192_303 = arith.constant 192 : index
    %c0_304 = arith.constant 0 : index
    %423 = vector.load %arg31[%c192_303, %c0_304] : memref<304x288xf32, #tpu.memory_space<vmem>>, vector<32x24xf32>
    tpu.vector_store %arg31[%c192_303, %c0_304], %422 {strides = array<i32>} : memref<304x288xf32, #tpu.memory_space<vmem>>, vector<32x24xf32>,
    %424 = vector.extract_strided_slice %409 {offsets = [0, 18], sizes = [32, 24], strides = [1, 1]} : vector<32x48xf32> to vector<32x24xf32>
    %c224_305 = arith.constant 224 : index
    %c0_306 = arith.constant 0 : index
    %425 = vector.load %arg31[%c224_305, %c0_306] : memref<304x288xf32, #tpu.memory_space<vmem>>, vector<32x24xf32>
    tpu.vector_store %arg31[%c224_305, %c0_306], %424 {strides = array<i32>} : memref<304x288xf32, #tpu.memory_space<vmem>>, vector<32x24xf32>,
    %426 = vector.extract_strided_slice %409 {offsets = [0, 19], sizes = [32, 24], strides = [1, 1]} : vector<32x48xf32> to vector<32x24xf32>
    %c256_307 = arith.constant 256 : index
    %c0_308 = arith.constant 0 : index
    %427 = vector.load %arg31[%c256_307, %c0_308] : memref<304x288xf32, #tpu.memory_space<vmem>>, vector<32x24xf32>
    tpu.vector_store %arg31[%c256_307, %c0_308], %426 {strides = array<i32>} : memref<304x288xf32, #tpu.memory_space<vmem>>, vector<32x24xf32>,
    %c0_309 = arith.constant 0 : index
    %c0_310 = arith.constant 0 : index
    %428 = vector.load %arg31[%c0_309, %c0_310] : memref<304x288xf32, #tpu.memory_space<vmem>>, vector<288x24xf32>
    %429 = arith.truncf %428 : vector<288x24xf32> to vector<288x24xbf16>
    %c0_311 = arith.constant 0 : index
    %c0_312 = arith.constant 0 : index
    %430 = vector.load %arg21[%c0_311, %c0_312] : memref<32x288xbf16, #tpu.memory_space<vmem>>, vector<32x288xbf16>
    %cst_313 = arith.constant dense<0.000000e+00> : vector<32x24xf32>
    %431 = tpu.matmul %430, %429, %cst_313 {dimension_numbers = #tpu.dot_dimension_numbers<[1], [0], [0], [1], [0, 0, 1, 1], [], []>} : vector<32x288xbf16>, vector<288x24xbf16>, vector<32x24xf32> -> vector<32x24xf32>
    %c0_314 = arith.constant 0 : index
    %c0_315 = arith.constant 0 : index
    %432 = vector.load %arg22[%c0_314, %c0_315] : memref<32x1xf32, #tpu.memory_space<vmem>>, vector<32x1xf32>
    %433 = vector.broadcast %432 : vector<32x1xf32> to vector<32x24xf32>
    %434 = arith.addf %431, %433 : vector<32x24xf32>
    %c0_316 = arith.constant 0 : index
    %c0_317 = arith.constant 0 : index
    %435 = vector.load %arg4[%c0_316, %c0_317] : memref<1x24xf32, #tpu.memory_space<vmem>>, vector<1x24xf32>
    %436 = vector.broadcast %435 : vector<1x24xf32> to vector<32x24xf32>
    %437 = arith.mulf %434, %436 : vector<32x24xf32>
    %cst_318 = arith.constant dense<0.000000e+00> : vector<32xf32>
    %438 = vector.multi_reduction <add>, %437, %cst_318 [1] : vector<32x24xf32> to vector<32xf32>
    %439 = vector.shape_cast %438 : vector<32xf32> to vector<32x1xf32>
    %cst_319 = arith.constant 6.250000e-02 : f32
    %440 = vector.broadcast %cst_319 : f32 to vector<32x1xf32>
    %441 = arith.mulf %439, %440 : vector<32x1xf32>
    %442 = arith.mulf %437, %437 : vector<32x24xf32>
    %cst_320 = arith.constant dense<0.000000e+00> : vector<32xf32>
    %443 = vector.multi_reduction <add>, %442, %cst_320 [1] : vector<32x24xf32> to vector<32xf32>
    %444 = vector.shape_cast %443 : vector<32xf32> to vector<32x1xf32>
    %cst_321 = arith.constant 6.250000e-02 : f32
    %445 = vector.broadcast %cst_321 : f32 to vector<32x1xf32>
    %446 = arith.mulf %444, %445 : vector<32x1xf32>
    %447 = arith.mulf %441, %441 : vector<32x1xf32>
    %448 = arith.subf %446, %447 : vector<32x1xf32>
    %449 = vector.broadcast %441 : vector<32x1xf32> to vector<32x24xf32>
    %450 = arith.subf %437, %449 : vector<32x24xf32>
    %cst_322 = arith.constant 0.000000e+00 : f32
    %451 = vector.broadcast %cst_322 : f32 to vector<32x1xf32>
    %452 = arith.maximumf %448, %451 : vector<32x1xf32>
    %cst_323 = arith.constant 9.99999974E-6 : f32
    %453 = vector.broadcast %cst_323 : f32 to vector<32x1xf32>
    %454 = arith.addf %452, %453 : vector<32x1xf32>
    %455 = math.rsqrt %454 : vector<32x1xf32>
    %456 = vector.broadcast %455 : vector<32x1xf32> to vector<32x24xf32>
    %457 = arith.mulf %450, %456 : vector<32x24xf32>
    %cst_324 = arith.constant 0.000000e+00 : f32
    %458 = vector.broadcast %cst_324 : f32 to vector<32x24xf32>
    %459 = arith.maximumf %457, %458 : vector<32x24xf32>
    %c0_325 = arith.constant 0 : index
    %c0_326 = arith.constant 0 : index
    %460 = vector.load %arg4[%c0_325, %c0_326] : memref<1x24xf32, #tpu.memory_space<vmem>>, vector<1x24xf32>
    %461 = vector.broadcast %460 : vector<1x24xf32> to vector<32x24xf32>
    %462 = arith.mulf %459, %461 : vector<32x24xf32>
    %c0_327 = arith.constant 0 : index
    %c12_328 = arith.constant 12 : index
    %463 = vector.load %arg30[%c0_327, %c12_328] : memref<32x48xf32, #tpu.memory_space<vmem>>, vector<32x24xf32>
    tpu.vector_store %arg30[%c0_327, %c12_328], %462 {strides = array<i32>} : memref<32x48xf32, #tpu.memory_space<vmem>>, vector<32x24xf32>,
    %c0_329 = arith.constant 0 : index
    %c0_330 = arith.constant 0 : index
    %464 = vector.load %arg30[%c0_329, %c0_330] : memref<32x48xf32, #tpu.memory_space<vmem>>, vector<32x48xf32>
    %465 = vector.extract_strided_slice %464 {offsets = [0, 5], sizes = [32, 24], strides = [1, 1]} : vector<32x48xf32> to vector<32x24xf32>
    %c0_331 = arith.constant 0 : index
    %c0_332 = arith.constant 0 : index
    %466 = vector.load %arg31[%c0_331, %c0_332] : memref<304x288xf32, #tpu.memory_space<vmem>>, vector<32x24xf32>
    tpu.vector_store %arg31[%c0_331, %c0_332], %465 {strides = array<i32>} : memref<304x288xf32, #tpu.memory_space<vmem>>, vector<32x24xf32>,
    %467 = vector.extract_strided_slice %464 {offsets = [0, 6], sizes = [32, 24], strides = [1, 1]} : vector<32x48xf32> to vector<32x24xf32>
    %c32_333 = arith.constant 32 : index
    %c0_334 = arith.constant 0 : index
    %468 = vector.load %arg31[%c32_333, %c0_334] : memref<304x288xf32, #tpu.memory_space<vmem>>, vector<32x24xf32>
    tpu.vector_store %arg31[%c32_333, %c0_334], %467 {strides = array<i32>} : memref<304x288xf32, #tpu.memory_space<vmem>>, vector<32x24xf32>,
    %469 = vector.extract_strided_slice %464 {offsets = [0, 7], sizes = [32, 24], strides = [1, 1]} : vector<32x48xf32> to vector<32x24xf32>
    %c64_335 = arith.constant 64 : index
    %c0_336 = arith.constant 0 : index
    %470 = vector.load %arg31[%c64_335, %c0_336] : memref<304x288xf32, #tpu.memory_space<vmem>>, vector<32x24xf32>
    tpu.vector_store %arg31[%c64_335, %c0_336], %469 {strides = array<i32>} : memref<304x288xf32, #tpu.memory_space<vmem>>, vector<32x24xf32>,
    %471 = vector.extract_strided_slice %464 {offsets = [0, 11], sizes = [32, 24], strides = [1, 1]} : vector<32x48xf32> to vector<32x24xf32>
    %c96_337 = arith.constant 96 : index
    %c0_338 = arith.constant 0 : index
    %472 = vector.load %arg31[%c96_337, %c0_338] : memref<304x288xf32, #tpu.memory_space<vmem>>, vector<32x24xf32>
    tpu.vector_store %arg31[%c96_337, %c0_338], %471 {strides = array<i32>} : memref<304x288xf32, #tpu.memory_space<vmem>>, vector<32x24xf32>,
    %473 = vector.extract_strided_slice %464 {offsets = [0, 12], sizes = [32, 24], strides = [1, 1]} : vector<32x48xf32> to vector<32x24xf32>
    %c128_339 = arith.constant 128 : index
    %c0_340 = arith.constant 0 : index
    %474 = vector.load %arg31[%c128_339, %c0_340] : memref<304x288xf32, #tpu.memory_space<vmem>>, vector<32x24xf32>
    tpu.vector_store %arg31[%c128_339, %c0_340], %473 {strides = array<i32>} : memref<304x288xf32, #tpu.memory_space<vmem>>, vector<32x24xf32>,
    %475 = vector.extract_strided_slice %464 {offsets = [0, 13], sizes = [32, 24], strides = [1, 1]} : vector<32x48xf32> to vector<32x24xf32>
    %c160_341 = arith.constant 160 : index
    %c0_342 = arith.constant 0 : index
    %476 = vector.load %arg31[%c160_341, %c0_342] : memref<304x288xf32, #tpu.memory_space<vmem>>, vector<32x24xf32>
    tpu.vector_store %arg31[%c160_341, %c0_342], %475 {strides = array<i32>} : memref<304x288xf32, #tpu.memory_space<vmem>>, vector<32x24xf32>,
    %477 = vector.extract_strided_slice %464 {offsets = [0, 17], sizes = [32, 24], strides = [1, 1]} : vector<32x48xf32> to vector<32x24xf32>
    %c192_343 = arith.constant 192 : index
    %c0_344 = arith.constant 0 : index
    %478 = vector.load %arg31[%c192_343, %c0_344] : memref<304x288xf32, #tpu.memory_space<vmem>>, vector<32x24xf32>
    tpu.vector_store %arg31[%c192_343, %c0_344], %477 {strides = array<i32>} : memref<304x288xf32, #tpu.memory_space<vmem>>, vector<32x24xf32>,
    %479 = vector.extract_strided_slice %464 {offsets = [0, 18], sizes = [32, 24], strides = [1, 1]} : vector<32x48xf32> to vector<32x24xf32>
    %c224_345 = arith.constant 224 : index
    %c0_346 = arith.constant 0 : index
    %480 = vector.load %arg31[%c224_345, %c0_346] : memref<304x288xf32, #tpu.memory_space<vmem>>, vector<32x24xf32>
    tpu.vector_store %arg31[%c224_345, %c0_346], %479 {strides = array<i32>} : memref<304x288xf32, #tpu.memory_space<vmem>>, vector<32x24xf32>,
    %481 = vector.extract_strided_slice %464 {offsets = [0, 19], sizes = [32, 24], strides = [1, 1]} : vector<32x48xf32> to vector<32x24xf32>
    %c256_347 = arith.constant 256 : index
    %c0_348 = arith.constant 0 : index
    %482 = vector.load %arg31[%c256_347, %c0_348] : memref<304x288xf32, #tpu.memory_space<vmem>>, vector<32x24xf32>
    tpu.vector_store %arg31[%c256_347, %c0_348], %481 {strides = array<i32>} : memref<304x288xf32, #tpu.memory_space<vmem>>, vector<32x24xf32>,
    %c0_349 = arith.constant 0 : index
    %c0_350 = arith.constant 0 : index
    %483 = vector.load %arg31[%c0_349, %c0_350] : memref<304x288xf32, #tpu.memory_space<vmem>>, vector<288x24xf32>
    %484 = arith.truncf %483 : vector<288x24xf32> to vector<288x24xbf16>
    %c0_351 = arith.constant 0 : index
    %c0_352 = arith.constant 0 : index
    %485 = vector.load %arg23[%c0_351, %c0_352] : memref<32x288xbf16, #tpu.memory_space<vmem>>, vector<32x288xbf16>
    %cst_353 = arith.constant dense<0.000000e+00> : vector<32x24xf32>
    %486 = tpu.matmul %485, %484, %cst_353 {dimension_numbers = #tpu.dot_dimension_numbers<[1], [0], [0], [1], [0, 0, 1, 1], [], []>} : vector<32x288xbf16>, vector<288x24xbf16>, vector<32x24xf32> -> vector<32x24xf32>
    %c0_354 = arith.constant 0 : index
    %c0_355 = arith.constant 0 : index
    %487 = vector.load %arg24[%c0_354, %c0_355] : memref<32x1xf32, #tpu.memory_space<vmem>>, vector<32x1xf32>
    %488 = vector.broadcast %487 : vector<32x1xf32> to vector<32x24xf32>
    %489 = arith.addf %486, %488 : vector<32x24xf32>
    %c0_356 = arith.constant 0 : index
    %c0_357 = arith.constant 0 : index
    %490 = vector.load %arg4[%c0_356, %c0_357] : memref<1x24xf32, #tpu.memory_space<vmem>>, vector<1x24xf32>
    %491 = vector.broadcast %490 : vector<1x24xf32> to vector<32x24xf32>
    %492 = arith.mulf %489, %491 : vector<32x24xf32>
    %493 = arith.addf %382, %492 : vector<32x24xf32>
    %cst_358 = arith.constant dense<0.000000e+00> : vector<32xf32>
    %494 = vector.multi_reduction <add>, %493, %cst_358 [1] : vector<32x24xf32> to vector<32xf32>
    %495 = vector.shape_cast %494 : vector<32xf32> to vector<32x1xf32>
    %cst_359 = arith.constant 6.250000e-02 : f32
    %496 = vector.broadcast %cst_359 : f32 to vector<32x1xf32>
    %497 = arith.mulf %495, %496 : vector<32x1xf32>
    %498 = arith.mulf %493, %493 : vector<32x24xf32>
    %cst_360 = arith.constant dense<0.000000e+00> : vector<32xf32>
    %499 = vector.multi_reduction <add>, %498, %cst_360 [1] : vector<32x24xf32> to vector<32xf32>
    %500 = vector.shape_cast %499 : vector<32xf32> to vector<32x1xf32>
    %cst_361 = arith.constant 6.250000e-02 : f32
    %501 = vector.broadcast %cst_361 : f32 to vector<32x1xf32>
    %502 = arith.mulf %500, %501 : vector<32x1xf32>
    %503 = arith.mulf %497, %497 : vector<32x1xf32>
    %504 = arith.subf %502, %503 : vector<32x1xf32>
    %505 = vector.broadcast %497 : vector<32x1xf32> to vector<32x24xf32>
    %506 = arith.subf %493, %505 : vector<32x24xf32>
    %cst_362 = arith.constant 0.000000e+00 : f32
    %507 = vector.broadcast %cst_362 : f32 to vector<32x1xf32>
    %508 = arith.maximumf %504, %507 : vector<32x1xf32>
    %cst_363 = arith.constant 9.99999974E-6 : f32
    %509 = vector.broadcast %cst_363 : f32 to vector<32x1xf32>
    %510 = arith.addf %508, %509 : vector<32x1xf32>
    %511 = math.rsqrt %510 : vector<32x1xf32>
    %512 = vector.broadcast %511 : vector<32x1xf32> to vector<32x24xf32>
    %513 = arith.mulf %506, %512 : vector<32x24xf32>
    %cst_364 = arith.constant 0.000000e+00 : f32
    %514 = vector.broadcast %cst_364 : f32 to vector<32x24xf32>
    %515 = arith.maximumf %513, %514 : vector<32x24xf32>
    %c0_365 = arith.constant 0 : index
    %c0_366 = arith.constant 0 : index
    %516 = vector.load %arg4[%c0_365, %c0_366] : memref<1x24xf32, #tpu.memory_space<vmem>>, vector<1x24xf32>
    %517 = vector.broadcast %516 : vector<1x24xf32> to vector<32x24xf32>
    %518 = arith.mulf %515, %517 : vector<32x24xf32>
    %c0_367 = arith.constant 0 : index
    %c0_368 = arith.constant 0 : index
    %c0_369 = arith.constant 0 : index
    %519 = vector.load %arg25[%c0_367, %c0_368, %c0_369] : memref<1x32x24xf32, #tpu.memory_space<vmem>>, vector<1x32x24xf32>
    %520 = vector.shape_cast %519 : vector<1x32x24xf32> to vector<32x24xf32>
    %521 = vector.shape_cast %518 : vector<32x24xf32> to vector<1x32x24xf32>
    tpu.vector_store %arg25[%c0_367, %c0_368, %c0_369], %521 {strides = array<i32>} : memref<1x32x24xf32, #tpu.memory_space<vmem>>, vector<1x32x24xf32>,
    return
  }
  func.func @transform_0(%arg0: i32) -> (i32, i32, i32) {
    %c0_i32 = arith.constant 0 : i32
    %c0_i32_0 = arith.constant 0 : i32
    %c0_i32_1 = arith.constant 0 : i32
    return %arg0, %c0_i32, %c0_i32_0 : i32, i32, i32
  }
  func.func @transform_1(%arg0: i32) -> (i32, i32) {
    %c0_i32 = arith.constant 0 : i32
    %c0_i32_0 = arith.constant 0 : i32
    %c0_i32_1 = arith.constant 0 : i32
    return %c0_i32, %c0_i32_0 : i32, i32
  }
  func.func @transform_2(%arg0: i32) -> (i32, i32) {
    %c0_i32 = arith.constant 0 : i32
    %c0_i32_0 = arith.constant 0 : i32
    %c0_i32_1 = arith.constant 0 : i32
    return %c0_i32, %c0_i32_0 : i32, i32
  }
  func.func @transform_3(%arg0: i32) -> (i32, i32) {
    %c0_i32 = arith.constant 0 : i32
    %c0_i32_0 = arith.constant 0 : i32
    %c0_i32_1 = arith.constant 0 : i32
    return %c0_i32, %c0_i32_0 : i32, i32
  }
  func.func @transform_4(%arg0: i32) -> (i32, i32) {
    %c0_i32 = arith.constant 0 : i32
    %c0_i32_0 = arith.constant 0 : i32
    %c0_i32_1 = arith.constant 0 : i32
    return %c0_i32, %c0_i32_0 : i32, i32
  }
  func.func @transform_5(%arg0: i32) -> (i32, i32) {
    %c0_i32 = arith.constant 0 : i32
    %c0_i32_0 = arith.constant 0 : i32
    %c0_i32_1 = arith.constant 0 : i32
    return %c0_i32, %c0_i32_0 : i32, i32
  }
  func.func @transform_6(%arg0: i32) -> (i32, i32) {
    %c0_i32 = arith.constant 0 : i32
    %c0_i32_0 = arith.constant 0 : i32
    %c0_i32_1 = arith.constant 0 : i32
    return %c0_i32, %c0_i32_0 : i32, i32
  }
  func.func @transform_7(%arg0: i32) -> (i32, i32) {
    %c0_i32 = arith.constant 0 : i32
    %c0_i32_0 = arith.constant 0 : i32
    %c0_i32_1 = arith.constant 0 : i32
    return %c0_i32, %c0_i32_0 : i32, i32
  }
  func.func @transform_8(%arg0: i32) -> (i32, i32) {
    %c0_i32 = arith.constant 0 : i32
    %c0_i32_0 = arith.constant 0 : i32
    %c0_i32_1 = arith.constant 0 : i32
    return %c0_i32, %c0_i32_0 : i32, i32
  }
  func.func @transform_9(%arg0: i32) -> (i32, i32) {
    %c0_i32 = arith.constant 0 : i32
    %c0_i32_0 = arith.constant 0 : i32
    %c0_i32_1 = arith.constant 0 : i32
    return %c0_i32, %c0_i32_0 : i32, i32
  }
  func.func @transform_10(%arg0: i32) -> (i32, i32) {
    %c0_i32 = arith.constant 0 : i32
    %c0_i32_0 = arith.constant 0 : i32
    %c0_i32_1 = arith.constant 0 : i32
    return %c0_i32, %c0_i32_0 : i32, i32
  }
  func.func @transform_11(%arg0: i32) -> (i32, i32) {
    %c0_i32 = arith.constant 0 : i32
    %c0_i32_0 = arith.constant 0 : i32
    %c0_i32_1 = arith.constant 0 : i32
    return %c0_i32, %c0_i32_0 : i32, i32
  }
  func.func @transform_12(%arg0: i32) -> (i32, i32) {
    %c0_i32 = arith.constant 0 : i32
    %c0_i32_0 = arith.constant 0 : i32
    %c0_i32_1 = arith.constant 0 : i32
    return %c0_i32, %c0_i32_0 : i32, i32
  }
  func.func @transform_13(%arg0: i32) -> (i32, i32) {
    %c0_i32 = arith.constant 0 : i32
    %c0_i32_0 = arith.constant 0 : i32
    %c0_i32_1 = arith.constant 0 : i32
    return %c0_i32, %c0_i32_0 : i32, i32
  }
  func.func @transform_14(%arg0: i32) -> (i32, i32) {
    %c0_i32 = arith.constant 0 : i32
    %c0_i32_0 = arith.constant 0 : i32
    %c0_i32_1 = arith.constant 0 : i32
    return %c0_i32, %c0_i32_0 : i32, i32
  }
  func.func @transform_15(%arg0: i32) -> (i32, i32) {
    %c0_i32 = arith.constant 0 : i32
    %c0_i32_0 = arith.constant 0 : i32
    %c0_i32_1 = arith.constant 0 : i32
    return %c0_i32, %c0_i32_0 : i32, i32
  }
  func.func @transform_16(%arg0: i32) -> (i32, i32) {
    %c0_i32 = arith.constant 0 : i32
    %c0_i32_0 = arith.constant 0 : i32
    %c0_i32_1 = arith.constant 0 : i32
    return %c0_i32, %c0_i32_0 : i32, i32
  }
  func.func @transform_17(%arg0: i32) -> (i32, i32) {
    %c0_i32 = arith.constant 0 : i32
    %c0_i32_0 = arith.constant 0 : i32
    %c0_i32_1 = arith.constant 0 : i32
    return %c0_i32, %c0_i32_0 : i32, i32
  }
  func.func @transform_18(%arg0: i32) -> (i32, i32) {
    %c0_i32 = arith.constant 0 : i32
    %c0_i32_0 = arith.constant 0 : i32
    %c0_i32_1 = arith.constant 0 : i32
    return %c0_i32, %c0_i32_0 : i32, i32
  }
  func.func @transform_19(%arg0: i32) -> (i32, i32) {
    %c0_i32 = arith.constant 0 : i32
    %c0_i32_0 = arith.constant 0 : i32
    %c0_i32_1 = arith.constant 0 : i32
    return %c0_i32, %c0_i32_0 : i32, i32
  }
  func.func @transform_20(%arg0: i32) -> (i32, i32) {
    %c0_i32 = arith.constant 0 : i32
    %c0_i32_0 = arith.constant 0 : i32
    %c0_i32_1 = arith.constant 0 : i32
    return %c0_i32, %c0_i32_0 : i32, i32
  }
  func.func @transform_21(%arg0: i32) -> (i32, i32) {
    %c0_i32 = arith.constant 0 : i32
    %c0_i32_0 = arith.constant 0 : i32
    %c0_i32_1 = arith.constant 0 : i32
    return %c0_i32, %c0_i32_0 : i32, i32
  }
  func.func @transform_22(%arg0: i32) -> (i32, i32) {
    %c0_i32 = arith.constant 0 : i32
    %c0_i32_0 = arith.constant 0 : i32
    %c0_i32_1 = arith.constant 0 : i32
    return %c0_i32, %c0_i32_0 : i32, i32
  }
  func.func @transform_23(%arg0: i32) -> (i32, i32) {
    %c0_i32 = arith.constant 0 : i32
    %c0_i32_0 = arith.constant 0 : i32
    %c0_i32_1 = arith.constant 0 : i32
    return %c0_i32, %c0_i32_0 : i32, i32
  }
  func.func @transform_24(%arg0: i32) -> (i32, i32, i32) {
    %c0_i32 = arith.constant 0 : i32
    %c0_i32_0 = arith.constant 0 : i32
    %c0_i32_1 = arith.constant 0 : i32
    return %arg0, %c0_i32, %c0_i32_0 : i32, i32, i32
  }
  func.func @transform_25(%arg0: i32) -> (i32, i32, i32) {
    %c0_i32 = arith.constant 0 : i32
    %c0_i32_0 = arith.constant 0 : i32
    %c0_i32_1 = arith.constant 0 : i32
    return %arg0, %c0_i32, %c0_i32_0 : i32, i32, i32
  }
  func.func @transform_26(%arg0: i32) -> (i32, i32, i32) {
    %c0_i32 = arith.constant 0 : i32
    %c0_i32_0 = arith.constant 0 : i32
    %c0_i32_1 = arith.constant 0 : i32
    return %arg0, %c0_i32, %c0_i32_0 : i32, i32, i32
  }
}

</mosaic_0001>

<bundles_post_ra>
// kernel: encoder_fwd.1
= control target key start
LH: loop header
LB: loop body
LE: loop exit
PB: predicated region body
PF: predicated region fallthrough
CT: control target
= control target key end

     0   :  { %s7929_s0 = inlined_call_operand.vmem [shape: f32[2,8,288], index: 0, kind: input, shape index: {}]   ;;  %s7930_s1 = inlined_call_operand.hbm [shape: f32[1,288], index: 1, kind: input, shape index: {}]   ;;  %s7931_s2 = inlined_call_operand.vmem [shape: f32[1,80], index: 2, kind: input, shape index: {}]   ;;  %s7932_s3 = inlined_call_operand.vmem [shape: f32[1,24], index: 3, kind: input, shape index: {}]   ;;  %s7933_s4 = inlined_call_operand.vmem [shape: f32[288,80], index: 4, kind: input, shape index: {}]   ;;  %s7934_s5 = inlined_call_operand.vmem [shape: f32[80,24], index: 5, kind: input, shape index: {}]   ;;  %s7935_s6 = inlined_call_operand.hbm [shape: bf16[8,72], index: 6, kind: input, shape index: {}]   ;;  %s7936_s7 = inlined_call_operand.vmem [shape: f32[8,1], index: 7, kind: input, shape index: {}]   ;;  %s7937_s8 = inlined_call_operand.hbm [shape: bf16[16,72], index: 8, kind: input, shape index: {}]   ;;  %s7938_s9 = inlined_call_operand.vmem [shape: f32[16,1], index: 9, kind: input, shape index: {}, may-alias: {9,11}]   ;;  %s7939_s10 = inlined_call_operand.hbm [shape: bf16[16,152], index: 10, kind: input, shape index: {}]   ;;  %s7940_s11 = inlined_call_operand.vmem [shape: f32[16,1], index: 11, kind: input, shape index: {}, may-alias: {9,11}]   ;;  %s7941_s12 = inlined_call_operand.hbm [shape: bf16[32,144], index: 12, kind: input, shape index: {}]   ;;  %s7942_s13 = inlined_call_operand.vmem [shape: f32[32,1], index: 13, kind: input, shape index: {}, may-alias: {13,15,17,19,21,23}]   ;;  %s7943_s14 = inlined_call_operand.vmem [shape: bf16[32,304], index: 14, kind: input, shape index: {}]   ;;  %s7944_s15 = inlined_call_operand.vmem [shape: f32[32,1], index: 15, kind: input, shape index: {}, may-alias: {13,15,17,19,21,23}]   ;;  %s7945_s16 = inlined_call_operand.vmem [shape: bf16[32,288], index: 16, kind: input, shape index: {}]   ;;  %s7946_s17 = inlined_call_operand.vmem [shape: f32[32,1], index: 17, kind: input, shape index: {}, may-alias: {13,15,17,19,21,23}]   ;;  %s7947_s18 = inlined_call_operand.vmem [shape: bf16[32,288], index: 18, kind: input, shape index: {}]   ;;  %s7948_s19 = inlined_call_operand.vmem [shape: f32[32,1], index: 19, kind: input, shape index: {}, may-alias: {13,15,17,19,21,23}]   ;;  %s7949_s20 = inlined_call_operand.vmem [shape: bf16[32,288], index: 20, kind: input, shape index: {}]   ;;  %s7950_s21 = inlined_call_operand.vmem [shape: f32[32,1], index: 21, kind: input, shape index: {}, may-alias: {13,15,17,19,21,23}]   ;;  %s7951_s22 = inlined_call_operand.hbm [shape: bf16[32,288], index: 22, kind: input, shape index: {}]   ;;  %s7952_s23 = inlined_call_operand.vmem [shape: f32[32,1], index: 23, kind: input, shape index: {}, may-alias: {13,15,17,19,21,23}]   ;;  %s7953_s24 = inlined_call_operand.vmem [shape: f32[2,32,24], index: 24, kind: output, shape index: {0}]   ;;  %s7954_s25 = inlined_call_operand.vmem [shape: f32[2,8,288], index: 25, kind: output, shape index: {1}]   ;;  %s7955_s26 = inlined_call_operand.vmem [shape: f32[2,16,80], index: 26, kind: output, shape index: {2}]  }
   0x1   :  { %7990 = sst [smem:[#allocation21_spill]] %s7929_s0 }
   0x2   :  { %7991 = sst [smem:[#allocation22_spill]] %s7930_s1 }
   0x3   :  { %7992 = sst [smem:[#allocation23_spill]] %s7931_s2 }
   0x4   :  { %7993 = sst [smem:[#allocation24_spill]] %s7932_s3 }
   0x5   :  { %7994 = sst [smem:[#allocation25_spill]] %s7933_s4 }
   0x6   :  { %7995 = sst [smem:[#allocation26_spill]] %s7934_s5 }
   0x7   :  { %7996 = sst [smem:[#allocation27_spill]] %s7935_s6 }
   0x8   :  { %7997 = sst [smem:[#allocation28_spill]] %s7936_s7 }
   0x9   :  { %7998 = sst [smem:[#allocation29_spill]] %s7937_s8 }
   0xa   :  { %7999 = sst [smem:[#allocation30_spill]] %s7938_s9 }
   0xb   :  { %8000 = sst [smem:[#allocation31_spill]] %s7939_s10 }
   0xc   :  { %8001 = sst [smem:[#allocation32_spill]] %s7940_s11 }
   0xd   :  { %8002 = sst [smem:[#allocation33_spill]] %s7941_s12 }
   0xe   :  { %8003 = sst [smem:[#allocation34_spill]] %s7942_s13 }
   0xf   :  { %8004 = sst [smem:[#allocation35_spill]] %s7952_s23 }
  0x10   :  { %8005 = sst [smem:[#allocation36_spill]] %s7953_s24 }
  0x11   :  { %32 = vsyncpa [#allocation7], 0 }
  0x12   :  { %33 = vsyncpa [#allocation9], 0 }
  0x13   :  { %34 = vsyncpa [#allocation12], 0 }
  0x14   :  { %35 = vsyncpa [#allocation15], 0  ;;  %s6407_s27 = smov 0  }
  0x15 LB: > { %8006 = sst [smem:[#allocation20_spill]] %s6230_s27  ;;  %s6232_s3 = smov [#allocation8]   ;;  %s6230_s27 = sphi %s6407_s27, %s41_s27  }
  0x16   : > { %s669_s7 = sshll.u32 %s6232_s3, 4  ;;  %s6413_s28 = sadd.s32 4294967295, %s6230_s27   ;;  %s670_s7 = int_to_ptr.vmem [resolvable:$true] %s669_s7 }
  0x17   : > { %p5314_p0 = scmp.ge.s32.totalorder %s6230_s27, 1  ;;  %p633_p1 = scmp.lt.s32.totalorder %s6230_s27, 3 }
  0x18   : > { %p5882_p2 = scmp.eq.s32.totalorder %s6413_s28, 0  ;;  %s6233_s4 = smov [#allocation11]  }
  0x19   : > { %p6418_p3 = pnand %p5314_p0, %p633_p1  ;;  %s698_s29 = sshll.u32 %s6233_s4, 4  ;;  %s6424_s29 = int_to_ptr.vmem [resolvable:$true] %s698_s29 }
  0x1a   : > { %s6234_s9 = smov [#allocation6]   ;;  %s6235_s2 = smov [#allocation10]  }
  0x1b   : > { %p5863_p4 = pneg %p6418_p3  ;;  %s646_s30 = sshll.u32 %s6234_s9, 4  ;;  %s6432_s30 = int_to_ptr.vmem [resolvable:$true] %s646_s30 }
  0x1c   : > { %s6434_s5 = sshll.u32 %s6235_s2, 4  ;;  %s6063_s6 = scalar_lea.vmem %s670_s7, 64  ;;  %s683_s5 = int_to_ptr.vmem [resolvable:$true] %s6434_s5 }
  0x1d   : > { %p6428_p5 = pnand %p5882_p2, %p5863_p4  ;;  %p6064_p7 = scmp.ne.s32.totalorder %s670_s7, %s6063_s6 }
  0x1e   : > { %p6071_p10 = scmp.lt.s32.totalorder %s670_s7, %s670_s7  ;;  %p6072_p11 = scmp.lt.s32.totalorder %s6063_s6, %s6063_s6 }
  0x1f   : > { %p6438_p6 = pneg %p6428_p5 }
  0x20   : > { %p6073_p12 = por %p6072_p11, %p6071_p10 }
  0x21   : > { %p6066_p8 = pnand %p6064_p7, %p6438_p6 }
  0x23   : > { %p6067_p9 = pneg %p6066_p8 }
  0x25   : > { %p6074_p13 = pnand %p6073_p12, %p6067_p9 }
  0x27   : > { %6077 = shalt.err (!%p6074_p13)
}
  0x28   : > { %s8010_s4 = sld [smem:[#allocation27_spill]]  ;;  %s6089_s9 = scalar_lea.vmem %s6424_s29, 256 }
  0x29   : > { %p6090_p0 = scmp.ne.s32.totalorder %s6424_s29, %s6089_s9  ;;  %p6097_p7 = scmp.lt.s32.totalorder %s6424_s29, %s6424_s29 }
  0x2a   : > { %p6098_p8 = scmp.lt.s32.totalorder %s6089_s9, %s6089_s9 }
  0x2b   : > { %p6092_p1 = pnand %p6090_p0, %p6438_p6 }
  0x2c   : > { %p6099_p9 = por %p6098_p8, %p6097_p7 }
  0x2d   : > { %p6093_p4 = pneg %p6092_p1 }
  0x2e   : > { %5869 = dma.hbm_to_vmem [thread:$0]  (!%p6428_p5), %s8010_s4, 64, %s670_s7, [#allocation9]  }
  0x2f   : > { %p6100_p10 = pnand %p6099_p9, %p6093_p4 }
  0x31   : > { %6103 = shalt.err (!%p6100_p10)
}
  0x32   : > { %s7962_s2 = smov 128   ;;  %s6237_s7 = smov 8  }
  0x33   : > { %s8011_s3 = sld [smem:[#allocation31_spill]]  ;;  %s6115_s4 = scalar_lea.vmem %s6432_s30, 48 }
  0x34   : > { %p6116_p11 = scmp.ne.s32.totalorder %s6432_s30, %s6115_s4  ;;  %s6122_s9 = scalar_lea.vmem %s6432_s30, 64 }
  0x35   : > { %p6123_p0 = scmp.lt.s32.totalorder %s6432_s30, %s6432_s30  ;;  %p6124_p1 = scmp.lt.s32.totalorder %s6122_s9, %s6115_s4 }
  0x36   : > { %p6118_p12 = pnand %p6116_p11, %p6438_p6 }
  0x37   : > { %p6125_p4 = por %p6124_p1, %p6123_p0 }
  0x38   : > { %p6119_p13 = pneg %p6118_p12 }
  0x39   : > { %5875 = dma.hbm_to_vmem [thread:$0]  (!%p6428_p5), %s8011_s3, 256, %s6424_s29, [#allocation12], %s7962_s2, %s7962_s2, %s6237_s7  }
  0x3a   : > { %p6126_p7 = pnand %p6125_p4, %p6119_p13 }
  0x3c   : > { %6129 = shalt.err (!%p6126_p7)
}
  0x3d   : > { %s8012_s23 = sld [smem:[#allocation22_spill]]  ;;  %s6141_s29 = scalar_lea.vmem %s683_s5, 128 }
  0x3e   : > { %p6142_p8 = scmp.ne.s32.totalorder %s683_s5, %s6141_s29  ;;  %p6149_p11 = scmp.lt.s32.totalorder %s683_s5, %s683_s5 }
  0x3f   : > { %p6150_p12 = scmp.lt.s32.totalorder %s6141_s29, %s6141_s29 }
  0x40   : > { %p6144_p9 = pnand %p6142_p8, %p6438_p6 }
  0x41   : > { %p6151_p0 = por %p6150_p12, %p6149_p11 }
  0x42   : > { %p6145_p10 = pneg %p6144_p9 }
  0x43   : > { %5866 = dma.hbm_to_vmem [thread:$0]  (!%p6428_p5), %s8012_s23, 48, %s6432_s30, [#allocation7]  }
  0x44   : > { %p6152_p13 = pnand %p6151_p0, %p6145_p10 }
  0x46   : > { %6155 = shalt.err (!%p6152_p13)
}
  0x47   : > { %s6238_s6 = smov 64   ;;  %s6239_s1 = smov 4  }
  0x48   : > { %s8013_s3 = sld [smem:[#allocation29_spill]]  ;;  %s6240_s23 = smov [#allocation13]  }
  0x49   : > { %s714_s30 = sshll.u32 %s6240_s23, 4  ;;  %s6241_s4 = smov [#allocation14]   ;;  %s715_s30 = int_to_ptr.vmem [resolvable:$true] %s714_s30 }
  0x4a   : > { %s754_s9 = sshll.u32 %s6241_s4, 4  ;;  %s6167_s2 = scalar_lea.vmem %s715_s30, 512  ;;  %s755_s9 = int_to_ptr.vmem [resolvable:$true] %s754_s9 }
  0x4b   : > { %p6168_p1 = scmp.ne.s32.totalorder %s715_s30, %s6167_s2  ;;  %p6175_p8 = scmp.lt.s32.totalorder %s715_s30, %s715_s30 }
  0x4c   : > { %p6176_p9 = scmp.lt.s32.totalorder %s6167_s2, %s6167_s2 }
  0x4d   : > { %p6170_p4 = pnand %p6168_p1, %p6438_p6 }
  0x4e   : > { %5872 = dma.hbm_to_vmem [thread:$0]  (!%p6428_p5), %s8013_s3, 128, %s683_s5, [#allocation9], %s6238_s6, %s6238_s6, %s6239_s1  }
  0x4f   : > { %p6171_p7 = pneg %p6170_p4  ;;  %p6177_p10 = por %p6176_p9, %p6175_p8 }
  0x51   : > { %p6178_p11 = pnand %p6177_p10, %p6171_p7 }
  0x53   : > { %6181 = shalt.err (!%p6178_p11)
}
  0x54   : > { %s8014_s29 = smov 128   ;;  %s8015_s12 = sld [smem:[#allocation33_spill]] }
  0x55   : > { %s6193_s1 = scalar_lea.vmem %s755_s9, 768  ;;  %p6201_p1 = scmp.lt.s32.totalorder %s755_s9, %s755_s9 }
  0x56   : > { %p6194_p12 = scmp.ne.s32.totalorder %s755_s9, %s6193_s1  ;;  %p6202_p4 = scmp.lt.s32.totalorder %s6193_s1, %s6193_s1 }
  0x58   : > { %p6196_p0 = pnand %p6194_p12, %p6438_p6  ;;  %p6203_p7 = por %p6202_p4, %p6201_p1 }
  0x5a   : > { %5878 = dma.hbm_to_vmem [thread:$0]  (!%p6428_p5), %s8015_s12, 512, %s715_s30, [#allocation12], %s8014_s29, %s8014_s29, %s6237_s7  }
  0x5b   : > { %p6197_p13 = pneg %p6196_p0 }
  0x5d   : > { %p6204_p8 = pnand %p6203_p7, %p6197_p13 }
  0x5f   : > { %6207 = shalt.err (!%p6204_p8)
}
  0x60   : > { %s6242_s2 = smov 192   ;;  %s6243_s24 = smov 12  }
  0x61   : > { %5881 = dma.hbm_to_vmem [thread:$0]  (!%p6428_p5), %s7951_s22, 768, %s755_s9, [#allocation15], %s6242_s2, %s6242_s2, %s6243_s24  }
  0x62   : > { %781 = sbr.rel (%p6418_p3) target bundleno = 6721 (0x1a41), region = 116 }
  0x67   : > { %6213 = dma.done.wait (%p5882_p2), [#allocation7], 48  }
  0x68   : > { %6215 = vsyncadd (%p5882_p2), [#allocation7], 4294967248 }
  0x69   : > { %6217 = dma.done.wait (%p5882_p2), [#allocation9], 192  }
  0x6a   : > { %6219 = vsyncadd (%p5882_p2), [#allocation9], 4294967104 }
  0x6b   : > { %6221 = dma.done.wait (%p5882_p2), [#allocation12], 768  }
  0x6c   : > { %6223 = vsyncadd (%p5882_p2), [#allocation12], 4294966528 }
  0x6d   : > { %6225 = dma.done.wait (%p5882_p2), [#allocation15], 768  }
  0x6e   : > { %6227 = vsyncadd (%p5882_p2), [#allocation15], 4294966528  ;;  %p881_p3 = scmp.lt.s32.totalorder %s6413_s28, 1  ;;  %v6244_v0 = vmov 0.0   ;;  %s8016_s7 = sld [smem:[#allocation21_spill]]  ;;  %vm904_vm0 = vcmask 850944  }
  0x6f   : > { %902 = vst [vmem:[#allocation2] sm:$0xff] %v6244_v0  ;;  %5697 = vmatprep.subr.bf16.mxu1 %v6244_v0  ;;  %s6245_s30 = smov 36   ;;  %905 = vst.msk [vmem:[#allocation2 + $0x10] sm:$0xff] %vm904_vm0, %v6244_v0  ;;  %vm932_vm1 = vcmask 1047840   ;;  %vm935_vm2 = vcmask 556032   ;;  %vm926_vm3 = vcmask 293888  }
  0x70   : > { %s8041_s28 = smov (!%p881_p3, %s6413_s28), 1  ;;  %s6246_s4 = smov 75   ;;  %v6255_v11 = vmov 0   ;;  %vm6256_vm4 = vmmov 0   ;;  %vm1070_vm5 = vcmask 596992   ;;  %vm957_vm6 = vcmask 261120  }
  0x71   : > { %s5838_s8 = smul.u32 24, %s8041_s28  ;;  %s6247_s9 = smov 73   ;;  %1174 = vmatprep.mubr.bf16.mxu0 %v6255_v11  ;;  %5942 = vset.pattern.permute.xlu0 %v6255_v11  ;;  %vm1132_vm7 = vcmask 1043456   ;;  %vm1055_vm8 = vcmask 605184   ;;  %vm1040_vm9 = vcmask 613376   ;;  %vm1025_vm10 = vcmask 744448  }
  0x72   : > { %s6248_s29 = smov 92   ;;  %s6249_s5 = smov 74   ;;  %5707 = vmatprep.mubr.msk.bf16.mxu1 %vm6256_vm4, %v6244_v0  ;;  %5943 = vset.pattern.permute.xlu1 %v6255_v11  ;;  %vm1010_vm11 = vcmask 752640   ;;  %vm995_vm12 = vcmask 760832   ;;  %vm980_vm13 = vcmask 891904   ;;  %vm949_vm14 = vcmask 908288  }
  0x73   : > { %s6250_s6 = smov 109   ;;  %s6251_s1 = smov 91   ;;  %vm965_vm15 = vcmask 900096   ;;  %vm1128_vm0 = vcmask 588800  }
  0x74   : > { %s885_s23 = scalar_lea.vmem %s8016_s7, %s5838_s8  ;;  %s6252_s2 = smov 93  }
  0x75   : > { %v914_v1 = vld [vmem:[%s885_s23] sm:$0xff]  ;;  %v916_v2 = vld [vmem:[%s885_s23 + $0x10] sm:$0xff]  ;;  %v915_v3 = vld [vmem:[%s885_s23 + $0x8] sm:$0xff]  ;;  %s7963_s24 = smov 111   ;;  %s7965_s27 = smov 110  }
  0x76   : > { %920 = vrot.lane.b32.xlu0 %v914_v1, %s6245_s30  ;;  %924 = vrot.lane.b32.xlu1 %v916_v2, %s6245_s30  ;;  %s8017_s10 = sld [smem:[#allocation28_spill]]  ;;  %s895_s3 = scalar_lea.vmem %s7954_s25, %s5838_s8 }
  0x77   : > { %s6261_s0 = smov 108   ;;  %s7971_s7 = smov 118  }
  0x78   : > { %s7969_s23 = smov 119   ;;  %s8021_s11 = sld [smem:[#allocation32_spill]] }
  0x79   : > { %s8022_s8 = sld [smem:[#allocation26_spill]] }
  0x7a   : > { %922 = vrot.lane.b32.xlu0 %v915_v3, %s6245_s30  ;;  %s8026_s13 = sld [smem:[#allocation34_spill]] }
  0x7c   : > { %v1122_v12 = vld [vmem:[%s8017_s10] sm:$0xff]  ;;  %s7981_s10 = smov 117  }
  0xe8   : > { %v921_v4 = vpop.permute.xlu0 %920  ;;  %v925_v5 = vpop.permute.xlu1 %924 }
  0xe9   : > { %933 = vst.msk [vmem:[#allocation2] sm:$0xff] %vm932_vm1, %v921_v4 }
  0xec   : > { %v923_v6 = vpop.permute.xlu0 %922 }
  0xed   : > { %v928_v7 = vsel %vm926_vm3, %v923_v6, %v925_v5  ;;  %v927_v9 = vsel %vm926_vm3, %v921_v4, %v923_v6 }
  0xee   : > { %936 = vst.msk [vmem:[#allocation2 + $0x10] sm:$0xff] %vm935_vm2, %v928_v7 }
  0xf0   : > { %v937_v8 = vld [vmem:[#allocation2] sm:$0xff] }
  0xf1   : > { %1034 = vrot.lane.b32.xlu0 %v937_v8, %s6246_s4  ;;  %1064 = vrot.lane.b32.xlu1 %v937_v8, %s6247_s9 }
  0xf5   : > { %1004 = vrot.lane.b32.xlu0 %v937_v8, %s6248_s29  ;;  %1049 = vrot.lane.b32.xlu1 %v937_v8, %s6249_s5  ;;  %v939_v10 = vld [vmem:[#allocation2 + $0x10] sm:$0xff] }
  0xf9   : > { %974 = vrot.lane.b32.xlu0 %v937_v8, %s6250_s6  ;;  %1019 = vrot.lane.b32.xlu1 %v937_v8, %s6251_s1 }
  0xfd   : > { %1066 = vrot.lane.b32.xlu0 %v927_v9, %s6247_s9  ;;  %989 = vrot.lane.b32.xlu1 %v937_v8, %s6252_s2 }
 0x101   : > { %1036 = vrot.lane.b32.xlu0 %v927_v9, %s6246_s4  ;;  %1068 = vrot.lane.b32.xlu1 %v939_v10, %s6247_s9 }
 0x105   : > { %1051 = vrot.lane.b32.xlu0 %v927_v9, %s6249_s5  ;;  %1038 = vrot.lane.b32.xlu1 %v939_v10, %s6246_s4 }
 0x109   : > { %1006 = vrot.lane.b32.xlu0 %v927_v9, %s6248_s29  ;;  %1053 = vrot.lane.b32.xlu1 %v939_v10, %s6249_s5 }
 0x10d   : > { %1021 = vrot.lane.b32.xlu0 %v927_v9, %s6251_s1  ;;  %1008 = vrot.lane.b32.xlu1 %v939_v10, %s6248_s29 }
 0x111   : > { %976 = vrot.lane.b32.xlu0 %v927_v9, %s6250_s6  ;;  %1023 = vrot.lane.b32.xlu1 %v939_v10, %s6251_s1 }
 0x115   : > { %991 = vrot.lane.b32.xlu0 %v927_v9, %s6252_s2  ;;  %978 = vrot.lane.b32.xlu1 %v939_v10, %s6250_s6 }
 0x119   : > { %945 = vrot.lane.b32.xlu0 %v927_v9, %s7963_s24  ;;  %993 = vrot.lane.b32.xlu1 %v939_v10, %s6252_s2 }
 0x11d   : > { %961 = vrot.lane.b32.xlu0 %v927_v9, %s7965_s27  ;;  %947 = vrot.lane.b32.xlu1 %v939_v10, %s7963_s24 }
 0x121   : > { %943 = vrot.lane.b32.xlu0 %v937_v8, %s7963_s24  ;;  %963 = vrot.lane.b32.xlu1 %v939_v10, %s7965_s27 }
 0x125   : > { %959 = vrot.lane.b32.xlu1 %v937_v8, %s7965_s27  ;;  %1125 = vperm.xlu0 %5942, %v1122_v12  }
 0x163   : > { %v1035_v13 = vpop.permute.xlu0 %1034  ;;  %v1065_v14 = vpop.permute.xlu1 %1064 }
 0x167   : > { %v1005_v15 = vpop.permute.xlu0 %1004  ;;  %v1050_v16 = vpop.permute.xlu1 %1049 }
 0x16b   : > { %v6575_v17 = vpop.permute.xlu0 %974  ;;  %v1020_v18 = vpop.permute.xlu1 %1019 }
 0x16f   : > { %v1067_v19 = vpop.permute.xlu0 %1066  ;;  %v990_v20 = vpop.permute.xlu1 %989 }
 0x170   : > { %v1071_v21 = vsel %vm1070_vm5, %v1065_v14, %v1067_v19 }
 0x171   : > { %v1118_v24 = vpack.c.bf16 %v1071_v21, %v1071_v21  ;;  %v1121_v21 = vld [vmem:[#allocation8] sm:$0xf] }
 0x173   : > { %v1037_v22 = vpop.permute.xlu0 %1036  ;;  %v1069_v23 = vpop.permute.xlu1 %1068  ;;  %v1134_v29 = vsel %vm1132_vm7, %v1118_v24, 0 }
 0x174   : > { %v1072_v25 = vsel %vm1070_vm5, %v1067_v19, %v1069_v23  ;;  %1078 = vst.msk [vmem:[#allocation5 + $0xd0] sm:$0xff] %vm957_vm6, %v1069_v23  ;;  %v1041_v37 = vsel %vm1040_vm9, %v1035_v13, %v1037_v22  ;;  %v1225_v23 = vlaneseq }
 0x175   : > { %v1119_v26 = vpack.c.bf16 %v1072_v25, %v1072_v25 }
 0x176   : > { %v1226_v24 = vshrl.u32 %v1225_v23, 7 }
 0x177   : > { %v1052_v27 = vpop.permute.xlu0 %1051  ;;  %v1039_v28 = vpop.permute.xlu1 %1038  ;;  %5335 = vmatprep.subr.msk.bf16.mxu0 %vm1132_vm7, %v1119_v26  ;;  %v1223_v26 = vld [vmem:[#allocation6] sm:$0x7] }
 0x178   : > { %1048 = vst.msk [vmem:[#allocation5 + $0xa0] sm:$0xff] %vm957_vm6, %v1039_v28  ;;  %1149 = vmatpush1.bf16.msra.mxu0 %v1134_v29  ;;  %v1056_v30 = vsel %vm1055_vm8, %v1050_v16, %v1052_v27  ;;  %v1042_v34 = vsel %vm1040_vm9, %v1037_v22, %v1039_v28  ;;  %v6618_v25 = vsub.s32 0, %v1226_v24  ;;  %v6622_v29 = vsub.s32 2, %v1226_v24 }
 0x179   : > { %v1115_v40 = vpack.c.bf16 %v1056_v30, %v1041_v37 }
 0x17a   : > { %v1228_v30 = vrot.slane %v1223_v26, %v6618_v25 }
 0x17b   : > { %v1007_v31 = vpop.permute.xlu0 %1006  ;;  %v1054_v32 = vpop.permute.xlu1 %1053  ;;  %v1105_v33 = vld [vmem:[#allocation5 + $0xd0] sm:$0xff] }
 0x17c   : > { %v1057_v35 = vsel %vm1055_vm8, %v1052_v27, %v1054_v32  ;;  %1063 = vst.msk [vmem:[#allocation5 + $0xb8] sm:$0xff] %vm957_vm6, %v1054_v32  ;;  %v1120_v36 = vpack.c.bf16 %v1105_v33, %v1105_v33  ;;  %v1011_v51 = vsel %vm1010_vm11, %v1005_v15, %v1007_v31  ;;  %v6620_v27 = vsub.s32 1, %v1226_v24 }
 0x17d   : > { %v1116_v38 = vpack.c.bf16 %v1057_v35, %v1042_v34  ;;  %v1236_v34 = vrot.slane %v1223_v26, %v6622_v29 }
 0x17e   : > { %v1140_v39 = vsel %vm1132_vm7, %v1120_v36, 0  ;;  %v1232_v33 = vrot.slane %v1223_v26, %v6620_v27 }
 0x17f   : > { %v1022_v41 = vpop.permute.xlu0 %1021  ;;  %5698 = vmatpush3.bf16.msra.mxu1 %v1140_v39  ;;  %v1009_v42 = vpop.permute.xlu1 %1008  ;;  %1150 = vmatprep.subr.bf16.mxu0 %v1116_v38  ;;  %v1099_v46 = vld [vmem:[#allocation5 + $0xa0] sm:$0xff] }
 0x180   : > { %1018 = vst.msk [vmem:[#allocation5 + $0x70] sm:$0xff] %vm957_vm6, %v1009_v42  ;;  %5699 = vmatprep.subr.bf16.mxu1 %v6244_v0  ;;  %1151 = vmatpush1.bf16.msra.mxu0 %v1115_v40  ;;  %v1026_v43 = vsel %vm1025_vm10, %v1020_v18, %v1022_v41  ;;  %v1012_v48 = vsel %vm1010_vm11, %v1007_v31, %v1009_v42 }
 0x181   : > { %v1112_v53 = vpack.c.bf16 %v1026_v43, %v1011_v51 }
 0x183   : > { %v977_v44 = vpop.permute.xlu0 %976  ;;  %v1024_v45 = vpop.permute.xlu1 %1023  ;;  %v1102_v47 = vld [vmem:[#allocation5 + $0xb8] sm:$0xff] }
 0x184   : > { %v1027_v49 = vsel %vm1025_vm10, %v1022_v41, %v1024_v45  ;;  %1033 = vst.msk [vmem:[#allocation5 + $0x88] sm:$0xff] %vm957_vm6, %v1024_v45  ;;  %v1117_v50 = vpack.c.bf16 %v1102_v47, %v1099_v46  ;;  %v981_v1 = vsel %vm980_vm13, %v6575_v17, %v977_v44 }
 0x185   : > { %v1113_v52 = vpack.c.bf16 %v1027_v49, %v1012_v48 }
 0x186   : > { %5700 = vmatpush3.bf16.msra.mxu1 %v1117_v50 }
 0x187   : > { %v992_v54 = vpop.permute.xlu0 %991  ;;  %v979_v55 = vpop.permute.xlu1 %978  ;;  %5701 = vmatprep.subr.bf16.mxu1 %v6244_v0  ;;  %1152 = vmatprep.subr.bf16.mxu0 %v1113_v52  ;;  %v1093_v59 = vld [vmem:[#allocation5 + $0x70] sm:$0xff] }
 0x188   : > { %988 = vst.msk [vmem:[#allocation5 + $0x40] sm:$0xff] %vm957_vm6, %v979_v55  ;;  %1153 = vmatpush1.bf16.msra.mxu0 %v1112_v53  ;;  %v996_v56 = vsel %vm995_vm12, %v990_v20, %v992_v54  ;;  %v982_v61 = vsel %vm980_vm13, %v977_v44, %v979_v55 }
 0x189   : > { %v1109_v3 = vpack.c.bf16 %v996_v56, %v981_v1  ;;  %v1275_v1 = vld [vmem:[#allocation6] sm:$0x7] }
 0x18b   : > { %v946_v57 = vpop.permute.xlu0 %945  ;;  %v994_v58 = vpop.permute.xlu1 %993  ;;  %v1096_v60 = vld [vmem:[#allocation5 + $0x88] sm:$0xff] }
 0x18c   : > { %v997_v62 = vsel %vm995_vm12, %v992_v54, %v994_v58  ;;  %1003 = vst.msk [vmem:[#allocation5 + $0x58] sm:$0xff] %vm957_vm6, %v994_v58  ;;  %v1114_v63 = vpack.c.bf16 %v1096_v60, %v1093_v59 }
 0x18d   : > { %v1110_v2 = vpack.c.bf16 %v997_v62, %v982_v61 }
 0x18e   : > { %5702 = vmatpush3.bf16.msra.mxu1 %v1114_v63 }
 0x18f   : > { %v962_v4 = vpop.permute.xlu0 %961  ;;  %v948_v5 = vpop.permute.xlu1 %947  ;;  %5703 = vmatprep.subr.bf16.mxu1 %v6244_v0  ;;  %1154 = vmatprep.subr.bf16.mxu0 %v1110_v2  ;;  %v1087_v7 = vld [vmem:[#allocation5 + $0x40] sm:$0xff] }
 0x190   : > { %958 = vst.msk [vmem:[#allocation5 + $0x10] sm:$0xff] %vm957_vm6, %v948_v5  ;;  %1155 = vmatpush1.bf16.msra.mxu0 %v1109_v3  ;;  %v951_v9 = vsel %vm949_vm14, %v946_v57, %v948_v5 }
 0x193   : > { %v964_v6 = vpop.permute.xlu1 %963  ;;  %v1090_v8 = vld [vmem:[#allocation5 + $0x58] sm:$0xff]  ;;  %v944_v13 = vpop.permute.xlu0 %943 }
 0x194   : > { %v967_v10 = vsel %vm965_vm15, %v962_v4, %v964_v6  ;;  %973 = vst.msk [vmem:[#allocation5 + $0x28] sm:$0xff] %vm957_vm6, %v964_v6  ;;  %v1111_v12 = vpack.c.bf16 %v1090_v8, %v1087_v7  ;;  %v950_v16 = vsel %vm949_vm14, %v944_v13, %v946_v57  ;;  %v1284_v6 = vrot.slane %v1275_v1, %v6620_v27 }
 0x195   : > { %v1107_v14 = vpack.c.bf16 %v967_v10, %v951_v9  ;;  %v1280_v9 = vrot.slane %v1275_v1, %v6618_v25 }
 0x196   : > { %5704 = vmatpush3.bf16.msra.mxu1 %v1111_v12 }
 0x197   : > { %v960_v15 = vpop.permute.xlu1 %959  ;;  %5705 = vmatprep.subr.bf16.mxu1 %v6244_v0  ;;  %1156 = vmatprep.subr.bf16.mxu0 %v1107_v14  ;;  %v1081_v19 = vld [vmem:[#allocation5 + $0x10] sm:$0xff] }
 0x198   : > { %v966_v17 = vsel %vm965_vm15, %v960_v15, %v962_v4 }
 0x199   : > { %v1106_v18 = vpack.c.bf16 %v966_v17, %v950_v16  ;;  %v1288_v17 = vrot.slane %v1275_v1, %v6622_v29 }
 0x19b   : > { %v1084_v20 = vld [vmem:[#allocation5 + $0x28] sm:$0xff]  ;;  %1157 = vmatpush1.bf16.msra.mxu0 %v1106_v18 }
 0x19c   : > { %v1108_v22 = vpack.c.bf16 %v1084_v20, %v1081_v19 }
 0x19e   : > { %5706 = vmatpush3.bf16.msra.mxu1 %v1108_v22  ;;  %5336 = vmatmul.mubr.msk.bf16.vlgmr.msra.gmra.mxu0 %vm1128_vm0, %v1121_v21 }
 0x19f   : > { %5711 = vmatprep.subr.bf16.mxu1 %v6244_v0  ;;  %1549 = vmatprep.mubr.bf16.mxu0 %v6255_v11 }
 0x1a0   : > { %v1126_v28 = vpop.permute.xlu0 %1125 }
 0x1a1   : > { %5708 = vmatmul.mubr.msk.bf16.vlgmr.msra.gmra.mxu1 %vm1128_vm0, %v1121_v21 }
 0x1a2   : > { %5721 = vmatprep.mubr.msk.bf16.mxu1 %vm6256_vm4, %v6244_v0 }
 0x25e   : > { %v1176_v31 = vpop.f32.mrf.mxu0 }
 0x25f   : > { %v1177_v32 = vadd.f32 %v1176_v31, %v1126_v28 }
 0x260   : > { %v1178_v35 = vpop.f32.mrf.mxu0 }
 0x261   : > { %v1217_v36 = vpop.f32.mrf.mxu1  ;;  %v6632_v37 = vmul.f32 %v1228_v30, %v1177_v32  ;;  %v1179_v38 = vadd.f32 %v1178_v35, %v1126_v28 }
 0x262   : > { %v1218_v39 = vadd.f32 %v1217_v36, %v1126_v28  ;;  %v1180_v40 = vpop.f32.mrf.mxu0 }
 0x263   : > { %v5709_v41 = vpop.f32.mrf.mxu1  ;;  %1243 = vst [vmem:[%s895_s3] sm:$0xff] %v6632_v37  ;;  %v6635_v42 = vmul.f32 %v1232_v33, %v1179_v38  ;;  %v1252_v47 = vmul.f32 %v6632_v37, %v6632_v37 }
 0x264   : > { %v6637_v43 = vmul.f32 %v1236_v34, %v1218_v39  ;;  %v1181_v44 = vpop.f32.mrf.mxu0 }
 0x265   : > { %v1220_v45 = vpop.f32.mrf.mxu1  ;;  %1244 = vst [vmem:[%s895_s3 + $0x8] sm:$0xff] %v6635_v42  ;;  %v1246_v46 = vadd.f32 %v6635_v42, %v6632_v37  ;;  %v1253_v48 = vmul.f32 %v6635_v42, %v6635_v42 }
 0x266   : > { %1245 = vst.msk [vmem:[%s895_s3 + $0x10] sm:$0xff] %vm957_vm6, %v6637_v43  ;;  %v1247_v49 = vsel %vm957_vm6, %v6637_v43, 0.0  ;;  %v1254_v50 = vmul.f32 %v6637_v43, %v6637_v43  ;;  %s7967_s3 = smov 97  }
 0x267   : > { %v5710_v51 = vpop.f32.mrf.mxu1  ;;  %v1248_v52 = vadd.f32 %v1247_v49, %v1246_v46  ;;  %v1255_v53 = vadd.f32 %v1253_v48, %v1252_v47 }
 0x268   : > { %v1256_v54 = vsel %vm957_vm6, %v1254_v50, 0.0 }
 0x269   : > { %1249 = vadd.xlane.f32.xlu1 %v1248_v52  ;;  %v1257_v55 = vadd.f32 %v1256_v54, %v1255_v53 }
 0x26b   : > { %1258 = vadd.xlane.f32.xlu0 %v1257_v55 }
 0x2f2   : > { %v1250_v56 = vpop.xlane.xlu1 %1249 }
 0x2f3   : > { %v1251_v57 = vmul.f32 0.00390625, %v1250_v56 }
 0x2f4   : > { %v1259_v58 = vpop.xlane.xlu0 %1258 }
 0x2f5   : > { %v1260_v59 = vmul.f32 0.00390625, %v1259_v58  ;;  %v1261_v60 = vmul.f32 %v1251_v57, %v1251_v57  ;;  %v1264_v2 = vsub.f32 %v6635_v42, %v1251_v57  ;;  %v1263_v3 = vsub.f32 %v6632_v37, %v1251_v57 }
 0x2f6   : > { %v1265_v4 = vsub.f32 %v6637_v43, %v1251_v57 }
 0x2f7   : > { %v1262_v61 = vsub.f32 %v1260_v59, %v1261_v60 }
 0x2f9   : > { %v1266_v62 = vmax.f32 %v1262_v61, 0.0 }
 0x2fb   : > { %v1267_v63 = vadd.f32 1e-05, %v1266_v62 }
 0x2fd   : > { %5994 = vrsqrt.f32 %v1267_v63 }
 0x30a   : > { %v5995_v5 = vpop.eup %5994 }
 0x30b   : > { %v1270_v7 = vmul.f32 %v5995_v5, %v1264_v2  ;;  %v1269_v8 = vmul.f32 %v5995_v5, %v1263_v3  ;;  %v1271_v10 = vmul.f32 %v5995_v5, %v1265_v4 }
 0x30d   : > { %v1273_v12 = vmax.f32 %v1270_v7, 0.0  ;;  %v1272_v13 = vmax.f32 %v1269_v8, 0.0  ;;  %v1274_v16 = vmax.f32 %v1271_v10, 0.0 }
 0x30f   : > { %v1293_v14 = vmul.f32 %v1284_v6, %v1273_v12  ;;  %v1292_v15 = vmul.f32 %v1280_v9, %v1272_v13  ;;  %v1294_v18 = vmul.f32 %v1288_v17, %v1274_v16 }
 0x311   : > { %1300 = vrot.lane.b32.xlu0 %v1293_v14, %s6245_s30  ;;  %1298 = vrot.lane.b32.xlu1 %v1292_v15, %s6245_s30 }
 0x315   : > { %1302 = vrot.lane.b32.xlu1 %v1294_v18, %s6245_s30  ;;  %s8020_s30 = sld [smem:[#allocation23_spill]] }
 0x383   : > { %v1301_v19 = vpop.permute.xlu0 %1300  ;;  %v1299_v20 = vpop.permute.xlu1 %1298 }
 0x384   : > { %v1304_v21 = vsel %vm926_vm3, %v1299_v20, %v1301_v19  ;;  %1309 = vst.msk [vmem:[#allocation2] sm:$0xff] %vm932_vm1, %v1299_v20  ;;  %vm1959_vm1 = vcmask 654336  }
 0x387   : > { %v1303_v22 = vpop.permute.xlu1 %1302 }
 0x388   : > { %v1305_v23 = vsel %vm926_vm3, %v1301_v19, %v1303_v22  ;;  %vm2011_vm3 = vcmask 818336  }
 0x389   : > { %1311 = vst.msk [vmem:[#allocation2 + $0x10] sm:$0xff] %vm935_vm2, %v1305_v23  ;;  %vm906_vm2 = vcmask 982016  }
 0x38a   : > { %907 = vst.msk [vmem:[#allocation3] sm:$0xff] %vm906_vm2, %v6244_v0  ;;  %908 = vst.msk [vmem:[#allocation3 + $0x8] sm:$0xff] %vm906_vm2, %v6244_v0 }
 0x38b   : > { %v1312_v24 = vld [vmem:[#allocation2] sm:$0xff] }
 0x38c   : > { %1402 = vrot.lane.b32.xlu0 %v1312_v24, %s6246_s4  ;;  %1430 = vrot.lane.b32.xlu1 %v1312_v24, %s6247_s9 }
 0x390   : > { %1374 = vrot.lane.b32.xlu0 %v1312_v24, %s6248_s29  ;;  %1416 = vrot.lane.b32.xlu1 %v1312_v24, %s6249_s5  ;;  %v1314_v26 = vld [vmem:[#allocation2 + $0x10] sm:$0xff] }
 0x394   : > { %1346 = vrot.lane.b32.xlu0 %v1312_v24, %s6250_s6  ;;  %1388 = vrot.lane.b32.xlu1 %v1312_v24, %s6251_s1 }
 0x398   : > { %1360 = vrot.lane.b32.xlu1 %v1312_v24, %s6252_s2  ;;  %1432 = vrot.lane.b32.xlu0 %v1304_v21, %s6247_s9 }
 0x39c   : > { %1404 = vrot.lane.b32.xlu0 %v1304_v21, %s6246_s4  ;;  %1434 = vrot.lane.b32.xlu1 %v1314_v26, %s6247_s9  ;;  %s6257_s9 = smov 20  }
 0x3a0   : > { %1418 = vrot.lane.b32.xlu0 %v1304_v21, %s6249_s5  ;;  %1406 = vrot.lane.b32.xlu1 %v1314_v26, %s6246_s4  ;;  %s8018_s4 = sld [smem:[#allocation30_spill]] }
 0x3a4   : > { %1376 = vrot.lane.b32.xlu0 %v1304_v21, %s6248_s29  ;;  %1420 = vrot.lane.b32.xlu1 %v1314_v26, %s6249_s5  ;;  %s6259_s5 = smov 98  }
 0x3a6   : > { %v1488_v28 = vld [vmem:[%s8018_s4] sm:$0xff]  ;;  %v1489_v30 = vld [vmem:[%s8018_s4 + $0x8] sm:$0xff] }
 0x3a8   : > { %1390 = vrot.lane.b32.xlu0 %v1304_v21, %s6251_s1  ;;  %1378 = vrot.lane.b32.xlu1 %v1314_v26, %s6248_s29  ;;  %s6258_s29 = smov 99  }
 0x3ac   : > { %1348 = vrot.lane.b32.xlu0 %v1304_v21, %s6250_s6  ;;  %1392 = vrot.lane.b32.xlu1 %v1314_v26, %s6251_s1  ;;  %s6260_s1 = smov 107  }
 0x3b0   : > { %1362 = vrot.lane.b32.xlu0 %v1304_v21, %s6252_s2  ;;  %1350 = vrot.lane.b32.xlu1 %v1314_v26, %s6250_s6 }
 0x3b4   : > { %1320 = vrot.lane.b32.xlu0 %v1304_v21, %s7963_s24  ;;  %1364 = vrot.lane.b32.xlu1 %v1314_v26, %s6252_s2  ;;  %s8019_s2 = sld [smem:[#allocation25_spill]] }
 0x3b8   : > { %1334 = vrot.lane.b32.xlu0 %v1304_v21, %s7965_s27  ;;  %1322 = vrot.lane.b32.xlu1 %v1314_v26, %s7963_s24 }
 0x3bc   : > { %1318 = vrot.lane.b32.xlu0 %v1312_v24, %s7963_s24  ;;  %1336 = vrot.lane.b32.xlu1 %v1314_v26, %s7965_s27  ;;  %s8024_s24 = smov 119  }
 0x3c0   : > { %1492 = vperm.xlu0 %5942, %v1488_v28   ;;  %1332 = vrot.lane.b32.xlu1 %v1312_v24, %s7965_s27  ;;  %s8028_s27 = smov 110  }
 0x3c4   : > { %1497 = vperm.xlu1 %5943, %v1489_v30  }
 0x3fe   : > { %v1403_v31 = vpop.permute.xlu0 %1402  ;;  %v1431_v32 = vpop.permute.xlu1 %1430 }
 0x402   : > { %v1375_v33 = vpop.permute.xlu0 %1374  ;;  %v1417_v34 = vpop.permute.xlu1 %1416 }
 0x406   : > { %v1347_v35 = vpop.permute.xlu0 %1346  ;;  %v1389_v36 = vpop.permute.xlu1 %1388 }
 0x40a   : > { %v1433_v38 = vpop.permute.xlu0 %1432  ;;  %v1361_v39 = vpop.permute.xlu1 %1360 }
 0x40b   : > { %v1436_v40 = vsel %vm1070_vm5, %v1431_v32, %v1433_v38 }
 0x40c   : > { %1441 = vst [vmem:[#allocation5 + $0xc0] sm:$0xff] %v1436_v40  ;;  %v1483_v45 = vpack.c.bf16 %v1436_v40, %v1436_v40 }
 0x40e   : > { %v1405_v41 = vpop.permute.xlu0 %1404  ;;  %v1435_v44 = vpop.permute.xlu1 %1434  ;;  %v1509_v51 = vsel %vm1132_vm7, %v1483_v45, 0 }
 0x40f   : > { %v1408_v46 = vsel %vm1040_vm9, %v1403_v31, %v1405_v41  ;;  %v1437_v47 = vsel %vm1070_vm5, %v1433_v38, %v1435_v44  ;;  %1443 = vst.msk [vmem:[#allocation5 + $0xd0] sm:$0xff] %vm957_vm6, %v1435_v44  ;;  %vm2404_vm5 = vcmask 130048  }
 0x410   : > { %1413 = vst [vmem:[#allocation5 + $0x90] sm:$0xff] %v1408_v46  ;;  %v1484_v48 = vpack.c.bf16 %v1437_v47, %v1437_v47 }
 0x412   : > { %v1419_v49 = vpop.permute.xlu0 %1418  ;;  %v1407_v50 = vpop.permute.xlu1 %1406  ;;  %5339 = vmatprep.subr.msk.bf16.mxu0 %vm1132_vm7, %v1484_v48 }
 0x413   : > { %v1422_v52 = vsel %vm1055_vm8, %v1417_v34, %v1419_v49  ;;  %v1409_v53 = vsel %vm1040_vm9, %v1405_v41, %v1407_v50  ;;  %1415 = vst.msk [vmem:[#allocation5 + $0xa0] sm:$0xff] %vm957_vm6, %v1407_v50  ;;  %1524 = vmatpush1.bf16.msra.mxu0 %v1509_v51  ;;  %v1639_v51 = vld [vmem:[%s8019_s2 + $0x78] sm:$0xff] }
 0x414   : > { %1427 = vst [vmem:[#allocation5 + $0xa8] sm:$0xff] %v1422_v52  ;;  %v1480_v62 = vpack.c.bf16 %v1422_v52, %v1408_v46  ;;  %v5944_v46 = vld [vmem:[#allocation10] sm:$0xff]   ;;  %v1654_v52 = vld [vmem:[%s8019_s2 + $0xf0] sm:$0xff] }
 0x416   : > { %v1377_v54 = vpop.permute.xlu0 %1376  ;;  %v1421_v55 = vpop.permute.xlu1 %1420  ;;  %v1470_v56 = vld [vmem:[#allocation5 + $0xd0] sm:$0xff] }
 0x417   : > { %v1380_v57 = vsel %vm1010_vm11, %v1375_v33, %v1377_v54  ;;  %v1423_v58 = vsel %vm1055_vm8, %v1419_v49, %v1421_v55  ;;  %1429 = vst.msk [vmem:[#allocation5 + $0xb8] sm:$0xff] %vm957_vm6, %v1421_v55  ;;  %v1485_v59 = vpack.c.bf16 %v1470_v56, %v1470_v56  ;;  %v1655_v49 = vld [vmem:[%s8019_s2 + $0xf8] sm:$0xff]  ;;  %v1637_v55 = vld [vmem:[%s8019_s2 + $0x68] sm:$0xff]  ;;  %v1652_v56 = vld [vmem:[%s8019_s2 + $0xe0] sm:$0xff]  ;;  %vm2754_vm8 = vcmask 293984  }
 0x418   : > { %1385 = vst [vmem:[#allocation5 + $0x60] sm:$0xff] %v1380_v57  ;;  %v1481_v60 = vpack.c.bf16 %v1423_v58, %v1409_v53  ;;  %v1638_v53 = vld [vmem:[%s8019_s2 + $0x70] sm:$0xff]  ;;  %v1635_v58 = vld [vmem:[%s8019_s2 + $0x58] sm:$0xff] }
 0x419   : > { %v1515_v61 = vsel %vm1132_vm7, %v1485_v59, 0  ;;  %v1650_v59 = vld [vmem:[%s8019_s2 + $0xd0] sm:$0xff] }
 0x41a   : > { %v1391_v63 = vpop.permute.xlu0 %1390  ;;  %5712 = vmatpush3.bf16.msra.mxu1 %v1515_v61  ;;  %v1379_v1 = vpop.permute.xlu1 %1378  ;;  %1525 = vmatprep.subr.bf16.mxu0 %v1481_v60  ;;  %v1464_v6 = vld [vmem:[#allocation5 + $0xa0] sm:$0xff]  ;;  %v1634_v60 = vld [vmem:[%s8019_s2 + $0x50] sm:$0xff] }
 0x41b   : > { %v1394_v2 = vsel %vm1025_vm10, %v1389_v36, %v1391_v63  ;;  %v1381_v3 = vsel %vm1010_vm11, %v1377_v54, %v1379_v1  ;;  %1387 = vst.msk [vmem:[#allocation5 + $0x70] sm:$0xff] %vm957_vm6, %v1379_v1  ;;  %5713 = vmatprep.subr.bf16.mxu1 %v6244_v0  ;;  %1526 = vmatpush1.bf16.msra.mxu0 %v1480_v62  ;;  %v1653_v54 = vld [vmem:[%s8019_s2 + $0xe8] sm:$0xff]  ;;  %v1632_v1 = vld [vmem:[%s8019_s2 + $0x40] sm:$0xff] }
 0x41c   : > { %1399 = vst [vmem:[#allocation5 + $0x78] sm:$0xff] %v1394_v2  ;;  %v1477_v13 = vpack.c.bf16 %v1394_v2, %v1380_v57  ;;  %v1651_v57 = vld [vmem:[%s8019_s2 + $0xd8] sm:$0xff]  ;;  %v1649_v61 = vld [vmem:[%s8019_s2 + $0xc8] sm:$0xff] }
 0x41d   : > { %v1633_v62 = vld [vmem:[%s8019_s2 + $0x48] sm:$0xff]  ;;  %v1647_v2 = vld [vmem:[%s8019_s2 + $0xb8] sm:$0xff] }
 0x41e   : > { %v1349_v4 = vpop.permute.xlu0 %1348  ;;  %v1393_v5 = vpop.permute.xlu1 %1392  ;;  %v1467_v7 = vld [vmem:[#allocation5 + $0xb8] sm:$0xff] }
 0x41f   : > { %v1352_v8 = vsel %vm980_vm13, %v1347_v35, %v1349_v4  ;;  %v1395_v9 = vsel %vm1025_vm10, %v1391_v63, %v1393_v5  ;;  %1401 = vst.msk [vmem:[#allocation5 + $0x88] sm:$0xff] %vm957_vm6, %v1393_v5  ;;  %v1482_v10 = vpack.c.bf16 %v1467_v7, %v1464_v6  ;;  %v1648_v63 = vld [vmem:[%s8019_s2 + $0xc0] sm:$0xff]  ;;  %v1630_v5 = vld [vmem:[%s8019_s2 + $0x30] sm:$0xff]  ;;  %v1645_v6 = vld [vmem:[%s8019_s2 + $0xa8] sm:$0xff] }
 0x420   : > { %1357 = vst [vmem:[#allocation5 + $0x30] sm:$0xff] %v1352_v8  ;;  %v1478_v12 = vpack.c.bf16 %v1395_v9, %v1381_v3  ;;  %v1631_v3 = vld [vmem:[%s8019_s2 + $0x38] sm:$0xff]  ;;  %v1629_v7 = vld [vmem:[%s8019_s2 + $0x28] sm:$0xff]  ;;  %v1628_v9 = vld [vmem:[%s8019_s2 + $0x20] sm:$0xff] }
 0x421   : > { %5714 = vmatpush3.bf16.msra.mxu1 %v1482_v10  ;;  %v1643_v10 = vld [vmem:[%s8019_s2 + $0x98] sm:$0xff] }
 0x422   : > { %v1363_v14 = vpop.permute.xlu0 %1362  ;;  %v1351_v15 = vpop.permute.xlu1 %1350  ;;  %5715 = vmatprep.subr.bf16.mxu1 %v6244_v0  ;;  %1527 = vmatprep.subr.bf16.mxu0 %v1478_v12  ;;  %v1458_v20 = vld [vmem:[#allocation5 + $0x70] sm:$0xff] }
 0x423   : > { %v1366_v16 = vsel %vm995_vm12, %v1361_v39, %v1363_v14  ;;  %v1353_v17 = vsel %vm980_vm13, %v1349_v4, %v1351_v15  ;;  %1359 = vst.msk [vmem:[#allocation5 + $0x40] sm:$0xff] %vm957_vm6, %v1351_v15  ;;  %1528 = vmatpush1.bf16.msra.mxu0 %v1477_v13  ;;  %v1646_v4 = vld [vmem:[%s8019_s2 + $0xb0] sm:$0xff]  ;;  %v1627_v12 = vld [vmem:[%s8019_s2 + $0x18] sm:$0xff]  ;;  %v1641_v15 = vld [vmem:[%s8019_s2 + $0x88] sm:$0xff] }
 0x424   : > { %1371 = vst [vmem:[#allocation5 + $0x48] sm:$0xff] %v1366_v16  ;;  %v1474_v26 = vpack.c.bf16 %v1366_v16, %v1352_v8  ;;  %v1644_v8 = vld [vmem:[%s8019_s2 + $0xa0] sm:$0xff]  ;;  %v1642_v13 = vld [vmem:[%s8019_s2 + $0x90] sm:$0xff]  ;;  %v1625_v16 = vld [vmem:[%s8019_s2 + $0x8] sm:$0xff] }
 0x426   : > { %v1321_v18 = vpop.permute.xlu0 %1320  ;;  %v1365_v19 = vpop.permute.xlu1 %1364  ;;  %v1461_v21 = vld [vmem:[#allocation5 + $0x88] sm:$0xff] }
 0x427   : > { %v1367_v22 = vsel %vm995_vm12, %v1363_v14, %v1365_v19  ;;  %1373 = vst.msk [vmem:[#allocation5 + $0x58] sm:$0xff] %vm957_vm6, %v1365_v19  ;;  %v1479_v23 = vpack.c.bf16 %v1461_v21, %v1458_v20  ;;  %v1626_v14 = vld [vmem:[%s8019_s2 + $0x10] sm:$0xff]  ;;  %v1659_v19 = vld [vmem:[%s8019_s2 + $0x118] sm:$0xff] }
 0x428   : > { %v1475_v24 = vpack.c.bf16 %v1367_v22, %v1353_v17  ;;  %v1640_v17 = vld [vmem:[%s8019_s2 + $0x80] sm:$0xff]  ;;  %v1601_v20 = vld [vmem:[#allocation6] sm:$0x7] }
 0x429   : > { %5716 = vmatpush3.bf16.msra.mxu1 %v1479_v23  ;;  %v1610_v23 = vrot.slane %v1601_v20, %v6620_v27 }
 0x42a   : > { %v1335_v28 = vpop.permute.xlu0 %1334  ;;  %v1323_v30 = vpop.permute.xlu1 %1322  ;;  %5717 = vmatprep.subr.bf16.mxu1 %v6244_v0  ;;  %1529 = vmatprep.subr.bf16.mxu0 %v1475_v24  ;;  %v1452_v34 = vld [vmem:[#allocation5 + $0x40] sm:$0xff] }
 0x42b   : > { %v1325_v31 = vsel %vm949_vm14, %v1321_v18, %v1323_v30  ;;  %1331 = vst.msk [vmem:[#allocation5 + $0x10] sm:$0xff] %vm957_vm6, %v1323_v30  ;;  %1530 = vmatpush1.bf16.msra.mxu0 %v1474_v26  ;;  %v1606_v26 = vrot.slane %v1601_v20, %v6618_v25  ;;  %v1658_v25 = vld [vmem:[%s8019_s2 + $0x110] sm:$0xff] }
 0x42e   : > { %v1319_v32 = vpop.permute.xlu0 %1318  ;;  %v1337_v33 = vpop.permute.xlu1 %1336  ;;  %v1455_v35 = vld [vmem:[#allocation5 + $0x58] sm:$0xff] }
 0x42f   : > { %v1324_v36 = vsel %vm949_vm14, %v1319_v32, %v1321_v18  ;;  %v1339_v38 = vsel %vm965_vm15, %v1335_v28, %v1337_v33  ;;  %1345 = vst.msk [vmem:[#allocation5 + $0x28] sm:$0xff] %vm957_vm6, %v1337_v33  ;;  %v1476_v39 = vpack.c.bf16 %v1455_v35, %v1452_v34  ;;  %v1624_v18 = vld [vmem:[%s8019_s2] sm:$0xff] }
 0x430   : > { %1329 = vst [vmem:[#allocation5] sm:$0xff] %v1324_v36  ;;  %v1472_v40 = vpack.c.bf16 %v1339_v38, %v1325_v31 }
 0x431   : > { %5718 = vmatpush3.bf16.msra.mxu1 %v1476_v39 }
 0x432   : > { %v1333_v41 = vpop.permute.xlu1 %1332  ;;  %5719 = vmatprep.subr.bf16.mxu1 %v6244_v0  ;;  %1531 = vmatprep.subr.bf16.mxu0 %v1472_v40  ;;  %v1446_v47 = vld [vmem:[#allocation5 + $0x10] sm:$0xff]  ;;  %v1614_v40 = vrot.slane %v1601_v20, %v6622_v29  ;;  %v1656_v29 = vld [vmem:[%s8019_s2 + $0x100] sm:$0xff] }
 0x433   : > { %v1338_v44 = vsel %vm965_vm15, %v1333_v41, %v1335_v28 }
 0x434   : > { %1343 = vst [vmem:[#allocation5 + $0x18] sm:$0xff] %v1338_v44  ;;  %v1471_v45 = vpack.c.bf16 %v1338_v44, %v1324_v36 }
 0x436   : > { %v1449_v48 = vld [vmem:[#allocation5 + $0x28] sm:$0xff]  ;;  %1532 = vmatpush1.bf16.msra.mxu0 %v1471_v45 }
 0x437   : > { %v1473_v50 = vpack.c.bf16 %v1449_v48, %v1446_v47  ;;  %5426 = vmatprep.subr.mxu0 %v1655_v49 }
 0x439   : > { %5720 = vmatpush3.bf16.msra.mxu1 %v1473_v50  ;;  %5340 = vmatmul.mubr.msk.bf16.vlgmr.msra.gmra.mxu0 %vm1128_vm0, %v5944_v46 }
 0x43a   : > { %5470 = vmatprep.subr.mxu1 %v1655_v49  ;;  %5427 = vmatpush3.msra.mxu0 %v1639_v51 }
 0x43b   : > { %5428 = vmatprep.subr.mxu0 %v1654_v52  ;;  %v1493_v22 = vpop.permute.xlu0 %1492 }
 0x43c   : > { %5722 = vmatmul.mubr.msk.bf16.vlgmr.msra.gmra.mxu1 %vm1128_vm0, %v5944_v46  ;;  %5429 = vmatpush3.msra.mxu0 %v1638_v53  ;;  %v1657_v46 = vld [vmem:[%s8019_s2 + $0x108] sm:$0xff] }
 0x43d   : > { %5471 = vmatpush3.msra.mxu1 %v1639_v51  ;;  %1883 = vmatprep.mubr.f32.mxu1 %v6635_v42  ;;  %v1636_v42 = vld [vmem:[%s8019_s2 + $0x60] sm:$0xff] }
 0x43e   : > { %5472 = vmatprep.subr.mxu1 %v1654_v52  ;;  %5430 = vmatprep.subr.mxu0 %v1653_v54 }
 0x43f   : > { %5473 = vmatpush3.msra.mxu1 %v1638_v53  ;;  %5431 = vmatpush3.msra.mxu0 %v1637_v55  ;;  %v1498_v32 = vpop.permute.xlu1 %1497 }
 0x440   : > { %5474 = vmatprep.subr.mxu1 %v1653_v54  ;;  %5432 = vmatprep.subr.mxu0 %v1652_v56 }
 0x441   : > { %5475 = vmatpush3.msra.mxu1 %v1637_v55  ;;  %5433 = vmatpush3.msra.mxu0 %v1636_v42 }
 0x442   : > { %5476 = vmatprep.subr.mxu1 %v1652_v56  ;;  %5434 = vmatprep.subr.mxu0 %v1651_v57 }
 0x443   : > { %5477 = vmatpush3.msra.mxu1 %v1636_v42  ;;  %5435 = vmatpush3.msra.mxu0 %v1635_v58 }
 0x444   : > { %5478 = vmatprep.subr.mxu1 %v1651_v57  ;;  %5436 = vmatprep.subr.mxu0 %v1650_v59 }
 0x445   : > { %5479 = vmatpush3.msra.mxu1 %v1635_v58  ;;  %5437 = vmatpush3.msra.mxu0 %v1634_v60 }
 0x446   : > { %5480 = vmatprep.subr.mxu1 %v1650_v59  ;;  %5438 = vmatprep.subr.mxu0 %v1649_v61 }
 0x447   : > { %5481 = vmatpush3.msra.mxu1 %v1634_v60  ;;  %5439 = vmatpush3.msra.mxu0 %v1633_v62 }
 0x448   : > { %5482 = vmatprep.subr.mxu1 %v1649_v61  ;;  %5440 = vmatprep.subr.mxu0 %v1648_v63 }
 0x449   : > { %5483 = vmatpush3.msra.mxu1 %v1633_v62  ;;  %5441 = vmatpush3.msra.mxu0 %v1632_v1 }
 0x44a   : > { %5484 = vmatprep.subr.mxu1 %v1648_v63  ;;  %5442 = vmatprep.subr.mxu0 %v1647_v2 }
 0x44b   : > { %5485 = vmatpush3.msra.mxu1 %v1632_v1  ;;  %5443 = vmatpush3.msra.mxu0 %v1631_v3 }
 0x44c   : > { %5486 = vmatprep.subr.mxu1 %v1647_v2  ;;  %5444 = vmatprep.subr.mxu0 %v1646_v4 }
 0x44d   : > { %5487 = vmatpush3.msra.mxu1 %v1631_v3  ;;  %5445 = vmatpush3.msra.mxu0 %v1630_v5 }
 0x44e   : > { %5488 = vmatprep.subr.mxu1 %v1646_v4  ;;  %5446 = vmatprep.subr.mxu0 %v1645_v6 }
 0x44f   : > { %5489 = vmatpush3.msra.mxu1 %v1630_v5  ;;  %5447 = vmatpush3.msra.mxu0 %v1629_v7 }
 0x450   : > { %5490 = vmatprep.subr.mxu1 %v1645_v6  ;;  %5448 = vmatprep.subr.mxu0 %v1644_v8 }
 0x451   : > { %5491 = vmatpush3.msra.mxu1 %v1629_v7  ;;  %5449 = vmatpush3.msra.mxu0 %v1628_v9 }
 0x452   : > { %5492 = vmatprep.subr.mxu1 %v1644_v8  ;;  %5450 = vmatprep.subr.mxu0 %v1643_v10 }
 0x453   : > { %5493 = vmatpush3.msra.mxu1 %v1628_v9  ;;  %5451 = vmatpush3.msra.mxu0 %v1627_v12 }
 0x454   : > { %5494 = vmatprep.subr.mxu1 %v1643_v10  ;;  %5452 = vmatprep.subr.mxu0 %v1642_v13 }
 0x455   : > { %5495 = vmatpush3.msra.mxu1 %v1627_v12  ;;  %5453 = vmatpush3.msra.mxu0 %v1626_v14 }
 0x456   : > { %5496 = vmatprep.subr.mxu1 %v1642_v13  ;;  %5454 = vmatprep.subr.mxu0 %v1641_v15 }
 0x457   : > { %5497 = vmatpush3.msra.mxu1 %v1626_v14  ;;  %5455 = vmatpush3.msra.mxu0 %v1625_v16 }
 0x458   : > { %5498 = vmatprep.subr.mxu1 %v1641_v15  ;;  %5456 = vmatprep.subr.mxu0 %v1640_v17 }
 0x459   : > { %5499 = vmatpush3.msra.mxu1 %v1625_v16  ;;  %5457 = vmatpush3.msra.mxu0 %v1624_v18 }
 0x45a   : > { %5500 = vmatprep.subr.mxu1 %v1640_v17  ;;  %5725 = vmatprep.subr.mxu0 %v1659_v19 }
 0x45b   : > { %5501 = vmatpush3.msra.mxu1 %v1624_v18 }
 0x45c   : > { %1884 = vmatmul.mubr.f32.vlgmr.msra.gmra.mxu1 %v6632_v37  ;;  %2411 = vmatprep.subr.bf16.mxu1 %v6255_v11 }
 0x4f9   : > { %v1551_v21 = vpop.f32.mrf.mxu0 }
 0x4fa   : > { %v1552_v24 = vadd.f32 %v1551_v21, %v1493_v22 }
 0x4fb   : > { %v1553_v28 = vpop.f32.mrf.mxu0 }
 0x4fc   : > { %v1594_v30 = vpop.f32.mrf.mxu1  ;;  %v1554_v31 = vadd.f32 %v1553_v28, %v1493_v22  ;;  %v1618_v35 = vmul.f32 %v1606_v26, %v1552_v24 }
 0x4fd   : > { %v1555_v37 = vpop.f32.mrf.mxu0  ;;  %v1595_v39 = vadd.f32 %v1594_v30, %v1493_v22 }
 0x4fe   : > { %v1619_v33 = vmul.f32 %v1610_v23, %v1554_v31  ;;  %v5723_v34 = vpop.f32.mrf.mxu1  ;;  %v1556_v36 = vadd.f32 %v1555_v37, %v1498_v32  ;;  %v6870_v31 = vld [vmem:[%s8020_s30] ss:$0 sm:$0xff]  ;;  %s7979_s30 = smov 122  }
 0x4ff   : > { %v1557_v38 = vpop.f32.mrf.mxu0  ;;  %v1620_v49 = vmul.f32 %v1614_v40, %v1595_v39 }
 0x500   : > { %v1597_v41 = vpop.f32.mrf.mxu1  ;;  %v1558_v44 = vadd.f32 %v1557_v38, %v1498_v32  ;;  %1730 = vmatprep.mubr.f32.mxu0 %v1619_v33  ;;  %v1621_v48 = vmul.f32 %v1606_v26, %v1556_v36 }
 0x501   : > { %1731 = vmatmul.mubr.f32.vlgmr.msra.gmra.mxu0 %v1618_v35  ;;  %v1598_v47 = vadd.f32 %v1597_v41, %v1498_v32 }
 0x502   : > { %v1622_v27 = vmul.f32 %v1610_v23, %v1558_v44  ;;  %v5724_v45 = vpop.f32.mrf.mxu1  ;;  %5726 = vmatpush3.msra.mxu0 %v1659_v19 }
 0x503   : > { %5727 = vmatprep.subr.mxu0 %v1658_v25  ;;  %v1623_v50 = vmul.f32 %v1614_v40, %v1598_v47  ;;  %v5945_v45 = vld [vmem:[#allocation11 + $0x4] ss:$8 sps:$4 sm:$0xff]  }
 0x504   : > { %5728 = vmatpush3.msra.mxu0 %v1658_v25  ;;  %1735 = vmatprep.mubr.f32.mxu0 %v1622_v27  ;;  %v2123_v27 = vld [vmem:[%s8021_s11 + $0x8] sm:$0xff] }
 0x505   : > { %5729 = vmatprep.subr.mxu0 %v1657_v46  ;;  %1736 = vmatmul.mubr.f32.gmra.mxu0 %v1621_v48 }
 0x506   : > { %5730 = vmatpush3.msra.mxu0 %v1657_v46  ;;  %5733 = vmatprep.mubr.msk.f32.mxu0 %vm957_vm6, %v1620_v49 }
 0x507   : > { %5731 = vmatprep.subr.mxu0 %v1656_v29 }
 0x508   : > { %5732 = vmatpush3.msra.mxu0 %v1656_v29 }
 0x509   : > { %5736 = vmatprep.subr.mxu0 %v6244_v0  ;;  %5734 = vmatmul.mubr.msk.f32.vlgmr.msra.gmra.mxu0 %vm957_vm6, %v1623_v50 }
 0x50a   : > { %5737 = vmatpush3.msra.mxu0 %v1659_v19  ;;  %5744 = vmatprep.mubr.msk.f32.mxu0 %vm6256_vm4, %v6244_v0  ;;  %vm2143_vm4 = vcmask 195584  }
 0x50b   : > { %5738 = vmatprep.subr.mxu0 %v6244_v0 }
 0x50c   : > { %5739 = vmatpush3.msra.mxu0 %v1658_v25  ;;  %v2122_v25 = vld [vmem:[%s8021_s11] sm:$0xff] }
 0x50d   : > { %5740 = vmatprep.subr.mxu0 %v6244_v0 }
 0x50e   : > { %5741 = vmatpush3.msra.mxu0 %v1657_v46 }
 0x50f   : > { %5742 = vmatprep.subr.mxu0 %v6244_v0 }
 0x510   : > { %5743 = vmatpush3.msra.mxu0 %v1656_v29 }
 0x511   : > { %5745 = vmatmul.mubr.msk.f32.vlgmr.msra.gmra.mxu0 %vm957_vm6, %v6637_v43  ;;  %2150 = vmatprep.subr.bf16.mxu0 %v6255_v11 }
 0x512   : > { %5348 = vmatprep.mubr.msk.bf16.mxu0 %vm2143_vm4, %v5945_v45 }
 0x51c   : > { %v5502_v56 = vpop.f32.mrf.mxu1 }
 0x51e   : > { %v5503_v62 = vpop.f32.mrf.mxu1 }
 0x51f   : > { %v5504_v1 = vadd.f32 %v5503_v62, %v5502_v56 }
 0x5c1   : > { %v5458_v51 = vpop.f32.mrf.mxu0 }
 0x5c3   : > { %v5459_v52 = vpop.f32.mrf.mxu0 }
 0x5c4   : > { %v5460_v57 = vadd.f32 %v5459_v52, %v5458_v51 }
 0x5c5   : > { %v5461_v53 = vpop.f32.mrf.mxu0 }
 0x5c7   : > { %v5462_v54 = vpop.f32.mrf.mxu0 }
 0x5c8   : > { %v5463_v55 = vadd.f32 %v5462_v54, %v5461_v53 }
 0x5c9   : > { %v5735_v42 = vpop.f32.mrf.mxu0 }
 0x5ca   : > { %v1813_v58 = vadd.f32 %v5735_v42, %v5463_v55 }
 0x5cb   : > { %v1807_v59 = vpop.f32.mrf.mxu0 }
 0x5cc   : > { %v1808_v60 = vadd.f32 %v5460_v57, %v1807_v59  ;;  %v1963_v61 = vsel %vm1959_vm1, %v1813_v58, 0.0  ;;  %v1969_v5 = vmul.f32 %v1813_v58, %v1813_v58 }
 0x5cd   : > { %1964 = vadd.xlane.f32.xlu1 %v1963_v61 }
 0x5ce   : > { %v1960_v43 = vsel %vm1959_vm1, %v1808_v60, 0.0  ;;  %v1968_v63 = vmul.f32 %v1808_v60, %v1808_v60  ;;  %v1973_v7 = vsel %vm1959_vm1, %v1969_v5, 0.0 }
 0x5cf   : > { %1961 = vadd.xlane.f32.xlu0 %v1960_v43 }
 0x5d0   : > { %v1970_v4 = vsel %vm1959_vm1, %v1968_v63, 0.0 }
 0x5d1   : > { %v1955_v2 = vpop.f32.mrf.mxu0 }
 0x5d2   : > { %v1956_v3 = vadd.f32 %v5504_v1, %v1955_v2 }
 0x5d3   : > { %v5746_v6 = vpop.f32.mrf.mxu0  ;;  %1971 = vadd.xlane.f32.xlu0 %v1970_v4 }
 0x5d4   : > { %2090 = vst.msk [vmem:[#allocation5 + $0x1b0] sm:$0xff] %vm1959_vm1, %v1956_v3 }
 0x5d7   : > { %1974 = vadd.xlane.f32.xlu0 %v1973_v7 }
 0x656   : > { %v1965_v10 = vpop.xlane.xlu1 %1964 }
 0x657   : > { %v1967_v13 = vmul.f32 0.015625, %v1965_v10 }
 0x658   : > { %v1962_v8 = vpop.xlane.xlu0 %1961 }
 0x659   : > { %v1966_v9 = vmul.f32 0.015625, %v1962_v8  ;;  %v1979_v18 = vmul.f32 %v1967_v13, %v1967_v13  ;;  %v1983_v32 = vsub.f32 %v1813_v58, %v1967_v13 }
 0x65b   : > { %v1978_v14 = vmul.f32 %v1966_v9, %v1966_v9  ;;  %v1982_v26 = vsub.f32 %v1808_v60, %v1966_v9 }
 0x65c   : > { %v1972_v12 = vpop.xlane.xlu0 %1971 }
 0x65d   : > { %v1976_v15 = vmul.f32 0.015625, %v1972_v12 }
 0x65f   : > { %v1980_v16 = vsub.f32 %v1976_v15, %v1978_v14 }
 0x660   : > { %v1975_v17 = vpop.xlane.xlu0 %1974 }
 0x661   : > { %v1984_v19 = vmax.f32 %v1980_v16, 0.0  ;;  %v1977_v20 = vmul.f32 0.015625, %v1975_v17 }
 0x663   : > { %v1986_v21 = vadd.f32 1e-05, %v1984_v19  ;;  %v1981_v22 = vsub.f32 %v1977_v20, %v1979_v18  ;;  %v2109_v20 = vld [vmem:[#allocation5 + $0x1b0] sm:$0xff] }
 0x665   : > { %5996 = vrsqrt.f32 %v1986_v21  ;;  %v1985_v23 = vmax.f32 %v1981_v22, 0.0 }
 0x667   : > { %v1987_v24 = vadd.f32 1e-05, %v1985_v23 }
 0x669   : > { %5998 = vrsqrt.f32 %v1987_v24  ;;  %v2119_v24 = vpack.c.bf16 %v2109_v20, %v2109_v20 }
 0x672   : > { %v5997_v28 = vpop.eup %5996 }
 0x673   : > { %v1990_v30 = vmul.f32 %v5997_v28, %v1982_v26  ;;  %v2148_v26 = vsel %vm1132_vm7, %v2119_v24, 0  ;;  %vm909_vm7 = vcmask 392192  }
 0x674   : > { %913 = vst.msk [vmem:[#allocation4 + $0x18] sm:$0xff] %vm909_vm7, %v6244_v0  ;;  %910 = vst.msk [vmem:[#allocation4] sm:$0xff] %vm909_vm7, %v6244_v0 }
 0x675   : > { %v1992_v37 = vmax.f32 %v1990_v30, 0.0  ;;  %911 = vst.msk [vmem:[#allocation4 + $0x8] sm:$0xff] %vm909_vm7, %v6244_v0  ;;  %912 = vst.msk [vmem:[#allocation4 + $0x10] sm:$0xff] %vm909_vm7, %v6244_v0 }
 0x676   : > { %v5999_v33 = vpop.eup %5998 }
 0x677   : > { %v2001_v34 = vmul.f32 %v6870_v31, %v1992_v37  ;;  %v1991_v35 = vmul.f32 %v5999_v33, %v1983_v32  ;;  %v6934_v37 = vld [vmem:[%s8022_s8 + $0x48] sm:$0xff] }
 0x678   : > { %v5947_v33 = vld [vmem:[#allocation11] ss:$8 sps:$4 sm:$0xff]  }
 0x679   : > { %2005 = vrot.lane.b32.xlu1 %v2001_v34, %s6257_s9  ;;  %v1993_v36 = vmax.f32 %v1991_v35, 0.0  ;;  %v6940_v34 = vld [vmem:[%s8022_s8 + $0x40] sm:$0xff]  ;;  %v6946_v35 = vld [vmem:[%s8022_s8 + $0x38] sm:$0xff] }
 0x67b   : > { %v2002_v38 = vmul.f32 %v6870_v31, %v1993_v36  ;;  %v6953_v36 = vld [vmem:[%s8022_s8 + $0x30] sm:$0xff] }
 0x67d   : > { %2007 = vrot.lane.b32.xlu0 %v2002_v38, %s6257_s9  ;;  %v6960_v38 = vld [vmem:[%s8022_s8 + $0x28] sm:$0xff] }
 0x6eb   : > { %v2006_v39 = vpop.permute.xlu1 %2005 }
 0x6ec   : > { %2012 = vst.msk [vmem:[#allocation3] sm:$0xff] %vm2011_vm3, %v2006_v39  ;;  %v6967_v39 = vld [vmem:[%s8022_s8 + $0x20] sm:$0xff] }
 0x6ef   : > { %v2008_v40 = vpop.permute.xlu0 %2007 }
 0x6f0   : > { %2013 = vst.msk [vmem:[#allocation3 + $0x8] sm:$0xff] %vm2011_vm3, %v2008_v40  ;;  %v6976_v40 = vld [vmem:[%s8022_s8 + $0x18] sm:$0xff] }
 0x6f3   : > { %v2014_v41 = vld [vmem:[#allocation3] sm:$0xff] }
 0x6f4   : > { %2066 = vrot.lane.b32.xlu0 %v2014_v41, %s6258_s29 }
 0x6f7   : > { %v2015_v44 = vld [vmem:[#allocation3 + $0x8] sm:$0xff] }
 0x6f8   : > { %2076 = vrot.lane.b32.xlu1 %v2015_v44, %s6259_s5  ;;  %2058 = vrot.lane.b32.xlu0 %v2014_v41, %s6260_s1 }
 0x6fc   : > { %2050 = vrot.lane.b32.xlu0 %v2014_v41, %s6261_s0  ;;  %2074 = vrot.lane.b32.xlu1 %v2014_v41, %s6259_s5 }
 0x700   : > { %2042 = vrot.lane.b32.xlu0 %v2014_v41, %s6250_s6  ;;  %2068 = vrot.lane.b32.xlu1 %v2015_v44, %s6258_s29 }
 0x704   : > { %2034 = vrot.lane.b32.xlu0 %v2014_v41, %s7981_s10  ;;  %2060 = vrot.lane.b32.xlu1 %v2015_v44, %s6260_s1 }
 0x708   : > { %2026 = vrot.lane.b32.xlu0 %v2014_v41, %s7971_s7  ;;  %2052 = vrot.lane.b32.xlu1 %v2015_v44, %s6261_s0 }
 0x70c   : > { %2018 = vrot.lane.b32.xlu0 %v2014_v41, %s7969_s23  ;;  %2044 = vrot.lane.b32.xlu1 %v2015_v44, %s6250_s6 }
 0x710   : > { %2082 = vrot.lane.b32.xlu0 %v2014_v41, %s7967_s3  ;;  %2036 = vrot.lane.b32.xlu1 %v2015_v44, %s7981_s10  ;;  %v6983_v41 = vld [vmem:[%s8022_s8 + $0x10] sm:$0xff] }
 0x714   : > { %2126 = vperm.xlu0 %5942, %v2122_v25   ;;  %2028 = vrot.lane.b32.xlu1 %v2015_v44, %s7971_s7  ;;  %v6997_v25 = vld [vmem:[%s8022_s8] sm:$0xff]  ;;  %s7977_s7 = smov 116  }
 0x718   : > { %2020 = vrot.lane.b32.xlu1 %v2015_v44, %s7969_s23 }
 0x71c   : > { %2084 = vrot.lane.b32.xlu1 %v2015_v44, %s7967_s3  ;;  %v6990_v44 = vld [vmem:[%s8022_s8 + $0x8] sm:$0xff]  ;;  %s5413_s3 = sshll.u32 %s8041_s28, 4  ;;  %s8036_s8 = smov 123  }
 0x71d   : > { %s900_s23 = scalar_lea.vmem %s7955_s26, %s5413_s3  ;;  %s7973_s3 = smov 115  }
 0x720   : > { %2131 = vperm.xlu1 %5943, %v2123_v27  }
 0x766   : > { %v2067_v46 = vpop.permute.xlu0 %2066 }
 0x767   : > { %2072 = vst.msk [vmem:[#allocation5 + $0x120] sm:$0xff] %vm1959_vm1, %v2067_v46 }
 0x76a   : > { %v2059_v47 = vpop.permute.xlu0 %2058  ;;  %v2077_v48 = vpop.permute.xlu1 %2076 }
 0x76b   : > { %2064 = vst.msk [vmem:[#allocation5 + $0xf0] sm:$0xff] %vm1959_vm1, %v2059_v47  ;;  %2081 = vst.msk [vmem:[#allocation5 + $0x168] sm:$0xff] %vm1959_vm1, %v2077_v48 }
 0x76e   : > { %v2051_v49 = vpop.permute.xlu0 %2050  ;;  %v2075_v29 = vpop.permute.xlu1 %2074  ;;  %v2103_v58 = vld [vmem:[#allocation5 + $0x120] sm:$0xff] }
 0x76f   : > { %2056 = vst.msk [vmem:[#allocation5 + $0xc0] sm:$0xff] %vm1959_vm1, %v2051_v49  ;;  %2080 = vst.msk [vmem:[#allocation5 + $0x150] sm:$0xff] %vm1959_vm1, %v2075_v29 }
 0x772   : > { %v2043_v50 = vpop.permute.xlu0 %2042  ;;  %v2069_v51 = vpop.permute.xlu1 %2068  ;;  %v2106_v55 = vld [vmem:[#allocation5 + $0x168] sm:$0xff]  ;;  %v2101_v43 = vld [vmem:[#allocation5 + $0xf0] sm:$0xff] }
 0x773   : > { %2048 = vst.msk [vmem:[#allocation5 + $0x90] sm:$0xff] %vm1959_vm1, %v2043_v50  ;;  %2073 = vst.msk [vmem:[#allocation5 + $0x138] sm:$0xff] %vm1959_vm1, %v2069_v51 }
 0x776   : > { %v2035_v52 = vpop.permute.xlu0 %2034  ;;  %v2061_v53 = vpop.permute.xlu1 %2060  ;;  %v2105_v54 = vld [vmem:[#allocation5 + $0x150] sm:$0xff]  ;;  %v2099_v4 = vld [vmem:[#allocation5 + $0xc0] sm:$0xff] }
 0x777   : > { %2040 = vst.msk [vmem:[#allocation5 + $0x60] sm:$0xff] %vm1959_vm1, %v2035_v52  ;;  %2065 = vst.msk [vmem:[#allocation5 + $0x108] sm:$0xff] %vm1959_vm1, %v2061_v53  ;;  %v2117_v56 = vpack.c.bf16 %v2106_v55, %v2105_v54 }
 0x779   : > { %2151 = vmatpush1.bf16.msra.mxu0 %v2117_v56 }
 0x77a   : > { %v2027_v42 = vpop.permute.xlu0 %2026  ;;  %v2053_v57 = vpop.permute.xlu1 %2052  ;;  %2152 = vmatprep.subr.bf16.mxu0 %v6255_v11  ;;  %v2104_v59 = vld [vmem:[#allocation5 + $0x138] sm:$0xff]  ;;  %v2097_v8 = vld [vmem:[#allocation5 + $0x90] sm:$0xff] }
 0x77b   : > { %2032 = vst.msk [vmem:[#allocation5 + $0x30] sm:$0xff] %vm1959_vm1, %v2027_v42  ;;  %2057 = vst.msk [vmem:[#allocation5 + $0xd8] sm:$0xff] %vm1959_vm1, %v2053_v57  ;;  %v2116_v60 = vpack.c.bf16 %v2104_v59, %v2103_v58 }
 0x77d   : > { %2153 = vmatpush1.bf16.msra.mxu0 %v2116_v60 }
 0x77e   : > { %v2019_v61 = vpop.permute.xlu0 %2018  ;;  %v2045_v62 = vpop.permute.xlu1 %2044  ;;  %2154 = vmatprep.subr.bf16.mxu0 %v6255_v11  ;;  %v2102_v63 = vld [vmem:[#allocation5 + $0x108] sm:$0xff]  ;;  %v2095_v13 = vld [vmem:[#allocation5 + $0x60] sm:$0xff] }
 0x77f   : > { %2024 = vst.msk [vmem:[#allocation5] sm:$0xff] %vm1959_vm1, %v2019_v61  ;;  %2049 = vst.msk [vmem:[#allocation5 + $0xa8] sm:$0xff] %vm1959_vm1, %v2045_v62  ;;  %v2115_v1 = vpack.c.bf16 %v2102_v63, %v2101_v43 }
 0x781   : > { %2155 = vmatpush1.bf16.msra.mxu0 %v2115_v1 }
 0x782   : > { %v2083_v2 = vpop.permute.xlu0 %2082  ;;  %v2037_v3 = vpop.permute.xlu1 %2036  ;;  %2156 = vmatprep.subr.bf16.mxu0 %v6255_v11  ;;  %v2100_v5 = vld [vmem:[#allocation5 + $0xd8] sm:$0xff]  ;;  %v2093_v17 = vld [vmem:[#allocation5 + $0x30] sm:$0xff] }
 0x783   : > { %2088 = vst.msk [vmem:[#allocation5 + $0x180] sm:$0xff] %vm1959_vm1, %v2083_v2  ;;  %2041 = vst.msk [vmem:[#allocation5 + $0x78] sm:$0xff] %vm1959_vm1, %v2037_v3  ;;  %v2114_v6 = vpack.c.bf16 %v2100_v5, %v2099_v4 }
 0x785   : > { %2157 = vmatpush1.bf16.msra.mxu0 %v2114_v6 }
 0x786   : > { %v2029_v7 = vpop.permute.xlu1 %2028  ;;  %2158 = vmatprep.subr.bf16.mxu0 %v6255_v11  ;;  %v2098_v9 = vld [vmem:[#allocation5 + $0xa8] sm:$0xff]  ;;  %v2091_v21 = vld [vmem:[#allocation5] sm:$0xff] }
 0x787   : > { %2033 = vst.msk [vmem:[#allocation5 + $0x48] sm:$0xff] %vm1959_vm1, %v2029_v7  ;;  %v2113_v10 = vpack.c.bf16 %v2098_v9, %v2097_v8 }
 0x789   : > { %2159 = vmatpush1.bf16.msra.mxu0 %v2113_v10 }
 0x78a   : > { %v2021_v12 = vpop.permute.xlu1 %2020  ;;  %2160 = vmatprep.subr.bf16.mxu0 %v6255_v11  ;;  %v2096_v14 = vld [vmem:[#allocation5 + $0x78] sm:$0xff]  ;;  %v2107_v30 = vld [vmem:[#allocation5 + $0x180] sm:$0xff] }
 0x78b   : > { %2025 = vst.msk [vmem:[#allocation5 + $0x18] sm:$0xff] %vm1959_vm1, %v2021_v12  ;;  %v2112_v15 = vpack.c.bf16 %v2096_v14, %v2095_v13 }
 0x78d   : > { %2161 = vmatpush1.bf16.msra.mxu0 %v2112_v15 }
 0x78e   : > { %v2085_v16 = vpop.permute.xlu1 %2084  ;;  %2162 = vmatprep.subr.bf16.mxu0 %v6255_v11  ;;  %v2094_v18 = vld [vmem:[#allocation5 + $0x48] sm:$0xff] }
 0x78f   : > { %2089 = vst.msk [vmem:[#allocation5 + $0x198] sm:$0xff] %vm1959_vm1, %v2085_v16  ;;  %v2111_v19 = vpack.c.bf16 %v2094_v18, %v2093_v17  ;;  %v2127_v27 = vpop.permute.xlu0 %2126 }
 0x791   : > { %2163 = vmatpush1.bf16.msra.mxu0 %v2111_v19 }
 0x792   : > { %2164 = vmatprep.subr.bf16.mxu0 %v6255_v11  ;;  %v2092_v22 = vld [vmem:[#allocation5 + $0x18] sm:$0xff] }
 0x793   : > { %v2110_v23 = vpack.c.bf16 %v2092_v22, %v2091_v21 }
 0x795   : > { %2165 = vmatpush1.bf16.msra.mxu0 %v2110_v23 }
 0x796   : > { %2178 = vmatprep.subr.bf16.mxu0 %v6255_v11  ;;  %v2108_v28 = vld [vmem:[#allocation5 + $0x198] sm:$0xff] }
 0x797   : > { %v2118_v32 = vpack.c.bf16 %v2108_v28, %v2107_v30 }
 0x799   : > { %2179 = vmatpush2.bf16.msra.mxu0 %v2148_v26 }
 0x79a   : > { %2180 = vmatprep.subr.bf16.mxu0 %v6255_v11 }
 0x79b   : > { %v2132_v49 = vpop.permute.xlu1 %2131 }
 0x79d   : > { %2181 = vmatpush2.bf16.msra.mxu0 %v2118_v32 }
 0x79e   : > { %5773 = vmatprep.subr.mxu0 %v6934_v37 }
 0x7a0   : > { %2183 = vmatmul.mubr.bf16.vlgmr.msra.gmra.mxu0 %v5947_v33 }
 0x7a1   : > { %5774 = vmatpush3.msra.mxu0 %v6934_v37 }
 0x7a2   : > { %5775 = vmatprep.subr.mxu0 %v6940_v34 }
 0x7a3   : > { %5776 = vmatpush3.msra.mxu0 %v6940_v34 }
 0x7a4   : > { %5777 = vmatprep.subr.mxu0 %v6946_v35 }
 0x7a5   : > { %5778 = vmatpush3.msra.mxu0 %v6946_v35 }
 0x7a6   : > { %5779 = vmatprep.subr.mxu0 %v6953_v36 }
 0x7a7   : > { %5780 = vmatpush3.msra.mxu0 %v6953_v36 }
 0x7a8   : > { %5781 = vmatprep.subr.mxu0 %v6960_v38 }
 0x7a9   : > { %5782 = vmatpush3.msra.mxu0 %v6960_v38 }
 0x7aa   : > { %5783 = vmatprep.subr.mxu0 %v6967_v39 }
 0x7ab   : > { %5784 = vmatpush3.msra.mxu0 %v6967_v39 }
 0x7ac   : > { %5785 = vmatprep.subr.mxu0 %v6976_v40 }
 0x7ad   : > { %5786 = vmatpush3.msra.mxu0 %v6976_v40 }
 0x7ae   : > { %5787 = vmatprep.subr.mxu0 %v6983_v41 }
 0x7af   : > { %5788 = vmatpush3.msra.mxu0 %v6983_v41 }
 0x7b0   : > { %5789 = vmatprep.subr.mxu0 %v6990_v44 }
 0x7b1   : > { %5790 = vmatpush3.msra.mxu0 %v6990_v44 }
 0x7b2   : > { %5791 = vmatprep.subr.mxu0 %v6997_v25 }
 0x7b3   : > { %5792 = vmatpush3.msra.mxu0 %v6997_v25 }
 0x860   : > { %v2184_v45 = vpop.f32.mrf.mxu0 }
 0x861   : > { %v2185_v46 = vadd.f32 %v2184_v45, %v2127_v27  ;;  %v2362_v27 = vld [vmem:[%s8026_s13] sm:$0xff]  ;;  %v2364_v45 = vld [vmem:[%s8026_s13 + $0x10] sm:$0xff] }
 0x862   : > { %v2186_v47 = vpop.f32.mrf.mxu0 }
 0x863   : > { %v2198_v48 = vmul.f32 %v6870_v31, %v2185_v46  ;;  %v5948_v46 = vld [vmem:[#allocation13 + $0x4] ss:$8 sps:$4 sm:$0xff]   ;;  %v2363_v47 = vld [vmem:[%s8026_s13 + $0x8] sm:$0xff] }
 0x864   : > { %v2187_v29 = vpop.f32.mrf.mxu0  ;;  %5355 = vmatprep.mubr.msk.bf16.mxu1 %vm2404_vm5, %v5948_v46 }
 0x865   : > { %2200 = vst.msk [vmem:[%s900_s23] sm:$0xff] %vm1959_vm1, %v2198_v48  ;;  %v2188_v50 = vadd.f32 %v2187_v29, %v2132_v49  ;;  %5793 = vmatprep.mubr.msk.f32.mxu0 %vm1959_vm1, %v2198_v48  ;;  %v2202_v51 = vsel %vm1959_vm1, %v2198_v48, 0.0  ;;  %v2210_v52 = vmul.f32 %v2198_v48, %v2198_v48 }
 0x866   : > { %v2189_v53 = vpop.f32.mrf.mxu0  ;;  %2203 = vadd.xlane.f32.xlu0 %v2202_v51 }
 0x867   : > { %v2199_v54 = vmul.f32 %v6870_v31, %v2188_v50  ;;  %v2212_v55 = vsel %vm1959_vm1, %v2210_v52, 0.0 }
 0x869   : > { %2201 = vst.msk [vmem:[%s900_s23 + $0x8] sm:$0xff] %vm1959_vm1, %v2199_v54  ;;  %5794 = vmatmul.mubr.msk.f32.vlgmr.msra.gmra.mxu0 %vm1959_vm1, %v2199_v54  ;;  %v2205_v56 = vsel %vm1959_vm1, %v2199_v54, 0.0  ;;  %v2211_v42 = vmul.f32 %v2199_v54, %v2199_v54  ;;  %s7988_s23 = smov 123  }
 0x86a   : > { %2213 = vadd.xlane.f32.xlu0 %v2212_v55  ;;  %2206 = vadd.xlane.f32.xlu1 %v2205_v56 }
 0x86b   : > { %v2215_v57 = vsel %vm1959_vm1, %v2211_v42, 0.0 }
 0x86e   : > { %2216 = vadd.xlane.f32.xlu0 %v2215_v57 }
 0x8ef   : > { %v2204_v58 = vpop.xlane.xlu0 %2203 }
 0x8f0   : > { %v2208_v59 = vmul.f32 0.015625, %v2204_v58 }
 0x8f2   : > { %v2220_v62 = vmul.f32 %v2208_v59, %v2208_v59  ;;  %v2224_v10 = vsub.f32 %v2198_v48, %v2208_v59  ;;  %v2365_v48 = vld [vmem:[%s8026_s13 + $0x18] sm:$0xff]  ;;  %s8038_s13 = sld [smem:[#allocation36_spill]] }
 0x8f3   : > { %v2214_v60 = vpop.xlane.xlu0 %2213  ;;  %v2207_v61 = vpop.xlane.xlu1 %2206 }
 0x8f4   : > { %v2218_v43 = vmul.f32 0.015625, %v2214_v60  ;;  %v2209_v63 = vmul.f32 0.015625, %v2207_v61 }
 0x8f6   : > { %v2222_v1 = vsub.f32 %v2218_v43, %v2220_v62  ;;  %v2221_v4 = vmul.f32 %v2209_v63, %v2209_v63  ;;  %v2225_v14 = vsub.f32 %v2199_v54, %v2209_v63 }
 0x8f7   : > { %v2217_v2 = vpop.xlane.xlu0 %2216 }
 0x8f8   : > { %v2226_v3 = vmax.f32 %v2222_v1, 0.0  ;;  %v2219_v5 = vmul.f32 0.015625, %v2217_v2 }
 0x8fa   : > { %v2228_v6 = vadd.f32 1e-05, %v2226_v3  ;;  %v2223_v7 = vsub.f32 %v2219_v5, %v2221_v4 }
 0x8fc   : > { %6000 = vrsqrt.f32 %v2228_v6  ;;  %v2227_v8 = vmax.f32 %v2223_v7, 0.0 }
 0x8fe   : > { %v2229_v9 = vadd.f32 1e-05, %v2227_v8 }
 0x900   : > { %6002 = vrsqrt.f32 %v2229_v9 }
 0x909   : > { %v6001_v12 = vpop.eup %6000 }
 0x90a   : > { %v2232_v13 = vmul.f32 %v6001_v12, %v2224_v10 }
 0x90c   : > { %v2234_v15 = vmax.f32 %v2232_v13, 0.0 }
 0x90d   : > { %v6003_v16 = vpop.eup %6002 }
 0x90e   : > { %v2243_v17 = vmul.f32 %v6870_v31, %v2234_v15  ;;  %v2233_v18 = vmul.f32 %v6003_v16, %v2225_v14 }
 0x910   : > { %2247 = vrot.lane.b32.xlu1 %v2243_v17, %s6257_s9  ;;  %v2235_v19 = vmax.f32 %v2233_v18, 0.0 }
 0x912   : > { %v2244_v20 = vmul.f32 %v6870_v31, %v2235_v19 }
 0x914   : > { %2249 = vrot.lane.b32.xlu0 %v2244_v20, %s6257_s9  ;;  %s8023_s9 = smov 118  }
 0x929   : > { %v5795_v21 = vpop.f32.mrf.mxu0 }
 0x92a   : > { %2912 = vst.msk [vmem:[#allocation5 + $0x378] sm:$0xff] %vm2143_vm4, %v5795_v21 }
 0x92b   : > { %v2650_v22 = vpop.f32.mrf.mxu0 }
 0x92c   : > { %2911 = vst.msk [vmem:[#allocation5 + $0x360] sm:$0xff] %vm2143_vm4, %v2650_v22 }
 0x931   : > { %v2950_v24 = vld [vmem:[#allocation5 + $0x378] sm:$0xff] }
 0x933   : > { %v2949_v23 = vld [vmem:[#allocation5 + $0x360] sm:$0xff] }
 0x934   : > { %v2969_v26 = vpack.c.bf16 %v2950_v24, %v2949_v23 }
 0x936   : > { %5796 = vmatprep.subr.bf16.mxu0 %v2969_v26 }
 0x937   : > { %5797 = vmatpush3.bf16.msra.mxu0 %v2969_v26 }
 0x982   : > { %v2248_v28 = vpop.permute.xlu1 %2247 }
 0x983   : > { %2253 = vst.msk [vmem:[#allocation3] sm:$0xff] %vm2011_vm3, %v2248_v28 }
 0x986   : > { %v2250_v30 = vpop.permute.xlu0 %2249 }
 0x987   : > { %2254 = vst.msk [vmem:[#allocation3 + $0x8] sm:$0xff] %vm2011_vm3, %v2250_v30 }
 0x98a   : > { %v2255_v32 = vld [vmem:[#allocation3] sm:$0xff] }
 0x98b   : > { %2307 = vrot.lane.b32.xlu0 %v2255_v32, %s6258_s29  ;;  %2315 = vrot.lane.b32.xlu1 %v2255_v32, %s6259_s5 }
 0x98e   : > { %v2256_v33 = vld [vmem:[#allocation3 + $0x8] sm:$0xff] }
 0x98f   : > { %2299 = vrot.lane.b32.xlu0 %v2255_v32, %s6260_s1  ;;  %2317 = vrot.lane.b32.xlu1 %v2256_v33, %s6259_s5  ;;  %s8025_s5 = smov 97  }
 0x993   : > { %2291 = vrot.lane.b32.xlu0 %v2255_v32, %s6261_s0  ;;  %2309 = vrot.lane.b32.xlu1 %v2256_v33, %s6258_s29  ;;  %s7983_s29 = smov 12  }
 0x997   : > { %2283 = vrot.lane.b32.xlu0 %v2255_v32, %s6250_s6  ;;  %2301 = vrot.lane.b32.xlu1 %v2256_v33, %s6260_s1  ;;  %s8029_s1 = smov 111  }
 0x99b   : > { %2275 = vrot.lane.b32.xlu0 %v2255_v32, %s7981_s10  ;;  %2293 = vrot.lane.b32.xlu1 %v2256_v33, %s6261_s0  ;;  %s7975_s0 = smov 121  }
 0x99f   : > { %2267 = vrot.lane.b32.xlu0 %v2255_v32, %s8023_s9  ;;  %2285 = vrot.lane.b32.xlu1 %v2256_v33, %s6250_s6 }
 0x9a3   : > { %2259 = vrot.lane.b32.xlu0 %v2255_v32, %s8024_s24  ;;  %2277 = vrot.lane.b32.xlu1 %v2256_v33, %s7981_s10 }
 0x9a7   : > { %2323 = vrot.lane.b32.xlu0 %v2255_v32, %s8025_s5  ;;  %2269 = vrot.lane.b32.xlu1 %v2256_v33, %s8023_s9  ;;  %s8034_s9 = smov 122  }
 0x9ab   : > { %2368 = vperm.xlu0 %5942, %v2362_v27   ;;  %2261 = vrot.lane.b32.xlu1 %v2256_v33, %s8024_s24  ;;  %v5951_v27 = vld [vmem:[#allocation13 + $0x14] ss:$8 sps:$4 sm:$0xff]   ;;  %s8035_s24 = smov 116  }
 0x9af   : > { %2378 = vperm.xlu0 %5942, %v2364_v45   ;;  %2325 = vrot.lane.b32.xlu1 %v2256_v33, %s8025_s5  ;;  %v5950_v33 = vld [vmem:[#allocation13] ss:$8 sps:$4 sm:$0xff]   ;;  %v5953_v45 = vld [vmem:[#allocation13 + $0x10] ss:$8 sps:$4 sm:$0xff]   ;;  %s8027_s5 = sld [smem:[#allocation24_spill]] }
 0x9b3   : > { %2373 = vperm.xlu1 %5943, %v2363_v47  }
 0x9b7   : > { %2383 = vperm.xlu1 %5943, %v2365_v48  }
 0x9fd   : > { %v2308_v49 = vpop.permute.xlu0 %2307  ;;  %v2316_v29 = vpop.permute.xlu1 %2315 }
 0x9fe   : > { %2313 = vst.msk [vmem:[#allocation5 + $0x120] sm:$0xff] %vm1959_vm1, %v2308_v49  ;;  %2321 = vst.msk [vmem:[#allocation5 + $0x150] sm:$0xff] %vm1959_vm1, %v2316_v29 }
 0xa01   : > { %v2300_v50 = vpop.permute.xlu0 %2299  ;;  %v2318_v51 = vpop.permute.xlu1 %2317 }
 0xa02   : > { %2305 = vst.msk [vmem:[#allocation5 + $0xf0] sm:$0xff] %vm1959_vm1, %v2300_v50  ;;  %2322 = vst.msk [vmem:[#allocation5 + $0x168] sm:$0xff] %vm1959_vm1, %v2318_v51 }
 0xa05   : > { %v2292_v52 = vpop.permute.xlu0 %2291  ;;  %v2310_v53 = vpop.permute.xlu1 %2309  ;;  %v2345_v56 = vld [vmem:[#allocation5 + $0x150] sm:$0xff]  ;;  %v2343_v60 = vld [vmem:[#allocation5 + $0x120] sm:$0xff] }
 0xa06   : > { %2297 = vst.msk [vmem:[#allocation5 + $0xc0] sm:$0xff] %vm1959_vm1, %v2292_v52  ;;  %2314 = vst.msk [vmem:[#allocation5 + $0x138] sm:$0xff] %vm1959_vm1, %v2310_v53 }
 0xa09   : > { %v2284_v54 = vpop.permute.xlu0 %2283  ;;  %v2302_v55 = vpop.permute.xlu1 %2301  ;;  %v2346_v42 = vld [vmem:[#allocation5 + $0x168] sm:$0xff]  ;;  %v2341_v1 = vld [vmem:[#allocation5 + $0xf0] sm:$0xff] }
 0xa0a   : > { %2289 = vst.msk [vmem:[#allocation5 + $0x90] sm:$0xff] %vm1959_vm1, %v2284_v54  ;;  %2306 = vst.msk [vmem:[#allocation5 + $0x108] sm:$0xff] %vm1959_vm1, %v2302_v55  ;;  %v2356_v57 = vpack.c.bf16 %v2346_v42, %v2345_v56 }
 0xa0c   : > { %2412 = vmatpush1.bf16.msra.mxu1 %v2356_v57 }
 0xa0d   : > { %v2276_v58 = vpop.permute.xlu0 %2275  ;;  %v2294_v59 = vpop.permute.xlu1 %2293  ;;  %2413 = vmatprep.subr.bf16.mxu1 %v6255_v11  ;;  %v2344_v61 = vld [vmem:[#allocation5 + $0x138] sm:$0xff]  ;;  %v2339_v6 = vld [vmem:[#allocation5 + $0xc0] sm:$0xff] }
 0xa0e   : > { %2281 = vst.msk [vmem:[#allocation5 + $0x60] sm:$0xff] %vm1959_vm1, %v2276_v58  ;;  %2298 = vst.msk [vmem:[#allocation5 + $0xd8] sm:$0xff] %vm1959_vm1, %v2294_v59  ;;  %v2355_v62 = vpack.c.bf16 %v2344_v61, %v2343_v60 }
 0xa10   : > { %2414 = vmatpush1.bf16.msra.mxu1 %v2355_v62 }
 0xa11   : > { %v2268_v43 = vpop.permute.xlu0 %2267  ;;  %v2286_v63 = vpop.permute.xlu1 %2285  ;;  %2415 = vmatprep.subr.bf16.mxu1 %v6255_v11  ;;  %v2342_v2 = vld [vmem:[#allocation5 + $0x108] sm:$0xff]  ;;  %v2337_v12 = vld [vmem:[#allocation5 + $0x90] sm:$0xff] }
 0xa12   : > { %2273 = vst.msk [vmem:[#allocation5 + $0x30] sm:$0xff] %vm1959_vm1, %v2268_v43  ;;  %2290 = vst.msk [vmem:[#allocation5 + $0xa8] sm:$0xff] %vm1959_vm1, %v2286_v63  ;;  %v2354_v3 = vpack.c.bf16 %v2342_v2, %v2341_v1 }
 0xa14   : > { %2416 = vmatpush1.bf16.msra.mxu1 %v2354_v3 }
 0xa15   : > { %v2260_v4 = vpop.permute.xlu0 %2259  ;;  %v2278_v5 = vpop.permute.xlu1 %2277  ;;  %2417 = vmatprep.subr.bf16.mxu1 %v6255_v11  ;;  %v2340_v7 = vld [vmem:[#allocation5 + $0xd8] sm:$0xff]  ;;  %v2335_v16 = vld [vmem:[#allocation5 + $0x60] sm:$0xff] }
 0xa16   : > { %2265 = vst.msk [vmem:[#allocation5] sm:$0xff] %vm1959_vm1, %v2260_v4  ;;  %2282 = vst.msk [vmem:[#allocation5 + $0x78] sm:$0xff] %vm1959_vm1, %v2278_v5  ;;  %v2353_v8 = vpack.c.bf16 %v2340_v7, %v2339_v6 }
 0xa18   : > { %2418 = vmatpush1.bf16.msra.mxu1 %v2353_v8 }
 0xa19   : > { %v2324_v9 = vpop.permute.xlu0 %2323  ;;  %v2270_v10 = vpop.permute.xlu1 %2269  ;;  %2419 = vmatprep.subr.bf16.mxu1 %v6255_v11  ;;  %v2338_v13 = vld [vmem:[#allocation5 + $0xa8] sm:$0xff]  ;;  %v2333_v20 = vld [vmem:[#allocation5 + $0x30] sm:$0xff] }
 0xa1a   : > { %2329 = vst.msk [vmem:[#allocation5 + $0x180] sm:$0xff] %vm1959_vm1, %v2324_v9  ;;  %2274 = vst.msk [vmem:[#allocation5 + $0x48] sm:$0xff] %vm1959_vm1, %v2270_v10  ;;  %v2352_v14 = vpack.c.bf16 %v2338_v13, %v2337_v12 }
 0xa1c   : > { %2420 = vmatpush1.bf16.msra.mxu1 %v2352_v14 }
 0xa1d   : > { %v2262_v15 = vpop.permute.xlu1 %2261  ;;  %2421 = vmatprep.subr.bf16.mxu1 %v6255_v11  ;;  %v2336_v17 = vld [vmem:[#allocation5 + $0x78] sm:$0xff]  ;;  %v2331_v23 = vld [vmem:[#allocation5] sm:$0xff] }
 0xa1e   : > { %2266 = vst.msk [vmem:[#allocation5 + $0x18] sm:$0xff] %vm1959_vm1, %v2262_v15  ;;  %v2351_v18 = vpack.c.bf16 %v2336_v17, %v2335_v16 }
 0xa20   : > { %2422 = vmatpush1.bf16.msra.mxu1 %v2351_v18 }
 0xa21   : > { %v2326_v19 = vpop.permute.xlu1 %2325  ;;  %2423 = vmatprep.subr.bf16.mxu1 %v6255_v11  ;;  %v2334_v21 = vld [vmem:[#allocation5 + $0x48] sm:$0xff]  ;;  %v2347_v28 = vld [vmem:[#allocation5 + $0x180] sm:$0xff] }
 0xa22   : > { %2330 = vst.msk [vmem:[#allocation5 + $0x198] sm:$0xff] %vm1959_vm1, %v2326_v19  ;;  %v2350_v22 = vpack.c.bf16 %v2334_v21, %v2333_v20 }
 0xa24   : > { %2424 = vmatpush1.bf16.msra.mxu1 %v2350_v22 }
 0xa25   : > { %2425 = vmatprep.subr.bf16.mxu1 %v6255_v11  ;;  %v2332_v24 = vld [vmem:[#allocation5 + $0x18] sm:$0xff] }
 0xa26   : > { %v2349_v26 = vpack.c.bf16 %v2332_v24, %v2331_v23 }
 0xa28   : > { %2426 = vmatpush1.bf16.msra.mxu1 %v2349_v26 }
 0xa29   : > { %2441 = vmatprep.subr.bf16.mxu1 %v6255_v11  ;;  %v2348_v30 = vld [vmem:[#allocation5 + $0x198] sm:$0xff]  ;;  %v2369_v11 = vpop.permute.xlu0 %2368 }
 0xa2a   : > { %v2357_v32 = vpack.c.bf16 %v2348_v30, %v2347_v28 }
 0xa2c   : > { %2442 = vmatpush2.bf16.msra.mxu1 %v2357_v32 }
 0xa2d   : > { %5747 = vmatprep.subr.mxu1 %v6934_v37  ;;  %v2379_v47 = vpop.permute.xlu0 %2378 }
 0xa2f   : > { %2444 = vmatmul.mubr.bf16.vlgmr.msra.gmra.mxu1 %v5950_v33 }
 0xa30   : > { %5356 = vmatprep.mubr.msk.bf16.mxu1 %vm2404_vm5, %v5951_v27  ;;  %5748 = vmatpush3.msra.mxu1 %v6934_v37 }
 0xa31   : > { %5749 = vmatprep.subr.mxu1 %v6940_v34 }
 0xa32   : > { %5750 = vmatpush3.msra.mxu1 %v6940_v34 }
 0xa33   : > { %5751 = vmatprep.subr.mxu1 %v6946_v35 }
 0xa34   : > { %5752 = vmatpush3.msra.mxu1 %v6946_v35 }
 0xa35   : > { %5753 = vmatprep.subr.mxu1 %v6953_v36 }
 0xa36   : > { %5754 = vmatpush3.msra.mxu1 %v6953_v36 }
 0xa37   : > { %2452 = vmatmul.mubr.bf16.gmra.mxu1 %v5953_v45  ;;  %5755 = vmatprep.subr.mxu1 %v6960_v38 }
 0xa38   : > { %5756 = vmatpush3.msra.mxu1 %v6960_v38  ;;  %v2374_v38 = vpop.permute.xlu1 %2373 }
 0xa39   : > { %5757 = vmatprep.subr.mxu1 %v6967_v39 }
 0xa3a   : > { %5758 = vmatpush3.msra.mxu1 %v6967_v39 }
 0xa3b   : > { %5759 = vmatprep.subr.mxu1 %v6976_v40 }
 0xa3c   : > { %5760 = vmatpush3.msra.mxu1 %v6976_v40  ;;  %v2384_v29 = vpop.permute.xlu1 %2383 }
 0xa3d   : > { %5761 = vmatprep.subr.mxu1 %v6983_v41 }
 0xa3e   : > { %5762 = vmatpush3.msra.mxu1 %v6983_v41 }
 0xa3f   : > { %5763 = vmatprep.subr.mxu1 %v6990_v44 }
 0xa40   : > { %5764 = vmatpush3.msra.mxu1 %v6990_v44 }
 0xa41   : > { %5765 = vmatprep.subr.mxu1 %v6997_v25 }
 0xa42   : > { %5766 = vmatpush3.msra.mxu1 %v6997_v25 }
 0xaef   : > { %v2445_v37 = vpop.f32.mrf.mxu1 }
 0xaf0   : > { %v2446_v34 = vadd.f32 %v2445_v37, %v2369_v11 }
 0xaf1   : > { %v2447_v35 = vpop.f32.mrf.mxu1 }
 0xaf2   : > { %v2467_v36 = vmul.f32 %v6870_v31, %v2446_v34 }
 0xaf3   : > { %v2448_v39 = vpop.f32.mrf.mxu1 }
 0xaf4   : > { %v2449_v40 = vadd.f32 %v2448_v39, %v2374_v38  ;;  %5767 = vmatprep.mubr.msk.f32.mxu1 %vm1959_vm1, %v2467_v36 }
 0xaf5   : > { %v2450_v41 = vpop.f32.mrf.mxu1 }
 0xaf6   : > { %v2468_v46 = vmul.f32 %v6870_v31, %v2449_v40 }
 0xaf7   : > { %v2453_v44 = vpop.f32.mrf.mxu1 }
 0xaf8   : > { %v2454_v48 = vadd.f32 %v2453_v44, %v2379_v47  ;;  %5768 = vmatmul.mubr.msk.f32.vlgmr.msra.gmra.mxu1 %vm1959_vm1, %v2468_v46  ;;  %v7150_v46 = vld [vmem:[%s8027_s5] ss:$0 sm:$0xff] }
 0xaf9   : > { %v2455_v25 = vpop.f32.mrf.mxu1 }
 0xafa   : > { %v2469_v49 = vmul.f32 %v6870_v31, %v2454_v48 }
 0xafb   : > { %v2456_v50 = vpop.f32.mrf.mxu1 }
 0xafc   : > { %v2457_v51 = vadd.f32 %v2456_v50, %v2384_v29  ;;  %5770 = vmatprep.mubr.msk.f32.mxu1 %vm1959_vm1, %v2469_v49 }
 0xafd   : > { %v2458_v52 = vpop.f32.mrf.mxu1 }
 0xafe   : > { %v2470_v53 = vmul.f32 %v6870_v31, %v2457_v51 }
 0xb00   : > { %5771 = vmatmul.mubr.msk.f32.gmra.mxu1 %vm1959_vm1, %v2470_v53 }
 0xbb8   : > { %v7109_v54 = vpop.f32.mrf.mxu1 }
 0xbb9   : > { %v2662_v55 = vsel %vm2143_vm4, %v7109_v54, 0.0  ;;  %v2676_v1 = vmul.f32 %v7109_v54, %v7109_v54 }
 0xbba   : > { %2663 = vadd.xlane.f32.xlu0 %v2662_v55  ;;  %v7113_v56 = vpop.f32.mrf.mxu1 }
 0xbbb   : > { %v2675_v60 = vmul.f32 %v7113_v56, %v7113_v56  ;;  %v2659_v61 = vsel %vm2143_vm4, %v7113_v56, 0.0  ;;  %v2682_v3 = vsel %vm2143_vm4, %v2676_v1, 0.0  ;;  %v5956_v1 = vld [vmem:[%s7943_s14 + $0x4] ss:$12 sps:$4 sm:$0xff]  }
 0xbbc   : > { %3070 = vmatprep.mubr.bf16.mxu1 %v5956_v1 }
 0xbbd   : > { %v2679_v63 = vsel %vm2143_vm4, %v2675_v60, 0.0 }
 0xbc0   : > { %v7115_v42 = vpop.f32.mrf.mxu1 }
 0xbc1   : > { %v2668_v57 = vsel %vm2143_vm4, %v7115_v42, 0.0  ;;  %v2678_v31 = vmul.f32 %v7115_v42, %v7115_v42 }
 0xbc2   : > { %2669 = vadd.xlane.f32.xlu1 %v2668_v57  ;;  %v7119_v58 = vpop.f32.mrf.mxu1 }
 0xbc3   : > { %v2665_v59 = vsel %vm2143_vm4, %v7119_v58, 0.0  ;;  %v2677_v62 = vmul.f32 %v7119_v58, %v7119_v58  ;;  %v2688_v43 = vsel %vm2143_vm4, %v2678_v31, 0.0 }
 0xbc4   : > { %2666 = vadd.xlane.f32.xlu0 %v2665_v59 }
 0xbc5   : > { %v2685_v2 = vsel %vm2143_vm4, %v2677_v62, 0.0 }
 0xbc6   : > { %2660 = vadd.xlane.f32.xlu1 %v2659_v61 }
 0xbc8   : > { %2689 = vadd.xlane.f32.xlu0 %v2688_v43 }
 0xbca   : > { %2680 = vadd.xlane.f32.xlu1 %v2679_v63 }
 0xbcc   : > { %2686 = vadd.xlane.f32.xlu0 %v2685_v2  ;;  %v2980_v2 = vld [vmem:[%s7944_s15 + $0x10] sm:$0xff] }
 0xbd0   : > { %2683 = vadd.xlane.f32.xlu0 %v2682_v3  ;;  %v2978_v3 = vld [vmem:[%s7944_s15] sm:$0xff] }
 0xc43   : > { %v2664_v4 = vpop.xlane.xlu0 %2663 }
 0xc44   : > { %v2672_v19 = vmul.f32 0.0625, %v2664_v4  ;;  %v5960_v4 = vld [vmem:[%s7943_s14 + $0x8] ss:$12 sps:$4 sm:$0xff]  }
 0xc45   : > { %5802 = vmatprep.mubr.msk.bf16.mxu0 %vm909_vm7, %v5960_v4 }
 0xc46   : > { %v2696_v30 = vmul.f32 %v2672_v19, %v2672_v19  ;;  %v2704_v51 = vsub.f32 %v7109_v54, %v2672_v19 }
 0xc4b   : > { %v2670_v5 = vpop.xlane.xlu1 %2669 }
 0xc4c   : > { %v2674_v7 = vmul.f32 0.0625, %v2670_v5  ;;  %v2981_v5 = vld [vmem:[%s7944_s15 + $0x18] sm:$0xff] }
 0xc4d   : > { %v2667_v6 = vpop.xlane.xlu0 %2666 }
 0xc4e   : > { %v2698_v12 = vmul.f32 %v2674_v7, %v2674_v7  ;;  %v2673_v13 = vmul.f32 0.0625, %v2667_v6  ;;  %v2706_v36 = vsub.f32 %v7115_v42, %v2674_v7  ;;  %v2979_v6 = vld [vmem:[%s7944_s15 + $0x8] sm:$0xff] }
 0xc4f   : > { %v2661_v8 = vpop.xlane.xlu1 %2660 }
 0xc50   : > { %v2671_v9 = vmul.f32 0.0625, %v2661_v8  ;;  %v2697_v21 = vmul.f32 %v2673_v13, %v2673_v13  ;;  %v2705_v47 = vsub.f32 %v7119_v58, %v2673_v13 }
 0xc51   : > { %v2690_v10 = vpop.xlane.xlu0 %2689 }
 0xc52   : > { %v2694_v14 = vmul.f32 0.0625, %v2690_v10  ;;  %v2695_v16 = vmul.f32 %v2671_v9, %v2671_v9  ;;  %v2703_v39 = vsub.f32 %v7113_v56, %v2671_v9 }
 0xc53   : > { %v2681_v15 = vpop.xlane.xlu1 %2680 }
 0xc54   : > { %v2702_v17 = vsub.f32 %v2694_v14, %v2698_v12  ;;  %v2691_v18 = vmul.f32 0.0625, %v2681_v15 }
 0xc55   : > { %v2687_v20 = vpop.xlane.xlu0 %2686 }
 0xc56   : > { %v2710_v22 = vmax.f32 %v2702_v17, 0.0  ;;  %v2699_v23 = vsub.f32 %v2691_v18, %v2695_v16  ;;  %v2693_v0 = vmul.f32 0.0625, %v2687_v20 }
 0xc58   : > { %v2714_v24 = vadd.f32 1e-05, %v2710_v22  ;;  %v2707_v26 = vmax.f32 %v2699_v23, 0.0  ;;  %v2701_v28 = vsub.f32 %v2693_v0, %v2697_v21 }
 0xc59   : > { %v2684_v32 = vpop.xlane.xlu0 %2683 }
 0xc5a   : > { %6004 = vrsqrt.f32 %v2714_v24  ;;  %v2711_v33 = vadd.f32 1e-05, %v2707_v26  ;;  %v2709_v27 = vmax.f32 %v2701_v28, 0.0  ;;  %v2692_v45 = vmul.f32 0.0625, %v2684_v32 }
 0xc5c   : > { %6006 = vrsqrt.f32 %v2711_v33  ;;  %v2713_v11 = vadd.f32 1e-05, %v2709_v27  ;;  %v2700_v37 = vsub.f32 %v2692_v45, %v2696_v30 }
 0xc5e   : > { %6008 = vrsqrt.f32 %v2713_v11  ;;  %v2708_v34 = vmax.f32 %v2700_v37, 0.0 }
 0xc60   : > { %v2712_v35 = vadd.f32 1e-05, %v2708_v34 }
 0xc62   : > { %6010 = vrsqrt.f32 %v2712_v35 }
 0xc67   : > { %v6005_v38 = vpop.eup %6004 }
 0xc68   : > { %v2722_v40 = vmul.f32 %v6005_v38, %v2706_v36 }
 0xc69   : > { %v6007_v41 = vpop.eup %6006 }
 0xc6a   : > { %v2726_v44 = vmax.f32 %v2722_v40, 0.0  ;;  %v2719_v48 = vmul.f32 %v6007_v41, %v2703_v39 }
 0xc6b   : > { %v6009_v25 = vpop.eup %6008 }
 0xc6c   : > { %v2737_v49 = vmul.f32 %v7150_v46, %v2726_v44  ;;  %v2723_v29 = vmax.f32 %v2719_v48, 0.0  ;;  %v2721_v50 = vmul.f32 %v6009_v25, %v2705_v47 }
 0xc6e   : > { %2748 = vrot.lane.b32.xlu0 %v2737_v49, %s7983_s29  ;;  %v2734_v52 = vmul.f32 %v7150_v46, %v2723_v29  ;;  %v2725_v53 = vmax.f32 %v2721_v50, 0.0 }
 0xc6f   : > { %v6011_v55 = vpop.eup %6010 }
 0xc70   : > { %2742 = vrot.lane.b32.xlu1 %v2734_v52, %s7983_s29  ;;  %v2720_v56 = vmul.f32 %v6011_v55, %v2704_v51  ;;  %v2736_v42 = vmul.f32 %v7150_v46, %v2725_v53 }
 0xc72   : > { %v2724_v57 = vmax.f32 %v2720_v56, 0.0 }
 0xc74   : > { %2746 = vrot.lane.b32.xlu1 %v2736_v42, %s7983_s29  ;;  %v2735_v58 = vmul.f32 %v7150_v46, %v2724_v57 }
 0xc78   : > { %2744 = vrot.lane.b32.xlu1 %v2735_v58, %s7983_s29  ;;  %s8031_s29 = smov 117  }
 0xce0   : > { %v2749_v54 = vpop.permute.xlu0 %2748 }
 0xce1   : > { %2758 = vst.msk [vmem:[#allocation4 + $0x18] sm:$0xff] %vm2754_vm8, %v2749_v54 }
 0xce2   : > { %v2743_v31 = vpop.permute.xlu1 %2742 }
 0xce3   : > { %2755 = vst.msk [vmem:[#allocation4] sm:$0xff] %vm2754_vm8, %v2743_v31 }
 0xce6   : > { %v2747_v59 = vpop.permute.xlu1 %2746 }
 0xce7   : > { %2757 = vst.msk [vmem:[#allocation4 + $0x10] sm:$0xff] %vm2754_vm8, %v2747_v59 }
 0xce8   : > { %v2762_v63 = vld [vmem:[#allocation4 + $0x18] sm:$0xff] }
 0xcea   : > { %v2745_v60 = vpop.permute.xlu1 %2744  ;;  %v2759_v61 = vld [vmem:[#allocation4] sm:$0xff] }
 0xceb   : > { %2756 = vst.msk [vmem:[#allocation4 + $0x8] sm:$0xff] %vm2754_vm8, %v2745_v60  ;;  %2879 = vrot.lane.b32.xlu0 %v2759_v61, %s8028_s27 }
 0xcee   : > { %v2761_v43 = vld [vmem:[#allocation4 + $0x10] sm:$0xff] }
 0xcef   : > { %2815 = vrot.lane.b32.xlu0 %v2759_v61, %s7981_s10 }
 0xcf2   : > { %v2760_v62 = vld [vmem:[#allocation4 + $0x8] sm:$0xff] }
 0xcf3   : > { %2863 = vrot.lane.b32.xlu0 %v2759_v61, %s8029_s1  ;;  %2881 = vrot.lane.b32.xlu1 %v2760_v62, %s8028_s27 }
 0xcf7   : > { %2799 = vrot.lane.b32.xlu0 %v2759_v61, %s7975_s0  ;;  %2817 = vrot.lane.b32.xlu1 %v2760_v62, %s7981_s10 }
 0xcfb   : > { %2847 = vrot.lane.b32.xlu0 %v2759_v61, %s7973_s3  ;;  %2865 = vrot.lane.b32.xlu1 %v2760_v62, %s8029_s1 }
 0xcff   : > { %2783 = vrot.lane.b32.xlu0 %v2759_v61, %s7979_s30  ;;  %2801 = vrot.lane.b32.xlu1 %v2760_v62, %s7975_s0 }
 0xd03   : > { %2831 = vrot.lane.b32.xlu0 %v2759_v61, %s7977_s7  ;;  %2849 = vrot.lane.b32.xlu1 %v2760_v62, %s7973_s3 }
 0xd07   : > { %2883 = vrot.lane.b32.xlu0 %v2761_v43, %s8028_s27  ;;  %2785 = vrot.lane.b32.xlu1 %v2760_v62, %s7979_s30 }
 0xd0b   : > { %2819 = vrot.lane.b32.xlu0 %v2761_v43, %s7981_s10  ;;  %2833 = vrot.lane.b32.xlu1 %v2760_v62, %s7977_s7 }
 0xd0f   : > { %2867 = vrot.lane.b32.xlu0 %v2761_v43, %s8029_s1  ;;  %2885 = vrot.lane.b32.xlu1 %v2762_v63, %s8028_s27 }
 0xd13   : > { %2803 = vrot.lane.b32.xlu0 %v2761_v43, %s7975_s0  ;;  %2821 = vrot.lane.b32.xlu1 %v2762_v63, %s7981_s10  ;;  %s8030_s10 = smov 12  }
 0xd17   : > { %2851 = vrot.lane.b32.xlu0 %v2761_v43, %s7973_s3  ;;  %2869 = vrot.lane.b32.xlu1 %v2762_v63, %s8029_s1 }
 0xd1b   : > { %2787 = vrot.lane.b32.xlu0 %v2761_v43, %s7979_s30  ;;  %2805 = vrot.lane.b32.xlu1 %v2762_v63, %s7975_s0 }
 0xd1f   : > { %2835 = vrot.lane.b32.xlu0 %v2761_v43, %s7977_s7  ;;  %2853 = vrot.lane.b32.xlu1 %v2762_v63, %s7973_s3 }
 0xd23   : > { %2771 = vrot.lane.b32.xlu0 %v2761_v43, %s7988_s23  ;;  %2789 = vrot.lane.b32.xlu1 %v2762_v63, %s7979_s30  ;;  %s8032_s30 = smov 121  }
 0xd27   : > { %2767 = vrot.lane.b32.xlu0 %v2759_v61, %s7988_s23  ;;  %2837 = vrot.lane.b32.xlu1 %v2762_v63, %s7977_s7  ;;  %s8033_s7 = smov 115  }
 0xd2b   : > { %2899 = vrot.lane.b32.xlu0 %v2761_v43, %s6250_s6  ;;  %2773 = vrot.lane.b32.xlu1 %v2762_v63, %s7988_s23 }
 0xd2f   : > { %2895 = vrot.lane.b32.xlu0 %v2759_v61, %s6250_s6  ;;  %2769 = vrot.lane.b32.xlu1 %v2760_v62, %s7988_s23 }
 0xd33   : > { %2994 = vperm.xlu0 %5942, %v2980_v2   ;;  %2901 = vrot.lane.b32.xlu1 %v2762_v63, %s6250_s6 }
 0xd37   : > { %2984 = vperm.xlu0 %5942, %v2978_v3   ;;  %2897 = vrot.lane.b32.xlu1 %v2760_v62, %s6250_s6 }
 0xd3b   : > { %2999 = vperm.xlu1 %5943, %v2981_v5  }
 0xd3f   : > { %2989 = vperm.xlu1 %5943, %v2979_v6  }
 0xd5d   : > { %v2880_v7 = vpop.permute.xlu0 %2879 }
 0xd5e   : > { %2891 = vst.msk [vmem:[#allocation5 + $0x2a0] sm:$0xff] %vm2143_vm4, %v2880_v7 }
 0xd61   : > { %v2816_v8 = vpop.permute.xlu0 %2815 }
 0xd62   : > { %2827 = vst.msk [vmem:[#allocation5 + $0x120] sm:$0xff] %vm2143_vm4, %v2816_v8 }
 0xd65   : > { %v2882_v9 = vpop.permute.xlu1 %2881  ;;  %v2864_v10 = vpop.permute.xlu0 %2863  ;;  %v2941_v39 = vld [vmem:[#allocation5 + $0x2a0] sm:$0xff] }
 0xd66   : > { %2892 = vst.msk [vmem:[#allocation5 + $0x2b8] sm:$0xff] %vm2143_vm4, %v2882_v9  ;;  %2875 = vst.msk [vmem:[#allocation5 + $0x240] sm:$0xff] %vm2143_vm4, %v2864_v10 }
 0xd69   : > { %v2818_v12 = vpop.permute.xlu1 %2817  ;;  %v2800_v13 = vpop.permute.xlu0 %2799  ;;  %v2925_v48 = vld [vmem:[#allocation5 + $0x120] sm:$0xff] }
 0xd6a   : > { %2828 = vst.msk [vmem:[#allocation5 + $0x138] sm:$0xff] %vm2143_vm4, %v2818_v12  ;;  %2811 = vst.msk [vmem:[#allocation5 + $0xc0] sm:$0xff] %vm2143_vm4, %v2800_v13 }
 0xd6d   : > { %v2866_v14 = vpop.permute.xlu1 %2865  ;;  %v2848_v15 = vpop.permute.xlu0 %2847  ;;  %v2942_v11 = vld [vmem:[#allocation5 + $0x2b8] sm:$0xff]  ;;  %v2937_v57 = vld [vmem:[#allocation5 + $0x240] sm:$0xff] }
 0xd6e   : > { %2876 = vst.msk [vmem:[#allocation5 + $0x258] sm:$0xff] %vm2143_vm4, %v2866_v14  ;;  %2859 = vst.msk [vmem:[#allocation5 + $0x1e0] sm:$0xff] %vm2143_vm4, %v2848_v15  ;;  %v2965_v40 = vpack.c.bf16 %v2942_v11, %v2941_v39 }
 0xd71   : > { %v2802_v16 = vpop.permute.xlu1 %2801  ;;  %v2784_v17 = vpop.permute.xlu0 %2783  ;;  %v2926_v41 = vld [vmem:[#allocation5 + $0x138] sm:$0xff]  ;;  %v2921_v60 = vld [vmem:[#allocation5 + $0xc0] sm:$0xff] }
 0xd72   : > { %2812 = vst.msk [vmem:[#allocation5 + $0xd8] sm:$0xff] %vm2143_vm4, %v2802_v16  ;;  %2795 = vst.msk [vmem:[#allocation5 + $0x60] sm:$0xff] %vm2143_vm4, %v2784_v17  ;;  %v2957_v29 = vpack.c.bf16 %v2926_v41, %v2925_v48 }
 0xd75   : > { %v2850_v18 = vpop.permute.xlu1 %2849  ;;  %v2832_v19 = vpop.permute.xlu0 %2831  ;;  %v2938_v51 = vld [vmem:[#allocation5 + $0x258] sm:$0xff]  ;;  %v2933_v7 = vld [vmem:[#allocation5 + $0x1e0] sm:$0xff] }
 0xd76   : > { %2860 = vst.msk [vmem:[#allocation5 + $0x1f8] sm:$0xff] %vm2143_vm4, %v2850_v18  ;;  %2843 = vst.msk [vmem:[#allocation5 + $0x180] sm:$0xff] %vm2143_vm4, %v2832_v19  ;;  %v2963_v58 = vpack.c.bf16 %v2938_v51, %v2937_v57 }
 0xd79   : > { %v2786_v20 = vpop.permute.xlu1 %2785  ;;  %v2884_v21 = vpop.permute.xlu0 %2883  ;;  %v2922_v54 = vld [vmem:[#allocation5 + $0xd8] sm:$0xff]  ;;  %v2917_v13 = vld [vmem:[#allocation5 + $0x60] sm:$0xff] }
 0xd7a   : > { %2796 = vst.msk [vmem:[#allocation5 + $0x78] sm:$0xff] %vm2143_vm4, %v2786_v20  ;;  %2893 = vst.msk [vmem:[#allocation5 + $0x2d0] sm:$0xff] %vm2143_vm4, %v2884_v21  ;;  %v2955_v43 = vpack.c.bf16 %v2922_v54, %v2921_v60 }
 0xd7d   : > { %v2834_v22 = vpop.permute.xlu1 %2833  ;;  %v2820_v23 = vpop.permute.xlu0 %2819  ;;  %v2934_v1 = vld [vmem:[#allocation5 + $0x1f8] sm:$0xff] }
 0xd7e   : > { %2844 = vst.msk [vmem:[#allocation5 + $0x198] sm:$0xff] %vm2143_vm4, %v2834_v22  ;;  %2829 = vst.msk [vmem:[#allocation5 + $0x150] sm:$0xff] %vm2143_vm4, %v2820_v23  ;;  %v2961_v8 = vpack.c.bf16 %v2934_v1, %v2933_v7  ;;  %v2929_v23 = vld [vmem:[#allocation5 + $0x180] sm:$0xff] }
 0xd81   : > { %v2886_v0 = vpop.permute.xlu1 %2885  ;;  %v2868_v24 = vpop.permute.xlu0 %2867  ;;  %v2943_v33 = vld [vmem:[#allocation5 + $0x2d0] sm:$0xff]  ;;  %v2918_v9 = vld [vmem:[#allocation5 + $0x78] sm:$0xff] }
 0xd82   : > { %2894 = vst.msk [vmem:[#allocation5 + $0x2e8] sm:$0xff] %vm2143_vm4, %v2886_v0  ;;  %2877 = vst.msk [vmem:[#allocation5 + $0x270] sm:$0xff] %vm2143_vm4, %v2868_v24  ;;  %v2953_v16 = vpack.c.bf16 %v2918_v9, %v2917_v13 }
 0xd85   : > { %v2822_v26 = vpop.permute.xlu1 %2821  ;;  %v2804_v28 = vpop.permute.xlu0 %2803  ;;  %v2927_v35 = vld [vmem:[#allocation5 + $0x150] sm:$0xff]  ;;  %v2930_v18 = vld [vmem:[#allocation5 + $0x198] sm:$0xff] }
 0xd86   : > { %2830 = vst.msk [vmem:[#allocation5 + $0x168] sm:$0xff] %vm2143_vm4, %v2822_v26  ;;  %2813 = vst.msk [vmem:[#allocation5 + $0xf0] sm:$0xff] %vm2143_vm4, %v2804_v28  ;;  %v2959_v0 = vpack.c.bf16 %v2930_v18, %v2929_v23 }
 0xd89   : > { %v2870_v30 = vpop.permute.xlu1 %2869  ;;  %v2852_v32 = vpop.permute.xlu0 %2851  ;;  %v2944_v27 = vld [vmem:[#allocation5 + $0x2e8] sm:$0xff]  ;;  %v2939_v25 = vld [vmem:[#allocation5 + $0x270] sm:$0xff] }
 0xd8a   : > { %2878 = vst.msk [vmem:[#allocation5 + $0x288] sm:$0xff] %vm2143_vm4, %v2870_v30  ;;  %2861 = vst.msk [vmem:[#allocation5 + $0x210] sm:$0xff] %vm2143_vm4, %v2852_v32  ;;  %v2966_v45 = vpack.c.bf16 %v2944_v27, %v2943_v33  ;;  %v5954_v32 = vld [vmem:[%s7943_s14] ss:$12 sps:$4 sm:$0xff]   ;;  %v5957_v33 = vld [vmem:[%s7943_s14 + $0x1c] ss:$12 sps:$4 sm:$0xff]  }
 0xd8c   : > { %5536 = vmatprep.subr.bf16.mxu1 %v2966_v45 }
 0xd8d   : > { %v2806_v37 = vpop.permute.xlu1 %2805  ;;  %v2788_v34 = vpop.permute.xlu0 %2787  ;;  %v2928_v36 = vld [vmem:[#allocation5 + $0x168] sm:$0xff]  ;;  %v2923_v55 = vld [vmem:[#allocation5 + $0xf0] sm:$0xff] }
 0xd8e   : > { %2814 = vst.msk [vmem:[#allocation5 + $0x108] sm:$0xff] %vm2143_vm4, %v2806_v37  ;;  %2797 = vst.msk [vmem:[#allocation5 + $0x90] sm:$0xff] %vm2143_vm4, %v2788_v34  ;;  %v2958_v38 = vpack.c.bf16 %v2928_v36, %v2927_v35  ;;  %v5959_v36 = vld [vmem:[%s7943_s14 + $0x18] ss:$12 sps:$4 sm:$0xff]  }
 0xd90   : > { %5537 = vmatpush3.bf16.msra.mxu1 %v2958_v38  ;;  %v5961_v38 = vld [vmem:[%s7943_s14 + $0x20] ss:$12 sps:$4 sm:$0xff]  }
 0xd91   : > { %v2854_v47 = vpop.permute.xlu1 %2853  ;;  %5538 = vmatprep.subr.bf16.mxu1 %v2965_v40  ;;  %v2836_v44 = vpop.permute.xlu0 %2835  ;;  %v2940_v49 = vld [vmem:[#allocation5 + $0x288] sm:$0xff]  ;;  %v2935_v61 = vld [vmem:[#allocation5 + $0x210] sm:$0xff] }
 0xd92   : > { %2862 = vst.msk [vmem:[#allocation5 + $0x228] sm:$0xff] %vm2143_vm4, %v2854_v47  ;;  %2845 = vst.msk [vmem:[#allocation5 + $0x1b0] sm:$0xff] %vm2143_vm4, %v2836_v44  ;;  %v2964_v50 = vpack.c.bf16 %v2940_v49, %v2939_v25 }
 0xd94   : > { %5539 = vmatpush3.bf16.msra.mxu1 %v2957_v29 }
 0xd95   : > { %v2790_v52 = vpop.permute.xlu1 %2789  ;;  %5540 = vmatprep.subr.bf16.mxu1 %v2964_v50  ;;  %v2772_v53 = vpop.permute.xlu0 %2771  ;;  %v2924_v56 = vld [vmem:[#allocation5 + $0x108] sm:$0xff]  ;;  %v2919_v4 = vld [vmem:[#allocation5 + $0x90] sm:$0xff] }
 0xd96   : > { %2798 = vst.msk [vmem:[#allocation5 + $0xa8] sm:$0xff] %vm2143_vm4, %v2790_v52  ;;  %2781 = vst.msk [vmem:[#allocation5 + $0x30] sm:$0xff] %vm2143_vm4, %v2772_v53  ;;  %v2956_v42 = vpack.c.bf16 %v2924_v56, %v2923_v55 }
 0xd98   : > { %5541 = vmatpush3.bf16.msra.mxu1 %v2956_v42 }
 0xd99   : > { %v2838_v31 = vpop.permute.xlu1 %2837  ;;  %5542 = vmatprep.subr.bf16.mxu1 %v2963_v58  ;;  %v2768_v59 = vpop.permute.xlu0 %2767  ;;  %v2936_v62 = vld [vmem:[#allocation5 + $0x228] sm:$0xff]  ;;  %v2931_v14 = vld [vmem:[#allocation5 + $0x1b0] sm:$0xff] }
 0xd9a   : > { %2846 = vst.msk [vmem:[#allocation5 + $0x1c8] sm:$0xff] %vm2143_vm4, %v2838_v31  ;;  %2779 = vst.msk [vmem:[#allocation5] sm:$0xff] %vm2143_vm4, %v2768_v59  ;;  %v2962_v63 = vpack.c.bf16 %v2936_v62, %v2935_v61 }
 0xd9c   : > { %5543 = vmatpush3.bf16.msra.mxu1 %v2955_v43 }
 0xd9d   : > { %v2774_v2 = vpop.permute.xlu1 %2773  ;;  %5544 = vmatprep.subr.bf16.mxu1 %v2962_v63  ;;  %v2900_v3 = vpop.permute.xlu0 %2899  ;;  %v2920_v5 = vld [vmem:[#allocation5 + $0xa8] sm:$0xff]  ;;  %v2915_v20 = vld [vmem:[#allocation5 + $0x30] sm:$0xff] }
 0xd9e   : > { %2782 = vst.msk [vmem:[#allocation5 + $0x48] sm:$0xff] %vm2143_vm4, %v2774_v2  ;;  %2909 = vst.msk [vmem:[#allocation5 + $0x330] sm:$0xff] %vm2143_vm4, %v2900_v3  ;;  %v2954_v6 = vpack.c.bf16 %v2920_v5, %v2919_v4 }
 0xda0   : > { %5545 = vmatpush3.bf16.msra.mxu1 %v2954_v6 }
 0xda1   : > { %v2770_v10 = vpop.permute.xlu1 %2769  ;;  %5546 = vmatprep.subr.bf16.mxu1 %v2961_v8  ;;  %v2896_v12 = vpop.permute.xlu0 %2895  ;;  %v2932_v15 = vld [vmem:[#allocation5 + $0x1c8] sm:$0xff]  ;;  %v2913_v26 = vld [vmem:[#allocation5] sm:$0xff] }
 0xda2   : > { %2780 = vst.msk [vmem:[#allocation5 + $0x18] sm:$0xff] %vm2143_vm4, %v2770_v10  ;;  %2907 = vst.msk [vmem:[#allocation5 + $0x300] sm:$0xff] %vm2143_vm4, %v2896_v12  ;;  %v2960_v17 = vpack.c.bf16 %v2932_v15, %v2931_v14 }
 0xda4   : > { %5547 = vmatpush3.bf16.msra.mxu1 %v2953_v16 }
 0xda5   : > { %v2902_v19 = vpop.permute.xlu1 %2901  ;;  %5548 = vmatprep.subr.bf16.mxu1 %v2960_v17  ;;  %v2916_v21 = vld [vmem:[#allocation5 + $0x48] sm:$0xff]  ;;  %v2947_v27 = vld [vmem:[#allocation5 + $0x330] sm:$0xff] }
 0xda6   : > { %2910 = vst.msk [vmem:[#allocation5 + $0x348] sm:$0xff] %vm2143_vm4, %v2902_v19  ;;  %v2952_v22 = vpack.c.bf16 %v2916_v21, %v2915_v20 }
 0xda8   : > { %5549 = vmatpush3.bf16.msra.mxu1 %v2952_v22 }
 0xda9   : > { %v2898_v24 = vpop.permute.xlu1 %2897  ;;  %5550 = vmatprep.subr.bf16.mxu1 %v2959_v0  ;;  %v2914_v28 = vld [vmem:[#allocation5 + $0x18] sm:$0xff]  ;;  %v2945_v37 = vld [vmem:[#allocation5 + $0x300] sm:$0xff] }
 0xdaa   : > { %2908 = vst.msk [vmem:[#allocation5 + $0x318] sm:$0xff] %vm2143_vm4, %v2898_v24  ;;  %v2951_v30 = vpack.c.bf16 %v2914_v28, %v2913_v26 }
 0xdac   : > { %5551 = vmatpush3.bf16.msra.mxu1 %v2951_v30 }
 0xdad   : > { %v2948_v45 = vld [vmem:[#allocation5 + $0x348] sm:$0xff] }
 0xdae   : > { %v2968_v11 = vpack.c.bf16 %v2948_v45, %v2947_v27  ;;  %v2995_v48 = vpop.permute.xlu0 %2994 }
 0xdaf   : > { %3071 = vmatmul.mubr.bf16.vlgmr.msra.gmra.mxu1 %v5954_v32 }
 0xdb0   : > { %5798 = vmatprep.subr.bf16.mxu0 %v2968_v11  ;;  %3078 = vmatprep.mubr.bf16.mxu1 %v5957_v33 }
 0xdb1   : > { %5799 = vmatpush3.bf16.msra.mxu0 %v2968_v11  ;;  %v2946_v34 = vld [vmem:[#allocation5 + $0x318] sm:$0xff] }
 0xdb2   : > { %v2967_v35 = vpack.c.bf16 %v2946_v34, %v2945_v37  ;;  %v2985_v58 = vpop.permute.xlu0 %2984 }
 0xdb4   : > { %5800 = vmatprep.subr.bf16.mxu0 %v2967_v35 }
 0xdb5   : > { %5801 = vmatpush3.bf16.msra.mxu0 %v2967_v35 }
 0xdb6   : > { %v3000_v49 = vpop.permute.xlu1 %2999 }
 0xdb7   : > { %3079 = vmatmul.mubr.bf16.gmra.mxu1 %v5959_v36 }
 0xdb8   : > { %5803 = vmatmul.mubr.msk.bf16.vlgmr.msra.gmra.mxu0 %vm909_vm7, %v5961_v38 }
 0xdba   : > { %v2990_v59 = vpop.permute.xlu1 %2989 }
 0xe6f   : > { %v5552_v39 = vpop.f32.mrf.mxu1 }
 0xe71   : > { %v5553_v40 = vpop.f32.mrf.mxu1 }
 0xe72   : > { %v5554_v52 = vadd.f32 %v5553_v40, %v5552_v39 }
 0xe73   : > { %v5555_v41 = vpop.f32.mrf.mxu1 }
 0xe74   : > { %v3073_v60 = vadd.f32 %v5554_v52, %v2985_v58 }
 0xe75   : > { %v5556_v47 = vpop.f32.mrf.mxu1 }
 0xe76   : > { %v5557_v55 = vadd.f32 %v5556_v47, %v5555_v41 }
 0xe77   : > { %v5558_v44 = vpop.f32.mrf.mxu1 }
 0xe78   : > { %v5804_v25 = vpop.f32.mrf.mxu0  ;;  %v3076_v63 = vadd.f32 %v5557_v55, %v2990_v59 }
 0xe79   : > { %v5559_v29 = vpop.f32.mrf.mxu1 }
 0xe7a   : > { %v5560_v50 = vadd.f32 %v5559_v29, %v5558_v44  ;;  %v3121_v51 = vpop.f32.mrf.mxu0 }
 0xe7b   : > { %v5561_v53 = vpop.f32.mrf.mxu1  ;;  %v3122_v1 = vadd.f32 %v3121_v51, %v3073_v60 }
 0xe7c   : > { %v3081_v56 = vadd.f32 %v5560_v50, %v2995_v48  ;;  %v5805_v42 = vpop.f32.mrf.mxu0 }
 0xe7d   : > { %v5562_v57 = vpop.f32.mrf.mxu1  ;;  %v7281_v7 = vmul.f32 %v7150_v46, %v3122_v1 }
 0xe7e   : > { %v3130_v54 = vadd.f32 %v5804_v25, %v3081_v56  ;;  %v5563_v31 = vadd.f32 %v5562_v57, %v5561_v53  ;;  %v3124_v61 = vpop.f32.mrf.mxu0 }
 0xe7f   : > { %v3125_v3 = vadd.f32 %v3124_v61, %v3076_v63  ;;  %v3147_v13 = vsel %vm2143_vm4, %v7281_v7, 0.0  ;;  %v3163_v15 = vmul.f32 %v7281_v7, %v7281_v7 }
 0xe80   : > { %v7271_v62 = vmul.f32 %v7150_v46, %v3130_v54  ;;  %v3084_v43 = vadd.f32 %v5563_v31, %v3000_v49 }
 0xe81   : > { %v7284_v8 = vmul.f32 %v7150_v46, %v3125_v3  ;;  %v3167_v17 = vsel %vm2143_vm4, %v3163_v15, 0.0 }
 0xe82   : > { %v3133_v2 = vadd.f32 %v5805_v42, %v3084_v43  ;;  %v3153_v4 = vsel %vm2143_vm4, %v7271_v62, 0.0  ;;  %v3165_v5 = vmul.f32 %v7271_v62, %v7271_v62 }
 0xe83   : > { %3154 = vadd.xlane.f32.xlu0 %v3153_v4  ;;  %v3150_v12 = vsel %vm2143_vm4, %v7284_v8, 0.0  ;;  %v3164_v18 = vmul.f32 %v7284_v8, %v7284_v8 }
 0xe84   : > { %v7278_v6 = vmul.f32 %v7150_v46, %v3133_v2  ;;  %v3173_v10 = vsel %vm2143_vm4, %v3165_v5, 0.0 }
 0xe85   : > { %v3170_v19 = vsel %vm2143_vm4, %v3164_v18, 0.0 }
 0xe86   : > { %v3156_v9 = vsel %vm2143_vm4, %v7278_v6, 0.0  ;;  %v3166_v14 = vmul.f32 %v7278_v6, %v7278_v6 }
 0xe87   : > { %3157 = vadd.xlane.f32.xlu1 %v3156_v9  ;;  %3174 = vadd.xlane.f32.xlu0 %v3173_v10 }
 0xe88   : > { %v3176_v16 = vsel %vm2143_vm4, %v3166_v14, 0.0 }
 0xe8b   : > { %3151 = vadd.xlane.f32.xlu0 %v3150_v12  ;;  %3148 = vadd.xlane.f32.xlu1 %v3147_v13 }
 0xe8f   : > { %3177 = vadd.xlane.f32.xlu0 %v3176_v16  ;;  %3168 = vadd.xlane.f32.xlu1 %v3167_v17 }
 0xe93   : > { %3171 = vadd.xlane.f32.xlu0 %v3170_v19 }
 0xf0c   : > { %v3155_v20 = vpop.xlane.xlu0 %3154 }
 0xf0d   : > { %v3161_v21 = vmul.f32 0.0625, %v3155_v20  ;;  %v5964_v20 = vld [vmem:[%s7945_s16 + $0x4] ss:$12 sps:$4 sm:$0xff]  }
 0xf0e   : > { %3545 = vmatprep.mubr.bf16.mxu0 %v5964_v20 }
 0xf0f   : > { %v3185_v0 = vmul.f32 %v3161_v21, %v3161_v21  ;;  %v3193_v55 = vsub.f32 %v7271_v62, %v3161_v21  ;;  %v3455_v21 = vld [vmem:[%s7946_s17 + $0x10] sm:$0xff] }
 0xf10   : > { %v3158_v22 = vpop.xlane.xlu1 %3157  ;;  %v3175_v23 = vpop.xlane.xlu0 %3174 }
 0xf11   : > { %v3181_v24 = vmul.f32 0.0625, %v3175_v23  ;;  %v3162_v28 = vmul.f32 0.0625, %v3158_v22  ;;  %v5968_v22 = vld [vmem:[%s7945_s16 + $0x8] ss:$12 sps:$4 sm:$0xff]   ;;  %v3453_v23 = vld [vmem:[%s7946_s17] sm:$0xff] }
 0xf12   : > { %5810 = vmatprep.mubr.msk.bf16.mxu1 %vm957_vm6, %v5968_v22 }
 0xf13   : > { %v3189_v26 = vsub.f32 %v3181_v24, %v3185_v0  ;;  %v3186_v11 = vmul.f32 %v3162_v28, %v3162_v28  ;;  %v3194_v59 = vsub.f32 %v7278_v6, %v3162_v28  ;;  %v3456_v0 = vld [vmem:[%s7946_s17 + $0x18] sm:$0xff]  ;;  %v3454_v24 = vld [vmem:[%s7946_s17 + $0x8] sm:$0xff] }
 0xf14   : > { %v3149_v30 = vpop.xlane.xlu1 %3148  ;;  %v3152_v32 = vpop.xlane.xlu0 %3151 }
 0xf15   : > { %v3197_v33 = vmax.f32 %v3189_v26, 0.0  ;;  %v3159_v27 = vmul.f32 0.0625, %v3149_v30  ;;  %v3160_v37 = vmul.f32 0.0625, %v3152_v32 }
 0xf17   : > { %v3201_v45 = vadd.f32 1e-05, %v3197_v33  ;;  %v3183_v36 = vmul.f32 %v3159_v27, %v3159_v27  ;;  %v3184_v44 = vmul.f32 %v3160_v37, %v3160_v37  ;;  %v3191_v54 = vsub.f32 %v7281_v7, %v3159_v27 }
 0xf18   : > { %v3169_v34 = vpop.xlane.xlu1 %3168  ;;  %v3178_v35 = vpop.xlane.xlu0 %3177  ;;  %v3192_v63 = vsub.f32 %v7284_v8, %v3160_v37 }
 0xf19   : > { %6012 = vrsqrt.f32 %v3201_v45  ;;  %v3179_v38 = vmul.f32 0.0625, %v3169_v34  ;;  %v3182_v39 = vmul.f32 0.0625, %v3178_v35 }
 0xf1b   : > { %v3187_v40 = vsub.f32 %v3179_v38, %v3183_v36  ;;  %v3190_v41 = vsub.f32 %v3182_v39, %v3186_v11 }
 0xf1c   : > { %v3172_v47 = vpop.xlane.xlu0 %3171 }
 0xf1d   : > { %v3195_v48 = vmax.f32 %v3187_v40, 0.0  ;;  %v3198_v25 = vmax.f32 %v3190_v41, 0.0  ;;  %v3180_v49 = vmul.f32 0.0625, %v3172_v47 }
 0xf1f   : > { %v3199_v29 = vadd.f32 1e-05, %v3195_v48  ;;  %v3202_v50 = vadd.f32 1e-05, %v3198_v25  ;;  %v3188_v51 = vsub.f32 %v3180_v49, %v3184_v44 }
 0xf21   : > { %6014 = vrsqrt.f32 %v3199_v29  ;;  %v3196_v52 = vmax.f32 %v3188_v51, 0.0 }
 0xf22   : > { %6016 = vrsqrt.f32 %v3202_v50 }
 0xf23   : > { %v3200_v53 = vadd.f32 1e-05, %v3196_v52 }
 0xf25   : > { %6018 = vrsqrt.f32 %v3200_v53 }
 0xf26   : > { %v6013_v56 = vpop.eup %6012 }
 0xf27   : > { %v3209_v42 = vmul.f32 %v6013_v56, %v3193_v55 }
 0xf29   : > { %v3213_v57 = vmax.f32 %v3209_v42, 0.0 }
 0xf2b   : > { %v3217_v58 = vmul.f32 %v7150_v46, %v3213_v57 }
 0xf2d   : > { %3227 = vrot.lane.b32.xlu1 %v3217_v58, %s8030_s10 }
 0xf2e   : > { %v6015_v31 = vpop.eup %6014 }
 0xf2f   : > { %v6017_v60 = vpop.eup %6016  ;;  %v3207_v61 = vmul.f32 %v6015_v31, %v3191_v54 }
 0xf30   : > { %v3210_v43 = vmul.f32 %v6017_v60, %v3194_v59 }
 0xf31   : > { %v3211_v1 = vmax.f32 %v3207_v61, 0.0 }
 0xf32   : > { %v6019_v2 = vpop.eup %6018  ;;  %v3214_v3 = vmax.f32 %v3210_v43, 0.0 }
 0xf33   : > { %v3215_v4 = vmul.f32 %v7150_v46, %v3211_v1  ;;  %v3208_v5 = vmul.f32 %v6019_v2, %v3192_v63 }
 0xf34   : > { %v3218_v9 = vmul.f32 %v7150_v46, %v3214_v3 }
 0xf35   : > { %3223 = vrot.lane.b32.xlu1 %v3215_v4, %s8030_s10  ;;  %v3212_v10 = vmax.f32 %v3208_v5, 0.0 }
 0xf36   : > { %3229 = vrot.lane.b32.xlu0 %v3218_v9, %s8030_s10 }
 0xf37   : > { %v3216_v12 = vmul.f32 %v7150_v46, %v3212_v10 }
 0xf39   : > { %3225 = vrot.lane.b32.xlu1 %v3216_v12, %s8030_s10 }
 0xf9f   : > { %v3228_v13 = vpop.permute.xlu1 %3227 }
 0xfa0   : > { %3237 = vst.msk [vmem:[#allocation4 + $0x10] sm:$0xff] %vm2754_vm8, %v3228_v13 }
 0xfa7   : > { %v3224_v14 = vpop.permute.xlu1 %3223  ;;  %v3241_v46 = vld [vmem:[#allocation4 + $0x10] sm:$0xff] }
 0xfa8   : > { %3235 = vst.msk [vmem:[#allocation4] sm:$0xff] %vm2754_vm8, %v3224_v14  ;;  %v3230_v15 = vpop.permute.xlu0 %3229 }
 0xfa9   : > { %3238 = vst.msk [vmem:[#allocation4 + $0x18] sm:$0xff] %vm2754_vm8, %v3230_v15 }
 0xfab   : > { %v3226_v16 = vpop.permute.xlu1 %3225 }
 0xfac   : > { %3236 = vst.msk [vmem:[#allocation4 + $0x8] sm:$0xff] %vm2754_vm8, %v3226_v16 }
 0xfaf   : > { %v3239_v17 = vld [vmem:[#allocation4] sm:$0xff] }
 0xfb0   : > { %3359 = vrot.lane.b32.xlu0 %v3239_v17, %s8028_s27  ;;  %v3242_v19 = vld [vmem:[#allocation4 + $0x18] sm:$0xff] }
 0xfb3   : > { %v3240_v18 = vld [vmem:[#allocation4 + $0x8] sm:$0xff] }
 0xfb4   : > { %3295 = vrot.lane.b32.xlu0 %v3239_v17, %s8031_s29  ;;  %3361 = vrot.lane.b32.xlu1 %v3240_v18, %s8028_s27 }
 0xfb8   : > { %3343 = vrot.lane.b32.xlu0 %v3239_v17, %s8029_s1  ;;  %3297 = vrot.lane.b32.xlu1 %v3240_v18, %s8031_s29 }
 0xfbc   : > { %3279 = vrot.lane.b32.xlu0 %v3239_v17, %s8032_s30  ;;  %3345 = vrot.lane.b32.xlu1 %v3240_v18, %s8029_s1 }
 0xfc0   : > { %3327 = vrot.lane.b32.xlu0 %v3239_v17, %s8033_s7  ;;  %3281 = vrot.lane.b32.xlu1 %v3240_v18, %s8032_s30 }
 0xfc4   : > { %3263 = vrot.lane.b32.xlu0 %v3239_v17, %s8034_s9  ;;  %3329 = vrot.lane.b32.xlu1 %v3240_v18, %s8033_s7 }
 0xfc8   : > { %3311 = vrot.lane.b32.xlu0 %v3239_v17, %s8035_s24  ;;  %3265 = vrot.lane.b32.xlu1 %v3240_v18, %s8034_s9 }
 0xfcc   : > { %3363 = vrot.lane.b32.xlu0 %v3241_v46, %s8028_s27  ;;  %3313 = vrot.lane.b32.xlu1 %v3240_v18, %s8035_s24 }
 0xfd0   : > { %3299 = vrot.lane.b32.xlu0 %v3241_v46, %s8031_s29  ;;  %3365 = vrot.lane.b32.xlu1 %v3242_v19, %s8028_s27 }
 0xfd4   : > { %3347 = vrot.lane.b32.xlu0 %v3241_v46, %s8029_s1  ;;  %3301 = vrot.lane.b32.xlu1 %v3242_v19, %s8031_s29 }
 0xfd8   : > { %3283 = vrot.lane.b32.xlu0 %v3241_v46, %s8032_s30  ;;  %3349 = vrot.lane.b32.xlu1 %v3242_v19, %s8029_s1 }
 0xfdc   : > { %3331 = vrot.lane.b32.xlu0 %v3241_v46, %s8033_s7  ;;  %3285 = vrot.lane.b32.xlu1 %v3242_v19, %s8032_s30 }
 0xfe0   : > { %3267 = vrot.lane.b32.xlu0 %v3241_v46, %s8034_s9  ;;  %3333 = vrot.lane.b32.xlu1 %v3242_v19, %s8033_s7 }
 0xfe4   : > { %3315 = vrot.lane.b32.xlu0 %v3241_v46, %s8035_s24  ;;  %3269 = vrot.lane.b32.xlu1 %v3242_v19, %s8034_s9 }
 0xfe8   : > { %3251 = vrot.lane.b32.xlu0 %v3241_v46, %s7988_s23  ;;  %3317 = vrot.lane.b32.xlu1 %v3242_v19, %s8035_s24 }
 0xfec   : > { %3247 = vrot.lane.b32.xlu0 %v3239_v17, %s7988_s23  ;;  %3253 = vrot.lane.b32.xlu1 %v3242_v19, %s7988_s23 }
 0xff0   : > { %3379 = vrot.lane.b32.xlu0 %v3241_v46, %s6250_s6  ;;  %3249 = vrot.lane.b32.xlu1 %v3240_v18, %s7988_s23 }
 0xff4   : > { %3375 = vrot.lane.b32.xlu0 %v3239_v17, %s6250_s6  ;;  %3381 = vrot.lane.b32.xlu1 %v3242_v19, %s6250_s6 }
 0xff8   : > { %3469 = vperm.xlu0 %5942, %v3455_v21   ;;  %3377 = vrot.lane.b32.xlu1 %v3240_v18, %s6250_s6 }
 0xffc   : > { %3459 = vperm.xlu0 %5942, %v3453_v23   ;;  %3474 = vperm.xlu1 %5943, %v3456_v0  }
0x1000   : > { %3464 = vperm.xlu1 %5943, %v3454_v24  }
0x1022   : > { %v3360_v26 = vpop.permute.xlu0 %3359 }
0x1023   : > { %3371 = vst.msk [vmem:[#allocation5 + $0x2a0] sm:$0xff] %vm2143_vm4, %v3360_v26 }
0x1026   : > { %v3362_v28 = vpop.permute.xlu1 %3361  ;;  %v3296_v30 = vpop.permute.xlu0 %3295 }
0x1027   : > { %3372 = vst.msk [vmem:[#allocation5 + $0x2b8] sm:$0xff] %vm2143_vm4, %v3362_v28  ;;  %3307 = vst.msk [vmem:[#allocation5 + $0x120] sm:$0xff] %vm2143_vm4, %v3296_v30 }
0x102a   : > { %v3298_v32 = vpop.permute.xlu1 %3297  ;;  %v3344_v33 = vpop.permute.xlu0 %3343  ;;  %v3419_v58 = vld [vmem:[#allocation5 + $0x2a0] sm:$0xff] }
0x102b   : > { %3308 = vst.msk [vmem:[#allocation5 + $0x138] sm:$0xff] %vm2143_vm4, %v3298_v32  ;;  %3355 = vst.msk [vmem:[#allocation5 + $0x240] sm:$0xff] %vm2143_vm4, %v3344_v33 }
0x102e   : > { %v3346_v27 = vpop.permute.xlu1 %3345  ;;  %v3280_v45 = vpop.permute.xlu0 %3279  ;;  %v3420_v52 = vld [vmem:[#allocation5 + $0x2b8] sm:$0xff]  ;;  %v3403_v61 = vld [vmem:[#allocation5 + $0x120] sm:$0xff] }
0x102f   : > { %3356 = vst.msk [vmem:[#allocation5 + $0x258] sm:$0xff] %vm2143_vm4, %v3346_v27  ;;  %3291 = vst.msk [vmem:[#allocation5 + $0xc0] sm:$0xff] %vm2143_vm4, %v3280_v45  ;;  %v3441_v54 = vpack.c.bf16 %v3420_v52, %v3419_v58  ;;  %v5962_v52 = vld [vmem:[%s7945_s16] ss:$12 sps:$4 sm:$0xff]  }
0x1032   : > { %v3282_v11 = vpop.permute.xlu1 %3281  ;;  %v3328_v37 = vpop.permute.xlu0 %3327  ;;  %v3404_v31 = vld [vmem:[#allocation5 + $0x138] sm:$0xff]  ;;  %v3415_v13 = vld [vmem:[#allocation5 + $0x240] sm:$0xff] }
0x1033   : > { %3292 = vst.msk [vmem:[#allocation5 + $0xd8] sm:$0xff] %vm2143_vm4, %v3282_v11  ;;  %3339 = vst.msk [vmem:[#allocation5 + $0x1e0] sm:$0xff] %vm2143_vm4, %v3328_v37  ;;  %v3433_v1 = vpack.c.bf16 %v3404_v31, %v3403_v61  ;;  %v5967_v31 = vld [vmem:[%s7945_s16 + $0x18] ss:$12 sps:$4 sm:$0xff]  }
0x1036   : > { %v3330_v34 = vpop.permute.xlu1 %3329  ;;  %v3264_v35 = vpop.permute.xlu0 %3263  ;;  %v3416_v3 = vld [vmem:[#allocation5 + $0x258] sm:$0xff]  ;;  %v3399_v18 = vld [vmem:[#allocation5 + $0xc0] sm:$0xff] }
0x1037   : > { %3340 = vst.msk [vmem:[#allocation5 + $0x1f8] sm:$0xff] %vm2143_vm4, %v3330_v34  ;;  %3275 = vst.msk [vmem:[#allocation5 + $0x60] sm:$0xff] %vm2143_vm4, %v3264_v35  ;;  %v3439_v14 = vpack.c.bf16 %v3416_v3, %v3415_v13 }
0x103a   : > { %v3266_v36 = vpop.permute.xlu1 %3265  ;;  %v3312_v38 = vpop.permute.xlu0 %3311  ;;  %v3400_v15 = vld [vmem:[#allocation5 + $0xd8] sm:$0xff]  ;;  %v3411_v30 = vld [vmem:[#allocation5 + $0x1e0] sm:$0xff] }
0x103b   : > { %3276 = vst.msk [vmem:[#allocation5 + $0x78] sm:$0xff] %vm2143_vm4, %v3266_v36  ;;  %3323 = vst.msk [vmem:[#allocation5 + $0x180] sm:$0xff] %vm2143_vm4, %v3312_v38  ;;  %v3431_v20 = vpack.c.bf16 %v3400_v15, %v3399_v18 }
0x103e   : > { %v3314_v39 = vpop.permute.xlu1 %3313  ;;  %v3364_v40 = vpop.permute.xlu0 %3363  ;;  %v3412_v22 = vld [vmem:[#allocation5 + $0x1f8] sm:$0xff]  ;;  %v3395_v11 = vld [vmem:[#allocation5 + $0x60] sm:$0xff] }
0x103f   : > { %3324 = vst.msk [vmem:[#allocation5 + $0x198] sm:$0xff] %vm2143_vm4, %v3314_v39  ;;  %3373 = vst.msk [vmem:[#allocation5 + $0x2d0] sm:$0xff] %vm2143_vm4, %v3364_v40  ;;  %v3437_v32 = vpack.c.bf16 %v3412_v22, %v3411_v30  ;;  %v7425_v22 = vld [vmem:[%s8027_s5] ss:$0 sm:$0xff] }
0x1042   : > { %v3366_v41 = vpop.permute.xlu1 %3365  ;;  %v3300_v47 = vpop.permute.xlu0 %3299  ;;  %v3396_v33 = vld [vmem:[#allocation5 + $0x78] sm:$0xff] }
0x1043   : > { %3374 = vst.msk [vmem:[#allocation5 + $0x2e8] sm:$0xff] %vm2143_vm4, %v3366_v41  ;;  %3309 = vst.msk [vmem:[#allocation5 + $0x150] sm:$0xff] %vm2143_vm4, %v3300_v47  ;;  %v3429_v35 = vpack.c.bf16 %v3396_v33, %v3395_v11 }
0x1046   : > { %v3302_v44 = vpop.permute.xlu1 %3301  ;;  %v3348_v48 = vpop.permute.xlu0 %3347  ;;  %v3421_v29 = vld [vmem:[#allocation5 + $0x2d0] sm:$0xff]  ;;  %v3408_v38 = vld [vmem:[#allocation5 + $0x198] sm:$0xff] }
0x1047   : > { %3310 = vst.msk [vmem:[#allocation5 + $0x168] sm:$0xff] %vm2143_vm4, %v3302_v44  ;;  %3357 = vst.msk [vmem:[#allocation5 + $0x270] sm:$0xff] %vm2143_vm4, %v3348_v48  ;;  %v3407_v48 = vld [vmem:[#allocation5 + $0x180] sm:$0xff] }
0x104a   : > { %v3350_v25 = vpop.permute.xlu1 %3349  ;;  %v3284_v49 = vpop.permute.xlu0 %3283  ;;  %v3422_v50 = vld [vmem:[#allocation5 + $0x2e8] sm:$0xff]  ;;  %v3405_v56 = vld [vmem:[#allocation5 + $0x150] sm:$0xff] }
0x104b   : > { %3358 = vst.msk [vmem:[#allocation5 + $0x288] sm:$0xff] %vm2143_vm4, %v3350_v25  ;;  %3293 = vst.msk [vmem:[#allocation5 + $0xf0] sm:$0xff] %vm2143_vm4, %v3284_v49  ;;  %v3442_v51 = vpack.c.bf16 %v3422_v50, %v3421_v29  ;;  %v3435_v25 = vpack.c.bf16 %v3408_v38, %v3407_v48 }
0x104d   : > { %5569 = vmatprep.subr.bf16.mxu0 %v3442_v51 }
0x104e   : > { %v3286_v53 = vpop.permute.xlu1 %3285  ;;  %v3332_v55 = vpop.permute.xlu0 %3331  ;;  %v3406_v42 = vld [vmem:[#allocation5 + $0x168] sm:$0xff]  ;;  %v3417_v43 = vld [vmem:[#allocation5 + $0x270] sm:$0xff] }
0x104f   : > { %3294 = vst.msk [vmem:[#allocation5 + $0x108] sm:$0xff] %vm2143_vm4, %v3286_v53  ;;  %3341 = vst.msk [vmem:[#allocation5 + $0x210] sm:$0xff] %vm2143_vm4, %v3332_v55  ;;  %v3434_v57 = vpack.c.bf16 %v3406_v42, %v3405_v56  ;;  %v5965_v53 = vld [vmem:[%s7945_s16 + $0x1c] ss:$12 sps:$4 sm:$0xff]  }
0x1051   : > { %5570 = vmatpush3.bf16.msra.mxu0 %v3434_v57 }
0x1052   : > { %v3334_v59 = vpop.permute.xlu1 %3333  ;;  %5571 = vmatprep.subr.bf16.mxu0 %v3441_v54  ;;  %v3268_v60 = vpop.permute.xlu0 %3267  ;;  %v3418_v63 = vld [vmem:[#allocation5 + $0x288] sm:$0xff]  ;;  %v3401_v9 = vld [vmem:[#allocation5 + $0xf0] sm:$0xff] }
0x1053   : > { %3342 = vst.msk [vmem:[#allocation5 + $0x228] sm:$0xff] %vm2143_vm4, %v3334_v59  ;;  %3277 = vst.msk [vmem:[#allocation5 + $0x90] sm:$0xff] %vm2143_vm4, %v3268_v60  ;;  %v3440_v2 = vpack.c.bf16 %v3418_v63, %v3417_v43  ;;  %v5969_v59 = vld [vmem:[%s7945_s16 + $0x20] ss:$12 sps:$4 sm:$0xff]  }
0x1055   : > { %5572 = vmatpush3.bf16.msra.mxu0 %v3433_v1 }
0x1056   : > { %v3270_v4 = vpop.permute.xlu1 %3269  ;;  %5573 = vmatprep.subr.bf16.mxu0 %v3440_v2  ;;  %v3316_v5 = vpop.permute.xlu0 %3315  ;;  %v3402_v10 = vld [vmem:[#allocation5 + $0x108] sm:$0xff]  ;;  %v3413_v46 = vld [vmem:[#allocation5 + $0x210] sm:$0xff] }
0x1057   : > { %3278 = vst.msk [vmem:[#allocation5 + $0xa8] sm:$0xff] %vm2143_vm4, %v3270_v4  ;;  %3325 = vst.msk [vmem:[#allocation5 + $0x1b0] sm:$0xff] %vm2143_vm4, %v3316_v5  ;;  %v3432_v12 = vpack.c.bf16 %v3402_v10, %v3401_v9 }
0x1059   : > { %5574 = vmatpush3.bf16.msra.mxu0 %v3432_v12 }
0x105a   : > { %v3318_v16 = vpop.permute.xlu1 %3317  ;;  %5575 = vmatprep.subr.bf16.mxu0 %v3439_v14  ;;  %v3252_v17 = vpop.permute.xlu0 %3251  ;;  %v3414_v19 = vld [vmem:[#allocation5 + $0x228] sm:$0xff]  ;;  %v3397_v24 = vld [vmem:[#allocation5 + $0x90] sm:$0xff] }
0x105b   : > { %3326 = vst.msk [vmem:[#allocation5 + $0x1c8] sm:$0xff] %vm2143_vm4, %v3318_v16  ;;  %3261 = vst.msk [vmem:[#allocation5 + $0x30] sm:$0xff] %vm2143_vm4, %v3252_v17  ;;  %v3438_v21 = vpack.c.bf16 %v3414_v19, %v3413_v46 }
0x105d   : > { %5576 = vmatpush3.bf16.msra.mxu0 %v3431_v20 }
0x105e   : > { %v3254_v23 = vpop.permute.xlu1 %3253  ;;  %5577 = vmatprep.subr.bf16.mxu0 %v3438_v21  ;;  %v3248_v0 = vpop.permute.xlu0 %3247  ;;  %v3398_v26 = vld [vmem:[#allocation5 + $0xa8] sm:$0xff]  ;;  %v3409_v37 = vld [vmem:[#allocation5 + $0x1b0] sm:$0xff] }
0x105f   : > { %3262 = vst.msk [vmem:[#allocation5 + $0x48] sm:$0xff] %vm2143_vm4, %v3254_v23  ;;  %3259 = vst.msk [vmem:[#allocation5] sm:$0xff] %vm2143_vm4, %v3248_v0  ;;  %v3430_v28 = vpack.c.bf16 %v3398_v26, %v3397_v24 }
0x1061   : > { %5578 = vmatpush3.bf16.msra.mxu0 %v3430_v28 }
0x1062   : > { %v3250_v27 = vpop.permute.xlu1 %3249  ;;  %5579 = vmatprep.subr.bf16.mxu0 %v3437_v32  ;;  %v3380_v45 = vpop.permute.xlu0 %3379  ;;  %v3410_v34 = vld [vmem:[#allocation5 + $0x1c8] sm:$0xff]  ;;  %v3393_v41 = vld [vmem:[#allocation5 + $0x30] sm:$0xff] }
0x1063   : > { %3260 = vst.msk [vmem:[#allocation5 + $0x18] sm:$0xff] %vm2143_vm4, %v3250_v27  ;;  %3389 = vst.msk [vmem:[#allocation5 + $0x330] sm:$0xff] %vm2143_vm4, %v3380_v45  ;;  %v3436_v36 = vpack.c.bf16 %v3410_v34, %v3409_v37 }
0x1065   : > { %5580 = vmatpush3.bf16.msra.mxu0 %v3429_v35 }
0x1066   : > { %v3382_v39 = vpop.permute.xlu1 %3381  ;;  %5581 = vmatprep.subr.bf16.mxu0 %v3436_v36  ;;  %v3376_v40 = vpop.permute.xlu0 %3375  ;;  %v3394_v47 = vld [vmem:[#allocation5 + $0x48] sm:$0xff]  ;;  %v3391_v29 = vld [vmem:[#allocation5] sm:$0xff] }
0x1067   : > { %3390 = vst.msk [vmem:[#allocation5 + $0x348] sm:$0xff] %vm2143_vm4, %v3382_v39  ;;  %3387 = vst.msk [vmem:[#allocation5 + $0x300] sm:$0xff] %vm2143_vm4, %v3376_v40  ;;  %v3428_v44 = vpack.c.bf16 %v3394_v47, %v3393_v41 }
0x1069   : > { %5582 = vmatpush3.bf16.msra.mxu0 %v3428_v44 }
0x106a   : > { %v3378_v49 = vpop.permute.xlu1 %3377  ;;  %5583 = vmatprep.subr.bf16.mxu0 %v3435_v25  ;;  %v3392_v50 = vld [vmem:[#allocation5 + $0x18] sm:$0xff]  ;;  %v3425_v55 = vld [vmem:[#allocation5 + $0x330] sm:$0xff] }
0x106b   : > { %3388 = vst.msk [vmem:[#allocation5 + $0x318] sm:$0xff] %vm2143_vm4, %v3378_v49  ;;  %v3427_v51 = vpack.c.bf16 %v3392_v50, %v3391_v29 }
0x106d   : > { %5584 = vmatpush3.bf16.msra.mxu0 %v3427_v51 }
0x106e   : > { %v3426_v56 = vld [vmem:[#allocation5 + $0x348] sm:$0xff]  ;;  %v3423_v57 = vld [vmem:[#allocation5 + $0x300] sm:$0xff] }
0x106f   : > { %v3444_v42 = vpack.c.bf16 %v3426_v56, %v3425_v55 }
0x1070   : > { %3546 = vmatmul.mubr.bf16.vlgmr.msra.gmra.mxu0 %v5962_v52 }
0x1071   : > { %5806 = vmatprep.subr.bf16.mxu1 %v3444_v42  ;;  %3553 = vmatprep.mubr.bf16.mxu0 %v5965_v53 }
0x1072   : > { %5807 = vmatpush3.bf16.msra.mxu1 %v3444_v42  ;;  %v3424_v58 = vld [vmem:[#allocation5 + $0x318] sm:$0xff] }
0x1073   : > { %v3443_v54 = vpack.c.bf16 %v3424_v58, %v3423_v57  ;;  %v3470_v2 = vpop.permute.xlu0 %3469 }
0x1075   : > { %5808 = vmatprep.subr.bf16.mxu1 %v3443_v54 }
0x1076   : > { %5809 = vmatpush3.bf16.msra.mxu1 %v3443_v54 }
0x1077   : > { %v3475_v4 = vpop.permute.xlu1 %3474  ;;  %v3460_v18 = vpop.permute.xlu0 %3459 }
0x1078   : > { %3554 = vmatmul.mubr.bf16.gmra.mxu0 %v5967_v31 }
0x1079   : > { %5811 = vmatmul.mubr.msk.bf16.vlgmr.msra.gmra.mxu1 %vm957_vm6, %v5969_v59 }
0x107b   : > { %v3465_v20 = vpop.permute.xlu1 %3464 }
0x1130   : > { %v5585_v60 = vpop.f32.mrf.mxu0 }
0x1132   : > { %v5586_v61 = vpop.f32.mrf.mxu0 }
0x1133   : > { %v5587_v12 = vadd.f32 %v5586_v61, %v5585_v60 }
0x1134   : > { %v5588_v43 = vpop.f32.mrf.mxu0 }
0x1135   : > { %v3548_v21 = vadd.f32 %v5587_v12, %v3460_v18 }
0x1136   : > { %v5589_v63 = vpop.f32.mrf.mxu0 }
0x1137   : > { %v5590_v14 = vadd.f32 %v5589_v63, %v5588_v43 }
0x1138   : > { %v5591_v1 = vpop.f32.mrf.mxu0 }
0x1139   : > { %v5812_v3 = vpop.f32.mrf.mxu1  ;;  %v3551_v24 = vadd.f32 %v5590_v14, %v3465_v20 }
0x113a   : > { %v5592_v5 = vpop.f32.mrf.mxu0 }
0x113b   : > { %v5593_v9 = vadd.f32 %v5592_v5, %v5591_v1  ;;  %v3596_v10 = vpop.f32.mrf.mxu1 }
0x113c   : > { %v5594_v13 = vpop.f32.mrf.mxu0  ;;  %v3597_v28 = vadd.f32 %v3596_v10, %v3548_v21 }
0x113d   : > { %v3556_v15 = vadd.f32 %v5593_v9, %v3470_v2  ;;  %v5813_v16 = vpop.f32.mrf.mxu1 }
0x113e   : > { %v5595_v17 = vpop.f32.mrf.mxu0  ;;  %v7438_v11 = vmul.f32 %v7425_v22, %v3597_v28 }
0x113f   : > { %v3605_v46 = vadd.f32 %v5812_v3, %v3556_v15  ;;  %v5596_v19 = vadd.f32 %v5595_v17, %v5594_v13  ;;  %v3599_v23 = vpop.f32.mrf.mxu1 }
0x1140   : > { %v3600_v32 = vadd.f32 %v3599_v23, %v3551_v24  ;;  %v3622_v38 = vsel %vm2143_vm4, %v7438_v11, 0.0  ;;  %v3638_v40 = vmul.f32 %v7438_v11, %v7438_v11 }
0x1141   : > { %v3559_v0 = vadd.f32 %v5596_v19, %v3475_v4  ;;  %v7428_v26 = vmul.f32 %v7425_v22, %v3605_v46 }
0x1142   : > { %v7441_v37 = vmul.f32 %v7425_v22, %v3600_v32  ;;  %v3642_v47 = vsel %vm2143_vm4, %v3638_v40, 0.0 }
0x1143   : > { %v3608_v30 = vadd.f32 %v5813_v16, %v3559_v0  ;;  %v3628_v33 = vsel %vm2143_vm4, %v7428_v26, 0.0  ;;  %v3640_v27 = vmul.f32 %v7428_v26, %v7428_v26 }
0x1144   : > { %3629 = vadd.xlane.f32.xlu0 %v3628_v33  ;;  %v3625_v36 = vsel %vm2143_vm4, %v7441_v37, 0.0  ;;  %v3639_v44 = vmul.f32 %v7441_v37, %v7441_v37 }
0x1145   : > { %v7435_v45 = vmul.f32 %v7425_v22, %v3608_v30  ;;  %v3648_v35 = vsel %vm2143_vm4, %v3640_v27, 0.0 }
0x1146   : > { %v3645_v48 = vsel %vm2143_vm4, %v3639_v44, 0.0 }
0x1147   : > { %v3631_v34 = vsel %vm2143_vm4, %v7435_v45, 0.0  ;;  %v3641_v39 = vmul.f32 %v7435_v45, %v7435_v45 }
0x1148   : > { %3632 = vadd.xlane.f32.xlu1 %v3631_v34  ;;  %3649 = vadd.xlane.f32.xlu0 %v3648_v35 }
0x1149   : > { %v3651_v41 = vsel %vm2143_vm4, %v3641_v39, 0.0 }
0x114c   : > { %3626 = vadd.xlane.f32.xlu0 %v3625_v36  ;;  %3623 = vadd.xlane.f32.xlu1 %v3622_v38 }
0x1150   : > { %3652 = vadd.xlane.f32.xlu0 %v3651_v41  ;;  %3643 = vadd.xlane.f32.xlu1 %v3642_v47 }
0x1154   : > { %3646 = vadd.xlane.f32.xlu0 %v3645_v48 }
0x11cd   : > { %v3630_v25 = vpop.xlane.xlu0 %3629 }
0x11ce   : > { %v3636_v49 = vmul.f32 0.0625, %v3630_v25 }
0x11d0   : > { %v3660_v51 = vmul.f32 %v3636_v49, %v3636_v49  ;;  %v3668_v18 = vsub.f32 %v7428_v26, %v3636_v49  ;;  %v5972_v49 = vld [vmem:[%s7947_s18 + $0x4] ss:$12 sps:$4 sm:$0xff]  }
0x11d1   : > { %v3633_v29 = vpop.xlane.xlu1 %3632  ;;  %v3650_v50 = vpop.xlane.xlu0 %3649  ;;  %4020 = vmatprep.mubr.bf16.mxu0 %v5972_v49 }
0x11d2   : > { %v3656_v52 = vmul.f32 0.0625, %v3650_v50  ;;  %v3637_v55 = vmul.f32 0.0625, %v3633_v29  ;;  %v3930_v29 = vld [vmem:[%s7948_s19 + $0x10] sm:$0xff] }
0x11d3   : > { %v5976_v50 = vld [vmem:[%s7947_s18 + $0x8] ss:$12 sps:$4 sm:$0xff]  }
0x11d4   : > { %v3664_v53 = vsub.f32 %v3656_v52, %v3660_v51  ;;  %v3661_v31 = vmul.f32 %v3637_v55, %v3637_v55  ;;  %v3669_v24 = vsub.f32 %v7435_v45, %v3637_v55  ;;  %v3928_v51 = vld [vmem:[%s7948_s19] sm:$0xff]  ;;  %v3931_v52 = vld [vmem:[%s7948_s19 + $0x18] sm:$0xff]  ;;  %5818 = vmatprep.mubr.msk.bf16.mxu1 %vm957_vm6, %v5976_v50 }
0x11d5   : > { %v3624_v56 = vpop.xlane.xlu1 %3623  ;;  %v3627_v42 = vpop.xlane.xlu0 %3626 }
0x11d6   : > { %v3672_v57 = vmax.f32 %v3664_v53, 0.0  ;;  %v3634_v58 = vmul.f32 0.0625, %v3624_v56  ;;  %v3635_v59 = vmul.f32 0.0625, %v3627_v42  ;;  %v3929_v53 = vld [vmem:[%s7948_s19 + $0x8] sm:$0xff] }
0x11d8   : > { %v3676_v54 = vadd.f32 1e-05, %v3672_v57  ;;  %v3658_v43 = vmul.f32 %v3634_v58, %v3634_v58  ;;  %v3659_v5 = vmul.f32 %v3635_v59, %v3635_v59  ;;  %v3666_v23 = vsub.f32 %v7438_v11, %v3634_v58 }
0x11d9   : > { %v3644_v60 = vpop.xlane.xlu1 %3643  ;;  %v3653_v61 = vpop.xlane.xlu0 %3652  ;;  %v3667_v33 = vsub.f32 %v7441_v37, %v3635_v59 }
0x11da   : > { %6020 = vrsqrt.f32 %v3676_v54  ;;  %v3654_v63 = vmul.f32 0.0625, %v3644_v60  ;;  %v3657_v1 = vmul.f32 0.0625, %v3653_v61 }
0x11dc   : > { %v3662_v2 = vsub.f32 %v3654_v63, %v3658_v43  ;;  %v3665_v3 = vsub.f32 %v3657_v1, %v3661_v31 }
0x11dd   : > { %v3647_v4 = vpop.xlane.xlu0 %3646 }
0x11de   : > { %v3670_v9 = vmax.f32 %v3662_v2, 0.0  ;;  %v3673_v10 = vmax.f32 %v3665_v3, 0.0  ;;  %v3655_v12 = vmul.f32 0.0625, %v3647_v4 }
0x11e0   : > { %v3674_v13 = vadd.f32 1e-05, %v3670_v9  ;;  %v3677_v14 = vadd.f32 1e-05, %v3673_v10  ;;  %v3663_v15 = vsub.f32 %v3655_v12, %v3659_v5 }
0x11e2   : > { %6022 = vrsqrt.f32 %v3674_v13  ;;  %v3671_v16 = vmax.f32 %v3663_v15, 0.0 }
0x11e3   : > { %6024 = vrsqrt.f32 %v3677_v14 }
0x11e4   : > { %v3675_v17 = vadd.f32 1e-05, %v3671_v16 }
0x11e6   : > { %6026 = vrsqrt.f32 %v3675_v17 }
0x11e7   : > { %v6021_v46 = vpop.eup %6020 }
0x11e8   : > { %v3684_v19 = vmul.f32 %v6021_v46, %v3668_v18 }
0x11ea   : > { %v3688_v20 = vmax.f32 %v3684_v19, 0.0 }
0x11ec   : > { %v3692_v21 = vmul.f32 %v7425_v22, %v3688_v20 }
0x11ee   : > { %3702 = vrot.lane.b32.xlu1 %v3692_v21, %s8030_s10 }
0x11ef   : > { %v6023_v0 = vpop.eup %6022 }
0x11f0   : > { %v6025_v28 = vpop.eup %6024  ;;  %v3682_v30 = vmul.f32 %v6023_v0, %v3666_v23 }
0x11f1   : > { %v3685_v32 = vmul.f32 %v6025_v28, %v3669_v24 }
0x11f2   : > { %v3686_v27 = vmax.f32 %v3682_v30, 0.0 }
0x11f3   : > { %v6027_v26 = vpop.eup %6026  ;;  %v3689_v34 = vmax.f32 %v3685_v32, 0.0 }
0x11f4   : > { %v3690_v35 = vmul.f32 %v7425_v22, %v3686_v27  ;;  %v3683_v36 = vmul.f32 %v6027_v26, %v3667_v33 }
0x11f5   : > { %v3693_v38 = vmul.f32 %v7425_v22, %v3689_v34 }
0x11f6   : > { %3698 = vrot.lane.b32.xlu1 %v3690_v35, %s8030_s10  ;;  %v3687_v11 = vmax.f32 %v3683_v36, 0.0 }
0x11f7   : > { %3704 = vrot.lane.b32.xlu0 %v3693_v38, %s8030_s10 }
0x11f8   : > { %v3691_v45 = vmul.f32 %v7425_v22, %v3687_v11 }
0x11fa   : > { %3700 = vrot.lane.b32.xlu1 %v3691_v45, %s8030_s10 }
0x1260   : > { %v3703_v39 = vpop.permute.xlu1 %3702 }
0x1261   : > { %3712 = vst.msk [vmem:[#allocation4 + $0x10] sm:$0xff] %vm2754_vm8, %v3703_v39 }
0x1268   : > { %v3699_v37 = vpop.permute.xlu1 %3698  ;;  %v3716_v48 = vld [vmem:[#allocation4 + $0x10] sm:$0xff] }
0x1269   : > { %3710 = vst.msk [vmem:[#allocation4] sm:$0xff] %vm2754_vm8, %v3699_v37  ;;  %v3705_v40 = vpop.permute.xlu0 %3704 }
0x126a   : > { %3713 = vst.msk [vmem:[#allocation4 + $0x18] sm:$0xff] %vm2754_vm8, %v3705_v40 }
0x126c   : > { %v3701_v41 = vpop.permute.xlu1 %3700 }
0x126d   : > { %3711 = vst.msk [vmem:[#allocation4 + $0x8] sm:$0xff] %vm2754_vm8, %v3701_v41 }
0x1270   : > { %v3714_v47 = vld [vmem:[#allocation4] sm:$0xff] }
0x1271   : > { %3834 = vrot.lane.b32.xlu0 %v3714_v47, %s8028_s27  ;;  %v3717_v25 = vld [vmem:[#allocation4 + $0x18] sm:$0xff] }
0x1274   : > { %v3715_v44 = vld [vmem:[#allocation4 + $0x8] sm:$0xff] }
0x1275   : > { %3770 = vrot.lane.b32.xlu0 %v3714_v47, %s8031_s29  ;;  %3836 = vrot.lane.b32.xlu1 %v3715_v44, %s8028_s27 }
0x1279   : > { %3818 = vrot.lane.b32.xlu0 %v3714_v47, %s8029_s1  ;;  %3772 = vrot.lane.b32.xlu1 %v3715_v44, %s8031_s29 }
0x127d   : > { %3754 = vrot.lane.b32.xlu0 %v3714_v47, %s8032_s30  ;;  %3820 = vrot.lane.b32.xlu1 %v3715_v44, %s8029_s1 }
0x1281   : > { %3802 = vrot.lane.b32.xlu0 %v3714_v47, %s8033_s7  ;;  %3756 = vrot.lane.b32.xlu1 %v3715_v44, %s8032_s30 }
0x1285   : > { %3738 = vrot.lane.b32.xlu0 %v3714_v47, %s8034_s9  ;;  %3804 = vrot.lane.b32.xlu1 %v3715_v44, %s8033_s7 }
0x1289   : > { %3786 = vrot.lane.b32.xlu0 %v3714_v47, %s8035_s24  ;;  %3740 = vrot.lane.b32.xlu1 %v3715_v44, %s8034_s9 }
0x128d   : > { %3838 = vrot.lane.b32.xlu0 %v3716_v48, %s8028_s27  ;;  %3788 = vrot.lane.b32.xlu1 %v3715_v44, %s8035_s24 }
0x1291   : > { %3774 = vrot.lane.b32.xlu0 %v3716_v48, %s8031_s29  ;;  %3840 = vrot.lane.b32.xlu1 %v3717_v25, %s8028_s27 }
0x1295   : > { %3822 = vrot.lane.b32.xlu0 %v3716_v48, %s8029_s1  ;;  %3776 = vrot.lane.b32.xlu1 %v3717_v25, %s8031_s29 }
0x1299   : > { %3758 = vrot.lane.b32.xlu0 %v3716_v48, %s8032_s30  ;;  %3824 = vrot.lane.b32.xlu1 %v3717_v25, %s8029_s1 }
0x129d   : > { %3806 = vrot.lane.b32.xlu0 %v3716_v48, %s8033_s7  ;;  %3760 = vrot.lane.b32.xlu1 %v3717_v25, %s8032_s30 }
0x12a1   : > { %3742 = vrot.lane.b32.xlu0 %v3716_v48, %s8034_s9  ;;  %3808 = vrot.lane.b32.xlu1 %v3717_v25, %s8033_s7 }
0x12a5   : > { %3790 = vrot.lane.b32.xlu0 %v3716_v48, %s8035_s24  ;;  %3744 = vrot.lane.b32.xlu1 %v3717_v25, %s8034_s9 }
0x12a9   : > { %3726 = vrot.lane.b32.xlu0 %v3716_v48, %s8036_s8  ;;  %3792 = vrot.lane.b32.xlu1 %v3717_v25, %s8035_s24 }
0x12ad   : > { %3722 = vrot.lane.b32.xlu0 %v3714_v47, %s8036_s8  ;;  %3728 = vrot.lane.b32.xlu1 %v3717_v25, %s8036_s8 }
0x12b1   : > { %3854 = vrot.lane.b32.xlu0 %v3716_v48, %s6250_s6  ;;  %3724 = vrot.lane.b32.xlu1 %v3715_v44, %s8036_s8 }
0x12b5   : > { %3850 = vrot.lane.b32.xlu0 %v3714_v47, %s6250_s6  ;;  %3856 = vrot.lane.b32.xlu1 %v3717_v25, %s6250_s6 }
0x12b9   : > { %3944 = vperm.xlu0 %5942, %v3930_v29   ;;  %3852 = vrot.lane.b32.xlu1 %v3715_v44, %s6250_s6 }
0x12bd   : > { %3934 = vperm.xlu0 %5942, %v3928_v51   ;;  %3949 = vperm.xlu1 %5943, %v3931_v52  }
0x12c1   : > { %3939 = vperm.xlu1 %5943, %v3929_v53  }
0x12e3   : > { %v3835_v55 = vpop.permute.xlu0 %3834 }
0x12e4   : > { %3846 = vst.msk [vmem:[#allocation5 + $0x2a0] sm:$0xff] %vm2143_vm4, %v3835_v55 }
0x12e7   : > { %v3837_v56 = vpop.permute.xlu1 %3836  ;;  %v3771_v42 = vpop.permute.xlu0 %3770 }
0x12e8   : > { %3847 = vst.msk [vmem:[#allocation5 + $0x2b8] sm:$0xff] %vm2143_vm4, %v3837_v56  ;;  %3782 = vst.msk [vmem:[#allocation5 + $0x120] sm:$0xff] %vm2143_vm4, %v3771_v42 }
0x12eb   : > { %v3773_v57 = vpop.permute.xlu1 %3772  ;;  %v3819_v58 = vpop.permute.xlu0 %3818  ;;  %v3894_v23 = vld [vmem:[#allocation5 + $0x2a0] sm:$0xff] }
0x12ec   : > { %3783 = vst.msk [vmem:[#allocation5 + $0x138] sm:$0xff] %vm2143_vm4, %v3773_v57  ;;  %3830 = vst.msk [vmem:[#allocation5 + $0x240] sm:$0xff] %vm2143_vm4, %v3819_v58 }
0x12ef   : > { %v3821_v54 = vpop.permute.xlu1 %3820  ;;  %v3755_v31 = vpop.permute.xlu0 %3754  ;;  %v3895_v17 = vld [vmem:[#allocation5 + $0x2b8] sm:$0xff]  ;;  %v3878_v32 = vld [vmem:[#allocation5 + $0x120] sm:$0xff] }
0x12f0   : > { %3831 = vst.msk [vmem:[#allocation5 + $0x258] sm:$0xff] %vm2143_vm4, %v3821_v54  ;;  %3766 = vst.msk [vmem:[#allocation5 + $0xc0] sm:$0xff] %vm2143_vm4, %v3755_v31  ;;  %v3916_v0 = vpack.c.bf16 %v3895_v17, %v3894_v23 }
0x12f3   : > { %v3757_v59 = vpop.permute.xlu1 %3756  ;;  %v3803_v60 = vpop.permute.xlu0 %3802  ;;  %v3879_v24 = vld [vmem:[#allocation5 + $0x138] sm:$0xff]  ;;  %v3890_v37 = vld [vmem:[#allocation5 + $0x240] sm:$0xff] }
0x12f4   : > { %3767 = vst.msk [vmem:[#allocation5 + $0xd8] sm:$0xff] %vm2143_vm4, %v3757_v59  ;;  %3814 = vst.msk [vmem:[#allocation5 + $0x1e0] sm:$0xff] %vm2143_vm4, %v3803_v60  ;;  %v3908_v26 = vpack.c.bf16 %v3879_v24, %v3878_v32 }
0x12f7   : > { %v3805_v61 = vpop.permute.xlu1 %3804  ;;  %v3739_v43 = vpop.permute.xlu0 %3738  ;;  %v3891_v35 = vld [vmem:[#allocation5 + $0x258] sm:$0xff]  ;;  %v3874_v48 = vld [vmem:[#allocation5 + $0xc0] sm:$0xff] }
0x12f8   : > { %3815 = vst.msk [vmem:[#allocation5 + $0x1f8] sm:$0xff] %vm2143_vm4, %v3805_v61  ;;  %3750 = vst.msk [vmem:[#allocation5 + $0x60] sm:$0xff] %vm2143_vm4, %v3739_v43  ;;  %v3914_v40 = vpack.c.bf16 %v3891_v35, %v3890_v37 }
0x12fb   : > { %v3741_v63 = vpop.permute.xlu1 %3740  ;;  %v3787_v1 = vpop.permute.xlu0 %3786  ;;  %v3875_v41 = vld [vmem:[#allocation5 + $0xd8] sm:$0xff]  ;;  %v3886_v57 = vld [vmem:[#allocation5 + $0x1e0] sm:$0xff] }
0x12fc   : > { %3751 = vst.msk [vmem:[#allocation5 + $0x78] sm:$0xff] %vm2143_vm4, %v3741_v63  ;;  %3798 = vst.msk [vmem:[#allocation5 + $0x180] sm:$0xff] %vm2143_vm4, %v3787_v1  ;;  %v3906_v29 = vpack.c.bf16 %v3875_v41, %v3874_v48 }
0x12ff   : > { %v3789_v2 = vpop.permute.xlu1 %3788  ;;  %v3839_v3 = vpop.permute.xlu0 %3838  ;;  %v3887_v51 = vld [vmem:[#allocation5 + $0x1f8] sm:$0xff]  ;;  %v3870_v60 = vld [vmem:[#allocation5 + $0x60] sm:$0xff] }
0x1300   : > { %3799 = vst.msk [vmem:[#allocation5 + $0x198] sm:$0xff] %vm2143_vm4, %v3789_v2  ;;  %3848 = vst.msk [vmem:[#allocation5 + $0x2d0] sm:$0xff] %vm2143_vm4, %v3839_v3  ;;  %v3912_v58 = vpack.c.bf16 %v3887_v51, %v3886_v57 }
0x1303   : > { %v3841_v4 = vpop.permute.xlu1 %3840  ;;  %v3775_v5 = vpop.permute.xlu0 %3774  ;;  %v3871_v54 = vld [vmem:[#allocation5 + $0x78] sm:$0xff] }
0x1304   : > { %3849 = vst.msk [vmem:[#allocation5 + $0x2e8] sm:$0xff] %vm2143_vm4, %v3841_v4  ;;  %3784 = vst.msk [vmem:[#allocation5 + $0x150] sm:$0xff] %vm2143_vm4, %v3775_v5  ;;  %v3904_v63 = vpack.c.bf16 %v3871_v54, %v3870_v60 }
0x1307   : > { %v3777_v9 = vpop.permute.xlu1 %3776  ;;  %v3823_v10 = vpop.permute.xlu0 %3822  ;;  %v3896_v14 = vld [vmem:[#allocation5 + $0x2d0] sm:$0xff]  ;;  %v3883_v2 = vld [vmem:[#allocation5 + $0x198] sm:$0xff] }
0x1308   : > { %3785 = vst.msk [vmem:[#allocation5 + $0x168] sm:$0xff] %vm2143_vm4, %v3777_v9  ;;  %3832 = vst.msk [vmem:[#allocation5 + $0x270] sm:$0xff] %vm2143_vm4, %v3823_v10 }
0x130b   : > { %v3825_v12 = vpop.permute.xlu1 %3824  ;;  %v3759_v13 = vpop.permute.xlu0 %3758  ;;  %v3897_v15 = vld [vmem:[#allocation5 + $0x2e8] sm:$0xff]  ;;  %v3880_v19 = vld [vmem:[#allocation5 + $0x150] sm:$0xff] }
0x130c   : > { %3833 = vst.msk [vmem:[#allocation5 + $0x288] sm:$0xff] %vm2143_vm4, %v3825_v12  ;;  %3768 = vst.msk [vmem:[#allocation5 + $0xf0] sm:$0xff] %vm2143_vm4, %v3759_v13  ;;  %v3917_v16 = vpack.c.bf16 %v3897_v15, %v3896_v14  ;;  %v3882_v12 = vld [vmem:[#allocation5 + $0x180] sm:$0xff] }
0x130d   : > { %v3910_v13 = vpack.c.bf16 %v3883_v2, %v3882_v12 }
0x130e   : > { %5601 = vmatprep.subr.bf16.mxu0 %v3917_v16 }
0x130f   : > { %v3761_v18 = vpop.permute.xlu1 %3760  ;;  %v3807_v46 = vpop.permute.xlu0 %3806  ;;  %v3881_v20 = vld [vmem:[#allocation5 + $0x168] sm:$0xff]  ;;  %v3892_v33 = vld [vmem:[#allocation5 + $0x270] sm:$0xff] }
0x1310   : > { %3769 = vst.msk [vmem:[#allocation5 + $0x108] sm:$0xff] %vm2143_vm4, %v3761_v18  ;;  %3816 = vst.msk [vmem:[#allocation5 + $0x210] sm:$0xff] %vm2143_vm4, %v3807_v46  ;;  %v3909_v21 = vpack.c.bf16 %v3881_v20, %v3880_v19  ;;  %v5970_v18 = vld [vmem:[%s7947_s18] ss:$12 sps:$4 sm:$0xff]   ;;  %v5973_v46 = vld [vmem:[%s7947_s18 + $0x1c] ss:$12 sps:$4 sm:$0xff]  }
0x1312   : > { %5602 = vmatpush3.bf16.msra.mxu0 %v3909_v21 }
0x1313   : > { %v3809_v28 = vpop.permute.xlu1 %3808  ;;  %5603 = vmatprep.subr.bf16.mxu0 %v3916_v0  ;;  %v3743_v30 = vpop.permute.xlu0 %3742  ;;  %v3893_v27 = vld [vmem:[#allocation5 + $0x288] sm:$0xff]  ;;  %v3876_v11 = vld [vmem:[#allocation5 + $0xf0] sm:$0xff] }
0x1314   : > { %3817 = vst.msk [vmem:[#allocation5 + $0x228] sm:$0xff] %vm2143_vm4, %v3809_v28  ;;  %3752 = vst.msk [vmem:[#allocation5 + $0x90] sm:$0xff] %vm2143_vm4, %v3743_v30  ;;  %v3915_v34 = vpack.c.bf16 %v3893_v27, %v3892_v33  ;;  %v5975_v28 = vld [vmem:[%s7947_s18 + $0x18] ss:$12 sps:$4 sm:$0xff]   ;;  %v5977_v30 = vld [vmem:[%s7947_s18 + $0x20] ss:$12 sps:$4 sm:$0xff]  }
0x1316   : > { %5604 = vmatpush3.bf16.msra.mxu0 %v3908_v26 }
0x1317   : > { %v3745_v36 = vpop.permute.xlu1 %3744  ;;  %5605 = vmatprep.subr.bf16.mxu0 %v3915_v34  ;;  %v3791_v38 = vpop.permute.xlu0 %3790  ;;  %v3877_v45 = vld [vmem:[#allocation5 + $0x108] sm:$0xff]  ;;  %v3888_v25 = vld [vmem:[#allocation5 + $0x210] sm:$0xff] }
0x1318   : > { %3753 = vst.msk [vmem:[#allocation5 + $0xa8] sm:$0xff] %vm2143_vm4, %v3745_v36  ;;  %3800 = vst.msk [vmem:[#allocation5 + $0x1b0] sm:$0xff] %vm2143_vm4, %v3791_v38  ;;  %v3907_v39 = vpack.c.bf16 %v3877_v45, %v3876_v11 }
0x131a   : > { %5606 = vmatpush3.bf16.msra.mxu0 %v3907_v39 }
0x131b   : > { %v3793_v47 = vpop.permute.xlu1 %3792  ;;  %5607 = vmatprep.subr.bf16.mxu0 %v3914_v40  ;;  %v3727_v44 = vpop.permute.xlu0 %3726  ;;  %v3889_v49 = vld [vmem:[#allocation5 + $0x228] sm:$0xff]  ;;  %v3872_v55 = vld [vmem:[#allocation5 + $0x90] sm:$0xff] }
0x131c   : > { %3801 = vst.msk [vmem:[#allocation5 + $0x1c8] sm:$0xff] %vm2143_vm4, %v3793_v47  ;;  %3736 = vst.msk [vmem:[#allocation5 + $0x30] sm:$0xff] %vm2143_vm4, %v3727_v44  ;;  %v3913_v50 = vpack.c.bf16 %v3889_v49, %v3888_v25 }
0x131e   : > { %5608 = vmatpush3.bf16.msra.mxu0 %v3906_v29 }
0x131f   : > { %v3729_v52 = vpop.permute.xlu1 %3728  ;;  %5609 = vmatprep.subr.bf16.mxu0 %v3913_v50  ;;  %v3723_v53 = vpop.permute.xlu0 %3722  ;;  %v3873_v56 = vld [vmem:[#allocation5 + $0xa8] sm:$0xff]  ;;  %v3884_v61 = vld [vmem:[#allocation5 + $0x1b0] sm:$0xff] }
0x1320   : > { %3737 = vst.msk [vmem:[#allocation5 + $0x48] sm:$0xff] %vm2143_vm4, %v3729_v52  ;;  %3734 = vst.msk [vmem:[#allocation5] sm:$0xff] %vm2143_vm4, %v3723_v53  ;;  %v3905_v42 = vpack.c.bf16 %v3873_v56, %v3872_v55 }
0x1322   : > { %5610 = vmatpush3.bf16.msra.mxu0 %v3905_v42 }
0x1323   : > { %v3725_v31 = vpop.permute.xlu1 %3724  ;;  %5611 = vmatprep.subr.bf16.mxu0 %v3912_v58  ;;  %v3855_v59 = vpop.permute.xlu0 %3854  ;;  %v3885_v43 = vld [vmem:[#allocation5 + $0x1c8] sm:$0xff]  ;;  %v3868_v5 = vld [vmem:[#allocation5 + $0x30] sm:$0xff] }
0x1324   : > { %3735 = vst.msk [vmem:[#allocation5 + $0x18] sm:$0xff] %vm2143_vm4, %v3725_v31  ;;  %3864 = vst.msk [vmem:[#allocation5 + $0x330] sm:$0xff] %vm2143_vm4, %v3855_v59  ;;  %v3911_v1 = vpack.c.bf16 %v3885_v43, %v3884_v61 }
0x1326   : > { %5612 = vmatpush3.bf16.msra.mxu0 %v3904_v63 }
0x1327   : > { %v3857_v3 = vpop.permute.xlu1 %3856  ;;  %5613 = vmatprep.subr.bf16.mxu0 %v3911_v1  ;;  %v3851_v4 = vpop.permute.xlu0 %3850  ;;  %v3869_v9 = vld [vmem:[#allocation5 + $0x48] sm:$0xff]  ;;  %v3866_v15 = vld [vmem:[#allocation5] sm:$0xff] }
0x1328   : > { %3865 = vst.msk [vmem:[#allocation5 + $0x348] sm:$0xff] %vm2143_vm4, %v3857_v3  ;;  %3862 = vst.msk [vmem:[#allocation5 + $0x300] sm:$0xff] %vm2143_vm4, %v3851_v4  ;;  %v3903_v10 = vpack.c.bf16 %v3869_v9, %v3868_v5 }
0x132a   : > { %5614 = vmatpush3.bf16.msra.mxu0 %v3903_v10 }
0x132b   : > { %v3853_v14 = vpop.permute.xlu1 %3852  ;;  %5615 = vmatprep.subr.bf16.mxu0 %v3910_v13  ;;  %v3867_v16 = vld [vmem:[#allocation5 + $0x18] sm:$0xff]  ;;  %v3900_v19 = vld [vmem:[#allocation5 + $0x330] sm:$0xff] }
0x132c   : > { %3863 = vst.msk [vmem:[#allocation5 + $0x318] sm:$0xff] %vm2143_vm4, %v3853_v14  ;;  %v3902_v17 = vpack.c.bf16 %v3867_v16, %v3866_v15 }
0x132e   : > { %5616 = vmatpush3.bf16.msra.mxu0 %v3902_v17 }
0x132f   : > { %v3901_v20 = vld [vmem:[#allocation5 + $0x348] sm:$0xff]  ;;  %v3898_v23 = vld [vmem:[#allocation5 + $0x300] sm:$0xff] }
0x1330   : > { %v3919_v21 = vpack.c.bf16 %v3901_v20, %v3900_v19 }
0x1331   : > { %4021 = vmatmul.mubr.bf16.vlgmr.msra.gmra.mxu0 %v5970_v18 }
0x1332   : > { %5814 = vmatprep.subr.bf16.mxu1 %v3919_v21  ;;  %4028 = vmatprep.mubr.bf16.mxu0 %v5973_v46 }
0x1333   : > { %5815 = vmatpush3.bf16.msra.mxu1 %v3919_v21  ;;  %v3899_v0 = vld [vmem:[#allocation5 + $0x318] sm:$0xff] }
0x1334   : > { %v3918_v24 = vpack.c.bf16 %v3899_v0, %v3898_v23  ;;  %v3945_v34 = vpop.permute.xlu0 %3944 }
0x1336   : > { %5816 = vmatprep.subr.bf16.mxu1 %v3918_v24 }
0x1337   : > { %5817 = vmatpush3.bf16.msra.mxu1 %v3918_v24 }
0x1338   : > { %v3950_v35 = vpop.permute.xlu1 %3949  ;;  %v3935_v47 = vpop.permute.xlu0 %3934 }
0x1339   : > { %4029 = vmatmul.mubr.bf16.gmra.mxu0 %v5975_v28 }
0x133a   : > { %5819 = vmatmul.mubr.msk.bf16.vlgmr.msra.gmra.mxu1 %vm957_vm6, %v5977_v30 }
0x133c   : > { %v3940_v25 = vpop.permute.xlu1 %3939 }
0x13f1   : > { %v5617_v32 = vpop.f32.mrf.mxu0 }
0x13f3   : > { %v5618_v33 = vpop.f32.mrf.mxu0 }
0x13f4   : > { %v5619_v11 = vadd.f32 %v5618_v33, %v5617_v32 }
0x13f5   : > { %v5620_v27 = vpop.f32.mrf.mxu0 }
0x13f6   : > { %v4023_v49 = vadd.f32 %v5619_v11, %v3935_v47 }
0x13f7   : > { %v5621_v26 = vpop.f32.mrf.mxu0 }
0x13f8   : > { %v5622_v39 = vadd.f32 %v5621_v26, %v5620_v27 }
0x13f9   : > { %v5623_v36 = vpop.f32.mrf.mxu0 }
0x13fa   : > { %v5820_v38 = vpop.f32.mrf.mxu1  ;;  %v4026_v52 = vadd.f32 %v5622_v39, %v3940_v25 }
0x13fb   : > { %v5624_v45 = vpop.f32.mrf.mxu0 }
0x13fc   : > { %v5625_v37 = vadd.f32 %v5624_v45, %v5623_v36  ;;  %v4071_v40 = vpop.f32.mrf.mxu1 }
0x13fd   : > { %v5626_v41 = vpop.f32.mrf.mxu0  ;;  %v4072_v55 = vadd.f32 %v4071_v40, %v4023_v49 }
0x13fe   : > { %v4031_v44 = vadd.f32 %v5625_v37, %v3945_v34  ;;  %v5821_v48 = vpop.f32.mrf.mxu1 }
0x13ff   : > { %v5627_v29 = vpop.f32.mrf.mxu0  ;;  %v4093_v31 = vmul.f32 %v7425_v22, %v4072_v55 }
0x1400   : > { %v4080_v50 = vadd.f32 %v5820_v38, %v4031_v44  ;;  %v5628_v51 = vadd.f32 %v5627_v29, %v5626_v41  ;;  %v4074_v53 = vpop.f32.mrf.mxu1 }
0x1401   : > { %v4075_v57 = vadd.f32 %v4074_v53, %v4026_v52 }
0x1402   : > { %v4095_v56 = vmul.f32 %v7425_v22, %v4080_v50  ;;  %v4034_v42 = vadd.f32 %v5628_v51, %v3950_v35 }
0x1403   : > { %v4094_v60 = vmul.f32 %v7425_v22, %v4075_v57 }
0x1404   : > { %v7581_v58 = vadd.f32 %v4095_v56, %v7271_v62  ;;  %v4083_v54 = vadd.f32 %v5821_v48, %v4034_v42  ;;  %v7594_v62 = vadd.f32 %v4093_v31, %v7281_v7 }
0x1405   : > { %v7597_v1 = vadd.f32 %v4094_v60, %v7284_v8 }
0x1406   : > { %v4096_v59 = vmul.f32 %v7425_v22, %v4083_v54  ;;  %v4107_v61 = vsel %vm2143_vm4, %v7581_v58, 0.0  ;;  %v4119_v43 = vmul.f32 %v7581_v58, %v7581_v58  ;;  %v4117_v8 = vmul.f32 %v7594_v62, %v7594_v62 }
0x1407   : > { %4108 = vadd.xlane.f32.xlu0 %v4107_v61  ;;  %v4104_v4 = vsel %vm2143_vm4, %v7597_v1, 0.0  ;;  %v4118_v10 = vmul.f32 %v7597_v1, %v7597_v1 }
0x1408   : > { %v7591_v63 = vadd.f32 %v4096_v59, %v7278_v6  ;;  %v4127_v3 = vsel %vm2143_vm4, %v4119_v43, 0.0  ;;  %v4101_v6 = vsel %vm2143_vm4, %v7594_v62, 0.0  ;;  %v4121_v9 = vsel %vm2143_vm4, %v4117_v8, 0.0 }
0x1409   : > { %v4124_v12 = vsel %vm2143_vm4, %v4118_v10, 0.0 }
0x140a   : > { %v4110_v2 = vsel %vm2143_vm4, %v7591_v63, 0.0  ;;  %v4120_v7 = vmul.f32 %v7591_v63, %v7591_v63 }
0x140b   : > { %4111 = vadd.xlane.f32.xlu1 %v4110_v2  ;;  %4128 = vadd.xlane.f32.xlu0 %v4127_v3 }
0x140c   : > { %v4130_v5 = vsel %vm2143_vm4, %v4120_v7, 0.0 }
0x140f   : > { %4105 = vadd.xlane.f32.xlu0 %v4104_v4  ;;  %4102 = vadd.xlane.f32.xlu1 %v4101_v6 }
0x1413   : > { %4131 = vadd.xlane.f32.xlu0 %v4130_v5  ;;  %4122 = vadd.xlane.f32.xlu1 %v4121_v9 }
0x1417   : > { %4125 = vadd.xlane.f32.xlu0 %v4124_v12 }
0x1490   : > { %v4109_v13 = vpop.xlane.xlu0 %4108 }
0x1491   : > { %v4115_v14 = vmul.f32 0.0625, %v4109_v13  ;;  %v5980_v13 = vld [vmem:[%s7949_s20 + $0x4] ss:$12 sps:$4 sm:$0xff]  }
0x1492   : > { %4499 = vmatprep.mubr.bf16.mxu1 %v5980_v13 }
0x1493   : > { %v4139_v17 = vmul.f32 %v4115_v14, %v4115_v14  ;;  %v4147_v25 = vsub.f32 %v7581_v58, %v4115_v14  ;;  %v4409_v14 = vld [vmem:[%s7950_s21 + $0x10] sm:$0xff] }
0x1494   : > { %v4112_v15 = vpop.xlane.xlu1 %4111  ;;  %v4129_v16 = vpop.xlane.xlu0 %4128 }
0x1495   : > { %v4135_v18 = vmul.f32 0.0625, %v4129_v16  ;;  %v4116_v19 = vmul.f32 0.0625, %v4112_v15  ;;  %v5984_v15 = vld [vmem:[%s7949_s20 + $0x8] ss:$12 sps:$4 sm:$0xff]   ;;  %v4407_v16 = vld [vmem:[%s7950_s21] sm:$0xff] }
0x1496   : > { %5826 = vmatprep.mubr.msk.bf16.mxu0 %vm957_vm6, %v5984_v15 }
0x1497   : > { %v4143_v46 = vsub.f32 %v4135_v18, %v4139_v17  ;;  %v4140_v28 = vmul.f32 %v4116_v19, %v4116_v19  ;;  %v4148_v55 = vsub.f32 %v7591_v63, %v4116_v19  ;;  %v4410_v17 = vld [vmem:[%s7950_s21 + $0x18] sm:$0xff]  ;;  %v4408_v18 = vld [vmem:[%s7950_s21 + $0x8] sm:$0xff] }
0x1498   : > { %v4103_v20 = vpop.xlane.xlu1 %4102  ;;  %v4106_v21 = vpop.xlane.xlu0 %4105 }
0x1499   : > { %v4151_v23 = vmax.f32 %v4143_v46, 0.0  ;;  %v4113_v0 = vmul.f32 0.0625, %v4103_v20  ;;  %v4114_v30 = vmul.f32 0.0625, %v4106_v21 }
0x149b   : > { %v4155_v24 = vadd.f32 1e-05, %v4151_v23  ;;  %v4137_v27 = vmul.f32 %v4113_v0, %v4113_v0  ;;  %v4138_v11 = vmul.f32 %v4114_v30, %v4114_v30  ;;  %v4145_v52 = vsub.f32 %v7594_v62, %v4113_v0 }
0x149c   : > { %v4123_v32 = vpop.xlane.xlu1 %4122  ;;  %v4132_v33 = vpop.xlane.xlu0 %4131  ;;  %v4146_v54 = vsub.f32 %v7597_v1, %v4114_v30 }
0x149d   : > { %6028 = vrsqrt.f32 %v4155_v24  ;;  %v4133_v26 = vmul.f32 0.0625, %v4123_v32  ;;  %v4136_v34 = vmul.f32 0.0625, %v4132_v33 }
0x149f   : > { %v4141_v35 = vsub.f32 %v4133_v26, %v4137_v27  ;;  %v4144_v36 = vsub.f32 %v4136_v34, %v4140_v28 }
0x14a0   : > { %v4126_v38 = vpop.xlane.xlu0 %4125 }
0x14a1   : > { %v4149_v45 = vmax.f32 %v4141_v35, 0.0  ;;  %v4152_v39 = vmax.f32 %v4144_v36, 0.0  ;;  %v4134_v37 = vmul.f32 0.0625, %v4126_v38 }
0x14a3   : > { %v4153_v40 = vadd.f32 1e-05, %v4149_v45  ;;  %v4156_v41 = vadd.f32 1e-05, %v4152_v39  ;;  %v4142_v47 = vsub.f32 %v4134_v37, %v4138_v11 }
0x14a5   : > { %6030 = vrsqrt.f32 %v4153_v40  ;;  %v4150_v44 = vmax.f32 %v4142_v47, 0.0 }
0x14a6   : > { %6032 = vrsqrt.f32 %v4156_v41 }
0x14a7   : > { %v4154_v48 = vadd.f32 1e-05, %v4150_v44 }
0x14a9   : > { %6034 = vrsqrt.f32 %v4154_v48 }
0x14aa   : > { %v6029_v49 = vpop.eup %6028 }
0x14ab   : > { %v4163_v29 = vmul.f32 %v6029_v49, %v4147_v25 }
0x14ad   : > { %v4167_v50 = vmax.f32 %v4163_v29, 0.0 }
0x14af   : > { %v4171_v51 = vmul.f32 %v7425_v22, %v4167_v50 }
0x14b1   : > { %4181 = vrot.lane.b32.xlu1 %v4171_v51, %s8030_s10 }
0x14b2   : > { %v6031_v53 = vpop.eup %6030 }
0x14b3   : > { %v6033_v56 = vpop.eup %6032  ;;  %v4161_v42 = vmul.f32 %v6031_v53, %v4145_v52 }
0x14b4   : > { %v4164_v57 = vmul.f32 %v6033_v56, %v4148_v55 }
0x14b5   : > { %v4165_v31 = vmax.f32 %v4161_v42, 0.0 }
0x14b6   : > { %v6035_v59 = vpop.eup %6034  ;;  %v4168_v60 = vmax.f32 %v4164_v57, 0.0 }
0x14b7   : > { %v4169_v61 = vmul.f32 %v7425_v22, %v4165_v31  ;;  %v4162_v43 = vmul.f32 %v6035_v59, %v4146_v54 }
0x14b8   : > { %v4172_v2 = vmul.f32 %v7425_v22, %v4168_v60 }
0x14b9   : > { %4177 = vrot.lane.b32.xlu1 %v4169_v61, %s8030_s10  ;;  %v4166_v3 = vmax.f32 %v4162_v43, 0.0 }
0x14ba   : > { %4183 = vrot.lane.b32.xlu0 %v4172_v2, %s8030_s10 }
0x14bb   : > { %v4170_v4 = vmul.f32 %v7425_v22, %v4166_v3 }
0x14bd   : > { %4179 = vrot.lane.b32.xlu1 %v4170_v4, %s8030_s10 }
0x1523   : > { %v4182_v6 = vpop.permute.xlu1 %4181 }
0x1524   : > { %4191 = vst.msk [vmem:[#allocation4 + $0x10] sm:$0xff] %vm2754_vm8, %v4182_v6 }
0x152b   : > { %v4178_v7 = vpop.permute.xlu1 %4177  ;;  %v4195_v22 = vld [vmem:[#allocation4 + $0x10] sm:$0xff] }
0x152c   : > { %4189 = vst.msk [vmem:[#allocation4] sm:$0xff] %vm2754_vm8, %v4178_v7  ;;  %v4184_v8 = vpop.permute.xlu0 %4183 }
0x152d   : > { %4192 = vst.msk [vmem:[#allocation4 + $0x18] sm:$0xff] %vm2754_vm8, %v4184_v8 }
0x152f   : > { %v4180_v5 = vpop.permute.xlu1 %4179 }
0x1530   : > { %4190 = vst.msk [vmem:[#allocation4 + $0x8] sm:$0xff] %vm2754_vm8, %v4180_v5 }
0x1533   : > { %v4193_v9 = vld [vmem:[#allocation4] sm:$0xff] }
0x1534   : > { %4313 = vrot.lane.b32.xlu0 %v4193_v9, %s8028_s27  ;;  %v4196_v12 = vld [vmem:[#allocation4 + $0x18] sm:$0xff] }
0x1537   : > { %v4194_v10 = vld [vmem:[#allocation4 + $0x8] sm:$0xff] }
0x1538   : > { %4249 = vrot.lane.b32.xlu0 %v4193_v9, %s8031_s29  ;;  %4315 = vrot.lane.b32.xlu1 %v4194_v10, %s8028_s27 }
0x153c   : > { %4297 = vrot.lane.b32.xlu0 %v4193_v9, %s8029_s1  ;;  %4251 = vrot.lane.b32.xlu1 %v4194_v10, %s8031_s29 }
0x1540   : > { %4233 = vrot.lane.b32.xlu0 %v4193_v9, %s8032_s30  ;;  %4299 = vrot.lane.b32.xlu1 %v4194_v10, %s8029_s1 }
0x1544   : > { %4281 = vrot.lane.b32.xlu0 %v4193_v9, %s8033_s7  ;;  %4235 = vrot.lane.b32.xlu1 %v4194_v10, %s8032_s30 }
0x1548   : > { %4217 = vrot.lane.b32.xlu0 %v4193_v9, %s8034_s9  ;;  %4283 = vrot.lane.b32.xlu1 %v4194_v10, %s8033_s7 }
0x154c   : > { %4265 = vrot.lane.b32.xlu0 %v4193_v9, %s8035_s24  ;;  %4219 = vrot.lane.b32.xlu1 %v4194_v10, %s8034_s9 }
0x1550   : > { %4317 = vrot.lane.b32.xlu0 %v4195_v22, %s8028_s27  ;;  %4267 = vrot.lane.b32.xlu1 %v4194_v10, %s8035_s24 }
0x1554   : > { %4253 = vrot.lane.b32.xlu0 %v4195_v22, %s8031_s29  ;;  %4319 = vrot.lane.b32.xlu1 %v4196_v12, %s8028_s27 }
0x1558   : > { %4301 = vrot.lane.b32.xlu0 %v4195_v22, %s8029_s1  ;;  %4255 = vrot.lane.b32.xlu1 %v4196_v12, %s8031_s29 }
0x155c   : > { %4237 = vrot.lane.b32.xlu0 %v4195_v22, %s8032_s30  ;;  %4303 = vrot.lane.b32.xlu1 %v4196_v12, %s8029_s1 }
0x1560   : > { %4285 = vrot.lane.b32.xlu0 %v4195_v22, %s8033_s7  ;;  %4239 = vrot.lane.b32.xlu1 %v4196_v12, %s8032_s30 }
0x1564   : > { %4221 = vrot.lane.b32.xlu0 %v4195_v22, %s8034_s9  ;;  %4287 = vrot.lane.b32.xlu1 %v4196_v12, %s8033_s7 }
0x1568   : > { %4269 = vrot.lane.b32.xlu0 %v4195_v22, %s8035_s24  ;;  %4223 = vrot.lane.b32.xlu1 %v4196_v12, %s8034_s9 }
0x156c   : > { %4205 = vrot.lane.b32.xlu0 %v4195_v22, %s8036_s8  ;;  %4271 = vrot.lane.b32.xlu1 %v4196_v12, %s8035_s24 }
0x1570   : > { %4201 = vrot.lane.b32.xlu0 %v4193_v9, %s8036_s8  ;;  %4207 = vrot.lane.b32.xlu1 %v4196_v12, %s8036_s8 }
0x1574   : > { %4333 = vrot.lane.b32.xlu0 %v4195_v22, %s6250_s6  ;;  %4203 = vrot.lane.b32.xlu1 %v4194_v10, %s8036_s8 }
0x1578   : > { %4329 = vrot.lane.b32.xlu0 %v4193_v9, %s6250_s6  ;;  %4335 = vrot.lane.b32.xlu1 %v4196_v12, %s6250_s6 }
0x157c   : > { %4423 = vperm.xlu0 %5942, %v4409_v14   ;;  %4331 = vrot.lane.b32.xlu1 %v4194_v10, %s6250_s6 }
0x1580   : > { %4413 = vperm.xlu0 %5942, %v4407_v16   ;;  %4428 = vperm.xlu1 %5943, %v4410_v17  }
0x1584   : > { %4418 = vperm.xlu1 %5943, %v4408_v18  }
0x15a6   : > { %v4314_v46 = vpop.permute.xlu0 %4313 }
0x15a7   : > { %4325 = vst.msk [vmem:[#allocation5 + $0x2a0] sm:$0xff] %vm2143_vm4, %v4314_v46 }
0x15aa   : > { %v4316_v19 = vpop.permute.xlu1 %4315  ;;  %v4250_v20 = vpop.permute.xlu0 %4249 }
0x15ab   : > { %4326 = vst.msk [vmem:[#allocation5 + $0x2b8] sm:$0xff] %vm2143_vm4, %v4316_v19  ;;  %4261 = vst.msk [vmem:[#allocation5 + $0x120] sm:$0xff] %vm2143_vm4, %v4250_v20 }
0x15ae   : > { %v4252_v21 = vpop.permute.xlu1 %4251  ;;  %v4298_v23 = vpop.permute.xlu0 %4297  ;;  %v4373_v51 = vld [vmem:[#allocation5 + $0x2a0] sm:$0xff] }
0x15af   : > { %4262 = vst.msk [vmem:[#allocation5 + $0x138] sm:$0xff] %vm2143_vm4, %v4252_v21  ;;  %4309 = vst.msk [vmem:[#allocation5 + $0x240] sm:$0xff] %vm2143_vm4, %v4298_v23 }
0x15b2   : > { %v4300_v0 = vpop.permute.xlu1 %4299  ;;  %v4234_v24 = vpop.permute.xlu0 %4233  ;;  %v4374_v44 = vld [vmem:[#allocation5 + $0x2b8] sm:$0xff]  ;;  %v4357_v42 = vld [vmem:[#allocation5 + $0x120] sm:$0xff] }
0x15b3   : > { %4310 = vst.msk [vmem:[#allocation5 + $0x258] sm:$0xff] %vm2143_vm4, %v4300_v0  ;;  %4245 = vst.msk [vmem:[#allocation5 + $0xc0] sm:$0xff] %vm2143_vm4, %v4234_v24  ;;  %v4395_v52 = vpack.c.bf16 %v4374_v44, %v4373_v51  ;;  %v5978_v44 = vld [vmem:[%s7949_s20] ss:$12 sps:$4 sm:$0xff]  }
0x15b6   : > { %v4236_v28 = vpop.permute.xlu1 %4235  ;;  %v4282_v30 = vpop.permute.xlu0 %4281  ;;  %v4358_v53 = vld [vmem:[#allocation5 + $0x138] sm:$0xff]  ;;  %v4369_v6 = vld [vmem:[#allocation5 + $0x240] sm:$0xff] }
0x15b7   : > { %4246 = vst.msk [vmem:[#allocation5 + $0xd8] sm:$0xff] %vm2143_vm4, %v4236_v28  ;;  %4293 = vst.msk [vmem:[#allocation5 + $0x1e0] sm:$0xff] %vm2143_vm4, %v4282_v30  ;;  %v4387_v31 = vpack.c.bf16 %v4358_v53, %v4357_v42  ;;  %v5983_v53 = vld [vmem:[%s7949_s20 + $0x18] ss:$12 sps:$4 sm:$0xff]  }
0x15ba   : > { %v4284_v32 = vpop.permute.xlu1 %4283  ;;  %v4218_v33 = vpop.permute.xlu0 %4217  ;;  %v4370_v60 = vld [vmem:[#allocation5 + $0x258] sm:$0xff]  ;;  %v4353_v10 = vld [vmem:[#allocation5 + $0xc0] sm:$0xff] }
0x15bb   : > { %4294 = vst.msk [vmem:[#allocation5 + $0x1f8] sm:$0xff] %vm2143_vm4, %v4284_v32  ;;  %4229 = vst.msk [vmem:[#allocation5 + $0x60] sm:$0xff] %vm2143_vm4, %v4218_v33  ;;  %v4393_v7 = vpack.c.bf16 %v4370_v60, %v4369_v6 }
0x15be   : > { %v4220_v27 = vpop.permute.xlu1 %4219  ;;  %v4266_v26 = vpop.permute.xlu0 %4265  ;;  %v4354_v8 = vld [vmem:[#allocation5 + $0xd8] sm:$0xff]  ;;  %v4365_v20 = vld [vmem:[#allocation5 + $0x1e0] sm:$0xff] }
0x15bf   : > { %4230 = vst.msk [vmem:[#allocation5 + $0x78] sm:$0xff] %vm2143_vm4, %v4220_v27  ;;  %4277 = vst.msk [vmem:[#allocation5 + $0x180] sm:$0xff] %vm2143_vm4, %v4266_v26  ;;  %v4385_v13 = vpack.c.bf16 %v4354_v8, %v4353_v10 }
0x15c2   : > { %v4268_v34 = vpop.permute.xlu1 %4267  ;;  %v4318_v35 = vpop.permute.xlu0 %4317  ;;  %v4366_v15 = vld [vmem:[#allocation5 + $0x1f8] sm:$0xff]  ;;  %v4349_v28 = vld [vmem:[#allocation5 + $0x60] sm:$0xff] }
0x15c3   : > { %4278 = vst.msk [vmem:[#allocation5 + $0x198] sm:$0xff] %vm2143_vm4, %v4268_v34  ;;  %4327 = vst.msk [vmem:[#allocation5 + $0x2d0] sm:$0xff] %vm2143_vm4, %v4318_v35  ;;  %v4391_v21 = vpack.c.bf16 %v4366_v15, %v4365_v20  ;;  %v7738_v15 = vld [vmem:[%s8027_s5] ss:$0 sm:$0xff] }
0x15c6   : > { %v4320_v36 = vpop.permute.xlu1 %4319  ;;  %v4254_v38 = vpop.permute.xlu0 %4253  ;;  %v4350_v23 = vld [vmem:[#allocation5 + $0x78] sm:$0xff] }
0x15c7   : > { %4328 = vst.msk [vmem:[#allocation5 + $0x2e8] sm:$0xff] %vm2143_vm4, %v4320_v36  ;;  %4263 = vst.msk [vmem:[#allocation5 + $0x150] sm:$0xff] %vm2143_vm4, %v4254_v38  ;;  %v4383_v33 = vpack.c.bf16 %v4350_v23, %v4349_v28 }
0x15ca   : > { %v4256_v11 = vpop.permute.xlu1 %4255  ;;  %v4302_v45 = vpop.permute.xlu0 %4301  ;;  %v4375_v40 = vld [vmem:[#allocation5 + $0x2d0] sm:$0xff]  ;;  %v4362_v26 = vld [vmem:[#allocation5 + $0x198] sm:$0xff] }
0x15cb   : > { %4264 = vst.msk [vmem:[#allocation5 + $0x168] sm:$0xff] %vm2143_vm4, %v4256_v11  ;;  %4311 = vst.msk [vmem:[#allocation5 + $0x270] sm:$0xff] %vm2143_vm4, %v4302_v45  ;;  %v4361_v45 = vld [vmem:[#allocation5 + $0x180] sm:$0xff] }
0x15ce   : > { %v4304_v39 = vpop.permute.xlu1 %4303  ;;  %v4238_v37 = vpop.permute.xlu0 %4237  ;;  %v4376_v41 = vld [vmem:[#allocation5 + $0x2e8] sm:$0xff]  ;;  %v4359_v49 = vld [vmem:[#allocation5 + $0x150] sm:$0xff] }
0x15cf   : > { %4312 = vst.msk [vmem:[#allocation5 + $0x288] sm:$0xff] %vm2143_vm4, %v4304_v39  ;;  %4247 = vst.msk [vmem:[#allocation5 + $0xf0] sm:$0xff] %vm2143_vm4, %v4238_v37  ;;  %v4396_v47 = vpack.c.bf16 %v4376_v41, %v4375_v40  ;;  %v4389_v39 = vpack.c.bf16 %v4362_v26, %v4361_v45 }
0x15d1   : > { %5633 = vmatprep.subr.bf16.mxu1 %v4396_v47 }
0x15d2   : > { %v4240_v48 = vpop.permute.xlu1 %4239  ;;  %v4286_v25 = vpop.permute.xlu0 %4285  ;;  %v4360_v29 = vld [vmem:[#allocation5 + $0x168] sm:$0xff]  ;;  %v4371_v57 = vld [vmem:[#allocation5 + $0x270] sm:$0xff] }
0x15d3   : > { %4248 = vst.msk [vmem:[#allocation5 + $0x108] sm:$0xff] %vm2143_vm4, %v4240_v48  ;;  %4295 = vst.msk [vmem:[#allocation5 + $0x210] sm:$0xff] %vm2143_vm4, %v4286_v25  ;;  %v4388_v50 = vpack.c.bf16 %v4360_v29, %v4359_v49  ;;  %v5981_v48 = vld [vmem:[%s7949_s20 + $0x1c] ss:$12 sps:$4 sm:$0xff]  }
0x15d5   : > { %5634 = vmatpush3.bf16.msra.mxu1 %v4388_v50 }
0x15d6   : > { %v4288_v55 = vpop.permute.xlu1 %4287  ;;  %5635 = vmatprep.subr.bf16.mxu1 %v4395_v52  ;;  %v4222_v56 = vpop.permute.xlu0 %4221  ;;  %v4372_v54 = vld [vmem:[#allocation5 + $0x288] sm:$0xff]  ;;  %v4355_v2 = vld [vmem:[#allocation5 + $0xf0] sm:$0xff] }
0x15d7   : > { %4296 = vst.msk [vmem:[#allocation5 + $0x228] sm:$0xff] %vm2143_vm4, %v4288_v55  ;;  %4231 = vst.msk [vmem:[#allocation5 + $0x90] sm:$0xff] %vm2143_vm4, %v4222_v56  ;;  %v4394_v59 = vpack.c.bf16 %v4372_v54, %v4371_v57  ;;  %v5985_v55 = vld [vmem:[%s7949_s20 + $0x20] ss:$12 sps:$4 sm:$0xff]  }
0x15d9   : > { %5636 = vmatpush3.bf16.msra.mxu1 %v4387_v31 }
0x15da   : > { %v4224_v61 = vpop.permute.xlu1 %4223  ;;  %5637 = vmatprep.subr.bf16.mxu1 %v4394_v59  ;;  %v4270_v43 = vpop.permute.xlu0 %4269  ;;  %v4356_v3 = vld [vmem:[#allocation5 + $0x108] sm:$0xff]  ;;  %v4367_v22 = vld [vmem:[#allocation5 + $0x210] sm:$0xff] }
0x15db   : > { %4232 = vst.msk [vmem:[#allocation5 + $0xa8] sm:$0xff] %vm2143_vm4, %v4224_v61  ;;  %4279 = vst.msk [vmem:[#allocation5 + $0x1b0] sm:$0xff] %vm2143_vm4, %v4270_v43  ;;  %v4386_v4 = vpack.c.bf16 %v4356_v3, %v4355_v2 }
0x15dd   : > { %5638 = vmatpush3.bf16.msra.mxu1 %v4386_v4 }
0x15de   : > { %v4272_v5 = vpop.permute.xlu1 %4271  ;;  %5639 = vmatprep.subr.bf16.mxu1 %v4393_v7  ;;  %v4206_v9 = vpop.permute.xlu0 %4205  ;;  %v4368_v12 = vld [vmem:[#allocation5 + $0x228] sm:$0xff]  ;;  %v4351_v18 = vld [vmem:[#allocation5 + $0x90] sm:$0xff] }
0x15df   : > { %4280 = vst.msk [vmem:[#allocation5 + $0x1c8] sm:$0xff] %vm2143_vm4, %v4272_v5  ;;  %4215 = vst.msk [vmem:[#allocation5 + $0x30] sm:$0xff] %vm2143_vm4, %v4206_v9  ;;  %v4392_v14 = vpack.c.bf16 %v4368_v12, %v4367_v22 }
0x15e1   : > { %5640 = vmatpush3.bf16.msra.mxu1 %v4385_v13 }
0x15e2   : > { %v4208_v16 = vpop.permute.xlu1 %4207  ;;  %5641 = vmatprep.subr.bf16.mxu1 %v4392_v14  ;;  %v4202_v17 = vpop.permute.xlu0 %4201  ;;  %v4352_v46 = vld [vmem:[#allocation5 + $0xa8] sm:$0xff]  ;;  %v4363_v30 = vld [vmem:[#allocation5 + $0x1b0] sm:$0xff] }
0x15e3   : > { %4216 = vst.msk [vmem:[#allocation5 + $0x48] sm:$0xff] %vm2143_vm4, %v4208_v16  ;;  %4213 = vst.msk [vmem:[#allocation5] sm:$0xff] %vm2143_vm4, %v4202_v17  ;;  %v4384_v19 = vpack.c.bf16 %v4352_v46, %v4351_v18 }
0x15e5   : > { %5642 = vmatpush3.bf16.msra.mxu1 %v4384_v19 }
0x15e6   : > { %v4204_v0 = vpop.permute.xlu1 %4203  ;;  %5643 = vmatprep.subr.bf16.mxu1 %v4391_v21  ;;  %v4334_v24 = vpop.permute.xlu0 %4333  ;;  %v4364_v32 = vld [vmem:[#allocation5 + $0x1c8] sm:$0xff]  ;;  %v4347_v36 = vld [vmem:[#allocation5 + $0x30] sm:$0xff] }
0x15e7   : > { %4214 = vst.msk [vmem:[#allocation5 + $0x18] sm:$0xff] %vm2143_vm4, %v4204_v0  ;;  %4343 = vst.msk [vmem:[#allocation5 + $0x330] sm:$0xff] %vm2143_vm4, %v4334_v24  ;;  %v4390_v27 = vpack.c.bf16 %v4364_v32, %v4363_v30 }
0x15e9   : > { %5644 = vmatpush3.bf16.msra.mxu1 %v4383_v33 }
0x15ea   : > { %v4336_v34 = vpop.permute.xlu1 %4335  ;;  %5645 = vmatprep.subr.bf16.mxu1 %v4390_v27  ;;  %v4330_v35 = vpop.permute.xlu0 %4329  ;;  %v4348_v38 = vld [vmem:[#allocation5 + $0x48] sm:$0xff]  ;;  %v4345_v40 = vld [vmem:[#allocation5] sm:$0xff] }
0x15eb   : > { %4344 = vst.msk [vmem:[#allocation5 + $0x348] sm:$0xff] %vm2143_vm4, %v4336_v34  ;;  %4341 = vst.msk [vmem:[#allocation5 + $0x300] sm:$0xff] %vm2143_vm4, %v4330_v35  ;;  %v4382_v11 = vpack.c.bf16 %v4348_v38, %v4347_v36 }
0x15ed   : > { %5646 = vmatpush3.bf16.msra.mxu1 %v4382_v11 }
0x15ee   : > { %v4332_v37 = vpop.permute.xlu1 %4331  ;;  %5647 = vmatprep.subr.bf16.mxu1 %v4389_v39  ;;  %v4346_v41 = vld [vmem:[#allocation5 + $0x18] sm:$0xff]  ;;  %v4379_v25 = vld [vmem:[#allocation5 + $0x330] sm:$0xff] }
0x15ef   : > { %4342 = vst.msk [vmem:[#allocation5 + $0x318] sm:$0xff] %vm2143_vm4, %v4332_v37  ;;  %v4381_v47 = vpack.c.bf16 %v4346_v41, %v4345_v40 }
0x15f1   : > { %5648 = vmatpush3.bf16.msra.mxu1 %v4381_v47 }
0x15f2   : > { %v4380_v49 = vld [vmem:[#allocation5 + $0x348] sm:$0xff]  ;;  %v4377_v50 = vld [vmem:[#allocation5 + $0x300] sm:$0xff] }
0x15f3   : > { %v4398_v29 = vpack.c.bf16 %v4380_v49, %v4379_v25 }
0x15f4   : > { %4500 = vmatmul.mubr.bf16.vlgmr.msra.gmra.mxu1 %v5978_v44 }
0x15f5   : > { %5822 = vmatprep.subr.bf16.mxu0 %v4398_v29  ;;  %4507 = vmatprep.mubr.bf16.mxu1 %v5981_v48 }
0x15f6   : > { %5823 = vmatpush3.bf16.msra.mxu0 %v4398_v29  ;;  %v4378_v51 = vld [vmem:[#allocation5 + $0x318] sm:$0xff] }
0x15f7   : > { %v4397_v52 = vpack.c.bf16 %v4378_v51, %v4377_v50  ;;  %v4424_v59 = vpop.permute.xlu0 %4423 }
0x15f9   : > { %5824 = vmatprep.subr.bf16.mxu0 %v4397_v52 }
0x15fa   : > { %5825 = vmatpush3.bf16.msra.mxu0 %v4397_v52 }
0x15fb   : > { %v4429_v61 = vpop.permute.xlu1 %4428  ;;  %v4414_v10 = vpop.permute.xlu0 %4413 }
0x15fc   : > { %4508 = vmatmul.mubr.bf16.gmra.mxu1 %v5983_v53 }
0x15fd   : > { %5827 = vmatmul.mubr.msk.bf16.vlgmr.msra.gmra.mxu0 %vm957_vm6, %v5985_v55 }
0x15ff   : > { %v4419_v13 = vpop.permute.xlu1 %4418 }
0x16b4   : > { %v5649_v56 = vpop.f32.mrf.mxu1 }
0x16b6   : > { %v5650_v42 = vpop.f32.mrf.mxu1 }
0x16b7   : > { %v5651_v4 = vadd.f32 %v5650_v42, %v5649_v56 }
0x16b8   : > { %v5652_v57 = vpop.f32.mrf.mxu1 }
0x16b9   : > { %v4502_v14 = vadd.f32 %v5651_v4, %v4414_v10 }
0x16ba   : > { %v5653_v54 = vpop.f32.mrf.mxu1 }
0x16bb   : > { %v5654_v7 = vadd.f32 %v5653_v54, %v5652_v57 }
0x16bc   : > { %v5655_v31 = vpop.f32.mrf.mxu1 }
0x16bd   : > { %v5828_v60 = vpop.f32.mrf.mxu0  ;;  %v4505_v18 = vadd.f32 %v5654_v7, %v4419_v13 }
0x16be   : > { %v5656_v43 = vpop.f32.mrf.mxu1 }
0x16bf   : > { %v5657_v2 = vadd.f32 %v5656_v43, %v5655_v31  ;;  %v4550_v3 = vpop.f32.mrf.mxu0 }
0x16c0   : > { %v5658_v6 = vpop.f32.mrf.mxu1  ;;  %v4551_v19 = vadd.f32 %v4550_v3, %v4502_v14 }
0x16c1   : > { %v4510_v8 = vadd.f32 %v5657_v2, %v4424_v59  ;;  %v5829_v5 = vpop.f32.mrf.mxu0 }
0x16c2   : > { %v5659_v9 = vpop.f32.mrf.mxu1  ;;  %v7751_v28 = vmul.f32 %v7738_v15, %v4551_v19 }
0x16c3   : > { %v4559_v22 = vadd.f32 %v5828_v60, %v4510_v8  ;;  %v5660_v12 = vadd.f32 %v5659_v9, %v5658_v6  ;;  %v4553_v16 = vpop.f32.mrf.mxu0 }
0x16c4   : > { %v4554_v21 = vadd.f32 %v4553_v16, %v4505_v18  ;;  %v4576_v26 = vsel %vm2143_vm4, %v7751_v28, 0.0  ;;  %v4592_v35 = vmul.f32 %v7751_v28, %v7751_v28 }
0x16c5   : > { %v4513_v17 = vadd.f32 %v5660_v12, %v4429_v61  ;;  %v7741_v46 = vmul.f32 %v7738_v15, %v4559_v22 }
0x16c6   : > { %v7754_v30 = vmul.f32 %v7738_v15, %v4554_v21  ;;  %v4596_v38 = vsel %vm2143_vm4, %v4592_v35, 0.0 }
0x16c7   : > { %v4562_v20 = vadd.f32 %v5829_v5, %v4513_v17  ;;  %v4582_v23 = vsel %vm2143_vm4, %v7741_v46, 0.0  ;;  %v4594_v0 = vmul.f32 %v7741_v46, %v7741_v46 }
0x16c8   : > { %4583 = vadd.xlane.f32.xlu0 %v4582_v23  ;;  %v4579_v27 = vsel %vm2143_vm4, %v7754_v30, 0.0  ;;  %v4593_v11 = vmul.f32 %v7754_v30, %v7754_v30 }
0x16c9   : > { %v7748_v24 = vmul.f32 %v7738_v15, %v4562_v20  ;;  %v4602_v33 = vsel %vm2143_vm4, %v4594_v0, 0.0 }
0x16ca   : > { %v4599_v45 = vsel %vm2143_vm4, %v4593_v11, 0.0 }
0x16cb   : > { %v4585_v32 = vsel %vm2143_vm4, %v7748_v24, 0.0  ;;  %v4595_v34 = vmul.f32 %v7748_v24, %v7748_v24 }
0x16cc   : > { %4586 = vadd.xlane.f32.xlu1 %v4585_v32  ;;  %4603 = vadd.xlane.f32.xlu0 %v4602_v33 }
0x16cd   : > { %v4605_v36 = vsel %vm2143_vm4, %v4595_v34, 0.0 }
0x16d0   : > { %4580 = vadd.xlane.f32.xlu0 %v4579_v27  ;;  %4577 = vadd.xlane.f32.xlu1 %v4576_v26 }
0x16d4   : > { %4606 = vadd.xlane.f32.xlu0 %v4605_v36  ;;  %4597 = vadd.xlane.f32.xlu1 %v4596_v38 }
0x16d8   : > { %4600 = vadd.xlane.f32.xlu0 %v4599_v45 }
0x1751   : > { %v4584_v39 = vpop.xlane.xlu0 %4583 }
0x1752   : > { %v4590_v37 = vmul.f32 0.0625, %v4584_v39 }
0x1754   : > { %v4614_v47 = vmul.f32 %v4590_v37, %v4590_v37  ;;  %v4622_v10 = vsub.f32 %v7741_v46, %v4590_v37  ;;  %v5988_v37 = vld [vmem:[#allocation14 + $0x4] ss:$12 sps:$4 sm:$0xff]  }
0x1755   : > { %v4587_v40 = vpop.xlane.xlu1 %4586  ;;  %v4604_v41 = vpop.xlane.xlu0 %4603  ;;  %4974 = vmatprep.mubr.bf16.mxu1 %v5988_v37 }
0x1756   : > { %v4610_v44 = vmul.f32 0.0625, %v4604_v41  ;;  %v4591_v25 = vmul.f32 0.0625, %v4587_v40  ;;  %v5992_v41 = vld [vmem:[#allocation14 + $0x8] ss:$12 sps:$4 sm:$0xff]  }
0x1757   : > { %5834 = vmatprep.mubr.msk.bf16.mxu0 %vm957_vm6, %v5992_v41 }
0x1758   : > { %v4618_v48 = vsub.f32 %v4610_v44, %v4614_v47  ;;  %v4615_v53 = vmul.f32 %v4591_v25, %v4591_v25  ;;  %v4623_v18 = vsub.f32 %v7748_v24, %v4591_v25 }
0x1759   : > { %v4578_v49 = vpop.xlane.xlu1 %4577  ;;  %v4581_v29 = vpop.xlane.xlu0 %4580 }
0x175a   : > { %v4626_v50 = vmax.f32 %v4618_v48, 0.0  ;;  %v4588_v51 = vmul.f32 0.0625, %v4578_v49  ;;  %v4589_v55 = vmul.f32 0.0625, %v4581_v29 }
0x175c   : > { %v4630_v52 = vadd.f32 1e-05, %v4626_v50  ;;  %v4612_v57 = vmul.f32 %v4588_v51, %v4588_v51  ;;  %v4613_v43 = vmul.f32 %v4589_v55, %v4589_v55  ;;  %v4620_v16 = vsub.f32 %v7751_v28, %v4588_v51 }
0x175d   : > { %v4598_v56 = vpop.xlane.xlu1 %4597  ;;  %v4607_v42 = vpop.xlane.xlu0 %4606  ;;  %v4621_v23 = vsub.f32 %v7754_v30, %v4589_v55 }
0x175e   : > { %6036 = vrsqrt.f32 %v4630_v52  ;;  %v4608_v54 = vmul.f32 0.0625, %v4598_v56  ;;  %v4611_v31 = vmul.f32 0.0625, %v4607_v42 }
0x1760   : > { %v4616_v59 = vsub.f32 %v4608_v54, %v4612_v57  ;;  %v4619_v60 = vsub.f32 %v4611_v31, %v4615_v53 }
0x1761   : > { %v4601_v61 = vpop.xlane.xlu0 %4600 }
0x1762   : > { %v4624_v2 = vmax.f32 %v4616_v59, 0.0  ;;  %v4627_v3 = vmax.f32 %v4619_v60, 0.0  ;;  %v4609_v4 = vmul.f32 0.0625, %v4601_v61 }
0x1764   : > { %v4628_v6 = vadd.f32 1e-05, %v4624_v2  ;;  %v4631_v7 = vadd.f32 1e-05, %v4627_v3  ;;  %v4617_v8 = vsub.f32 %v4609_v4, %v4613_v43 }
0x1766   : > { %6038 = vrsqrt.f32 %v4628_v6  ;;  %v4625_v5 = vmax.f32 %v4617_v8, 0.0 }
0x1767   : > { %6040 = vrsqrt.f32 %v4631_v7 }
0x1768   : > { %v4629_v9 = vadd.f32 1e-05, %v4625_v5 }
0x176a   : > { %6042 = vrsqrt.f32 %v4629_v9 }
0x176b   : > { %v6037_v22 = vpop.eup %6036 }
0x176c   : > { %v4638_v12 = vmul.f32 %v6037_v22, %v4622_v10 }
0x176e   : > { %v4642_v13 = vmax.f32 %v4638_v12, 0.0 }
0x1770   : > { %v4646_v14 = vmul.f32 %v7738_v15, %v4642_v13 }
0x1772   : > { %4656 = vrot.lane.b32.xlu1 %v4646_v14, %s8030_s10 }
0x1773   : > { %v6039_v17 = vpop.eup %6038 }
0x1774   : > { %v6041_v19 = vpop.eup %6040  ;;  %v4636_v20 = vmul.f32 %v6039_v17, %v4620_v16 }
0x1775   : > { %v4639_v21 = vmul.f32 %v6041_v19, %v4623_v18 }
0x1776   : > { %v4640_v0 = vmax.f32 %v4636_v20, 0.0 }
0x1777   : > { %v6043_v46 = vpop.eup %6042  ;;  %v4643_v32 = vmax.f32 %v4639_v21, 0.0 }
0x1778   : > { %v4644_v33 = vmul.f32 %v7738_v15, %v4640_v0  ;;  %v4637_v27 = vmul.f32 %v6043_v46, %v4621_v23 }
0x1779   : > { %v4647_v26 = vmul.f32 %v7738_v15, %v4643_v32 }
0x177a   : > { %4652 = vrot.lane.b32.xlu1 %v4644_v33, %s8030_s10  ;;  %v4641_v28 = vmax.f32 %v4637_v27, 0.0 }
0x177b   : > { %4658 = vrot.lane.b32.xlu0 %v4647_v26, %s8030_s10 }
0x177c   : > { %v4645_v24 = vmul.f32 %v7738_v15, %v4641_v28 }
0x177e   : > { %4654 = vrot.lane.b32.xlu1 %v4645_v24, %s8030_s10  ;;  %s8037_s10 = sld [smem:[#allocation35_spill]] }
0x1784   : > { %v4882_v40 = vld [vmem:[%s8037_s10] sm:$0xff]  ;;  %v4884_v47 = vld [vmem:[%s8037_s10 + $0x10] sm:$0xff]  ;;  %v4883_v44 = vld [vmem:[%s8037_s10 + $0x8] sm:$0xff] }
0x1785   : > { %v4885_v48 = vld [vmem:[%s8037_s10 + $0x18] sm:$0xff] }
0x17e4   : > { %v4657_v34 = vpop.permute.xlu1 %4656 }
0x17e5   : > { %4666 = vst.msk [vmem:[#allocation4 + $0x10] sm:$0xff] %vm2754_vm8, %v4657_v34 }
0x17ec   : > { %v4653_v30 = vpop.permute.xlu1 %4652  ;;  %v4670_v45 = vld [vmem:[#allocation4 + $0x10] sm:$0xff] }
0x17ed   : > { %4664 = vst.msk [vmem:[#allocation4] sm:$0xff] %vm2754_vm8, %v4653_v30  ;;  %v4659_v35 = vpop.permute.xlu0 %4658 }
0x17ee   : > { %4667 = vst.msk [vmem:[#allocation4 + $0x18] sm:$0xff] %vm2754_vm8, %v4659_v35 }
0x17f0   : > { %v4655_v36 = vpop.permute.xlu1 %4654 }
0x17f1   : > { %4665 = vst.msk [vmem:[#allocation4 + $0x8] sm:$0xff] %vm2754_vm8, %v4655_v36 }
0x17f4   : > { %v4668_v38 = vld [vmem:[#allocation4] sm:$0xff] }
0x17f5   : > { %4788 = vrot.lane.b32.xlu0 %v4668_v38, %s8028_s27  ;;  %v4671_v39 = vld [vmem:[#allocation4 + $0x18] sm:$0xff] }
0x17f8   : > { %v4669_v11 = vld [vmem:[#allocation4 + $0x8] sm:$0xff] }
0x17f9   : > { %4724 = vrot.lane.b32.xlu0 %v4668_v38, %s8031_s29  ;;  %4790 = vrot.lane.b32.xlu1 %v4669_v11, %s8028_s27 }
0x17fd   : > { %4772 = vrot.lane.b32.xlu0 %v4668_v38, %s8029_s1  ;;  %4726 = vrot.lane.b32.xlu1 %v4669_v11, %s8031_s29 }
0x1801   : > { %4708 = vrot.lane.b32.xlu0 %v4668_v38, %s8032_s30  ;;  %4774 = vrot.lane.b32.xlu1 %v4669_v11, %s8029_s1 }
0x1805   : > { %4756 = vrot.lane.b32.xlu0 %v4668_v38, %s8033_s7  ;;  %4710 = vrot.lane.b32.xlu1 %v4669_v11, %s8032_s30 }
0x1809   : > { %4692 = vrot.lane.b32.xlu0 %v4668_v38, %s8034_s9  ;;  %4758 = vrot.lane.b32.xlu1 %v4669_v11, %s8033_s7 }
0x180d   : > { %4740 = vrot.lane.b32.xlu0 %v4668_v38, %s8035_s24  ;;  %4694 = vrot.lane.b32.xlu1 %v4669_v11, %s8034_s9 }
0x1811   : > { %4792 = vrot.lane.b32.xlu0 %v4670_v45, %s8028_s27  ;;  %4742 = vrot.lane.b32.xlu1 %v4669_v11, %s8035_s24 }
0x1815   : > { %4728 = vrot.lane.b32.xlu0 %v4670_v45, %s8031_s29  ;;  %4794 = vrot.lane.b32.xlu1 %v4671_v39, %s8028_s27 }
0x1819   : > { %4776 = vrot.lane.b32.xlu0 %v4670_v45, %s8029_s1  ;;  %4730 = vrot.lane.b32.xlu1 %v4671_v39, %s8031_s29 }
0x181d   : > { %4712 = vrot.lane.b32.xlu0 %v4670_v45, %s8032_s30  ;;  %4778 = vrot.lane.b32.xlu1 %v4671_v39, %s8029_s1 }
0x1821   : > { %4760 = vrot.lane.b32.xlu0 %v4670_v45, %s8033_s7  ;;  %4714 = vrot.lane.b32.xlu1 %v4671_v39, %s8032_s30 }
0x1825   : > { %4696 = vrot.lane.b32.xlu0 %v4670_v45, %s8034_s9  ;;  %4762 = vrot.lane.b32.xlu1 %v4671_v39, %s8033_s7 }
0x1829   : > { %4744 = vrot.lane.b32.xlu0 %v4670_v45, %s8035_s24  ;;  %4698 = vrot.lane.b32.xlu1 %v4671_v39, %s8034_s9 }
0x182d   : > { %4680 = vrot.lane.b32.xlu0 %v4670_v45, %s8036_s8  ;;  %4746 = vrot.lane.b32.xlu1 %v4671_v39, %s8035_s24 }
0x1831   : > { %4676 = vrot.lane.b32.xlu0 %v4668_v38, %s8036_s8  ;;  %4682 = vrot.lane.b32.xlu1 %v4671_v39, %s8036_s8 }
0x1835   : > { %4808 = vrot.lane.b32.xlu0 %v4670_v45, %s6250_s6  ;;  %4678 = vrot.lane.b32.xlu1 %v4669_v11, %s8036_s8 }
0x1839   : > { %4804 = vrot.lane.b32.xlu0 %v4668_v38, %s6250_s6  ;;  %4810 = vrot.lane.b32.xlu1 %v4671_v39, %s6250_s6 }
0x183d   : > { %4888 = vperm.xlu0 %5942, %v4882_v40   ;;  %4806 = vrot.lane.b32.xlu1 %v4669_v11, %s6250_s6  ;;  %s5412_s6 = sshll.u32 %s8041_s28, 5 }
0x183e   : > { %s890_s2 = scalar_lea.vmem %s8038_s13, %s5412_s6 }
0x1841   : > { %4898 = vperm.xlu0 %5942, %v4884_v47   ;;  %4893 = vperm.xlu1 %5943, %v4883_v44  }
0x1845   : > { %4903 = vperm.xlu1 %5943, %v4885_v48  }
0x1867   : > { %v4789_v25 = vpop.permute.xlu0 %4788 }
0x1868   : > { %4800 = vst.msk [vmem:[#allocation5 + $0x2a0] sm:$0xff] %vm2143_vm4, %v4789_v25 }
0x186b   : > { %v4791_v49 = vpop.permute.xlu1 %4790  ;;  %v4725_v29 = vpop.permute.xlu0 %4724 }
0x186c   : > { %4801 = vst.msk [vmem:[#allocation5 + $0x2b8] sm:$0xff] %vm2143_vm4, %v4791_v49  ;;  %4736 = vst.msk [vmem:[#allocation5 + $0x120] sm:$0xff] %vm2143_vm4, %v4725_v29 }
0x186f   : > { %v4727_v50 = vpop.permute.xlu1 %4726  ;;  %v4773_v51 = vpop.permute.xlu0 %4772  ;;  %v4848_v16 = vld [vmem:[#allocation5 + $0x2a0] sm:$0xff] }
0x1870   : > { %4737 = vst.msk [vmem:[#allocation5 + $0x138] sm:$0xff] %vm2143_vm4, %v4727_v50  ;;  %4784 = vst.msk [vmem:[#allocation5 + $0x240] sm:$0xff] %vm2143_vm4, %v4773_v51 }
0x1873   : > { %v4775_v52 = vpop.permute.xlu1 %4774  ;;  %v4709_v53 = vpop.permute.xlu0 %4708  ;;  %v4849_v9 = vld [vmem:[#allocation5 + $0x2b8] sm:$0xff]  ;;  %v4832_v21 = vld [vmem:[#allocation5 + $0x120] sm:$0xff] }
0x1874   : > { %4785 = vst.msk [vmem:[#allocation5 + $0x258] sm:$0xff] %vm2143_vm4, %v4775_v52  ;;  %4720 = vst.msk [vmem:[#allocation5 + $0xc0] sm:$0xff] %vm2143_vm4, %v4709_v53  ;;  %v4870_v17 = vpack.c.bf16 %v4849_v9, %v4848_v16 }
0x1877   : > { %v4711_v55 = vpop.permute.xlu1 %4710  ;;  %v4757_v56 = vpop.permute.xlu0 %4756  ;;  %v4833_v18 = vld [vmem:[#allocation5 + $0x138] sm:$0xff]  ;;  %v4844_v30 = vld [vmem:[#allocation5 + $0x240] sm:$0xff] }
0x1878   : > { %4721 = vst.msk [vmem:[#allocation5 + $0xd8] sm:$0xff] %vm2143_vm4, %v4711_v55  ;;  %4768 = vst.msk [vmem:[#allocation5 + $0x1e0] sm:$0xff] %vm2143_vm4, %v4757_v56  ;;  %v4862_v46 = vpack.c.bf16 %v4833_v18, %v4832_v21 }
0x187b   : > { %v4759_v42 = vpop.permute.xlu1 %4758  ;;  %v4693_v57 = vpop.permute.xlu0 %4692  ;;  %v4845_v33 = vld [vmem:[#allocation5 + $0x258] sm:$0xff]  ;;  %v4828_v45 = vld [vmem:[#allocation5 + $0xc0] sm:$0xff] }
0x187c   : > { %4769 = vst.msk [vmem:[#allocation5 + $0x1f8] sm:$0xff] %vm2143_vm4, %v4759_v42  ;;  %4704 = vst.msk [vmem:[#allocation5 + $0x60] sm:$0xff] %vm2143_vm4, %v4693_v57  ;;  %v4868_v35 = vpack.c.bf16 %v4845_v33, %v4844_v30 }
0x187f   : > { %v4695_v54 = vpop.permute.xlu1 %4694  ;;  %v4741_v31 = vpop.permute.xlu0 %4740  ;;  %v4829_v36 = vld [vmem:[#allocation5 + $0xd8] sm:$0xff]  ;;  %v4840_v50 = vld [vmem:[#allocation5 + $0x1e0] sm:$0xff] }
0x1880   : > { %4705 = vst.msk [vmem:[#allocation5 + $0x78] sm:$0xff] %vm2143_vm4, %v4695_v54  ;;  %4752 = vst.msk [vmem:[#allocation5 + $0x180] sm:$0xff] %vm2143_vm4, %v4741_v31  ;;  %v4860_v40 = vpack.c.bf16 %v4829_v36, %v4828_v45 }
0x1883   : > { %v4743_v59 = vpop.permute.xlu1 %4742  ;;  %v4793_v60 = vpop.permute.xlu0 %4792  ;;  %v4841_v47 = vld [vmem:[#allocation5 + $0x1f8] sm:$0xff]  ;;  %v4824_v56 = vld [vmem:[#allocation5 + $0x60] sm:$0xff] }
0x1884   : > { %4753 = vst.msk [vmem:[#allocation5 + $0x198] sm:$0xff] %vm2143_vm4, %v4743_v59  ;;  %4802 = vst.msk [vmem:[#allocation5 + $0x2d0] sm:$0xff] %vm2143_vm4, %v4793_v60  ;;  %v4866_v51 = vpack.c.bf16 %v4841_v47, %v4840_v50 }
0x1887   : > { %v4795_v61 = vpop.permute.xlu1 %4794  ;;  %v4729_v43 = vpop.permute.xlu0 %4728  ;;  %v4825_v52 = vld [vmem:[#allocation5 + $0x78] sm:$0xff] }
0x1888   : > { %4803 = vst.msk [vmem:[#allocation5 + $0x2e8] sm:$0xff] %vm2143_vm4, %v4795_v61  ;;  %4738 = vst.msk [vmem:[#allocation5 + $0x150] sm:$0xff] %vm2143_vm4, %v4729_v43  ;;  %v4858_v54 = vpack.c.bf16 %v4825_v52, %v4824_v56 }
0x188b   : > { %v4731_v2 = vpop.permute.xlu1 %4730  ;;  %v4777_v3 = vpop.permute.xlu0 %4776  ;;  %v4850_v7 = vld [vmem:[#allocation5 + $0x2d0] sm:$0xff]  ;;  %v4837_v59 = vld [vmem:[#allocation5 + $0x198] sm:$0xff] }
0x188c   : > { %4739 = vst.msk [vmem:[#allocation5 + $0x168] sm:$0xff] %vm2143_vm4, %v4731_v2  ;;  %4786 = vst.msk [vmem:[#allocation5 + $0x270] sm:$0xff] %vm2143_vm4, %v4777_v3 }
0x188f   : > { %v4779_v4 = vpop.permute.xlu1 %4778  ;;  %v4713_v6 = vpop.permute.xlu0 %4712  ;;  %v4851_v8 = vld [vmem:[#allocation5 + $0x2e8] sm:$0xff]  ;;  %v4834_v12 = vld [vmem:[#allocation5 + $0x150] sm:$0xff] }
0x1890   : > { %4787 = vst.msk [vmem:[#allocation5 + $0x288] sm:$0xff] %vm2143_vm4, %v4779_v4  ;;  %4722 = vst.msk [vmem:[#allocation5 + $0xf0] sm:$0xff] %vm2143_vm4, %v4713_v6  ;;  %v4871_v5 = vpack.c.bf16 %v4851_v8, %v4850_v7  ;;  %v4836_v4 = vld [vmem:[#allocation5 + $0x180] sm:$0xff] }
0x1891   : > { %v4864_v6 = vpack.c.bf16 %v4837_v59, %v4836_v4 }
0x1892   : > { %5665 = vmatprep.subr.bf16.mxu1 %v4871_v5 }
0x1893   : > { %v4715_v10 = vpop.permute.xlu1 %4714  ;;  %v4761_v22 = vpop.permute.xlu0 %4760  ;;  %v4835_v13 = vld [vmem:[#allocation5 + $0x168] sm:$0xff]  ;;  %v4846_v23 = vld [vmem:[#allocation5 + $0x270] sm:$0xff] }
0x1894   : > { %4723 = vst.msk [vmem:[#allocation5 + $0x108] sm:$0xff] %vm2143_vm4, %v4715_v10  ;;  %4770 = vst.msk [vmem:[#allocation5 + $0x210] sm:$0xff] %vm2143_vm4, %v4761_v22  ;;  %v4863_v14 = vpack.c.bf16 %v4835_v13, %v4834_v12  ;;  %v5986_v10 = vld [vmem:[#allocation14] ss:$12 sps:$4 sm:$0xff]   ;;  %v5989_v22 = vld [vmem:[#allocation14 + $0x1c] ss:$12 sps:$4 sm:$0xff]  }
0x1896   : > { %5666 = vmatpush3.bf16.msra.mxu1 %v4863_v14 }
0x1897   : > { %v4763_v19 = vpop.permute.xlu1 %4762  ;;  %5667 = vmatprep.subr.bf16.mxu1 %v4870_v17  ;;  %v4697_v20 = vpop.permute.xlu0 %4696  ;;  %v4847_v0 = vld [vmem:[#allocation5 + $0x288] sm:$0xff]  ;;  %v4830_v28 = vld [vmem:[#allocation5 + $0xf0] sm:$0xff] }
0x1898   : > { %4771 = vst.msk [vmem:[#allocation5 + $0x228] sm:$0xff] %vm2143_vm4, %v4763_v19  ;;  %4706 = vst.msk [vmem:[#allocation5 + $0x90] sm:$0xff] %vm2143_vm4, %v4697_v20  ;;  %v4869_v32 = vpack.c.bf16 %v4847_v0, %v4846_v23  ;;  %v5991_v19 = vld [vmem:[#allocation14 + $0x18] ss:$12 sps:$4 sm:$0xff]   ;;  %v5993_v20 = vld [vmem:[#allocation14 + $0x20] ss:$12 sps:$4 sm:$0xff]  }
0x189a   : > { %5668 = vmatpush3.bf16.msra.mxu1 %v4862_v46 }
0x189b   : > { %v4699_v27 = vpop.permute.xlu1 %4698  ;;  %5669 = vmatprep.subr.bf16.mxu1 %v4869_v32  ;;  %v4745_v26 = vpop.permute.xlu0 %4744  ;;  %v4831_v24 = vld [vmem:[#allocation5 + $0x108] sm:$0xff]  ;;  %v4842_v39 = vld [vmem:[#allocation5 + $0x210] sm:$0xff] }
0x189c   : > { %4707 = vst.msk [vmem:[#allocation5 + $0xa8] sm:$0xff] %vm2143_vm4, %v4699_v27  ;;  %4754 = vst.msk [vmem:[#allocation5 + $0x1b0] sm:$0xff] %vm2143_vm4, %v4745_v26  ;;  %v4861_v34 = vpack.c.bf16 %v4831_v24, %v4830_v28 }
0x189e   : > { %5670 = vmatpush3.bf16.msra.mxu1 %v4861_v34 }
0x189f   : > { %v4747_v38 = vpop.permute.xlu1 %4746  ;;  %5671 = vmatprep.subr.bf16.mxu1 %v4868_v35  ;;  %v4681_v11 = vpop.permute.xlu0 %4680  ;;  %v4843_v37 = vld [vmem:[#allocation5 + $0x228] sm:$0xff]  ;;  %v4826_v25 = vld [vmem:[#allocation5 + $0x90] sm:$0xff] }
0x18a0   : > { %4755 = vst.msk [vmem:[#allocation5 + $0x1c8] sm:$0xff] %vm2143_vm4, %v4747_v38  ;;  %4690 = vst.msk [vmem:[#allocation5 + $0x30] sm:$0xff] %vm2143_vm4, %v4681_v11  ;;  %v4867_v41 = vpack.c.bf16 %v4843_v37, %v4842_v39 }
0x18a2   : > { %5672 = vmatpush3.bf16.msra.mxu1 %v4860_v40 }
0x18a3   : > { %v4683_v44 = vpop.permute.xlu1 %4682  ;;  %5673 = vmatprep.subr.bf16.mxu1 %v4867_v41  ;;  %v4677_v48 = vpop.permute.xlu0 %4676  ;;  %v4827_v49 = vld [vmem:[#allocation5 + $0xa8] sm:$0xff]  ;;  %v4838_v42 = vld [vmem:[#allocation5 + $0x1b0] sm:$0xff] }
0x18a4   : > { %4691 = vst.msk [vmem:[#allocation5 + $0x48] sm:$0xff] %vm2143_vm4, %v4683_v44  ;;  %4688 = vst.msk [vmem:[#allocation5] sm:$0xff] %vm2143_vm4, %v4677_v48  ;;  %v4859_v29 = vpack.c.bf16 %v4827_v49, %v4826_v25 }
0x18a6   : > { %5674 = vmatpush3.bf16.msra.mxu1 %v4859_v29 }
0x18a7   : > { %v4679_v53 = vpop.permute.xlu1 %4678  ;;  %5675 = vmatprep.subr.bf16.mxu1 %v4866_v51  ;;  %v4809_v55 = vpop.permute.xlu0 %4808  ;;  %v4839_v57 = vld [vmem:[#allocation5 + $0x1c8] sm:$0xff]  ;;  %v4822_v43 = vld [vmem:[#allocation5 + $0x30] sm:$0xff] }
0x18a8   : > { %4689 = vst.msk [vmem:[#allocation5 + $0x18] sm:$0xff] %vm2143_vm4, %v4679_v53  ;;  %4818 = vst.msk [vmem:[#allocation5 + $0x330] sm:$0xff] %vm2143_vm4, %v4809_v55  ;;  %v4865_v31 = vpack.c.bf16 %v4839_v57, %v4838_v42 }
0x18aa   : > { %5676 = vmatpush3.bf16.msra.mxu1 %v4858_v54 }
0x18ab   : > { %v4811_v60 = vpop.permute.xlu1 %4810  ;;  %5677 = vmatprep.subr.bf16.mxu1 %v4865_v31  ;;  %v4805_v61 = vpop.permute.xlu0 %4804  ;;  %v4823_v2 = vld [vmem:[#allocation5 + $0x48] sm:$0xff]  ;;  %v4820_v8 = vld [vmem:[#allocation5] sm:$0xff] }
0x18ac   : > { %4819 = vst.msk [vmem:[#allocation5 + $0x348] sm:$0xff] %vm2143_vm4, %v4811_v60  ;;  %4816 = vst.msk [vmem:[#allocation5 + $0x300] sm:$0xff] %vm2143_vm4, %v4805_v61  ;;  %v4857_v3 = vpack.c.bf16 %v4823_v2, %v4822_v43 }
0x18ae   : > { %5678 = vmatpush3.bf16.msra.mxu1 %v4857_v3 }
0x18af   : > { %v4807_v7 = vpop.permute.xlu1 %4806  ;;  %5679 = vmatprep.subr.bf16.mxu1 %v4864_v6  ;;  %v4821_v5 = vld [vmem:[#allocation5 + $0x18] sm:$0xff]  ;;  %v4854_v12 = vld [vmem:[#allocation5 + $0x330] sm:$0xff] }
0x18b0   : > { %4817 = vst.msk [vmem:[#allocation5 + $0x318] sm:$0xff] %vm2143_vm4, %v4807_v7  ;;  %v4856_v9 = vpack.c.bf16 %v4821_v5, %v4820_v8 }
0x18b2   : > { %5680 = vmatpush3.bf16.msra.mxu1 %v4856_v9 }
0x18b3   : > { %v4855_v13 = vld [vmem:[#allocation5 + $0x348] sm:$0xff]  ;;  %v4852_v16 = vld [vmem:[#allocation5 + $0x300] sm:$0xff] }
0x18b4   : > { %v4873_v14 = vpack.c.bf16 %v4855_v13, %v4854_v12 }
0x18b5   : > { %4975 = vmatmul.mubr.bf16.vlgmr.msra.gmra.mxu1 %v5986_v10 }
0x18b6   : > { %5830 = vmatprep.subr.bf16.mxu0 %v4873_v14  ;;  %4982 = vmatprep.mubr.bf16.mxu1 %v5989_v22 }
0x18b7   : > { %5831 = vmatpush3.bf16.msra.mxu0 %v4873_v14  ;;  %v4853_v17 = vld [vmem:[#allocation5 + $0x318] sm:$0xff] }
0x18b8   : > { %v4872_v18 = vpack.c.bf16 %v4853_v17, %v4852_v16  ;;  %v4889_v46 = vpop.permute.xlu0 %4888 }
0x18ba   : > { %5832 = vmatprep.subr.bf16.mxu0 %v4872_v18 }
0x18bb   : > { %5833 = vmatpush3.bf16.msra.mxu0 %v4872_v18 }
0x18bc   : > { %v4894_v28 = vpop.permute.xlu1 %4893  ;;  %v4899_v38 = vpop.permute.xlu0 %4898 }
0x18bd   : > { %4983 = vmatmul.mubr.bf16.gmra.mxu1 %v5991_v19 }
0x18be   : > { %5835 = vmatmul.mubr.msk.bf16.vlgmr.msra.gmra.mxu0 %vm957_vm6, %v5993_v20 }
0x18c0   : > { %v4904_v49 = vpop.permute.xlu1 %4903 }
0x1975   : > { %v5681_v21 = vpop.f32.mrf.mxu1 }
0x1977   : > { %v5682_v23 = vpop.f32.mrf.mxu1 }
0x1978   : > { %v5683_v32 = vadd.f32 %v5682_v23, %v5681_v21 }
0x1979   : > { %v5684_v0 = vpop.f32.mrf.mxu1 }
0x197a   : > { %v4977_v30 = vadd.f32 %v5683_v32, %v4889_v46 }
0x197b   : > { %v5685_v33 = vpop.f32.mrf.mxu1 }
0x197c   : > { %v5686_v24 = vadd.f32 %v5685_v33, %v5684_v0 }
0x197d   : > { %v5687_v27 = vpop.f32.mrf.mxu1 }
0x197e   : > { %v5836_v26 = vpop.f32.mrf.mxu0  ;;  %v4980_v47 = vadd.f32 %v5686_v24, %v4894_v28 }
0x197f   : > { %v5688_v34 = vpop.f32.mrf.mxu1 }
0x1980   : > { %v5689_v35 = vadd.f32 %v5688_v34, %v5687_v27  ;;  %v5025_v36 = vpop.f32.mrf.mxu0 }
0x1981   : > { %v5026_v11 = vadd.f32 %v5025_v36, %v4977_v30  ;;  %v5690_v45 = vpop.f32.mrf.mxu1 }
0x1982   : > { %v4985_v39 = vadd.f32 %v5689_v35, %v4899_v38  ;;  %v5837_v37 = vpop.f32.mrf.mxu0 }
0x1983   : > { %v5047_v40 = vmul.f32 %v7738_v15, %v5026_v11  ;;  %v5691_v41 = vpop.f32.mrf.mxu1 }
0x1984   : > { %v5034_v44 = vadd.f32 %v5836_v26, %v4985_v39  ;;  %v5692_v48 = vadd.f32 %v5691_v41, %v5690_v45  ;;  %v5028_v25 = vpop.f32.mrf.mxu0 }
0x1985   : > { %v7876_v29 = vadd.f32 %v5047_v40, %v7594_v62  ;;  %v5029_v50 = vadd.f32 %v5028_v25, %v4980_v47 }
0x1986   : > { %v5049_v51 = vmul.f32 %v7738_v15, %v5034_v44  ;;  %v4988_v52 = vadd.f32 %v5692_v48, %v4904_v49 }
0x1987   : > { %v5048_v53 = vmul.f32 %v7738_v15, %v5029_v50  ;;  %v5055_v55 = vsel %vm2143_vm4, %v7876_v29, 0.0  ;;  %v5071_v56 = vmul.f32 %v7876_v29, %v7876_v29 }
0x1988   : > { %5056 = vadd.xlane.f32.xlu0 %v5055_v55  ;;  %v5037_v42 = vadd.f32 %v5837_v37, %v4988_v52  ;;  %v7889_v54 = vadd.f32 %v5049_v51, %v7581_v58 }
0x1989   : > { %v7885_v57 = vadd.f32 %v5048_v53, %v7597_v1  ;;  %v5075_v62 = vsel %vm2143_vm4, %v5071_v56, 0.0 }
0x198a   : > { %5076 = vadd.xlane.f32.xlu1 %v5075_v62  ;;  %v5050_v59 = vmul.f32 %v7738_v15, %v5037_v42  ;;  %v5073_v1 = vmul.f32 %v7889_v54, %v7889_v54  ;;  %v5061_v58 = vsel %vm2143_vm4, %v7889_v54, 0.0 }
0x198b   : > { %v5072_v31 = vmul.f32 %v7885_v57, %v7885_v57  ;;  %v5058_v60 = vsel %vm2143_vm4, %v7885_v57, 0.0 }
0x198c   : > { %v5081_v43 = vsel %vm2143_vm4, %v5073_v1, 0.0  ;;  %v7903_v2 = vadd.f32 %v5050_v59, %v7591_v63 }
0x198d   : > { %v5078_v61 = vsel %vm2143_vm4, %v5072_v31, 0.0 }
0x198e   : > { %5059 = vadd.xlane.f32.xlu1 %v5058_v60  ;;  %5079 = vadd.xlane.f32.xlu0 %v5078_v61  ;;  %v5064_v3 = vsel %vm2143_vm4, %v7903_v2, 0.0  ;;  %v5074_v4 = vmul.f32 %v7903_v2, %v7903_v2 }
0x1990   : > { %v5084_v6 = vsel %vm2143_vm4, %v5074_v4, 0.0 }
0x1992   : > { %5082 = vadd.xlane.f32.xlu1 %v5081_v43  ;;  %5062 = vadd.xlane.f32.xlu0 %v5061_v58 }
0x1996   : > { %5065 = vadd.xlane.f32.xlu0 %v5064_v3 }
0x199a   : > { %5085 = vadd.xlane.f32.xlu0 %v5084_v6 }
0x1a11   : > { %v5057_v7 = vpop.xlane.xlu0 %5056 }
0x1a12   : > { %v5067_v8 = vmul.f32 0.0625, %v5057_v7 }
0x1a13   : > { %v5077_v5 = vpop.xlane.xlu1 %5076 }
0x1a14   : > { %v5091_v9 = vmul.f32 %v5067_v8, %v5067_v8  ;;  %v5087_v10 = vmul.f32 0.0625, %v5077_v5  ;;  %v5099_v11 = vsub.f32 %v7876_v29, %v5067_v8 }
0x1a16   : > { %v5095_v22 = vsub.f32 %v5087_v10, %v5091_v9 }
0x1a17   : > { %v5060_v63 = vpop.xlane.xlu1 %5059  ;;  %v5080_v12 = vpop.xlane.xlu0 %5079 }
0x1a18   : > { %v5103_v13 = vmax.f32 %v5095_v22, 0.0  ;;  %v5068_v14 = vmul.f32 0.0625, %v5060_v63  ;;  %v5088_v18 = vmul.f32 0.0625, %v5080_v12 }
0x1a1a   : > { %v5107_v16 = vadd.f32 1e-05, %v5103_v13  ;;  %v5092_v17 = vmul.f32 %v5068_v14, %v5068_v14  ;;  %v5100_v44 = vsub.f32 %v7885_v57, %v5068_v14 }
0x1a1b   : > { %v5083_v19 = vpop.xlane.xlu1 %5082  ;;  %v5063_v20 = vpop.xlane.xlu0 %5062 }
0x1a1c   : > { %6044 = vrsqrt.f32 %v5107_v16  ;;  %v5096_v21 = vsub.f32 %v5088_v18, %v5092_v17  ;;  %v5069_v23 = vmul.f32 0.0625, %v5063_v20  ;;  %v5089_v46 = vmul.f32 0.0625, %v5083_v19 }
0x1a1e   : > { %v5104_v0 = vmax.f32 %v5096_v21, 0.0  ;;  %v5093_v32 = vmul.f32 %v5069_v23, %v5069_v23  ;;  %v5101_v29 = vsub.f32 %v7889_v54, %v5069_v23 }
0x1a1f   : > { %v5066_v33 = vpop.xlane.xlu0 %5065 }
0x1a20   : > { %v5108_v27 = vadd.f32 1e-05, %v5104_v0  ;;  %v5097_v26 = vsub.f32 %v5089_v46, %v5093_v32  ;;  %v5070_v28 = vmul.f32 0.0625, %v5066_v33 }
0x1a22   : > { %6046 = vrsqrt.f32 %v5108_v27  ;;  %v5105_v24 = vmax.f32 %v5097_v26, 0.0  ;;  %v5094_v35 = vmul.f32 %v5070_v28, %v5070_v28  ;;  %v5102_v56 = vsub.f32 %v7903_v2, %v5070_v28 }
0x1a23   : > { %v5086_v34 = vpop.xlane.xlu0 %5085 }
0x1a24   : > { %v5109_v30 = vadd.f32 1e-05, %v5105_v24  ;;  %v5090_v36 = vmul.f32 0.0625, %v5086_v34 }
0x1a26   : > { %6048 = vrsqrt.f32 %v5109_v30  ;;  %v5098_v38 = vsub.f32 %v5090_v36, %v5094_v35 }
0x1a28   : > { %v5106_v45 = vmax.f32 %v5098_v38, 0.0 }
0x1a29   : > { %v6045_v39 = vpop.eup %6044 }
0x1a2a   : > { %v5115_v37 = vmul.f32 %v6045_v39, %v5099_v11  ;;  %v5110_v40 = vadd.f32 1e-05, %v5106_v45 }
0x1a2c   : > { %v5119_v41 = vmax.f32 %v5115_v37, 0.0  ;;  %6050 = vrsqrt.f32 %v5110_v40 }
0x1a2e   : > { %v5123_v47 = vmul.f32 %v7738_v15, %v5119_v41 }
0x1a2f   : > { %v6047_v48 = vpop.eup %6046 }
0x1a30   : > { %5127 = vst.msk [vmem:[%s890_s2] sm:$0xff] %vm2143_vm4, %v5123_v47  ;;  %v5116_v25 = vmul.f32 %v6047_v48, %v5100_v44 }
0x1a32   : > { %v5120_v49 = vmax.f32 %v5116_v25, 0.0 }
0x1a33   : > { %v6049_v50 = vpop.eup %6048 }
0x1a34   : > { %v5124_v51 = vmul.f32 %v7738_v15, %v5120_v49  ;;  %v5117_v52 = vmul.f32 %v6049_v50, %v5101_v29 }
0x1a36   : > { %5128 = vst.msk [vmem:[%s890_s2 + $0x8] sm:$0xff] %vm2143_vm4, %v5124_v51  ;;  %v5121_v53 = vmax.f32 %v5117_v52, 0.0 }
0x1a38   : > { %v5125_v55 = vmul.f32 %v7738_v15, %v5121_v53 }
0x1a39   : > { %v6051_v42 = vpop.eup %6050 }
0x1a3a   : > { %5129 = vst.msk [vmem:[%s890_s2 + $0x10] sm:$0xff] %vm2143_vm4, %v5125_v55  ;;  %v5118_v57 = vmul.f32 %v6051_v42, %v5102_v56 }
0x1a3c   : > { %v5122_v62 = vmax.f32 %v5118_v57, 0.0 }
0x1a3e   : > { %v5126_v31 = vmul.f32 %v7738_v15, %v5122_v62 }
0x1a40   : > { %5130 = vst.msk [vmem:[%s890_s2 + $0x18] sm:$0xff] %vm2143_vm4, %v5126_v31 }
0x1a41 PF: > { %s8039_s28 = sld [smem:[#allocation20_spill]] }
0x1a47   : > { %s41_s27 = sadd.s32 1, %s8039_s28  }
0x1a48   : > { %p38_p2 = scmp.ge.s32.totalorder %s41_s27, 4  }
0x1a4a   :  { %40 = sbr.rel (!%p38_p2) target bundleno = 21 (0x15), region = 195 }
0x1a4f   :  { %5184 = vsyncpa [#allocation7], 1 }
0x1a50   :  { %5186 = vsyncpa [#allocation7 + $0x1], 1 }
0x1a51   :  { %5187 = vsyncpa [#allocation9], 1 }
0x1a52   :  { %5188 = vsyncpa [#allocation12], 1 }
0x1a53   :  { %5189 = vsyncpa [#allocation15], 1 }

</bundles_post_ra>
